<compile_context>
chip_gen: v5e
topology: v5e:2x2
jax: 0.10.0
libtpu: 0.0.40
codegen_flags: <defaults>
</compile_context>

<pallas_src>
import functools
import math

import numpy as np
import jax
import jax.numpy as jnp
from jax import lax
from jax.experimental import pallas as pl
from jax.experimental.pallas import tpu as pltpu


def _vmem_limit_bytes():
    # ~3/4 of physical VMEM, capped at 96 MiB: 96 MiB on v5e/v6e (128 MiB phys),
    # 48 MiB on v7x (64 MiB phys).  Falls back to 48 MiB if the query fails.
    try:
        phys = int(pltpu.get_tpu_info().vmem_capacity_bytes)
    except Exception:
        phys = 64 * 1024 * 1024
    return min(96 * 1024 * 1024, (3 * phys) // 4)


_VMEM_LIMIT = _vmem_limit_bytes()


def _cparams(*sems):
    return pltpu.CompilerParams(dimension_semantics=tuple(sems),
                                vmem_limit_bytes=_VMEM_LIMIT)


# -----------------------------------------------------------------------------
# Row-tiled matmul (+bias, optional fused residual add).  bf16 MXU, f32 acc.
# -----------------------------------------------------------------------------

def _matmul_kernel(a_ref, b_ref, bias_ref, o_ref):
    acc = jnp.dot(a_ref[...].astype(jnp.bfloat16), b_ref[...],
                  preferred_element_type=jnp.float32) + bias_ref[...]
    o_ref[...] = acc.astype(o_ref.dtype)


def _matmul_res_kernel(a_ref, b_ref, bias_ref, r_ref, o_ref):
    acc = (jnp.dot(a_ref[...].astype(jnp.bfloat16), b_ref[...],
                   preferred_element_type=jnp.float32)
           + bias_ref[...] + r_ref[...].astype(jnp.float32))
    o_ref[...] = acc.astype(o_ref.dtype)


def matmul_bias(a, b, bias, residual=None, *, out_dtype=jnp.float32,
                row_tile=512):
    """a:[M,K] @ b:[K,N] + bias[N] (+ residual[M,N]) -> [M,N] out_dtype."""
    M, K = a.shape
    N = b.shape[1]
    tm = min(row_tile, M)
    args = [a, b.astype(jnp.bfloat16), bias.reshape(1, N).astype(jnp.float32)]
    in_specs = [
        pl.BlockSpec((tm, K), lambda i: (i, 0)),
        pl.BlockSpec((K, N), lambda i: (0, 0)),
        pl.BlockSpec((1, N), lambda i: (0, 0)),
    ]
    kernel = _matmul_kernel
    if residual is not None:
        args.append(residual)
        in_specs.append(pl.BlockSpec((tm, N), lambda i: (i, 0)))
        kernel = _matmul_res_kernel
    return pl.pallas_call(
        kernel,
        out_shape=jax.ShapeDtypeStruct((M, N), out_dtype),
        grid=(pl.cdiv(M, tm),),
        in_specs=in_specs,
        out_specs=pl.BlockSpec((tm, N), lambda i: (i, 0)),
        compiler_params=_cparams("parallel"),
    )(*args)


# -----------------------------------------------------------------------------
# LayerNorm fused as a prologue of a matmul (used for the LSTM gate projection)
# -----------------------------------------------------------------------------

def _ln_matmul_kernel(a_ref, g_ref, b_ref, w_ref, bias_ref, o_ref, *, eps):
    x = a_ref[...].astype(jnp.float32)
    mu = jnp.mean(x, axis=-1, keepdims=True)
    var = jnp.mean(jnp.square(x - mu), axis=-1, keepdims=True)
    xn = (x - mu) * lax.rsqrt(var + eps) * g_ref[...] + b_ref[...]
    acc = jnp.dot(xn.astype(jnp.bfloat16), w_ref[...],
                  preferred_element_type=jnp.float32) + bias_ref[...]
    o_ref[...] = acc.astype(o_ref.dtype)


def layernorm_matmul(x, ln_g, ln_b, w, bias, *, eps=1e-5, row_tile=512,
                     out_dtype=jnp.bfloat16):
    """LN(x over K) @ w + bias.  x:[M,K], w:[K,N] -> [M,N] out_dtype."""
    M, K = x.shape
    N = w.shape[1]
    tm = min(row_tile, M)
    return pl.pallas_call(
        functools.partial(_ln_matmul_kernel, eps=eps),
        out_shape=jax.ShapeDtypeStruct((M, N), out_dtype),
        grid=(pl.cdiv(M, tm),),
        in_specs=[
            pl.BlockSpec((tm, K), lambda i: (i, 0)),
            pl.BlockSpec((1, K), lambda i: (0, 0)),
            pl.BlockSpec((1, K), lambda i: (0, 0)),
            pl.BlockSpec((K, N), lambda i: (0, 0)),
            pl.BlockSpec((1, N), lambda i: (0, 0)),
        ],
        out_specs=pl.BlockSpec((tm, N), lambda i: (i, 0)),
        compiler_params=_cparams("parallel"),
    )(x, ln_g.reshape(1, K).astype(jnp.float32),
      ln_b.reshape(1, K).astype(jnp.float32),
      w.astype(jnp.bfloat16), bias.reshape(1, N).astype(jnp.float32))


# -----------------------------------------------------------------------------
# (PReLU +) layer-norm kernels (shared body; optional fused residual add)
# -----------------------------------------------------------------------------

def _ln_body(x_ref, a_ref, g_ref, b_ref, eps):
    x = x_ref[...].astype(jnp.float32)
    a = a_ref[...]                       # broadcastable PReLU slope (==1 => id)
    x = jnp.where(x >= 0, x, a * x)
    mu = jnp.mean(x, axis=-1, keepdims=True)
    var = jnp.mean(jnp.square(x - mu), axis=-1, keepdims=True)
    return (x - mu) * lax.rsqrt(var + eps) * g_ref[...] + b_ref[...]


def _ln_kernel(x_ref, a_ref, g_ref, b_ref, o_ref, *, eps):
    o_ref[...] = _ln_body(x_ref, a_ref, g_ref, b_ref, eps).astype(o_ref.dtype)


def _ln_res_kernel(x_ref, a_ref, g_ref, b_ref, r_ref, o_ref, *, eps):
    y = _ln_body(x_ref, a_ref, g_ref, b_ref, eps) + r_ref[...].astype(jnp.float32)
    o_ref[...] = y.astype(o_ref.dtype)


def rownorm(x, gamma, beta, *, alpha=None, residual=None, eps=1e-5,
            row_tile=512, out_dtype=jnp.float32):
    """Row-wise LN over the last dim; optional scalar PReLU + fused residual."""
    R, D = x.shape
    tr = min(row_tile, R)
    if alpha is None:
        a = jnp.ones((1, 1), jnp.float32)
    else:
        a = jnp.asarray(alpha, jnp.float32).reshape(1, 1)
    args = [x, a, gamma.reshape(1, D).astype(jnp.float32),
            beta.reshape(1, D).astype(jnp.float32)]
    in_specs = [
        pl.BlockSpec((tr, D), lambda i: (i, 0)),
        pl.BlockSpec((1, 1), lambda i: (0, 0)),
        pl.BlockSpec((1, D), lambda i: (0, 0)),
        pl.BlockSpec((1, D), lambda i: (0, 0)),
    ]
    kernel = _ln_kernel
    if residual is not None:
        args.append(residual)
        in_specs.append(pl.BlockSpec((tr, D), lambda i: (i, 0)))
        kernel = _ln_res_kernel
    return pl.pallas_call(
        functools.partial(kernel, eps=eps),
        out_shape=jax.ShapeDtypeStruct((R, D), out_dtype),
        grid=(pl.cdiv(R, tr),),
        in_specs=in_specs,
        out_specs=pl.BlockSpec((tr, D), lambda i: (i, 0)),
        compiler_params=_cparams("parallel"),
    )(*args)


def allhead_prelu_ln(x4, alpha, gamma, beta, *, eps=1e-5,
                     out_dtype=jnp.bfloat16):
    """AllHeadPReLULayerNormalization4DCF on x4: [B, H, T, D] (D = E*F)."""
    B, H, T, D = x4.shape
    a = alpha.reshape(H, 1, 1).astype(jnp.float32)
    g = gamma.reshape(H, 1, D).astype(jnp.float32)
    b = beta.reshape(H, 1, D).astype(jnp.float32)
    return pl.pallas_call(
        functools.partial(_ln_kernel, eps=eps),
        out_shape=jax.ShapeDtypeStruct((B, H, T, D), out_dtype),
        grid=(B, H),
        in_specs=[
            pl.BlockSpec((1, 1, T, D), lambda bi, hi: (bi, hi, 0, 0)),
            pl.BlockSpec((1, 1, 1), lambda bi, hi: (hi, 0, 0)),
            pl.BlockSpec((1, 1, D), lambda bi, hi: (hi, 0, 0)),
            pl.BlockSpec((1, 1, D), lambda bi, hi: (hi, 0, 0)),
        ],
        out_specs=pl.BlockSpec((1, 1, T, D), lambda bi, hi: (bi, hi, 0, 0)),
        compiler_params=_cparams("parallel", "parallel"),
    )(x4, a, g, b)


def _groupnorm_kernel(x_ref, g_ref, b_ref, o_ref, *, eps):
    x = x_ref[...]
    mu = jnp.mean(x)
    var = jnp.mean(jnp.square(x - mu))
    o_ref[...] = (x - mu) * lax.rsqrt(var + eps) * g_ref[...] + b_ref[...]


def groupnorm1_cl(x, weight, bias, eps=1e-5):
    """GroupNorm(1, C) on channels-last x: [B, T, F, C]."""
    B, T, Fq, C = x.shape
    xr = x.reshape(B, T * Fq, C).astype(jnp.float32)
    g = weight.reshape(1, C).astype(jnp.float32)
    b = bias.reshape(1, C).astype(jnp.float32)
    out = pl.pallas_call(
        functools.partial(_groupnorm_kernel, eps=eps),
        out_shape=jax.ShapeDtypeStruct((B, T * Fq, C), jnp.float32),
        grid=(B,),
        in_specs=[
            pl.BlockSpec((1, T * Fq, C), lambda i: (i, 0, 0)),
            pl.BlockSpec((1, C), lambda i: (0, 0)),
            pl.BlockSpec((1, C), lambda i: (0, 0)),
        ],
        out_specs=pl.BlockSpec((1, T * Fq, C), lambda i: (i, 0, 0)),
        compiler_params=_cparams("parallel"),
    )(xr, g, b)
    return out.reshape(B, T, Fq, C)


# -----------------------------------------------------------------------------
# Attention: grid over (head, q-tile); K pre-transposed (plain jnp.dot on MXU);
# K/V for a head stay resident while q tiles stream; f32 softmax.
# TODO(synk): switch to a flash-style KV-tiled inner loop for long T (v7x VMEM).
# -----------------------------------------------------------------------------

def _attn_kernel(q_ref, kt_ref, v_ref, o_ref, *, scale):
    q = q_ref[0]                           # [tq, dk] bf16
    kt = kt_ref[0]                         # [dk, T]  bf16
    v = v_ref[0]                           # [T,  dv] bf16
    s = jnp.dot(q, kt, preferred_element_type=jnp.float32) * scale
    s = s - jnp.max(s, axis=-1, keepdims=True)
    p = jnp.exp(s)
    p = p * pl.reciprocal(jnp.sum(p, axis=-1, keepdims=True), approx=True)
    o_ref[0] = jnp.dot(p.astype(v.dtype), v,
                       preferred_element_type=jnp.float32).astype(o_ref.dtype)


def attention(q, kt, v, scale, *, q_tile=256, out_dtype=jnp.bfloat16):
    """q:[G,T,dk], kt:[G,dk,T], v:[G,T,dv] -> [G,T,dv]."""
    G, T, dk = q.shape
    dv = v.shape[-1]
    tq = min(q_tile, T)
    return pl.pallas_call(
        functools.partial(_attn_kernel, scale=scale),
        out_shape=jax.ShapeDtypeStruct((G, T, dv), out_dtype),
        grid=(G, pl.cdiv(T, tq)),
        in_specs=[
            pl.BlockSpec((1, tq, dk), lambda g, i: (g, i, 0)),
            pl.BlockSpec((1, dk, T), lambda g, i: (g, 0, 0)),
            pl.BlockSpec((1, T, dv), lambda g, i: (g, 0, 0)),
        ],
        out_specs=pl.BlockSpec((1, tq, dv), lambda g, i: (g, i, 0)),
        compiler_params=_cparams("parallel", "parallel"),
    )(q.astype(jnp.bfloat16), kt.astype(jnp.bfloat16), v.astype(jnp.bfloat16))


# -----------------------------------------------------------------------------
# Fused bidirectional LSTM recurrence.  Gate-major gx layout [S, 4, Bn, 2H] and
# recurrent weight [4, 2H, 2H]: gate extraction is a leading-axis index (no
# lane-crossing slices on the serial critical path).  Batch rows = "parallel"
# grid axis, time chunks = "arbitrary" with h/c carried in VMEM scratch.
# -----------------------------------------------------------------------------

def _bilstm_kernel(gx_ref, whh_ref, o_ref, h_sc, c_sc, *, ts):
    @pl.when(pl.program_id(1) == 0)
    def _():
        h_sc[...] = jnp.zeros_like(h_sc)
        c_sc[...] = jnp.zeros_like(c_sc)

    def step(s, carry):
        h_prev = h_sc[...].astype(jnp.bfloat16)

        def gate(gidx):
            return (gx_ref[s, gidx].astype(jnp.float32)
                    + jnp.dot(h_prev, whh_ref[gidx],
                              preferred_element_type=jnp.float32))

        i = jax.nn.sigmoid(gate(0))
        f = jax.nn.sigmoid(gate(1))
        g = jnp.tanh(gate(2))
        o = jax.nn.sigmoid(gate(3))
        c = f * c_sc[...] + i * g
        h = o * jnp.tanh(c)
        c_sc[...] = c
        h_sc[...] = h
        o_ref[s] = h.astype(o_ref.dtype)
        return carry

    lax.fori_loop(0, ts, step, 0, unroll=True)


def lstm_scan(gx, whhT, *, row_tile=128, time_chunk=16):
    """gx: [S, 4, Bn, 2H] (gate-major, both directions fused); whhT: [4,2H,2H]."""
    S, _, Bn, H2 = gx.shape
    bt = min(row_tile, Bn)
    ts = min(time_chunk, S)
    return pl.pallas_call(
        functools.partial(_bilstm_kernel, ts=ts),
        out_shape=jax.ShapeDtypeStruct((S, Bn, H2), jnp.bfloat16),
        grid=(pl.cdiv(Bn, bt), pl.cdiv(S, ts)),
        in_specs=[
            pl.BlockSpec((ts, 4, bt, H2), lambda i, j: (j, 0, i, 0)),
            pl.BlockSpec((4, H2, H2), lambda i, j: (0, 0, 0)),
        ],
        out_specs=pl.BlockSpec((ts, bt, H2), lambda i, j: (j, i, 0)),
        scratch_shapes=[pltpu.VMEM((bt, H2), jnp.float32),
                        pltpu.VMEM((bt, H2), jnp.float32)],
        compiler_params=_cparams("parallel", "arbitrary"),
    )(gx.astype(jnp.bfloat16), whhT.astype(jnp.bfloat16))


def _combine_whh(whh_f, whh_b, H):
    """Gate-major block-diagonal recurrent weight: [4, 2H(in), 2H(out)]."""
    whhT_f = whh_f.T.reshape(H, 4, H).transpose(1, 0, 2)    # [gate, H_in, H_out]
    whhT_b = whh_b.T.reshape(H, 4, H).transpose(1, 0, 2)
    comb = jnp.zeros((4, 2, H, 2, H), jnp.float32)
    comb = comb.at[:, 0, :, 0, :].set(whhT_f)
    comb = comb.at[:, 1, :, 1, :].set(whhT_b)
    return comb.reshape(4, 2 * H, 2 * H)


def bilstm(x, ln_g, ln_b, p, H, eps):
    """LayerNorm(C) + bidirectional LSTM over axis 1.  x:[Bn,S,C] -> [Bn,S,2H]."""
    Bn, S, C = x.shape
    w_cat = jnp.concatenate([p['wih_f'], p['wih_b']], axis=0)           # [8H, C]
    b_cat = jnp.concatenate([p['bih_f'] + p['bhh_f'],
                             p['bih_b'] + p['bhh_b']], axis=0)          # [8H]
    # LN fused into the gate projection; gx streamed in bf16.
    g_all = layernorm_matmul(x.reshape(Bn * S, C), ln_g, ln_b,
                             w_cat.T, b_cat, eps=eps)                   # [Bn*S, 8H]
    g_all = g_all.reshape(Bn, S, 2, 4, H)
    gxf = g_all[:, :, 0]                       # [Bn, S, 4, H] forward gates
    gxb = g_all[:, ::-1, 1]                    # backward gates, time-reversed
    gx = jnp.stack([gxf, gxb], axis=3).reshape(Bn, S, 4, 2 * H)
    gx = gx.transpose(1, 2, 0, 3)              # [S, 4, Bn, 2H], gate-major
    whhT = _combine_whh(p['whh_f'], p['whh_b'], H)
    out = lstm_scan(gx, whhT).transpose(1, 0, 2)                        # [Bn, S, 2H]
    h_f = out[:, :, :H]
    h_b = out[:, ::-1, H:]
    return jnp.concatenate([h_f, h_b], axis=-1)


# -----------------------------------------------------------------------------
# Channels-last conv helpers (im2col + Pallas matmul)
# -----------------------------------------------------------------------------

def conv3x3_cl(x, w, b):
    """3x3 conv, padding 1.  x: [B, T, F, Cin]; w: [Cout, Cin, 3, 3] (torch)."""
    # TODO(synk): accumulate the 9 taps inside one Pallas kernel (shifted input
    # windows) to avoid the 9x im2col HBM blow-up; small cost here (2 calls).
    B, T, Fq, Cin = x.shape
    Cout = w.shape[0]
    xp = jnp.pad(x, ((0, 0), (1, 1), (1, 1), (0, 0)))
    pats = [xp[:, kh:kh + T, kw:kw + Fq, :] for kh in range(3) for kw in range(3)]
    pat = jnp.concatenate(pats, axis=-1).reshape(B * T * Fq, 9 * Cin)
    wr = w.transpose(0, 2, 3, 1).reshape(Cout, 9 * Cin)    # (kh, kw, cin)
    y = matmul_bias(pat, wr.T, b)
    return y.reshape(B, T, Fq, Cout)


def interp_nearest(x, size):
    """F.interpolate(mode='nearest') for 4-D NCHW input."""
    B, C, H, W = x.shape
    Ho, Wo = size
    hi = np.minimum(np.floor(np.arange(Ho) * (H / Ho)).astype(np.int32), H - 1)
    wi = np.minimum(np.floor(np.arange(Wo) * (W / Wo)).astype(np.int32), W - 1)
    return x[:, :, hi][:, :, :, wi]


# -----------------------------------------------------------------------------
# STFT encoder / decoder (DFT as a Pallas matmul; framing / OLA is glue)
# -----------------------------------------------------------------------------

def stft_enc(x, n_fft, hop, window):
    """x: [B, N] -> (real, imag) each [B, n_frames, n_fft//2+1]."""
    B, N = x.shape
    pad = n_fft // 2
    xp = jnp.pad(x, ((0, 0), (pad, pad)), mode='reflect')
    n_frames = (xp.shape[1] - n_fft) // hop + 1
    idx = np.arange(n_frames)[:, None] * hop + np.arange(n_fft)[None, :]
    frames = xp[:, idx] * window[None, None, :]
    Fq = n_fft // 2 + 1
    n = np.arange(n_fft)
    k = np.arange(Fq)
    ang = 2.0 * np.pi * np.outer(n, k) / n_fft
    CS = jnp.asarray(np.concatenate([np.cos(ang), -np.sin(ang)], axis=1),
                     jnp.float32)                         # [n_fft, 2*Fq]
    z = jnp.zeros((2 * Fq,), jnp.float32)
    y = matmul_bias(frames.reshape(B * n_frames, n_fft).astype(jnp.float32),
                    CS, z)
    y = y.reshape(B, n_frames, 2 * Fq)
    return y[..., :Fq], y[..., Fq:]


def istft_dec(re, im, n_fft, hop, window, length):
    """re/im: [B, T, F] -> [B, length] waveform."""
    # TODO(synk): fuse the lane-sparse deconv output with this DFT matmul so the
    # stored output width becomes n_fft (lane-dense) instead of 2*n_srcs.
    B, T, Fq = re.shape
    n = np.arange(n_fft)
    k = np.arange(Fq)
    ang = 2.0 * np.pi * np.outer(k, n) / n_fft
    w_k = np.ones((Fq, 1))
    w_k[1:-1] = 2.0
    A = w_k * np.cos(ang) / n_fft
    Bm = -w_k * np.sin(ang) / n_fft
    M = jnp.asarray(np.concatenate([A, Bm], axis=0), jnp.float32)  # [2Fq, n_fft]
    z = jnp.zeros((n_fft,), jnp.float32)
    spec = jnp.concatenate([re, im], axis=-1).reshape(B * T, 2 * Fq)
    fr = matmul_bias(spec.astype(jnp.float32), M, z)
    fr = fr.reshape(B, T, n_fft) * window[None, None, :]

    w2 = window * window
    if n_fft == 2 * hop:
        out_len = (T + 1) * hop
        y = jnp.zeros((B, T + 1, hop), jnp.float32)
        y = y.at[:, :T].add(fr[:, :, :hop])
        y = y.at[:, 1:].add(fr[:, :, hop:])
        y = y.reshape(B, out_len)
        wsq = jnp.zeros((T + 1, hop), jnp.float32)
        wsq = wsq.at[:T].add(w2[None, :hop])
        wsq = wsq.at[1:].add(w2[None, hop:])
        wsq = wsq.reshape(out_len)
    else:
        # TODO(synk): general-hop overlap-add kept as an unrolled scatter.
        out_len = (T - 1) * hop + n_fft
        y = jnp.zeros((B, out_len), jnp.float32)
        wsq = jnp.zeros((out_len,), jnp.float32)
        for t in range(T):
            y = y.at[:, t * hop:t * hop + n_fft].add(fr[:, t])
            wsq = wsq.at[t * hop:t * hop + n_fft].add(w2)

    pad = n_fft // 2
    y = y[:, pad:pad + length]
    wsq = wsq[pad:pad + length]
    wsq = jnp.where(wsq > 1e-11, wsq, 1.0)
    return y / wsq[None, :]


# -----------------------------------------------------------------------------
# GridNetV2Block (channels-last) and TFGridNetV2 forward
# -----------------------------------------------------------------------------

def gridnet_block(x, p, cfg):
    """x: [B, T, F, C] -> [B, T, F, C]   (emb_ks == emb_hs == 1 path)."""
    B, T, Fq, C = x.shape
    H = cfg['hidden']
    nh = cfg['n_head']
    E = cfg['E']
    Dv = C // nh
    eps = cfg['eps']

    # ---- intra (along frequency): LN fused into the LSTM gate projection ----
    rows = x.reshape(B * T * Fq, C)
    h = bilstm(x.reshape(B * T, Fq, C), p['intra_norm_g'], p['intra_norm_b'],
               p['intra_lstm'], H, eps)                            # [B*T, F, 2H]
    intra = matmul_bias(h.reshape(B * T * Fq, 2 * H), p['intra_lin_w'].T,
                        p['intra_lin_b'], residual=rows)           # fused +x
    intra = intra.reshape(B, T, Fq, C)

    # ---- inter (along time) ----
    xi = intra.transpose(0, 2, 1, 3)                               # [B, F, T, C]
    rows_i = xi.reshape(B * Fq * T, C)
    hv = bilstm(xi.reshape(B * Fq, T, C), p['inter_norm_g'], p['inter_norm_b'],
                p['inter_lstm'], H, eps)                           # [B*F, T, 2H]
    inter = matmul_bias(hv.reshape(B * Fq * T, 2 * H), p['inter_lin_w'].T,
                        p['inter_lin_b'], residual=rows_i)         # fused +intra
    inter = inter.reshape(B, Fq, T, C).transpose(0, 2, 1, 3)       # [B, T, F, C]

    # ---- full-band self-attention: single fused QKV projection ----
    rows_a = inter.reshape(B * T * Fq, C)
    nQ = nh * E
    nV = nh * Dv
    w_qkv = jnp.concatenate([p['wq'], p['wk'], p['wv']], axis=0)   # [2nQ+nV, C]
    b_qkv = jnp.concatenate([p['bq'], p['bk'], p['bv']], axis=0)
    qkv = matmul_bias(rows_a, w_qkv.T, b_qkv, out_dtype=jnp.bfloat16)

    def split_heads(y, d):
        # [B*T*F, nh*d] -> [B, nh, T, d*F]
        y = y.reshape(B, T, Fq, nh, d).transpose(0, 3, 1, 4, 2)
        return y.reshape(B, nh, T, d * Fq)

    Qh = split_heads(qkv[:, :nQ], E)
    Kh = split_heads(qkv[:, nQ:2 * nQ], E)
    Vh = split_heads(qkv[:, 2 * nQ:], Dv)

    Qn = allhead_prelu_ln(Qh, p['aq'], p['gq'], p['betq'], eps=eps)
    Kn = allhead_prelu_ln(Kh, p['ak'], p['gk'], p['betk'], eps=eps)
    Vn = allhead_prelu_ln(Vh, p['av'], p['gv'], p['betv'], eps=eps)

    KnT = jnp.swapaxes(Kn, -1, -2)                                 # [B, nh, E*F, T]
    att = attention(Qn.reshape(B * nh, T, E * Fq),
                    KnT.reshape(B * nh, E * Fq, T),
                    Vn.reshape(B * nh, T, Dv * Fq),
                    1.0 / math.sqrt(E * Fq))                       # [B*nh, T, Dv*F]

    Vc = att.reshape(B, nh, T, Dv, Fq).transpose(0, 2, 4, 1, 3)    # [B, T, F, nh, Dv]
    proj = matmul_bias(Vc.reshape(B * T * Fq, C), p['wproj'].T, p['bproj'],
                       out_dtype=jnp.bfloat16)                     # [B*T*F, C]

    # PReLU + LayerNormalization4DCF over (C, F): stats are order-agnostic, so
    # run on the [B*T, F*C] layout directly (gamma/beta permuted) and fuse the
    # "+inter" residual into the norm kernel.  No transposes.
    g_fc = p['gproj'].T.reshape(-1)                                # [F*C]
    b_fc = p['betproj'].T.reshape(-1)
    out = rownorm(proj.reshape(B * T, Fq * C), g_fc, b_fc,
                  alpha=p['aproj'], residual=inter.reshape(B * T, Fq * C),
                  eps=eps)
    return out.reshape(B, T, Fq, C)


def tfgridnet_forward(audio, mouth, params, cfg):
    """audio: [B, N] mono waveform; mouth: [B, 2, h, w] aux features."""
    B, N = audio.shape
    n_fft, hop = cfg['n_fft'], cfg['stride']

    x = audio[..., None]                                           # [B, N, 1]
    mix_std = jnp.std(x, axis=(1, 2), keepdims=True, ddof=1)       # unbiased std
    mix_std = jnp.maximum(mix_std, 1e-8)                           # guard silence
    xn = (x / mix_std)[..., 0]

    re, im = stft_enc(xn, n_fft, hop, params['window'])            # [B, T, F]
    T_, Fq = re.shape[1], re.shape[2]

    m = interp_nearest(mouth, (T_, Fq))                            # [B, 2, T, F]
    feat = jnp.concatenate([re[..., None], im[..., None],
                            m.transpose(0, 2, 3, 1)], axis=-1)     # [B, T, F, 4]

    feat = conv3x3_cl(feat, params['conv_w'], params['conv_b'])    # [B, T, F, C]
    feat = groupnorm1_cl(feat, params['gn_w'], params['gn_b'], cfg['eps'])

    for bp in params['blocks']:
        feat = gridnet_block(feat, bp, cfg)

    # ConvTranspose2d(3x3, stride 1, pad 1) == conv with flipped, swapped weights
    w_eq = jnp.flip(params['deconv_w'], axis=(2, 3)).transpose(1, 0, 2, 3)
    out = conv3x3_cl(feat, w_eq, params['deconv_b'])               # [B, T, F, 2*S]
    out = out.reshape(B, T_, Fq, cfg['n_srcs'], 2).transpose(0, 3, 4, 1, 2)
    re_o = out[:, :, 0].reshape(B * cfg['n_srcs'], T_, Fq)
    im_o = out[:, :, 1].reshape(B * cfg['n_srcs'], T_, Fq)

    wav = istft_dec(re_o, im_o, n_fft, hop, params['window'], N)
    wav = wav.reshape(B, cfg['n_srcs'], N) * mix_std               # [B,1,1] bcast
    return wav


# -----------------------------------------------------------------------------
# Deterministic parameter construction (synthetic weights, no checkpoint)
# -----------------------------------------------------------------------------

def init_params(key, cfg):
    counter = [0]

    def w(shape, scale=0.1):
        counter[0] += 1
        k = jax.random.fold_in(key, counter[0])
        return (scale * jax.random.normal(k, shape)).astype(jnp.float32)

    C = cfg['emb_dim']
    H = cfg['hidden']
    nh = cfg['n_head']
    Fq = cfg['n_freqs']
    E = cfg['E']
    Dv = C // nh

    def lstm_p():
        return {
            'wih_f': w((4 * H, C)), 'whh_f': w((4 * H, H)),
            'bih_f': w((4 * H,), 0.01), 'bhh_f': w((4 * H,), 0.01),
            'wih_b': w((4 * H, C)), 'whh_b': w((4 * H, H)),
            'bih_b': w((4 * H,), 0.01), 'bhh_b': w((4 * H,), 0.01),
        }

    def block_p():
        return {
            'intra_norm_g': jnp.ones((C,), jnp.float32),
            'intra_norm_b': jnp.zeros((C,), jnp.float32),
            'inter_norm_g': jnp.ones((C,), jnp.float32),
            'inter_norm_b': jnp.zeros((C,), jnp.float32),
            'intra_lstm': lstm_p(), 'inter_lstm': lstm_p(),
            'intra_lin_w': w((C, 2 * H)), 'intra_lin_b': w((C,), 0.01),
            'inter_lin_w': w((C, 2 * H)), 'inter_lin_b': w((C,), 0.01),
            'wq': w((nh * E, C)), 'bq': w((nh * E,), 0.01),
            'aq': jnp.full((nh,), 0.25, jnp.float32),
            'gq': jnp.ones((nh, E, Fq), jnp.float32),
            'betq': jnp.zeros((nh, E, Fq), jnp.float32),
            'wk': w((nh * E, C)), 'bk': w((nh * E,), 0.01),
            'ak': jnp.full((nh,), 0.25, jnp.float32),
            'gk': jnp.ones((nh, E, Fq), jnp.float32),
            'betk': jnp.zeros((nh, E, Fq), jnp.float32),
            'wv': w((nh * Dv, C)), 'bv': w((nh * Dv,), 0.01),
            'av': jnp.full((nh,), 0.25, jnp.float32),
            'gv': jnp.ones((nh, Dv, Fq), jnp.float32),
            'betv': jnp.zeros((nh, Dv, Fq), jnp.float32),
            'wproj': w((C, C)), 'bproj': w((C,), 0.01),
            'aproj': jnp.full((), 0.25, jnp.float32),
            'gproj': jnp.ones((C, Fq), jnp.float32),
            'betproj': jnp.zeros((C, Fq), jnp.float32),
        }

    n = np.arange(cfg['n_fft'])
    window = jnp.asarray(0.5 - 0.5 * np.cos(2.0 * np.pi * n / cfg['n_fft']),
                         jnp.float32)  # periodic hann (torch.hann_window)

    return {
        'window': window,
        'conv_w': w((C, 4 * cfg['n_imics'], 3, 3)), 'conv_b': w((C,), 0.01),
        'gn_w': jnp.ones((C,), jnp.float32), 'gn_b': jnp.zeros((C,), jnp.float32),
        'deconv_w': w((C, 2 * cfg['n_srcs'], 3, 3)),
        'deconv_b': w((2 * cfg['n_srcs'],), 0.01),
        'blocks': [block_p() for _ in range(cfg['n_layers'])],
    }


# -----------------------------------------------------------------------------
# Main
# -----------------------------------------------------------------------------

if __name__ == "__main__":
    cfg = dict(
        n_srcs=2, n_fft=16, stride=8, n_imics=1, n_layers=2,
        hidden=16, n_head=2, approx_qk_dim=16, emb_dim=8,
        emb_ks=1, emb_hs=1, eps=1e-5,
    )
    cfg['n_freqs'] = cfg['n_fft'] // 2 + 1                        # 9
    cfg['E'] = math.ceil(cfg['approx_qk_dim'] / cfg['n_freqs'])   # 2

    key = jax.random.PRNGKey(0)
    k_audio, k_mouth, k_par = jax.random.split(key, 3)

    B, N = 2, 64
    audio = jax.random.normal(k_audio, (B, N), jnp.float32)
    mouth = jax.random.normal(k_mouth, (B, 2 * cfg['n_imics'], 4, 4), jnp.float32)

    params = init_params(k_par, cfg)

    fwd = jax.jit(lambda a, m, p: tfgridnet_forward(a, m, p, cfg))
    out = fwd(audio, mouth, params)
    out = jax.block_until_ready(out)

    assert out.shape == (B, cfg['n_srcs'], N)
    assert bool(jnp.all(jnp.isfinite(out)))
    print("KERNEL_OK")
</pallas_src>

<mosaic_0001>
module attributes {stable_mosaic.version = 11 : i64} {
  func.func @_matmul_kernel(%arg0: i32, %arg1: memref<18x16xf32, #tpu.memory_space<vmem>>, %arg2: memref<16x18xbf16, #tpu.memory_space<vmem>>, %arg3: memref<1x18xf32, #tpu.memory_space<vmem>>, %arg4: memref<18x18xf32, #tpu.memory_space<vmem>>) attributes {dimension_semantics = [#tpu.dimension_semantics<parallel>], iteration_bounds = array<i64: 1>, scalar_prefetch = 0 : i64, scratch_operands = 0 : i64, tpu.core_type = #tpu.core_type<tc>, window_params = [{transform_indices = @transform_0, window_bounds = array<i64: 18, 16>}, {pipeline_mode = #tpu.pipeline_mode<synchronous>, transform_indices = @transform_1, window_bounds = array<i64: 16, 18>}, {pipeline_mode = #tpu.pipeline_mode<synchronous>, transform_indices = @transform_2, window_bounds = array<i64: 1, 18>}, {transform_indices = @transform_3, window_bounds = array<i64: 18, 18>}]} {
    %c0 = arith.constant 0 : index
    %c0_0 = arith.constant 0 : index
    %0 = vector.load %arg1[%c0, %c0_0] : memref<18x16xf32, #tpu.memory_space<vmem>>, vector<18x16xf32>
    %1 = arith.truncf %0 : vector<18x16xf32> to vector<18x16xbf16>
    %c0_1 = arith.constant 0 : index
    %c0_2 = arith.constant 0 : index
    %2 = vector.load %arg2[%c0_1, %c0_2] : memref<16x18xbf16, #tpu.memory_space<vmem>>, vector<16x18xbf16>
    %cst = arith.constant dense<0.000000e+00> : vector<18x18xf32>
    %3 = tpu.matmul %1, %2, %cst {dimension_numbers = #tpu.dot_dimension_numbers<[1], [0], [0], [1], [0, 0, 1, 1], [], []>} : vector<18x16xbf16>, vector<16x18xbf16>, vector<18x18xf32> -> vector<18x18xf32>
    %c0_3 = arith.constant 0 : index
    %c0_4 = arith.constant 0 : index
    %4 = vector.load %arg3[%c0_3, %c0_4] : memref<1x18xf32, #tpu.memory_space<vmem>>, vector<1x18xf32>
    %5 = vector.broadcast %4 : vector<1x18xf32> to vector<18x18xf32>
    %6 = arith.addf %3, %5 : vector<18x18xf32>
    %c0_5 = arith.constant 0 : index
    %c0_6 = arith.constant 0 : index
    %7 = vector.load %arg4[%c0_5, %c0_6] : memref<18x18xf32, #tpu.memory_space<vmem>>, vector<18x18xf32>
    tpu.vector_store %arg4[%c0_5, %c0_6], %6 {strides = array<i32>} : memref<18x18xf32, #tpu.memory_space<vmem>>, vector<18x18xf32>,
    return
  }
  func.func @transform_0(%arg0: i32) -> (i32, i32) {
    %c0_i32 = arith.constant 0 : i32
    %c0_i32_0 = arith.constant 0 : i32
    return %arg0, %c0_i32 : i32, i32
  }
  func.func @transform_1(%arg0: i32) -> (i32, i32) {
    %c0_i32 = arith.constant 0 : i32
    %c0_i32_0 = arith.constant 0 : i32
    %c0_i32_1 = arith.constant 0 : i32
    return %c0_i32, %c0_i32_0 : i32, i32
  }
  func.func @transform_2(%arg0: i32) -> (i32, i32) {
    %c0_i32 = arith.constant 0 : i32
    %c0_i32_0 = arith.constant 0 : i32
    %c0_i32_1 = arith.constant 0 : i32
    return %c0_i32, %c0_i32_0 : i32, i32
  }
  func.func @transform_3(%arg0: i32) -> (i32, i32) {
    %c0_i32 = arith.constant 0 : i32
    %c0_i32_0 = arith.constant 0 : i32
    return %arg0, %c0_i32 : i32, i32
  }
}

module attributes {stable_mosaic.version = 11 : i64} {
  func.func @_matmul_kernel(%arg0: i32, %arg1: memref<162x36xf32, #tpu.memory_space<vmem>>, %arg2: memref<36x8xbf16, #tpu.memory_space<vmem>>, %arg3: memref<1x8xf32, #tpu.memory_space<vmem>>, %arg4: memref<162x8xf32, #tpu.memory_space<vmem>>) attributes {dimension_semantics = [#tpu.dimension_semantics<parallel>], iteration_bounds = array<i64: 1>, scalar_prefetch = 0 : i64, scratch_operands = 0 : i64, tpu.core_type = #tpu.core_type<tc>, window_params = [{transform_indices = @transform_0, window_bounds = array<i64: 162, 36>}, {pipeline_mode = #tpu.pipeline_mode<synchronous>, transform_indices = @transform_1, window_bounds = array<i64: 36, 8>}, {pipeline_mode = #tpu.pipeline_mode<synchronous>, transform_indices = @transform_2, window_bounds = array<i64: 1, 8>}, {transform_indices = @transform_3, window_bounds = array<i64: 162, 8>}]} {
    %c0 = arith.constant 0 : index
    %c0_0 = arith.constant 0 : index
    %0 = vector.load %arg1[%c0, %c0_0] : memref<162x36xf32, #tpu.memory_space<vmem>>, vector<162x36xf32>
    %1 = arith.truncf %0 : vector<162x36xf32> to vector<162x36xbf16>
    %c0_1 = arith.constant 0 : index
    %c0_2 = arith.constant 0 : index
    %2 = vector.load %arg2[%c0_1, %c0_2] : memref<36x8xbf16, #tpu.memory_space<vmem>>, vector<36x8xbf16>
    %cst = arith.constant dense<0.000000e+00> : vector<162x8xf32>
    %3 = tpu.matmul %1, %2, %cst {dimension_numbers = #tpu.dot_dimension_numbers<[1], [0], [0], [1], [0, 0, 1, 1], [], []>} : vector<162x36xbf16>, vector<36x8xbf16>, vector<162x8xf32> -> vector<162x8xf32>
    %c0_3 = arith.constant 0 : index
    %c0_4 = arith.constant 0 : index
    %4 = vector.load %arg3[%c0_3, %c0_4] : memref<1x8xf32, #tpu.memory_space<vmem>>, vector<1x8xf32>
    %5 = vector.broadcast %4 : vector<1x8xf32> to vector<162x8xf32>
    %6 = arith.addf %3, %5 : vector<162x8xf32>
    %c0_5 = arith.constant 0 : index
    %c0_6 = arith.constant 0 : index
    %7 = vector.load %arg4[%c0_5, %c0_6] : memref<162x8xf32, #tpu.memory_space<vmem>>, vector<162x8xf32>
    tpu.vector_store %arg4[%c0_5, %c0_6], %6 {strides = array<i32>} : memref<162x8xf32, #tpu.memory_space<vmem>>, vector<162x8xf32>,
    return
  }
  func.func @transform_0(%arg0: i32) -> (i32, i32) {
    %c0_i32 = arith.constant 0 : i32
    %c0_i32_0 = arith.constant 0 : i32
    return %arg0, %c0_i32 : i32, i32
  }
  func.func @transform_1(%arg0: i32) -> (i32, i32) {
    %c0_i32 = arith.constant 0 : i32
    %c0_i32_0 = arith.constant 0 : i32
    %c0_i32_1 = arith.constant 0 : i32
    return %c0_i32, %c0_i32_0 : i32, i32
  }
  func.func @transform_2(%arg0: i32) -> (i32, i32) {
    %c0_i32 = arith.constant 0 : i32
    %c0_i32_0 = arith.constant 0 : i32
    %c0_i32_1 = arith.constant 0 : i32
    return %c0_i32, %c0_i32_0 : i32, i32
  }
  func.func @transform_3(%arg0: i32) -> (i32, i32) {
    %c0_i32 = arith.constant 0 : i32
    %c0_i32_0 = arith.constant 0 : i32
    return %arg0, %c0_i32 : i32, i32
  }
}

module attributes {stable_mosaic.version = 11 : i64} {
  func.func @_groupnorm_kernel(%arg0: i32, %arg1: memref<1x81x8xf32, #tpu.memory_space<vmem>>, %arg2: memref<1x8xf32, #tpu.memory_space<vmem>>, %arg3: memref<1x8xf32, #tpu.memory_space<vmem>>, %arg4: memref<1x81x8xf32, #tpu.memory_space<vmem>>) attributes {dimension_semantics = [#tpu.dimension_semantics<parallel>], iteration_bounds = array<i64: 2>, scalar_prefetch = 0 : i64, scratch_operands = 0 : i64, tpu.core_type = #tpu.core_type<tc>, window_params = [{transform_indices = @transform_0, window_bounds = array<i64: 1, 81, 8>}, {pipeline_mode = #tpu.pipeline_mode<synchronous>, transform_indices = @transform_1, window_bounds = array<i64: 1, 8>}, {pipeline_mode = #tpu.pipeline_mode<synchronous>, transform_indices = @transform_2, window_bounds = array<i64: 1, 8>}, {transform_indices = @transform_3, window_bounds = array<i64: 1, 81, 8>}]} {
    %c0 = arith.constant 0 : index
    %c0_0 = arith.constant 0 : index
    %c0_1 = arith.constant 0 : index
    %0 = vector.load %arg1[%c0, %c0_0, %c0_1] : memref<1x81x8xf32, #tpu.memory_space<vmem>>, vector<1x81x8xf32>
    %1 = vector.shape_cast %0 : vector<1x81x8xf32> to vector<1x1x81x8xf32>
    %cst = arith.constant dense<0.000000e+00> : vector<1xf32>
    %2 = vector.multi_reduction <add>, %1, %cst [1, 2, 3] : vector<1x1x81x8xf32> to vector<1xf32>
    %3 = vector.shape_cast %2 : vector<1xf32> to vector<1x1x1x1xf32>
    %4 = vector.extract %3[0, 0, 0, 0] : f32 from vector<1x1x1x1xf32>
    %cst_2 = arith.constant 6.480000e+02 : f32
    %5 = arith.divf %4, %cst_2 : f32
    %6 = vector.broadcast %5 : f32 to vector<1x81x8xf32>
    %7 = arith.subf %0, %6 : vector<1x81x8xf32>
    %8 = arith.mulf %7, %7 : vector<1x81x8xf32>
    %9 = vector.shape_cast %8 : vector<1x81x8xf32> to vector<1x1x81x8xf32>
    %cst_3 = arith.constant dense<0.000000e+00> : vector<1xf32>
    %10 = vector.multi_reduction <add>, %9, %cst_3 [1, 2, 3] : vector<1x1x81x8xf32> to vector<1xf32>
    %11 = vector.shape_cast %10 : vector<1xf32> to vector<1x1x1x1xf32>
    %12 = vector.extract %11[0, 0, 0, 0] : f32 from vector<1x1x1x1xf32>
    %cst_4 = arith.constant 6.480000e+02 : f32
    %13 = arith.divf %12, %cst_4 : f32
    %14 = vector.broadcast %5 : f32 to vector<1x81x8xf32>
    %15 = arith.subf %0, %14 : vector<1x81x8xf32>
    %cst_5 = arith.constant 9.99999974E-6 : f32
    %16 = arith.addf %13, %cst_5 : f32
    %17 = math.rsqrt %16 : f32
    %18 = vector.broadcast %17 : f32 to vector<1x81x8xf32>
    %19 = arith.mulf %15, %18 : vector<1x81x8xf32>
    %c0_6 = arith.constant 0 : index
    %c0_7 = arith.constant 0 : index
    %20 = vector.load %arg2[%c0_6, %c0_7] : memref<1x8xf32, #tpu.memory_space<vmem>>, vector<1x8xf32>
    %21 = vector.shape_cast %20 : vector<1x8xf32> to vector<1x1x8xf32>
    %22 = vector.broadcast %21 : vector<1x1x8xf32> to vector<1x81x8xf32>
    %23 = arith.mulf %19, %22 : vector<1x81x8xf32>
    %c0_8 = arith.constant 0 : index
    %c0_9 = arith.constant 0 : index
    %24 = vector.load %arg3[%c0_8, %c0_9] : memref<1x8xf32, #tpu.memory_space<vmem>>, vector<1x8xf32>
    %25 = vector.shape_cast %24 : vector<1x8xf32> to vector<1x1x8xf32>
    %26 = vector.broadcast %25 : vector<1x1x8xf32> to vector<1x81x8xf32>
    %27 = arith.addf %23, %26 : vector<1x81x8xf32>
    %c0_10 = arith.constant 0 : index
    %c0_11 = arith.constant 0 : index
    %c0_12 = arith.constant 0 : index
    %28 = vector.load %arg4[%c0_10, %c0_11, %c0_12] : memref<1x81x8xf32, #tpu.memory_space<vmem>>, vector<1x81x8xf32>
    tpu.vector_store %arg4[%c0_10, %c0_11, %c0_12], %27 {strides = array<i32>} : memref<1x81x8xf32, #tpu.memory_space<vmem>>, vector<1x81x8xf32>,
    return
  }
  func.func @transform_0(%arg0: i32) -> (i32, i32, i32) {
    %c0_i32 = arith.constant 0 : i32
    %c0_i32_0 = arith.constant 0 : i32
    %c0_i32_1 = arith.constant 0 : i32
    return %arg0, %c0_i32, %c0_i32_0 : i32, i32, i32
  }
  func.func @transform_1(%arg0: i32) -> (i32, i32) {
    %c0_i32 = arith.constant 0 : i32
    %c0_i32_0 = arith.constant 0 : i32
    %c0_i32_1 = arith.constant 0 : i32
    return %c0_i32, %c0_i32_0 : i32, i32
  }
  func.func @transform_2(%arg0: i32) -> (i32, i32) {
    %c0_i32 = arith.constant 0 : i32
    %c0_i32_0 = arith.constant 0 : i32
    %c0_i32_1 = arith.constant 0 : i32
    return %c0_i32, %c0_i32_0 : i32, i32
  }
  func.func @transform_3(%arg0: i32) -> (i32, i32, i32) {
    %c0_i32 = arith.constant 0 : i32
    %c0_i32_0 = arith.constant 0 : i32
    %c0_i32_1 = arith.constant 0 : i32
    return %arg0, %c0_i32, %c0_i32_0 : i32, i32, i32
  }
}

module attributes {stable_mosaic.version = 11 : i64} {
  func.func @_ln_matmul_kernel(%arg0: i32, %arg1: memref<162x8xf32, #tpu.memory_space<vmem>>, %arg2: memref<1x8xf32, #tpu.memory_space<vmem>>, %arg3: memref<1x8xf32, #tpu.memory_space<vmem>>, %arg4: memref<8x128xbf16, #tpu.memory_space<vmem>>, %arg5: memref<1x128xf32, #tpu.memory_space<vmem>>, %arg6: memref<162x128xbf16, #tpu.memory_space<vmem>>) attributes {dimension_semantics = [#tpu.dimension_semantics<parallel>], iteration_bounds = array<i64: 1>, scalar_prefetch = 0 : i64, scratch_operands = 0 : i64, tpu.core_type = #tpu.core_type<tc>, window_params = [{transform_indices = @transform_0, window_bounds = array<i64: 162, 8>}, {pipeline_mode = #tpu.pipeline_mode<synchronous>, transform_indices = @transform_1, window_bounds = array<i64: 1, 8>}, {pipeline_mode = #tpu.pipeline_mode<synchronous>, transform_indices = @transform_2, window_bounds = array<i64: 1, 8>}, {pipeline_mode = #tpu.pipeline_mode<synchronous>, transform_indices = @transform_3, window_bounds = array<i64: 8, 128>}, {pipeline_mode = #tpu.pipeline_mode<synchronous>, transform_indices = @transform_4, window_bounds = array<i64: 1, 128>}, {transform_indices = @transform_5, window_bounds = array<i64: 162, 128>}]} {
    %c0 = arith.constant 0 : index
    %c0_0 = arith.constant 0 : index
    %0 = vector.load %arg1[%c0, %c0_0] : memref<162x8xf32, #tpu.memory_space<vmem>>, vector<162x8xf32>
    %cst = arith.constant dense<0.000000e+00> : vector<162xf32>
    %1 = vector.multi_reduction <add>, %0, %cst [1] : vector<162x8xf32> to vector<162xf32>
    %2 = vector.shape_cast %1 : vector<162xf32> to vector<162x1xf32>
    %cst_1 = arith.constant 8.000000e+00 : f32
    %3 = vector.broadcast %cst_1 : f32 to vector<162x1xf32>
    %4 = arith.divf %2, %3 : vector<162x1xf32>
    %5 = vector.broadcast %4 : vector<162x1xf32> to vector<162x8xf32>
    %6 = arith.subf %0, %5 : vector<162x8xf32>
    %7 = arith.mulf %6, %6 : vector<162x8xf32>
    %cst_2 = arith.constant dense<0.000000e+00> : vector<162xf32>
    %8 = vector.multi_reduction <add>, %7, %cst_2 [1] : vector<162x8xf32> to vector<162xf32>
    %9 = vector.shape_cast %8 : vector<162xf32> to vector<162x1xf32>
    %cst_3 = arith.constant 8.000000e+00 : f32
    %10 = vector.broadcast %cst_3 : f32 to vector<162x1xf32>
    %11 = arith.divf %9, %10 : vector<162x1xf32>
    %12 = vector.broadcast %4 : vector<162x1xf32> to vector<162x8xf32>
    %13 = arith.subf %0, %12 : vector<162x8xf32>
    %cst_4 = arith.constant 9.99999974E-6 : f32
    %14 = vector.broadcast %cst_4 : f32 to vector<162x1xf32>
    %15 = arith.addf %11, %14 : vector<162x1xf32>
    %16 = math.rsqrt %15 : vector<162x1xf32>
    %17 = vector.broadcast %16 : vector<162x1xf32> to vector<162x8xf32>
    %18 = arith.mulf %13, %17 : vector<162x8xf32>
    %c0_5 = arith.constant 0 : index
    %c0_6 = arith.constant 0 : index
    %19 = vector.load %arg2[%c0_5, %c0_6] : memref<1x8xf32, #tpu.memory_space<vmem>>, vector<1x8xf32>
    %20 = vector.broadcast %19 : vector<1x8xf32> to vector<162x8xf32>
    %21 = arith.mulf %18, %20 : vector<162x8xf32>
    %c0_7 = arith.constant 0 : index
    %c0_8 = arith.constant 0 : index
    %22 = vector.load %arg3[%c0_7, %c0_8] : memref<1x8xf32, #tpu.memory_space<vmem>>, vector<1x8xf32>
    %23 = vector.broadcast %22 : vector<1x8xf32> to vector<162x8xf32>
    %24 = arith.addf %21, %23 : vector<162x8xf32>
    %25 = arith.truncf %24 : vector<162x8xf32> to vector<162x8xbf16>
    %c0_9 = arith.constant 0 : index
    %c0_10 = arith.constant 0 : index
    %26 = vector.load %arg4[%c0_9, %c0_10] : memref<8x128xbf16, #tpu.memory_space<vmem>>, vector<8x128xbf16>
    %cst_11 = arith.constant dense<0.000000e+00> : vector<162x128xf32>
    %27 = tpu.matmul %25, %26, %cst_11 {dimension_numbers = #tpu.dot_dimension_numbers<[1], [0], [0], [1], [0, 0, 1, 1], [], []>} : vector<162x8xbf16>, vector<8x128xbf16>, vector<162x128xf32> -> vector<162x128xf32>
    %c0_12 = arith.constant 0 : index
    %c0_13 = arith.constant 0 : index
    %28 = vector.load %arg5[%c0_12, %c0_13] : memref<1x128xf32, #tpu.memory_space<vmem>>, vector<1x128xf32>
    %29 = vector.broadcast %28 : vector<1x128xf32> to vector<162x128xf32>
    %30 = arith.addf %27, %29 : vector<162x128xf32>
    %31 = arith.truncf %30 : vector<162x128xf32> to vector<162x128xbf16>
    %c0_14 = arith.constant 0 : index
    %c0_15 = arith.constant 0 : index
    %32 = vector.load %arg6[%c0_14, %c0_15] : memref<162x128xbf16, #tpu.memory_space<vmem>>, vector<162x128xbf16>
    tpu.vector_store %arg6[%c0_14, %c0_15], %31 {strides = array<i32>} : memref<162x128xbf16, #tpu.memory_space<vmem>>, vector<162x128xbf16>,
    return
  }
  func.func @transform_0(%arg0: i32) -> (i32, i32) {
    %c0_i32 = arith.constant 0 : i32
    %c0_i32_0 = arith.constant 0 : i32
    return %arg0, %c0_i32 : i32, i32
  }
  func.func @transform_1(%arg0: i32) -> (i32, i32) {
    %c0_i32 = arith.constant 0 : i32
    %c0_i32_0 = arith.constant 0 : i32
    %c0_i32_1 = arith.constant 0 : i32
    return %c0_i32, %c0_i32_0 : i32, i32
  }
  func.func @transform_2(%arg0: i32) -> (i32, i32) {
    %c0_i32 = arith.constant 0 : i32
    %c0_i32_0 = arith.constant 0 : i32
    %c0_i32_1 = arith.constant 0 : i32
    return %c0_i32, %c0_i32_0 : i32, i32
  }
  func.func @transform_3(%arg0: i32) -> (i32, i32) {
    %c0_i32 = arith.constant 0 : i32
    %c0_i32_0 = arith.constant 0 : i32
    %c0_i32_1 = arith.constant 0 : i32
    return %c0_i32, %c0_i32_0 : i32, i32
  }
  func.func @transform_4(%arg0: i32) -> (i32, i32) {
    %c0_i32 = arith.constant 0 : i32
    %c0_i32_0 = arith.constant 0 : i32
    %c0_i32_1 = arith.constant 0 : i32
    return %c0_i32, %c0_i32_0 : i32, i32
  }
  func.func @transform_5(%arg0: i32) -> (i32, i32) {
    %c0_i32 = arith.constant 0 : i32
    %c0_i32_0 = arith.constant 0 : i32
    return %arg0, %c0_i32 : i32, i32
  }
}

module attributes {stable_mosaic.version = 11 : i64} {
  func.func @_bilstm_kernel(%arg0: i32, %arg1: i32, %arg2: memref<9x4x18x32xbf16, #tpu.memory_space<vmem>>, %arg3: memref<4x32x32xbf16, #tpu.memory_space<vmem>>, %arg4: memref<9x18x32xbf16, #tpu.memory_space<vmem>>, %arg5: memref<18x32xf32, #tpu.memory_space<vmem>>, %arg6: memref<18x32xf32, #tpu.memory_space<vmem>>) attributes {dimension_semantics = [#tpu.dimension_semantics<parallel>, #tpu.dimension_semantics<arbitrary>], iteration_bounds = array<i64: 1, 1>, scalar_prefetch = 0 : i64, scratch_operands = 2 : i64, tpu.core_type = #tpu.core_type<tc>, window_params = [{transform_indices = @transform_0, window_bounds = array<i64: 9, 4, 18, 32>}, {pipeline_mode = #tpu.pipeline_mode<synchronous>, transform_indices = @transform_1, window_bounds = array<i64: 4, 32, 32>}, {transform_indices = @transform_2, window_bounds = array<i64: 9, 18, 32>}]} {
    %c0_i32 = arith.constant 0 : i32
    %0 = arith.cmpi eq, %arg1, %c0_i32 : i32
    %1 = arith.extui %0 : i1 to i32
    %c0_i32_0 = arith.constant 0 : i32
    %2 = arith.cmpi ne, %1, %c0_i32_0 : i32
    scf.if %2 {
      %cst_366 = arith.constant 0.000000e+00 : f32
      %570 = vector.broadcast %cst_366 : f32 to vector<18x32xf32>
      %c0_367 = arith.constant 0 : index
      %c0_368 = arith.constant 0 : index
      %571 = vector.load %arg5[%c0_367, %c0_368] : memref<18x32xf32, #tpu.memory_space<vmem>>, vector<18x32xf32>
      tpu.vector_store %arg5[%c0_367, %c0_368], %570 {strides = array<i32>} : memref<18x32xf32, #tpu.memory_space<vmem>>, vector<18x32xf32>,
      %cst_369 = arith.constant 0.000000e+00 : f32
      %572 = vector.broadcast %cst_369 : f32 to vector<18x32xf32>
      %c0_370 = arith.constant 0 : index
      %c0_371 = arith.constant 0 : index
      %573 = vector.load %arg6[%c0_370, %c0_371] : memref<18x32xf32, #tpu.memory_space<vmem>>, vector<18x32xf32>
      tpu.vector_store %arg6[%c0_370, %c0_371], %572 {strides = array<i32>} : memref<18x32xf32, #tpu.memory_space<vmem>>, vector<18x32xf32>,
    } else {
    }
    %c0_i32_1 = arith.constant 0 : i32
    %c0 = arith.constant 0 : index
    %c0_2 = arith.constant 0 : index
    %3 = vector.load %arg5[%c0, %c0_2] : memref<18x32xf32, #tpu.memory_space<vmem>>, vector<18x32xf32>
    %4 = arith.truncf %3 : vector<18x32xf32> to vector<18x32xbf16>
    %5 = arith.index_cast %c0_i32_1 : i32 to index
    %c0_3 = arith.constant 0 : index
    %c0_4 = arith.constant 0 : index
    %c0_5 = arith.constant 0 : index
    %6 = vector.load %arg2[%5, %c0_3, %c0_4, %c0_5] : memref<9x4x18x32xbf16, #tpu.memory_space<vmem>>, vector<1x1x18x32xbf16>
    %7 = vector.shape_cast %6 : vector<1x1x18x32xbf16> to vector<18x32xbf16>
    %8 = arith.extf %7 : vector<18x32xbf16> to vector<18x32xf32>
    %c0_6 = arith.constant 0 : index
    %c0_7 = arith.constant 0 : index
    %c0_8 = arith.constant 0 : index
    %9 = vector.load %arg3[%c0_6, %c0_7, %c0_8] : memref<4x32x32xbf16, #tpu.memory_space<vmem>>, vector<1x32x32xbf16>
    %10 = vector.shape_cast %9 : vector<1x32x32xbf16> to vector<32x32xbf16>
    %cst = arith.constant dense<0.000000e+00> : vector<18x32xf32>
    %11 = tpu.matmul %4, %10, %cst {dimension_numbers = #tpu.dot_dimension_numbers<[1], [0], [0], [1], [0, 0, 1, 1], [], []>} : vector<18x32xbf16>, vector<32x32xbf16>, vector<18x32xf32> -> vector<18x32xf32>
    %12 = arith.addf %8, %11 : vector<18x32xf32>
    %13 = arith.negf %12 : vector<18x32xf32>
    %14 = math.exp %13 : vector<18x32xf32>
    %cst_9 = arith.constant 1.000000e+00 : f32
    %15 = vector.broadcast %cst_9 : f32 to vector<18x32xf32>
    %16 = arith.addf %15, %14 : vector<18x32xf32>
    %17 = arith.divf %15, %16 : vector<18x32xf32>
    %18 = arith.index_cast %c0_i32_1 : i32 to index
    %c1 = arith.constant 1 : index
    %c0_10 = arith.constant 0 : index
    %c0_11 = arith.constant 0 : index
    %19 = vector.load %arg2[%18, %c1, %c0_10, %c0_11] : memref<9x4x18x32xbf16, #tpu.memory_space<vmem>>, vector<1x1x18x32xbf16>
    %20 = vector.shape_cast %19 : vector<1x1x18x32xbf16> to vector<18x32xbf16>
    %21 = arith.extf %20 : vector<18x32xbf16> to vector<18x32xf32>
    %c1_12 = arith.constant 1 : index
    %c0_13 = arith.constant 0 : index
    %c0_14 = arith.constant 0 : index
    %22 = vector.load %arg3[%c1_12, %c0_13, %c0_14] : memref<4x32x32xbf16, #tpu.memory_space<vmem>>, vector<1x32x32xbf16>
    %23 = vector.shape_cast %22 : vector<1x32x32xbf16> to vector<32x32xbf16>
    %cst_15 = arith.constant dense<0.000000e+00> : vector<18x32xf32>
    %24 = tpu.matmul %4, %23, %cst_15 {dimension_numbers = #tpu.dot_dimension_numbers<[1], [0], [0], [1], [0, 0, 1, 1], [], []>} : vector<18x32xbf16>, vector<32x32xbf16>, vector<18x32xf32> -> vector<18x32xf32>
    %25 = arith.addf %21, %24 : vector<18x32xf32>
    %26 = arith.negf %25 : vector<18x32xf32>
    %27 = math.exp %26 : vector<18x32xf32>
    %cst_16 = arith.constant 1.000000e+00 : f32
    %28 = vector.broadcast %cst_16 : f32 to vector<18x32xf32>
    %29 = arith.addf %28, %27 : vector<18x32xf32>
    %30 = arith.divf %28, %29 : vector<18x32xf32>
    %31 = arith.index_cast %c0_i32_1 : i32 to index
    %c2 = arith.constant 2 : index
    %c0_17 = arith.constant 0 : index
    %c0_18 = arith.constant 0 : index
    %32 = vector.load %arg2[%31, %c2, %c0_17, %c0_18] : memref<9x4x18x32xbf16, #tpu.memory_space<vmem>>, vector<1x1x18x32xbf16>
    %33 = vector.shape_cast %32 : vector<1x1x18x32xbf16> to vector<18x32xbf16>
    %34 = arith.extf %33 : vector<18x32xbf16> to vector<18x32xf32>
    %c2_19 = arith.constant 2 : index
    %c0_20 = arith.constant 0 : index
    %c0_21 = arith.constant 0 : index
    %35 = vector.load %arg3[%c2_19, %c0_20, %c0_21] : memref<4x32x32xbf16, #tpu.memory_space<vmem>>, vector<1x32x32xbf16>
    %36 = vector.shape_cast %35 : vector<1x32x32xbf16> to vector<32x32xbf16>
    %cst_22 = arith.constant dense<0.000000e+00> : vector<18x32xf32>
    %37 = tpu.matmul %4, %36, %cst_22 {dimension_numbers = #tpu.dot_dimension_numbers<[1], [0], [0], [1], [0, 0, 1, 1], [], []>} : vector<18x32xbf16>, vector<32x32xbf16>, vector<18x32xf32> -> vector<18x32xf32>
    %38 = arith.addf %34, %37 : vector<18x32xf32>
    %39 = math.tanh %38 : vector<18x32xf32>
    %40 = arith.index_cast %c0_i32_1 : i32 to index
    %c3 = arith.constant 3 : index
    %c0_23 = arith.constant 0 : index
    %c0_24 = arith.constant 0 : index
    %41 = vector.load %arg2[%40, %c3, %c0_23, %c0_24] : memref<9x4x18x32xbf16, #tpu.memory_space<vmem>>, vector<1x1x18x32xbf16>
    %42 = vector.shape_cast %41 : vector<1x1x18x32xbf16> to vector<18x32xbf16>
    %43 = arith.extf %42 : vector<18x32xbf16> to vector<18x32xf32>
    %c3_25 = arith.constant 3 : index
    %c0_26 = arith.constant 0 : index
    %c0_27 = arith.constant 0 : index
    %44 = vector.load %arg3[%c3_25, %c0_26, %c0_27] : memref<4x32x32xbf16, #tpu.memory_space<vmem>>, vector<1x32x32xbf16>
    %45 = vector.shape_cast %44 : vector<1x32x32xbf16> to vector<32x32xbf16>
    %cst_28 = arith.constant dense<0.000000e+00> : vector<18x32xf32>
    %46 = tpu.matmul %4, %45, %cst_28 {dimension_numbers = #tpu.dot_dimension_numbers<[1], [0], [0], [1], [0, 0, 1, 1], [], []>} : vector<18x32xbf16>, vector<32x32xbf16>, vector<18x32xf32> -> vector<18x32xf32>
    %47 = arith.addf %43, %46 : vector<18x32xf32>
    %48 = arith.negf %47 : vector<18x32xf32>
    %49 = math.exp %48 : vector<18x32xf32>
    %cst_29 = arith.constant 1.000000e+00 : f32
    %50 = vector.broadcast %cst_29 : f32 to vector<18x32xf32>
    %51 = arith.addf %50, %49 : vector<18x32xf32>
    %52 = arith.divf %50, %51 : vector<18x32xf32>
    %c0_30 = arith.constant 0 : index
    %c0_31 = arith.constant 0 : index
    %53 = vector.load %arg6[%c0_30, %c0_31] : memref<18x32xf32, #tpu.memory_space<vmem>>, vector<18x32xf32>
    %54 = arith.mulf %30, %53 : vector<18x32xf32>
    %55 = arith.mulf %17, %39 : vector<18x32xf32>
    %56 = arith.addf %54, %55 : vector<18x32xf32>
    %57 = math.tanh %56 : vector<18x32xf32>
    %58 = arith.mulf %52, %57 : vector<18x32xf32>
    %c0_32 = arith.constant 0 : index
    %c0_33 = arith.constant 0 : index
    %59 = vector.load %arg6[%c0_32, %c0_33] : memref<18x32xf32, #tpu.memory_space<vmem>>, vector<18x32xf32>
    tpu.vector_store %arg6[%c0_32, %c0_33], %56 {strides = array<i32>} : memref<18x32xf32, #tpu.memory_space<vmem>>, vector<18x32xf32>,
    %c0_34 = arith.constant 0 : index
    %c0_35 = arith.constant 0 : index
    %60 = vector.load %arg5[%c0_34, %c0_35] : memref<18x32xf32, #tpu.memory_space<vmem>>, vector<18x32xf32>
    tpu.vector_store %arg5[%c0_34, %c0_35], %58 {strides = array<i32>} : memref<18x32xf32, #tpu.memory_space<vmem>>, vector<18x32xf32>,
    %61 = arith.truncf %58 : vector<18x32xf32> to vector<18x32xbf16>
    %62 = arith.index_cast %c0_i32_1 : i32 to index
    %c0_36 = arith.constant 0 : index
    %c0_37 = arith.constant 0 : index
    %63 = vector.load %arg4[%62, %c0_36, %c0_37] : memref<9x18x32xbf16, #tpu.memory_space<vmem>>, vector<1x18x32xbf16>
    %64 = vector.shape_cast %63 : vector<1x18x32xbf16> to vector<18x32xbf16>
    %65 = vector.shape_cast %61 : vector<18x32xbf16> to vector<1x18x32xbf16>
    tpu.vector_store %arg4[%62, %c0_36, %c0_37], %65 {strides = array<i32>} : memref<9x18x32xbf16, #tpu.memory_space<vmem>>, vector<1x18x32xbf16>,
    %c1_i32 = arith.constant 1 : i32
    %c0_38 = arith.constant 0 : index
    %c0_39 = arith.constant 0 : index
    %66 = vector.load %arg5[%c0_38, %c0_39] : memref<18x32xf32, #tpu.memory_space<vmem>>, vector<18x32xf32>
    %67 = arith.truncf %66 : vector<18x32xf32> to vector<18x32xbf16>
    %68 = arith.index_cast %c1_i32 : i32 to index
    %c0_40 = arith.constant 0 : index
    %c0_41 = arith.constant 0 : index
    %c0_42 = arith.constant 0 : index
    %69 = vector.load %arg2[%68, %c0_40, %c0_41, %c0_42] : memref<9x4x18x32xbf16, #tpu.memory_space<vmem>>, vector<1x1x18x32xbf16>
    %70 = vector.shape_cast %69 : vector<1x1x18x32xbf16> to vector<18x32xbf16>
    %71 = arith.extf %70 : vector<18x32xbf16> to vector<18x32xf32>
    %c0_43 = arith.constant 0 : index
    %c0_44 = arith.constant 0 : index
    %c0_45 = arith.constant 0 : index
    %72 = vector.load %arg3[%c0_43, %c0_44, %c0_45] : memref<4x32x32xbf16, #tpu.memory_space<vmem>>, vector<1x32x32xbf16>
    %73 = vector.shape_cast %72 : vector<1x32x32xbf16> to vector<32x32xbf16>
    %cst_46 = arith.constant dense<0.000000e+00> : vector<18x32xf32>
    %74 = tpu.matmul %67, %73, %cst_46 {dimension_numbers = #tpu.dot_dimension_numbers<[1], [0], [0], [1], [0, 0, 1, 1], [], []>} : vector<18x32xbf16>, vector<32x32xbf16>, vector<18x32xf32> -> vector<18x32xf32>
    %75 = arith.addf %71, %74 : vector<18x32xf32>
    %76 = arith.negf %75 : vector<18x32xf32>
    %77 = math.exp %76 : vector<18x32xf32>
    %cst_47 = arith.constant 1.000000e+00 : f32
    %78 = vector.broadcast %cst_47 : f32 to vector<18x32xf32>
    %79 = arith.addf %78, %77 : vector<18x32xf32>
    %80 = arith.divf %78, %79 : vector<18x32xf32>
    %81 = arith.index_cast %c1_i32 : i32 to index
    %c1_48 = arith.constant 1 : index
    %c0_49 = arith.constant 0 : index
    %c0_50 = arith.constant 0 : index
    %82 = vector.load %arg2[%81, %c1_48, %c0_49, %c0_50] : memref<9x4x18x32xbf16, #tpu.memory_space<vmem>>, vector<1x1x18x32xbf16>
    %83 = vector.shape_cast %82 : vector<1x1x18x32xbf16> to vector<18x32xbf16>
    %84 = arith.extf %83 : vector<18x32xbf16> to vector<18x32xf32>
    %c1_51 = arith.constant 1 : index
    %c0_52 = arith.constant 0 : index
    %c0_53 = arith.constant 0 : index
    %85 = vector.load %arg3[%c1_51, %c0_52, %c0_53] : memref<4x32x32xbf16, #tpu.memory_space<vmem>>, vector<1x32x32xbf16>
    %86 = vector.shape_cast %85 : vector<1x32x32xbf16> to vector<32x32xbf16>
    %cst_54 = arith.constant dense<0.000000e+00> : vector<18x32xf32>
    %87 = tpu.matmul %67, %86, %cst_54 {dimension_numbers = #tpu.dot_dimension_numbers<[1], [0], [0], [1], [0, 0, 1, 1], [], []>} : vector<18x32xbf16>, vector<32x32xbf16>, vector<18x32xf32> -> vector<18x32xf32>
    %88 = arith.addf %84, %87 : vector<18x32xf32>
    %89 = arith.negf %88 : vector<18x32xf32>
    %90 = math.exp %89 : vector<18x32xf32>
    %cst_55 = arith.constant 1.000000e+00 : f32
    %91 = vector.broadcast %cst_55 : f32 to vector<18x32xf32>
    %92 = arith.addf %91, %90 : vector<18x32xf32>
    %93 = arith.divf %91, %92 : vector<18x32xf32>
    %94 = arith.index_cast %c1_i32 : i32 to index
    %c2_56 = arith.constant 2 : index
    %c0_57 = arith.constant 0 : index
    %c0_58 = arith.constant 0 : index
    %95 = vector.load %arg2[%94, %c2_56, %c0_57, %c0_58] : memref<9x4x18x32xbf16, #tpu.memory_space<vmem>>, vector<1x1x18x32xbf16>
    %96 = vector.shape_cast %95 : vector<1x1x18x32xbf16> to vector<18x32xbf16>
    %97 = arith.extf %96 : vector<18x32xbf16> to vector<18x32xf32>
    %c2_59 = arith.constant 2 : index
    %c0_60 = arith.constant 0 : index
    %c0_61 = arith.constant 0 : index
    %98 = vector.load %arg3[%c2_59, %c0_60, %c0_61] : memref<4x32x32xbf16, #tpu.memory_space<vmem>>, vector<1x32x32xbf16>
    %99 = vector.shape_cast %98 : vector<1x32x32xbf16> to vector<32x32xbf16>
    %cst_62 = arith.constant dense<0.000000e+00> : vector<18x32xf32>
    %100 = tpu.matmul %67, %99, %cst_62 {dimension_numbers = #tpu.dot_dimension_numbers<[1], [0], [0], [1], [0, 0, 1, 1], [], []>} : vector<18x32xbf16>, vector<32x32xbf16>, vector<18x32xf32> -> vector<18x32xf32>
    %101 = arith.addf %97, %100 : vector<18x32xf32>
    %102 = math.tanh %101 : vector<18x32xf32>
    %103 = arith.index_cast %c1_i32 : i32 to index
    %c3_63 = arith.constant 3 : index
    %c0_64 = arith.constant 0 : index
    %c0_65 = arith.constant 0 : index
    %104 = vector.load %arg2[%103, %c3_63, %c0_64, %c0_65] : memref<9x4x18x32xbf16, #tpu.memory_space<vmem>>, vector<1x1x18x32xbf16>
    %105 = vector.shape_cast %104 : vector<1x1x18x32xbf16> to vector<18x32xbf16>
    %106 = arith.extf %105 : vector<18x32xbf16> to vector<18x32xf32>
    %c3_66 = arith.constant 3 : index
    %c0_67 = arith.constant 0 : index
    %c0_68 = arith.constant 0 : index
    %107 = vector.load %arg3[%c3_66, %c0_67, %c0_68] : memref<4x32x32xbf16, #tpu.memory_space<vmem>>, vector<1x32x32xbf16>
    %108 = vector.shape_cast %107 : vector<1x32x32xbf16> to vector<32x32xbf16>
    %cst_69 = arith.constant dense<0.000000e+00> : vector<18x32xf32>
    %109 = tpu.matmul %67, %108, %cst_69 {dimension_numbers = #tpu.dot_dimension_numbers<[1], [0], [0], [1], [0, 0, 1, 1], [], []>} : vector<18x32xbf16>, vector<32x32xbf16>, vector<18x32xf32> -> vector<18x32xf32>
    %110 = arith.addf %106, %109 : vector<18x32xf32>
    %111 = arith.negf %110 : vector<18x32xf32>
    %112 = math.exp %111 : vector<18x32xf32>
    %cst_70 = arith.constant 1.000000e+00 : f32
    %113 = vector.broadcast %cst_70 : f32 to vector<18x32xf32>
    %114 = arith.addf %113, %112 : vector<18x32xf32>
    %115 = arith.divf %113, %114 : vector<18x32xf32>
    %c0_71 = arith.constant 0 : index
    %c0_72 = arith.constant 0 : index
    %116 = vector.load %arg6[%c0_71, %c0_72] : memref<18x32xf32, #tpu.memory_space<vmem>>, vector<18x32xf32>
    %117 = arith.mulf %93, %116 : vector<18x32xf32>
    %118 = arith.mulf %80, %102 : vector<18x32xf32>
    %119 = arith.addf %117, %118 : vector<18x32xf32>
    %120 = math.tanh %119 : vector<18x32xf32>
    %121 = arith.mulf %115, %120 : vector<18x32xf32>
    %c0_73 = arith.constant 0 : index
    %c0_74 = arith.constant 0 : index
    %122 = vector.load %arg6[%c0_73, %c0_74] : memref<18x32xf32, #tpu.memory_space<vmem>>, vector<18x32xf32>
    tpu.vector_store %arg6[%c0_73, %c0_74], %119 {strides = array<i32>} : memref<18x32xf32, #tpu.memory_space<vmem>>, vector<18x32xf32>,
    %c0_75 = arith.constant 0 : index
    %c0_76 = arith.constant 0 : index
    %123 = vector.load %arg5[%c0_75, %c0_76] : memref<18x32xf32, #tpu.memory_space<vmem>>, vector<18x32xf32>
    tpu.vector_store %arg5[%c0_75, %c0_76], %121 {strides = array<i32>} : memref<18x32xf32, #tpu.memory_space<vmem>>, vector<18x32xf32>,
    %124 = arith.truncf %121 : vector<18x32xf32> to vector<18x32xbf16>
    %125 = arith.index_cast %c1_i32 : i32 to index
    %c0_77 = arith.constant 0 : index
    %c0_78 = arith.constant 0 : index
    %126 = vector.load %arg4[%125, %c0_77, %c0_78] : memref<9x18x32xbf16, #tpu.memory_space<vmem>>, vector<1x18x32xbf16>
    %127 = vector.shape_cast %126 : vector<1x18x32xbf16> to vector<18x32xbf16>
    %128 = vector.shape_cast %124 : vector<18x32xbf16> to vector<1x18x32xbf16>
    tpu.vector_store %arg4[%125, %c0_77, %c0_78], %128 {strides = array<i32>} : memref<9x18x32xbf16, #tpu.memory_space<vmem>>, vector<1x18x32xbf16>,
    %c2_i32 = arith.constant 2 : i32
    %c0_79 = arith.constant 0 : index
    %c0_80 = arith.constant 0 : index
    %129 = vector.load %arg5[%c0_79, %c0_80] : memref<18x32xf32, #tpu.memory_space<vmem>>, vector<18x32xf32>
    %130 = arith.truncf %129 : vector<18x32xf32> to vector<18x32xbf16>
    %131 = arith.index_cast %c2_i32 : i32 to index
    %c0_81 = arith.constant 0 : index
    %c0_82 = arith.constant 0 : index
    %c0_83 = arith.constant 0 : index
    %132 = vector.load %arg2[%131, %c0_81, %c0_82, %c0_83] : memref<9x4x18x32xbf16, #tpu.memory_space<vmem>>, vector<1x1x18x32xbf16>
    %133 = vector.shape_cast %132 : vector<1x1x18x32xbf16> to vector<18x32xbf16>
    %134 = arith.extf %133 : vector<18x32xbf16> to vector<18x32xf32>
    %c0_84 = arith.constant 0 : index
    %c0_85 = arith.constant 0 : index
    %c0_86 = arith.constant 0 : index
    %135 = vector.load %arg3[%c0_84, %c0_85, %c0_86] : memref<4x32x32xbf16, #tpu.memory_space<vmem>>, vector<1x32x32xbf16>
    %136 = vector.shape_cast %135 : vector<1x32x32xbf16> to vector<32x32xbf16>
    %cst_87 = arith.constant dense<0.000000e+00> : vector<18x32xf32>
    %137 = tpu.matmul %130, %136, %cst_87 {dimension_numbers = #tpu.dot_dimension_numbers<[1], [0], [0], [1], [0, 0, 1, 1], [], []>} : vector<18x32xbf16>, vector<32x32xbf16>, vector<18x32xf32> -> vector<18x32xf32>
    %138 = arith.addf %134, %137 : vector<18x32xf32>
    %139 = arith.negf %138 : vector<18x32xf32>
    %140 = math.exp %139 : vector<18x32xf32>
    %cst_88 = arith.constant 1.000000e+00 : f32
    %141 = vector.broadcast %cst_88 : f32 to vector<18x32xf32>
    %142 = arith.addf %141, %140 : vector<18x32xf32>
    %143 = arith.divf %141, %142 : vector<18x32xf32>
    %144 = arith.index_cast %c2_i32 : i32 to index
    %c1_89 = arith.constant 1 : index
    %c0_90 = arith.constant 0 : index
    %c0_91 = arith.constant 0 : index
    %145 = vector.load %arg2[%144, %c1_89, %c0_90, %c0_91] : memref<9x4x18x32xbf16, #tpu.memory_space<vmem>>, vector<1x1x18x32xbf16>
    %146 = vector.shape_cast %145 : vector<1x1x18x32xbf16> to vector<18x32xbf16>
    %147 = arith.extf %146 : vector<18x32xbf16> to vector<18x32xf32>
    %c1_92 = arith.constant 1 : index
    %c0_93 = arith.constant 0 : index
    %c0_94 = arith.constant 0 : index
    %148 = vector.load %arg3[%c1_92, %c0_93, %c0_94] : memref<4x32x32xbf16, #tpu.memory_space<vmem>>, vector<1x32x32xbf16>
    %149 = vector.shape_cast %148 : vector<1x32x32xbf16> to vector<32x32xbf16>
    %cst_95 = arith.constant dense<0.000000e+00> : vector<18x32xf32>
    %150 = tpu.matmul %130, %149, %cst_95 {dimension_numbers = #tpu.dot_dimension_numbers<[1], [0], [0], [1], [0, 0, 1, 1], [], []>} : vector<18x32xbf16>, vector<32x32xbf16>, vector<18x32xf32> -> vector<18x32xf32>
    %151 = arith.addf %147, %150 : vector<18x32xf32>
    %152 = arith.negf %151 : vector<18x32xf32>
    %153 = math.exp %152 : vector<18x32xf32>
    %cst_96 = arith.constant 1.000000e+00 : f32
    %154 = vector.broadcast %cst_96 : f32 to vector<18x32xf32>
    %155 = arith.addf %154, %153 : vector<18x32xf32>
    %156 = arith.divf %154, %155 : vector<18x32xf32>
    %157 = arith.index_cast %c2_i32 : i32 to index
    %c2_97 = arith.constant 2 : index
    %c0_98 = arith.constant 0 : index
    %c0_99 = arith.constant 0 : index
    %158 = vector.load %arg2[%157, %c2_97, %c0_98, %c0_99] : memref<9x4x18x32xbf16, #tpu.memory_space<vmem>>, vector<1x1x18x32xbf16>
    %159 = vector.shape_cast %158 : vector<1x1x18x32xbf16> to vector<18x32xbf16>
    %160 = arith.extf %159 : vector<18x32xbf16> to vector<18x32xf32>
    %c2_100 = arith.constant 2 : index
    %c0_101 = arith.constant 0 : index
    %c0_102 = arith.constant 0 : index
    %161 = vector.load %arg3[%c2_100, %c0_101, %c0_102] : memref<4x32x32xbf16, #tpu.memory_space<vmem>>, vector<1x32x32xbf16>
    %162 = vector.shape_cast %161 : vector<1x32x32xbf16> to vector<32x32xbf16>
    %cst_103 = arith.constant dense<0.000000e+00> : vector<18x32xf32>
    %163 = tpu.matmul %130, %162, %cst_103 {dimension_numbers = #tpu.dot_dimension_numbers<[1], [0], [0], [1], [0, 0, 1, 1], [], []>} : vector<18x32xbf16>, vector<32x32xbf16>, vector<18x32xf32> -> vector<18x32xf32>
    %164 = arith.addf %160, %163 : vector<18x32xf32>
    %165 = math.tanh %164 : vector<18x32xf32>
    %166 = arith.index_cast %c2_i32 : i32 to index
    %c3_104 = arith.constant 3 : index
    %c0_105 = arith.constant 0 : index
    %c0_106 = arith.constant 0 : index
    %167 = vector.load %arg2[%166, %c3_104, %c0_105, %c0_106] : memref<9x4x18x32xbf16, #tpu.memory_space<vmem>>, vector<1x1x18x32xbf16>
    %168 = vector.shape_cast %167 : vector<1x1x18x32xbf16> to vector<18x32xbf16>
    %169 = arith.extf %168 : vector<18x32xbf16> to vector<18x32xf32>
    %c3_107 = arith.constant 3 : index
    %c0_108 = arith.constant 0 : index
    %c0_109 = arith.constant 0 : index
    %170 = vector.load %arg3[%c3_107, %c0_108, %c0_109] : memref<4x32x32xbf16, #tpu.memory_space<vmem>>, vector<1x32x32xbf16>
    %171 = vector.shape_cast %170 : vector<1x32x32xbf16> to vector<32x32xbf16>
    %cst_110 = arith.constant dense<0.000000e+00> : vector<18x32xf32>
    %172 = tpu.matmul %130, %171, %cst_110 {dimension_numbers = #tpu.dot_dimension_numbers<[1], [0], [0], [1], [0, 0, 1, 1], [], []>} : vector<18x32xbf16>, vector<32x32xbf16>, vector<18x32xf32> -> vector<18x32xf32>
    %173 = arith.addf %169, %172 : vector<18x32xf32>
    %174 = arith.negf %173 : vector<18x32xf32>
    %175 = math.exp %174 : vector<18x32xf32>
    %cst_111 = arith.constant 1.000000e+00 : f32
    %176 = vector.broadcast %cst_111 : f32 to vector<18x32xf32>
    %177 = arith.addf %176, %175 : vector<18x32xf32>
    %178 = arith.divf %176, %177 : vector<18x32xf32>
    %c0_112 = arith.constant 0 : index
    %c0_113 = arith.constant 0 : index
    %179 = vector.load %arg6[%c0_112, %c0_113] : memref<18x32xf32, #tpu.memory_space<vmem>>, vector<18x32xf32>
    %180 = arith.mulf %156, %179 : vector<18x32xf32>
    %181 = arith.mulf %143, %165 : vector<18x32xf32>
    %182 = arith.addf %180, %181 : vector<18x32xf32>
    %183 = math.tanh %182 : vector<18x32xf32>
    %184 = arith.mulf %178, %183 : vector<18x32xf32>
    %c0_114 = arith.constant 0 : index
    %c0_115 = arith.constant 0 : index
    %185 = vector.load %arg6[%c0_114, %c0_115] : memref<18x32xf32, #tpu.memory_space<vmem>>, vector<18x32xf32>
    tpu.vector_store %arg6[%c0_114, %c0_115], %182 {strides = array<i32>} : memref<18x32xf32, #tpu.memory_space<vmem>>, vector<18x32xf32>,
    %c0_116 = arith.constant 0 : index
    %c0_117 = arith.constant 0 : index
    %186 = vector.load %arg5[%c0_116, %c0_117] : memref<18x32xf32, #tpu.memory_space<vmem>>, vector<18x32xf32>
    tpu.vector_store %arg5[%c0_116, %c0_117], %184 {strides = array<i32>} : memref<18x32xf32, #tpu.memory_space<vmem>>, vector<18x32xf32>,
    %187 = arith.truncf %184 : vector<18x32xf32> to vector<18x32xbf16>
    %188 = arith.index_cast %c2_i32 : i32 to index
    %c0_118 = arith.constant 0 : index
    %c0_119 = arith.constant 0 : index
    %189 = vector.load %arg4[%188, %c0_118, %c0_119] : memref<9x18x32xbf16, #tpu.memory_space<vmem>>, vector<1x18x32xbf16>
    %190 = vector.shape_cast %189 : vector<1x18x32xbf16> to vector<18x32xbf16>
    %191 = vector.shape_cast %187 : vector<18x32xbf16> to vector<1x18x32xbf16>
    tpu.vector_store %arg4[%188, %c0_118, %c0_119], %191 {strides = array<i32>} : memref<9x18x32xbf16, #tpu.memory_space<vmem>>, vector<1x18x32xbf16>,
    %c3_i32 = arith.constant 3 : i32
    %c0_120 = arith.constant 0 : index
    %c0_121 = arith.constant 0 : index
    %192 = vector.load %arg5[%c0_120, %c0_121] : memref<18x32xf32, #tpu.memory_space<vmem>>, vector<18x32xf32>
    %193 = arith.truncf %192 : vector<18x32xf32> to vector<18x32xbf16>
    %194 = arith.index_cast %c3_i32 : i32 to index
    %c0_122 = arith.constant 0 : index
    %c0_123 = arith.constant 0 : index
    %c0_124 = arith.constant 0 : index
    %195 = vector.load %arg2[%194, %c0_122, %c0_123, %c0_124] : memref<9x4x18x32xbf16, #tpu.memory_space<vmem>>, vector<1x1x18x32xbf16>
    %196 = vector.shape_cast %195 : vector<1x1x18x32xbf16> to vector<18x32xbf16>
    %197 = arith.extf %196 : vector<18x32xbf16> to vector<18x32xf32>
    %c0_125 = arith.constant 0 : index
    %c0_126 = arith.constant 0 : index
    %c0_127 = arith.constant 0 : index
    %198 = vector.load %arg3[%c0_125, %c0_126, %c0_127] : memref<4x32x32xbf16, #tpu.memory_space<vmem>>, vector<1x32x32xbf16>
    %199 = vector.shape_cast %198 : vector<1x32x32xbf16> to vector<32x32xbf16>
    %cst_128 = arith.constant dense<0.000000e+00> : vector<18x32xf32>
    %200 = tpu.matmul %193, %199, %cst_128 {dimension_numbers = #tpu.dot_dimension_numbers<[1], [0], [0], [1], [0, 0, 1, 1], [], []>} : vector<18x32xbf16>, vector<32x32xbf16>, vector<18x32xf32> -> vector<18x32xf32>
    %201 = arith.addf %197, %200 : vector<18x32xf32>
    %202 = arith.negf %201 : vector<18x32xf32>
    %203 = math.exp %202 : vector<18x32xf32>
    %cst_129 = arith.constant 1.000000e+00 : f32
    %204 = vector.broadcast %cst_129 : f32 to vector<18x32xf32>
    %205 = arith.addf %204, %203 : vector<18x32xf32>
    %206 = arith.divf %204, %205 : vector<18x32xf32>
    %207 = arith.index_cast %c3_i32 : i32 to index
    %c1_130 = arith.constant 1 : index
    %c0_131 = arith.constant 0 : index
    %c0_132 = arith.constant 0 : index
    %208 = vector.load %arg2[%207, %c1_130, %c0_131, %c0_132] : memref<9x4x18x32xbf16, #tpu.memory_space<vmem>>, vector<1x1x18x32xbf16>
    %209 = vector.shape_cast %208 : vector<1x1x18x32xbf16> to vector<18x32xbf16>
    %210 = arith.extf %209 : vector<18x32xbf16> to vector<18x32xf32>
    %c1_133 = arith.constant 1 : index
    %c0_134 = arith.constant 0 : index
    %c0_135 = arith.constant 0 : index
    %211 = vector.load %arg3[%c1_133, %c0_134, %c0_135] : memref<4x32x32xbf16, #tpu.memory_space<vmem>>, vector<1x32x32xbf16>
    %212 = vector.shape_cast %211 : vector<1x32x32xbf16> to vector<32x32xbf16>
    %cst_136 = arith.constant dense<0.000000e+00> : vector<18x32xf32>
    %213 = tpu.matmul %193, %212, %cst_136 {dimension_numbers = #tpu.dot_dimension_numbers<[1], [0], [0], [1], [0, 0, 1, 1], [], []>} : vector<18x32xbf16>, vector<32x32xbf16>, vector<18x32xf32> -> vector<18x32xf32>
    %214 = arith.addf %210, %213 : vector<18x32xf32>
    %215 = arith.negf %214 : vector<18x32xf32>
    %216 = math.exp %215 : vector<18x32xf32>
    %cst_137 = arith.constant 1.000000e+00 : f32
    %217 = vector.broadcast %cst_137 : f32 to vector<18x32xf32>
    %218 = arith.addf %217, %216 : vector<18x32xf32>
    %219 = arith.divf %217, %218 : vector<18x32xf32>
    %220 = arith.index_cast %c3_i32 : i32 to index
    %c2_138 = arith.constant 2 : index
    %c0_139 = arith.constant 0 : index
    %c0_140 = arith.constant 0 : index
    %221 = vector.load %arg2[%220, %c2_138, %c0_139, %c0_140] : memref<9x4x18x32xbf16, #tpu.memory_space<vmem>>, vector<1x1x18x32xbf16>
    %222 = vector.shape_cast %221 : vector<1x1x18x32xbf16> to vector<18x32xbf16>
    %223 = arith.extf %222 : vector<18x32xbf16> to vector<18x32xf32>
    %c2_141 = arith.constant 2 : index
    %c0_142 = arith.constant 0 : index
    %c0_143 = arith.constant 0 : index
    %224 = vector.load %arg3[%c2_141, %c0_142, %c0_143] : memref<4x32x32xbf16, #tpu.memory_space<vmem>>, vector<1x32x32xbf16>
    %225 = vector.shape_cast %224 : vector<1x32x32xbf16> to vector<32x32xbf16>
    %cst_144 = arith.constant dense<0.000000e+00> : vector<18x32xf32>
    %226 = tpu.matmul %193, %225, %cst_144 {dimension_numbers = #tpu.dot_dimension_numbers<[1], [0], [0], [1], [0, 0, 1, 1], [], []>} : vector<18x32xbf16>, vector<32x32xbf16>, vector<18x32xf32> -> vector<18x32xf32>
    %227 = arith.addf %223, %226 : vector<18x32xf32>
    %228 = math.tanh %227 : vector<18x32xf32>
    %229 = arith.index_cast %c3_i32 : i32 to index
    %c3_145 = arith.constant 3 : index
    %c0_146 = arith.constant 0 : index
    %c0_147 = arith.constant 0 : index
    %230 = vector.load %arg2[%229, %c3_145, %c0_146, %c0_147] : memref<9x4x18x32xbf16, #tpu.memory_space<vmem>>, vector<1x1x18x32xbf16>
    %231 = vector.shape_cast %230 : vector<1x1x18x32xbf16> to vector<18x32xbf16>
    %232 = arith.extf %231 : vector<18x32xbf16> to vector<18x32xf32>
    %c3_148 = arith.constant 3 : index
    %c0_149 = arith.constant 0 : index
    %c0_150 = arith.constant 0 : index
    %233 = vector.load %arg3[%c3_148, %c0_149, %c0_150] : memref<4x32x32xbf16, #tpu.memory_space<vmem>>, vector<1x32x32xbf16>
    %234 = vector.shape_cast %233 : vector<1x32x32xbf16> to vector<32x32xbf16>
    %cst_151 = arith.constant dense<0.000000e+00> : vector<18x32xf32>
    %235 = tpu.matmul %193, %234, %cst_151 {dimension_numbers = #tpu.dot_dimension_numbers<[1], [0], [0], [1], [0, 0, 1, 1], [], []>} : vector<18x32xbf16>, vector<32x32xbf16>, vector<18x32xf32> -> vector<18x32xf32>
    %236 = arith.addf %232, %235 : vector<18x32xf32>
    %237 = arith.negf %236 : vector<18x32xf32>
    %238 = math.exp %237 : vector<18x32xf32>
    %cst_152 = arith.constant 1.000000e+00 : f32
    %239 = vector.broadcast %cst_152 : f32 to vector<18x32xf32>
    %240 = arith.addf %239, %238 : vector<18x32xf32>
    %241 = arith.divf %239, %240 : vector<18x32xf32>
    %c0_153 = arith.constant 0 : index
    %c0_154 = arith.constant 0 : index
    %242 = vector.load %arg6[%c0_153, %c0_154] : memref<18x32xf32, #tpu.memory_space<vmem>>, vector<18x32xf32>
    %243 = arith.mulf %219, %242 : vector<18x32xf32>
    %244 = arith.mulf %206, %228 : vector<18x32xf32>
    %245 = arith.addf %243, %244 : vector<18x32xf32>
    %246 = math.tanh %245 : vector<18x32xf32>
    %247 = arith.mulf %241, %246 : vector<18x32xf32>
    %c0_155 = arith.constant 0 : index
    %c0_156 = arith.constant 0 : index
    %248 = vector.load %arg6[%c0_155, %c0_156] : memref<18x32xf32, #tpu.memory_space<vmem>>, vector<18x32xf32>
    tpu.vector_store %arg6[%c0_155, %c0_156], %245 {strides = array<i32>} : memref<18x32xf32, #tpu.memory_space<vmem>>, vector<18x32xf32>,
    %c0_157 = arith.constant 0 : index
    %c0_158 = arith.constant 0 : index
    %249 = vector.load %arg5[%c0_157, %c0_158] : memref<18x32xf32, #tpu.memory_space<vmem>>, vector<18x32xf32>
    tpu.vector_store %arg5[%c0_157, %c0_158], %247 {strides = array<i32>} : memref<18x32xf32, #tpu.memory_space<vmem>>, vector<18x32xf32>,
    %250 = arith.truncf %247 : vector<18x32xf32> to vector<18x32xbf16>
    %251 = arith.index_cast %c3_i32 : i32 to index
    %c0_159 = arith.constant 0 : index
    %c0_160 = arith.constant 0 : index
    %252 = vector.load %arg4[%251, %c0_159, %c0_160] : memref<9x18x32xbf16, #tpu.memory_space<vmem>>, vector<1x18x32xbf16>
    %253 = vector.shape_cast %252 : vector<1x18x32xbf16> to vector<18x32xbf16>
    %254 = vector.shape_cast %250 : vector<18x32xbf16> to vector<1x18x32xbf16>
    tpu.vector_store %arg4[%251, %c0_159, %c0_160], %254 {strides = array<i32>} : memref<9x18x32xbf16, #tpu.memory_space<vmem>>, vector<1x18x32xbf16>,
    %c4_i32 = arith.constant 4 : i32
    %c0_161 = arith.constant 0 : index
    %c0_162 = arith.constant 0 : index
    %255 = vector.load %arg5[%c0_161, %c0_162] : memref<18x32xf32, #tpu.memory_space<vmem>>, vector<18x32xf32>
    %256 = arith.truncf %255 : vector<18x32xf32> to vector<18x32xbf16>
    %257 = arith.index_cast %c4_i32 : i32 to index
    %c0_163 = arith.constant 0 : index
    %c0_164 = arith.constant 0 : index
    %c0_165 = arith.constant 0 : index
    %258 = vector.load %arg2[%257, %c0_163, %c0_164, %c0_165] : memref<9x4x18x32xbf16, #tpu.memory_space<vmem>>, vector<1x1x18x32xbf16>
    %259 = vector.shape_cast %258 : vector<1x1x18x32xbf16> to vector<18x32xbf16>
    %260 = arith.extf %259 : vector<18x32xbf16> to vector<18x32xf32>
    %c0_166 = arith.constant 0 : index
    %c0_167 = arith.constant 0 : index
    %c0_168 = arith.constant 0 : index
    %261 = vector.load %arg3[%c0_166, %c0_167, %c0_168] : memref<4x32x32xbf16, #tpu.memory_space<vmem>>, vector<1x32x32xbf16>
    %262 = vector.shape_cast %261 : vector<1x32x32xbf16> to vector<32x32xbf16>
    %cst_169 = arith.constant dense<0.000000e+00> : vector<18x32xf32>
    %263 = tpu.matmul %256, %262, %cst_169 {dimension_numbers = #tpu.dot_dimension_numbers<[1], [0], [0], [1], [0, 0, 1, 1], [], []>} : vector<18x32xbf16>, vector<32x32xbf16>, vector<18x32xf32> -> vector<18x32xf32>
    %264 = arith.addf %260, %263 : vector<18x32xf32>
    %265 = arith.negf %264 : vector<18x32xf32>
    %266 = math.exp %265 : vector<18x32xf32>
    %cst_170 = arith.constant 1.000000e+00 : f32
    %267 = vector.broadcast %cst_170 : f32 to vector<18x32xf32>
    %268 = arith.addf %267, %266 : vector<18x32xf32>
    %269 = arith.divf %267, %268 : vector<18x32xf32>
    %270 = arith.index_cast %c4_i32 : i32 to index
    %c1_171 = arith.constant 1 : index
    %c0_172 = arith.constant 0 : index
    %c0_173 = arith.constant 0 : index
    %271 = vector.load %arg2[%270, %c1_171, %c0_172, %c0_173] : memref<9x4x18x32xbf16, #tpu.memory_space<vmem>>, vector<1x1x18x32xbf16>
    %272 = vector.shape_cast %271 : vector<1x1x18x32xbf16> to vector<18x32xbf16>
    %273 = arith.extf %272 : vector<18x32xbf16> to vector<18x32xf32>
    %c1_174 = arith.constant 1 : index
    %c0_175 = arith.constant 0 : index
    %c0_176 = arith.constant 0 : index
    %274 = vector.load %arg3[%c1_174, %c0_175, %c0_176] : memref<4x32x32xbf16, #tpu.memory_space<vmem>>, vector<1x32x32xbf16>
    %275 = vector.shape_cast %274 : vector<1x32x32xbf16> to vector<32x32xbf16>
    %cst_177 = arith.constant dense<0.000000e+00> : vector<18x32xf32>
    %276 = tpu.matmul %256, %275, %cst_177 {dimension_numbers = #tpu.dot_dimension_numbers<[1], [0], [0], [1], [0, 0, 1, 1], [], []>} : vector<18x32xbf16>, vector<32x32xbf16>, vector<18x32xf32> -> vector<18x32xf32>
    %277 = arith.addf %273, %276 : vector<18x32xf32>
    %278 = arith.negf %277 : vector<18x32xf32>
    %279 = math.exp %278 : vector<18x32xf32>
    %cst_178 = arith.constant 1.000000e+00 : f32
    %280 = vector.broadcast %cst_178 : f32 to vector<18x32xf32>
    %281 = arith.addf %280, %279 : vector<18x32xf32>
    %282 = arith.divf %280, %281 : vector<18x32xf32>
    %283 = arith.index_cast %c4_i32 : i32 to index
    %c2_179 = arith.constant 2 : index
    %c0_180 = arith.constant 0 : index
    %c0_181 = arith.constant 0 : index
    %284 = vector.load %arg2[%283, %c2_179, %c0_180, %c0_181] : memref<9x4x18x32xbf16, #tpu.memory_space<vmem>>, vector<1x1x18x32xbf16>
    %285 = vector.shape_cast %284 : vector<1x1x18x32xbf16> to vector<18x32xbf16>
    %286 = arith.extf %285 : vector<18x32xbf16> to vector<18x32xf32>
    %c2_182 = arith.constant 2 : index
    %c0_183 = arith.constant 0 : index
    %c0_184 = arith.constant 0 : index
    %287 = vector.load %arg3[%c2_182, %c0_183, %c0_184] : memref<4x32x32xbf16, #tpu.memory_space<vmem>>, vector<1x32x32xbf16>
    %288 = vector.shape_cast %287 : vector<1x32x32xbf16> to vector<32x32xbf16>
    %cst_185 = arith.constant dense<0.000000e+00> : vector<18x32xf32>
    %289 = tpu.matmul %256, %288, %cst_185 {dimension_numbers = #tpu.dot_dimension_numbers<[1], [0], [0], [1], [0, 0, 1, 1], [], []>} : vector<18x32xbf16>, vector<32x32xbf16>, vector<18x32xf32> -> vector<18x32xf32>
    %290 = arith.addf %286, %289 : vector<18x32xf32>
    %291 = math.tanh %290 : vector<18x32xf32>
    %292 = arith.index_cast %c4_i32 : i32 to index
    %c3_186 = arith.constant 3 : index
    %c0_187 = arith.constant 0 : index
    %c0_188 = arith.constant 0 : index
    %293 = vector.load %arg2[%292, %c3_186, %c0_187, %c0_188] : memref<9x4x18x32xbf16, #tpu.memory_space<vmem>>, vector<1x1x18x32xbf16>
    %294 = vector.shape_cast %293 : vector<1x1x18x32xbf16> to vector<18x32xbf16>
    %295 = arith.extf %294 : vector<18x32xbf16> to vector<18x32xf32>
    %c3_189 = arith.constant 3 : index
    %c0_190 = arith.constant 0 : index
    %c0_191 = arith.constant 0 : index
    %296 = vector.load %arg3[%c3_189, %c0_190, %c0_191] : memref<4x32x32xbf16, #tpu.memory_space<vmem>>, vector<1x32x32xbf16>
    %297 = vector.shape_cast %296 : vector<1x32x32xbf16> to vector<32x32xbf16>
    %cst_192 = arith.constant dense<0.000000e+00> : vector<18x32xf32>
    %298 = tpu.matmul %256, %297, %cst_192 {dimension_numbers = #tpu.dot_dimension_numbers<[1], [0], [0], [1], [0, 0, 1, 1], [], []>} : vector<18x32xbf16>, vector<32x32xbf16>, vector<18x32xf32> -> vector<18x32xf32>
    %299 = arith.addf %295, %298 : vector<18x32xf32>
    %300 = arith.negf %299 : vector<18x32xf32>
    %301 = math.exp %300 : vector<18x32xf32>
    %cst_193 = arith.constant 1.000000e+00 : f32
    %302 = vector.broadcast %cst_193 : f32 to vector<18x32xf32>
    %303 = arith.addf %302, %301 : vector<18x32xf32>
    %304 = arith.divf %302, %303 : vector<18x32xf32>
    %c0_194 = arith.constant 0 : index
    %c0_195 = arith.constant 0 : index
    %305 = vector.load %arg6[%c0_194, %c0_195] : memref<18x32xf32, #tpu.memory_space<vmem>>, vector<18x32xf32>
    %306 = arith.mulf %282, %305 : vector<18x32xf32>
    %307 = arith.mulf %269, %291 : vector<18x32xf32>
    %308 = arith.addf %306, %307 : vector<18x32xf32>
    %309 = math.tanh %308 : vector<18x32xf32>
    %310 = arith.mulf %304, %309 : vector<18x32xf32>
    %c0_196 = arith.constant 0 : index
    %c0_197 = arith.constant 0 : index
    %311 = vector.load %arg6[%c0_196, %c0_197] : memref<18x32xf32, #tpu.memory_space<vmem>>, vector<18x32xf32>
    tpu.vector_store %arg6[%c0_196, %c0_197], %308 {strides = array<i32>} : memref<18x32xf32, #tpu.memory_space<vmem>>, vector<18x32xf32>,
    %c0_198 = arith.constant 0 : index
    %c0_199 = arith.constant 0 : index
    %312 = vector.load %arg5[%c0_198, %c0_199] : memref<18x32xf32, #tpu.memory_space<vmem>>, vector<18x32xf32>
    tpu.vector_store %arg5[%c0_198, %c0_199], %310 {strides = array<i32>} : memref<18x32xf32, #tpu.memory_space<vmem>>, vector<18x32xf32>,
    %313 = arith.truncf %310 : vector<18x32xf32> to vector<18x32xbf16>
    %314 = arith.index_cast %c4_i32 : i32 to index
    %c0_200 = arith.constant 0 : index
    %c0_201 = arith.constant 0 : index
    %315 = vector.load %arg4[%314, %c0_200, %c0_201] : memref<9x18x32xbf16, #tpu.memory_space<vmem>>, vector<1x18x32xbf16>
    %316 = vector.shape_cast %315 : vector<1x18x32xbf16> to vector<18x32xbf16>
    %317 = vector.shape_cast %313 : vector<18x32xbf16> to vector<1x18x32xbf16>
    tpu.vector_store %arg4[%314, %c0_200, %c0_201], %317 {strides = array<i32>} : memref<9x18x32xbf16, #tpu.memory_space<vmem>>, vector<1x18x32xbf16>,
    %c5_i32 = arith.constant 5 : i32
    %c0_202 = arith.constant 0 : index
    %c0_203 = arith.constant 0 : index
    %318 = vector.load %arg5[%c0_202, %c0_203] : memref<18x32xf32, #tpu.memory_space<vmem>>, vector<18x32xf32>
    %319 = arith.truncf %318 : vector<18x32xf32> to vector<18x32xbf16>
    %320 = arith.index_cast %c5_i32 : i32 to index
    %c0_204 = arith.constant 0 : index
    %c0_205 = arith.constant 0 : index
    %c0_206 = arith.constant 0 : index
    %321 = vector.load %arg2[%320, %c0_204, %c0_205, %c0_206] : memref<9x4x18x32xbf16, #tpu.memory_space<vmem>>, vector<1x1x18x32xbf16>
    %322 = vector.shape_cast %321 : vector<1x1x18x32xbf16> to vector<18x32xbf16>
    %323 = arith.extf %322 : vector<18x32xbf16> to vector<18x32xf32>
    %c0_207 = arith.constant 0 : index
    %c0_208 = arith.constant 0 : index
    %c0_209 = arith.constant 0 : index
    %324 = vector.load %arg3[%c0_207, %c0_208, %c0_209] : memref<4x32x32xbf16, #tpu.memory_space<vmem>>, vector<1x32x32xbf16>
    %325 = vector.shape_cast %324 : vector<1x32x32xbf16> to vector<32x32xbf16>
    %cst_210 = arith.constant dense<0.000000e+00> : vector<18x32xf32>
    %326 = tpu.matmul %319, %325, %cst_210 {dimension_numbers = #tpu.dot_dimension_numbers<[1], [0], [0], [1], [0, 0, 1, 1], [], []>} : vector<18x32xbf16>, vector<32x32xbf16>, vector<18x32xf32> -> vector<18x32xf32>
    %327 = arith.addf %323, %326 : vector<18x32xf32>
    %328 = arith.negf %327 : vector<18x32xf32>
    %329 = math.exp %328 : vector<18x32xf32>
    %cst_211 = arith.constant 1.000000e+00 : f32
    %330 = vector.broadcast %cst_211 : f32 to vector<18x32xf32>
    %331 = arith.addf %330, %329 : vector<18x32xf32>
    %332 = arith.divf %330, %331 : vector<18x32xf32>
    %333 = arith.index_cast %c5_i32 : i32 to index
    %c1_212 = arith.constant 1 : index
    %c0_213 = arith.constant 0 : index
    %c0_214 = arith.constant 0 : index
    %334 = vector.load %arg2[%333, %c1_212, %c0_213, %c0_214] : memref<9x4x18x32xbf16, #tpu.memory_space<vmem>>, vector<1x1x18x32xbf16>
    %335 = vector.shape_cast %334 : vector<1x1x18x32xbf16> to vector<18x32xbf16>
    %336 = arith.extf %335 : vector<18x32xbf16> to vector<18x32xf32>
    %c1_215 = arith.constant 1 : index
    %c0_216 = arith.constant 0 : index
    %c0_217 = arith.constant 0 : index
    %337 = vector.load %arg3[%c1_215, %c0_216, %c0_217] : memref<4x32x32xbf16, #tpu.memory_space<vmem>>, vector<1x32x32xbf16>
    %338 = vector.shape_cast %337 : vector<1x32x32xbf16> to vector<32x32xbf16>
    %cst_218 = arith.constant dense<0.000000e+00> : vector<18x32xf32>
    %339 = tpu.matmul %319, %338, %cst_218 {dimension_numbers = #tpu.dot_dimension_numbers<[1], [0], [0], [1], [0, 0, 1, 1], [], []>} : vector<18x32xbf16>, vector<32x32xbf16>, vector<18x32xf32> -> vector<18x32xf32>
    %340 = arith.addf %336, %339 : vector<18x32xf32>
    %341 = arith.negf %340 : vector<18x32xf32>
    %342 = math.exp %341 : vector<18x32xf32>
    %cst_219 = arith.constant 1.000000e+00 : f32
    %343 = vector.broadcast %cst_219 : f32 to vector<18x32xf32>
    %344 = arith.addf %343, %342 : vector<18x32xf32>
    %345 = arith.divf %343, %344 : vector<18x32xf32>
    %346 = arith.index_cast %c5_i32 : i32 to index
    %c2_220 = arith.constant 2 : index
    %c0_221 = arith.constant 0 : index
    %c0_222 = arith.constant 0 : index
    %347 = vector.load %arg2[%346, %c2_220, %c0_221, %c0_222] : memref<9x4x18x32xbf16, #tpu.memory_space<vmem>>, vector<1x1x18x32xbf16>
    %348 = vector.shape_cast %347 : vector<1x1x18x32xbf16> to vector<18x32xbf16>
    %349 = arith.extf %348 : vector<18x32xbf16> to vector<18x32xf32>
    %c2_223 = arith.constant 2 : index
    %c0_224 = arith.constant 0 : index
    %c0_225 = arith.constant 0 : index
    %350 = vector.load %arg3[%c2_223, %c0_224, %c0_225] : memref<4x32x32xbf16, #tpu.memory_space<vmem>>, vector<1x32x32xbf16>
    %351 = vector.shape_cast %350 : vector<1x32x32xbf16> to vector<32x32xbf16>
    %cst_226 = arith.constant dense<0.000000e+00> : vector<18x32xf32>
    %352 = tpu.matmul %319, %351, %cst_226 {dimension_numbers = #tpu.dot_dimension_numbers<[1], [0], [0], [1], [0, 0, 1, 1], [], []>} : vector<18x32xbf16>, vector<32x32xbf16>, vector<18x32xf32> -> vector<18x32xf32>
    %353 = arith.addf %349, %352 : vector<18x32xf32>
    %354 = math.tanh %353 : vector<18x32xf32>
    %355 = arith.index_cast %c5_i32 : i32 to index
    %c3_227 = arith.constant 3 : index
    %c0_228 = arith.constant 0 : index
    %c0_229 = arith.constant 0 : index
    %356 = vector.load %arg2[%355, %c3_227, %c0_228, %c0_229] : memref<9x4x18x32xbf16, #tpu.memory_space<vmem>>, vector<1x1x18x32xbf16>
    %357 = vector.shape_cast %356 : vector<1x1x18x32xbf16> to vector<18x32xbf16>
    %358 = arith.extf %357 : vector<18x32xbf16> to vector<18x32xf32>
    %c3_230 = arith.constant 3 : index
    %c0_231 = arith.constant 0 : index
    %c0_232 = arith.constant 0 : index
    %359 = vector.load %arg3[%c3_230, %c0_231, %c0_232] : memref<4x32x32xbf16, #tpu.memory_space<vmem>>, vector<1x32x32xbf16>
    %360 = vector.shape_cast %359 : vector<1x32x32xbf16> to vector<32x32xbf16>
    %cst_233 = arith.constant dense<0.000000e+00> : vector<18x32xf32>
    %361 = tpu.matmul %319, %360, %cst_233 {dimension_numbers = #tpu.dot_dimension_numbers<[1], [0], [0], [1], [0, 0, 1, 1], [], []>} : vector<18x32xbf16>, vector<32x32xbf16>, vector<18x32xf32> -> vector<18x32xf32>
    %362 = arith.addf %358, %361 : vector<18x32xf32>
    %363 = arith.negf %362 : vector<18x32xf32>
    %364 = math.exp %363 : vector<18x32xf32>
    %cst_234 = arith.constant 1.000000e+00 : f32
    %365 = vector.broadcast %cst_234 : f32 to vector<18x32xf32>
    %366 = arith.addf %365, %364 : vector<18x32xf32>
    %367 = arith.divf %365, %366 : vector<18x32xf32>
    %c0_235 = arith.constant 0 : index
    %c0_236 = arith.constant 0 : index
    %368 = vector.load %arg6[%c0_235, %c0_236] : memref<18x32xf32, #tpu.memory_space<vmem>>, vector<18x32xf32>
    %369 = arith.mulf %345, %368 : vector<18x32xf32>
    %370 = arith.mulf %332, %354 : vector<18x32xf32>
    %371 = arith.addf %369, %370 : vector<18x32xf32>
    %372 = math.tanh %371 : vector<18x32xf32>
    %373 = arith.mulf %367, %372 : vector<18x32xf32>
    %c0_237 = arith.constant 0 : index
    %c0_238 = arith.constant 0 : index
    %374 = vector.load %arg6[%c0_237, %c0_238] : memref<18x32xf32, #tpu.memory_space<vmem>>, vector<18x32xf32>
    tpu.vector_store %arg6[%c0_237, %c0_238], %371 {strides = array<i32>} : memref<18x32xf32, #tpu.memory_space<vmem>>, vector<18x32xf32>,
    %c0_239 = arith.constant 0 : index
    %c0_240 = arith.constant 0 : index
    %375 = vector.load %arg5[%c0_239, %c0_240] : memref<18x32xf32, #tpu.memory_space<vmem>>, vector<18x32xf32>
    tpu.vector_store %arg5[%c0_239, %c0_240], %373 {strides = array<i32>} : memref<18x32xf32, #tpu.memory_space<vmem>>, vector<18x32xf32>,
    %376 = arith.truncf %373 : vector<18x32xf32> to vector<18x32xbf16>
    %377 = arith.index_cast %c5_i32 : i32 to index
    %c0_241 = arith.constant 0 : index
    %c0_242 = arith.constant 0 : index
    %378 = vector.load %arg4[%377, %c0_241, %c0_242] : memref<9x18x32xbf16, #tpu.memory_space<vmem>>, vector<1x18x32xbf16>
    %379 = vector.shape_cast %378 : vector<1x18x32xbf16> to vector<18x32xbf16>
    %380 = vector.shape_cast %376 : vector<18x32xbf16> to vector<1x18x32xbf16>
    tpu.vector_store %arg4[%377, %c0_241, %c0_242], %380 {strides = array<i32>} : memref<9x18x32xbf16, #tpu.memory_space<vmem>>, vector<1x18x32xbf16>,
    %c6_i32 = arith.constant 6 : i32
    %c0_243 = arith.constant 0 : index
    %c0_244 = arith.constant 0 : index
    %381 = vector.load %arg5[%c0_243, %c0_244] : memref<18x32xf32, #tpu.memory_space<vmem>>, vector<18x32xf32>
    %382 = arith.truncf %381 : vector<18x32xf32> to vector<18x32xbf16>
    %383 = arith.index_cast %c6_i32 : i32 to index
    %c0_245 = arith.constant 0 : index
    %c0_246 = arith.constant 0 : index
    %c0_247 = arith.constant 0 : index
    %384 = vector.load %arg2[%383, %c0_245, %c0_246, %c0_247] : memref<9x4x18x32xbf16, #tpu.memory_space<vmem>>, vector<1x1x18x32xbf16>
    %385 = vector.shape_cast %384 : vector<1x1x18x32xbf16> to vector<18x32xbf16>
    %386 = arith.extf %385 : vector<18x32xbf16> to vector<18x32xf32>
    %c0_248 = arith.constant 0 : index
    %c0_249 = arith.constant 0 : index
    %c0_250 = arith.constant 0 : index
    %387 = vector.load %arg3[%c0_248, %c0_249, %c0_250] : memref<4x32x32xbf16, #tpu.memory_space<vmem>>, vector<1x32x32xbf16>
    %388 = vector.shape_cast %387 : vector<1x32x32xbf16> to vector<32x32xbf16>
    %cst_251 = arith.constant dense<0.000000e+00> : vector<18x32xf32>
    %389 = tpu.matmul %382, %388, %cst_251 {dimension_numbers = #tpu.dot_dimension_numbers<[1], [0], [0], [1], [0, 0, 1, 1], [], []>} : vector<18x32xbf16>, vector<32x32xbf16>, vector<18x32xf32> -> vector<18x32xf32>
    %390 = arith.addf %386, %389 : vector<18x32xf32>
    %391 = arith.negf %390 : vector<18x32xf32>
    %392 = math.exp %391 : vector<18x32xf32>
    %cst_252 = arith.constant 1.000000e+00 : f32
    %393 = vector.broadcast %cst_252 : f32 to vector<18x32xf32>
    %394 = arith.addf %393, %392 : vector<18x32xf32>
    %395 = arith.divf %393, %394 : vector<18x32xf32>
    %396 = arith.index_cast %c6_i32 : i32 to index
    %c1_253 = arith.constant 1 : index
    %c0_254 = arith.constant 0 : index
    %c0_255 = arith.constant 0 : index
    %397 = vector.load %arg2[%396, %c1_253, %c0_254, %c0_255] : memref<9x4x18x32xbf16, #tpu.memory_space<vmem>>, vector<1x1x18x32xbf16>
    %398 = vector.shape_cast %397 : vector<1x1x18x32xbf16> to vector<18x32xbf16>
    %399 = arith.extf %398 : vector<18x32xbf16> to vector<18x32xf32>
    %c1_256 = arith.constant 1 : index
    %c0_257 = arith.constant 0 : index
    %c0_258 = arith.constant 0 : index
    %400 = vector.load %arg3[%c1_256, %c0_257, %c0_258] : memref<4x32x32xbf16, #tpu.memory_space<vmem>>, vector<1x32x32xbf16>
    %401 = vector.shape_cast %400 : vector<1x32x32xbf16> to vector<32x32xbf16>
    %cst_259 = arith.constant dense<0.000000e+00> : vector<18x32xf32>
    %402 = tpu.matmul %382, %401, %cst_259 {dimension_numbers = #tpu.dot_dimension_numbers<[1], [0], [0], [1], [0, 0, 1, 1], [], []>} : vector<18x32xbf16>, vector<32x32xbf16>, vector<18x32xf32> -> vector<18x32xf32>
    %403 = arith.addf %399, %402 : vector<18x32xf32>
    %404 = arith.negf %403 : vector<18x32xf32>
    %405 = math.exp %404 : vector<18x32xf32>
    %cst_260 = arith.constant 1.000000e+00 : f32
    %406 = vector.broadcast %cst_260 : f32 to vector<18x32xf32>
    %407 = arith.addf %406, %405 : vector<18x32xf32>
    %408 = arith.divf %406, %407 : vector<18x32xf32>
    %409 = arith.index_cast %c6_i32 : i32 to index
    %c2_261 = arith.constant 2 : index
    %c0_262 = arith.constant 0 : index
    %c0_263 = arith.constant 0 : index
    %410 = vector.load %arg2[%409, %c2_261, %c0_262, %c0_263] : memref<9x4x18x32xbf16, #tpu.memory_space<vmem>>, vector<1x1x18x32xbf16>
    %411 = vector.shape_cast %410 : vector<1x1x18x32xbf16> to vector<18x32xbf16>
    %412 = arith.extf %411 : vector<18x32xbf16> to vector<18x32xf32>
    %c2_264 = arith.constant 2 : index
    %c0_265 = arith.constant 0 : index
    %c0_266 = arith.constant 0 : index
    %413 = vector.load %arg3[%c2_264, %c0_265, %c0_266] : memref<4x32x32xbf16, #tpu.memory_space<vmem>>, vector<1x32x32xbf16>
    %414 = vector.shape_cast %413 : vector<1x32x32xbf16> to vector<32x32xbf16>
    %cst_267 = arith.constant dense<0.000000e+00> : vector<18x32xf32>
    %415 = tpu.matmul %382, %414, %cst_267 {dimension_numbers = #tpu.dot_dimension_numbers<[1], [0], [0], [1], [0, 0, 1, 1], [], []>} : vector<18x32xbf16>, vector<32x32xbf16>, vector<18x32xf32> -> vector<18x32xf32>
    %416 = arith.addf %412, %415 : vector<18x32xf32>
    %417 = math.tanh %416 : vector<18x32xf32>
    %418 = arith.index_cast %c6_i32 : i32 to index
    %c3_268 = arith.constant 3 : index
    %c0_269 = arith.constant 0 : index
    %c0_270 = arith.constant 0 : index
    %419 = vector.load %arg2[%418, %c3_268, %c0_269, %c0_270] : memref<9x4x18x32xbf16, #tpu.memory_space<vmem>>, vector<1x1x18x32xbf16>
    %420 = vector.shape_cast %419 : vector<1x1x18x32xbf16> to vector<18x32xbf16>
    %421 = arith.extf %420 : vector<18x32xbf16> to vector<18x32xf32>
    %c3_271 = arith.constant 3 : index
    %c0_272 = arith.constant 0 : index
    %c0_273 = arith.constant 0 : index
    %422 = vector.load %arg3[%c3_271, %c0_272, %c0_273] : memref<4x32x32xbf16, #tpu.memory_space<vmem>>, vector<1x32x32xbf16>
    %423 = vector.shape_cast %422 : vector<1x32x32xbf16> to vector<32x32xbf16>
    %cst_274 = arith.constant dense<0.000000e+00> : vector<18x32xf32>
    %424 = tpu.matmul %382, %423, %cst_274 {dimension_numbers = #tpu.dot_dimension_numbers<[1], [0], [0], [1], [0, 0, 1, 1], [], []>} : vector<18x32xbf16>, vector<32x32xbf16>, vector<18x32xf32> -> vector<18x32xf32>
    %425 = arith.addf %421, %424 : vector<18x32xf32>
    %426 = arith.negf %425 : vector<18x32xf32>
    %427 = math.exp %426 : vector<18x32xf32>
    %cst_275 = arith.constant 1.000000e+00 : f32
    %428 = vector.broadcast %cst_275 : f32 to vector<18x32xf32>
    %429 = arith.addf %428, %427 : vector<18x32xf32>
    %430 = arith.divf %428, %429 : vector<18x32xf32>
    %c0_276 = arith.constant 0 : index
    %c0_277 = arith.constant 0 : index
    %431 = vector.load %arg6[%c0_276, %c0_277] : memref<18x32xf32, #tpu.memory_space<vmem>>, vector<18x32xf32>
    %432 = arith.mulf %408, %431 : vector<18x32xf32>
    %433 = arith.mulf %395, %417 : vector<18x32xf32>
    %434 = arith.addf %432, %433 : vector<18x32xf32>
    %435 = math.tanh %434 : vector<18x32xf32>
    %436 = arith.mulf %430, %435 : vector<18x32xf32>
    %c0_278 = arith.constant 0 : index
    %c0_279 = arith.constant 0 : index
    %437 = vector.load %arg6[%c0_278, %c0_279] : memref<18x32xf32, #tpu.memory_space<vmem>>, vector<18x32xf32>
    tpu.vector_store %arg6[%c0_278, %c0_279], %434 {strides = array<i32>} : memref<18x32xf32, #tpu.memory_space<vmem>>, vector<18x32xf32>,
    %c0_280 = arith.constant 0 : index
    %c0_281 = arith.constant 0 : index
    %438 = vector.load %arg5[%c0_280, %c0_281] : memref<18x32xf32, #tpu.memory_space<vmem>>, vector<18x32xf32>
    tpu.vector_store %arg5[%c0_280, %c0_281], %436 {strides = array<i32>} : memref<18x32xf32, #tpu.memory_space<vmem>>, vector<18x32xf32>,
    %439 = arith.truncf %436 : vector<18x32xf32> to vector<18x32xbf16>
    %440 = arith.index_cast %c6_i32 : i32 to index
    %c0_282 = arith.constant 0 : index
    %c0_283 = arith.constant 0 : index
    %441 = vector.load %arg4[%440, %c0_282, %c0_283] : memref<9x18x32xbf16, #tpu.memory_space<vmem>>, vector<1x18x32xbf16>
    %442 = vector.shape_cast %441 : vector<1x18x32xbf16> to vector<18x32xbf16>
    %443 = vector.shape_cast %439 : vector<18x32xbf16> to vector<1x18x32xbf16>
    tpu.vector_store %arg4[%440, %c0_282, %c0_283], %443 {strides = array<i32>} : memref<9x18x32xbf16, #tpu.memory_space<vmem>>, vector<1x18x32xbf16>,
    %c7_i32 = arith.constant 7 : i32
    %c0_284 = arith.constant 0 : index
    %c0_285 = arith.constant 0 : index
    %444 = vector.load %arg5[%c0_284, %c0_285] : memref<18x32xf32, #tpu.memory_space<vmem>>, vector<18x32xf32>
    %445 = arith.truncf %444 : vector<18x32xf32> to vector<18x32xbf16>
    %446 = arith.index_cast %c7_i32 : i32 to index
    %c0_286 = arith.constant 0 : index
    %c0_287 = arith.constant 0 : index
    %c0_288 = arith.constant 0 : index
    %447 = vector.load %arg2[%446, %c0_286, %c0_287, %c0_288] : memref<9x4x18x32xbf16, #tpu.memory_space<vmem>>, vector<1x1x18x32xbf16>
    %448 = vector.shape_cast %447 : vector<1x1x18x32xbf16> to vector<18x32xbf16>
    %449 = arith.extf %448 : vector<18x32xbf16> to vector<18x32xf32>
    %c0_289 = arith.constant 0 : index
    %c0_290 = arith.constant 0 : index
    %c0_291 = arith.constant 0 : index
    %450 = vector.load %arg3[%c0_289, %c0_290, %c0_291] : memref<4x32x32xbf16, #tpu.memory_space<vmem>>, vector<1x32x32xbf16>
    %451 = vector.shape_cast %450 : vector<1x32x32xbf16> to vector<32x32xbf16>
    %cst_292 = arith.constant dense<0.000000e+00> : vector<18x32xf32>
    %452 = tpu.matmul %445, %451, %cst_292 {dimension_numbers = #tpu.dot_dimension_numbers<[1], [0], [0], [1], [0, 0, 1, 1], [], []>} : vector<18x32xbf16>, vector<32x32xbf16>, vector<18x32xf32> -> vector<18x32xf32>
    %453 = arith.addf %449, %452 : vector<18x32xf32>
    %454 = arith.negf %453 : vector<18x32xf32>
    %455 = math.exp %454 : vector<18x32xf32>
    %cst_293 = arith.constant 1.000000e+00 : f32
    %456 = vector.broadcast %cst_293 : f32 to vector<18x32xf32>
    %457 = arith.addf %456, %455 : vector<18x32xf32>
    %458 = arith.divf %456, %457 : vector<18x32xf32>
    %459 = arith.index_cast %c7_i32 : i32 to index
    %c1_294 = arith.constant 1 : index
    %c0_295 = arith.constant 0 : index
    %c0_296 = arith.constant 0 : index
    %460 = vector.load %arg2[%459, %c1_294, %c0_295, %c0_296] : memref<9x4x18x32xbf16, #tpu.memory_space<vmem>>, vector<1x1x18x32xbf16>
    %461 = vector.shape_cast %460 : vector<1x1x18x32xbf16> to vector<18x32xbf16>
    %462 = arith.extf %461 : vector<18x32xbf16> to vector<18x32xf32>
    %c1_297 = arith.constant 1 : index
    %c0_298 = arith.constant 0 : index
    %c0_299 = arith.constant 0 : index
    %463 = vector.load %arg3[%c1_297, %c0_298, %c0_299] : memref<4x32x32xbf16, #tpu.memory_space<vmem>>, vector<1x32x32xbf16>
    %464 = vector.shape_cast %463 : vector<1x32x32xbf16> to vector<32x32xbf16>
    %cst_300 = arith.constant dense<0.000000e+00> : vector<18x32xf32>
    %465 = tpu.matmul %445, %464, %cst_300 {dimension_numbers = #tpu.dot_dimension_numbers<[1], [0], [0], [1], [0, 0, 1, 1], [], []>} : vector<18x32xbf16>, vector<32x32xbf16>, vector<18x32xf32> -> vector<18x32xf32>
    %466 = arith.addf %462, %465 : vector<18x32xf32>
    %467 = arith.negf %466 : vector<18x32xf32>
    %468 = math.exp %467 : vector<18x32xf32>
    %cst_301 = arith.constant 1.000000e+00 : f32
    %469 = vector.broadcast %cst_301 : f32 to vector<18x32xf32>
    %470 = arith.addf %469, %468 : vector<18x32xf32>
    %471 = arith.divf %469, %470 : vector<18x32xf32>
    %472 = arith.index_cast %c7_i32 : i32 to index
    %c2_302 = arith.constant 2 : index
    %c0_303 = arith.constant 0 : index
    %c0_304 = arith.constant 0 : index
    %473 = vector.load %arg2[%472, %c2_302, %c0_303, %c0_304] : memref<9x4x18x32xbf16, #tpu.memory_space<vmem>>, vector<1x1x18x32xbf16>
    %474 = vector.shape_cast %473 : vector<1x1x18x32xbf16> to vector<18x32xbf16>
    %475 = arith.extf %474 : vector<18x32xbf16> to vector<18x32xf32>
    %c2_305 = arith.constant 2 : index
    %c0_306 = arith.constant 0 : index
    %c0_307 = arith.constant 0 : index
    %476 = vector.load %arg3[%c2_305, %c0_306, %c0_307] : memref<4x32x32xbf16, #tpu.memory_space<vmem>>, vector<1x32x32xbf16>
    %477 = vector.shape_cast %476 : vector<1x32x32xbf16> to vector<32x32xbf16>
    %cst_308 = arith.constant dense<0.000000e+00> : vector<18x32xf32>
    %478 = tpu.matmul %445, %477, %cst_308 {dimension_numbers = #tpu.dot_dimension_numbers<[1], [0], [0], [1], [0, 0, 1, 1], [], []>} : vector<18x32xbf16>, vector<32x32xbf16>, vector<18x32xf32> -> vector<18x32xf32>
    %479 = arith.addf %475, %478 : vector<18x32xf32>
    %480 = math.tanh %479 : vector<18x32xf32>
    %481 = arith.index_cast %c7_i32 : i32 to index
    %c3_309 = arith.constant 3 : index
    %c0_310 = arith.constant 0 : index
    %c0_311 = arith.constant 0 : index
    %482 = vector.load %arg2[%481, %c3_309, %c0_310, %c0_311] : memref<9x4x18x32xbf16, #tpu.memory_space<vmem>>, vector<1x1x18x32xbf16>
    %483 = vector.shape_cast %482 : vector<1x1x18x32xbf16> to vector<18x32xbf16>
    %484 = arith.extf %483 : vector<18x32xbf16> to vector<18x32xf32>
    %c3_312 = arith.constant 3 : index
    %c0_313 = arith.constant 0 : index
    %c0_314 = arith.constant 0 : index
    %485 = vector.load %arg3[%c3_312, %c0_313, %c0_314] : memref<4x32x32xbf16, #tpu.memory_space<vmem>>, vector<1x32x32xbf16>
    %486 = vector.shape_cast %485 : vector<1x32x32xbf16> to vector<32x32xbf16>
    %cst_315 = arith.constant dense<0.000000e+00> : vector<18x32xf32>
    %487 = tpu.matmul %445, %486, %cst_315 {dimension_numbers = #tpu.dot_dimension_numbers<[1], [0], [0], [1], [0, 0, 1, 1], [], []>} : vector<18x32xbf16>, vector<32x32xbf16>, vector<18x32xf32> -> vector<18x32xf32>
    %488 = arith.addf %484, %487 : vector<18x32xf32>
    %489 = arith.negf %488 : vector<18x32xf32>
    %490 = math.exp %489 : vector<18x32xf32>
    %cst_316 = arith.constant 1.000000e+00 : f32
    %491 = vector.broadcast %cst_316 : f32 to vector<18x32xf32>
    %492 = arith.addf %491, %490 : vector<18x32xf32>
    %493 = arith.divf %491, %492 : vector<18x32xf32>
    %c0_317 = arith.constant 0 : index
    %c0_318 = arith.constant 0 : index
    %494 = vector.load %arg6[%c0_317, %c0_318] : memref<18x32xf32, #tpu.memory_space<vmem>>, vector<18x32xf32>
    %495 = arith.mulf %471, %494 : vector<18x32xf32>
    %496 = arith.mulf %458, %480 : vector<18x32xf32>
    %497 = arith.addf %495, %496 : vector<18x32xf32>
    %498 = math.tanh %497 : vector<18x32xf32>
    %499 = arith.mulf %493, %498 : vector<18x32xf32>
    %c0_319 = arith.constant 0 : index
    %c0_320 = arith.constant 0 : index
    %500 = vector.load %arg6[%c0_319, %c0_320] : memref<18x32xf32, #tpu.memory_space<vmem>>, vector<18x32xf32>
    tpu.vector_store %arg6[%c0_319, %c0_320], %497 {strides = array<i32>} : memref<18x32xf32, #tpu.memory_space<vmem>>, vector<18x32xf32>,
    %c0_321 = arith.constant 0 : index
    %c0_322 = arith.constant 0 : index
    %501 = vector.load %arg5[%c0_321, %c0_322] : memref<18x32xf32, #tpu.memory_space<vmem>>, vector<18x32xf32>
    tpu.vector_store %arg5[%c0_321, %c0_322], %499 {strides = array<i32>} : memref<18x32xf32, #tpu.memory_space<vmem>>, vector<18x32xf32>,
    %502 = arith.truncf %499 : vector<18x32xf32> to vector<18x32xbf16>
    %503 = arith.index_cast %c7_i32 : i32 to index
    %c0_323 = arith.constant 0 : index
    %c0_324 = arith.constant 0 : index
    %504 = vector.load %arg4[%503, %c0_323, %c0_324] : memref<9x18x32xbf16, #tpu.memory_space<vmem>>, vector<1x18x32xbf16>
    %505 = vector.shape_cast %504 : vector<1x18x32xbf16> to vector<18x32xbf16>
    %506 = vector.shape_cast %502 : vector<18x32xbf16> to vector<1x18x32xbf16>
    tpu.vector_store %arg4[%503, %c0_323, %c0_324], %506 {strides = array<i32>} : memref<9x18x32xbf16, #tpu.memory_space<vmem>>, vector<1x18x32xbf16>,
    %c8_i32 = arith.constant 8 : i32
    %c0_325 = arith.constant 0 : index
    %c0_326 = arith.constant 0 : index
    %507 = vector.load %arg5[%c0_325, %c0_326] : memref<18x32xf32, #tpu.memory_space<vmem>>, vector<18x32xf32>
    %508 = arith.truncf %507 : vector<18x32xf32> to vector<18x32xbf16>
    %509 = arith.index_cast %c8_i32 : i32 to index
    %c0_327 = arith.constant 0 : index
    %c0_328 = arith.constant 0 : index
    %c0_329 = arith.constant 0 : index
    %510 = vector.load %arg2[%509, %c0_327, %c0_328, %c0_329] : memref<9x4x18x32xbf16, #tpu.memory_space<vmem>>, vector<1x1x18x32xbf16>
    %511 = vector.shape_cast %510 : vector<1x1x18x32xbf16> to vector<18x32xbf16>
    %512 = arith.extf %511 : vector<18x32xbf16> to vector<18x32xf32>
    %c0_330 = arith.constant 0 : index
    %c0_331 = arith.constant 0 : index
    %c0_332 = arith.constant 0 : index
    %513 = vector.load %arg3[%c0_330, %c0_331, %c0_332] : memref<4x32x32xbf16, #tpu.memory_space<vmem>>, vector<1x32x32xbf16>
    %514 = vector.shape_cast %513 : vector<1x32x32xbf16> to vector<32x32xbf16>
    %cst_333 = arith.constant dense<0.000000e+00> : vector<18x32xf32>
    %515 = tpu.matmul %508, %514, %cst_333 {dimension_numbers = #tpu.dot_dimension_numbers<[1], [0], [0], [1], [0, 0, 1, 1], [], []>} : vector<18x32xbf16>, vector<32x32xbf16>, vector<18x32xf32> -> vector<18x32xf32>
    %516 = arith.addf %512, %515 : vector<18x32xf32>
    %517 = arith.negf %516 : vector<18x32xf32>
    %518 = math.exp %517 : vector<18x32xf32>
    %cst_334 = arith.constant 1.000000e+00 : f32
    %519 = vector.broadcast %cst_334 : f32 to vector<18x32xf32>
    %520 = arith.addf %519, %518 : vector<18x32xf32>
    %521 = arith.divf %519, %520 : vector<18x32xf32>
    %522 = arith.index_cast %c8_i32 : i32 to index
    %c1_335 = arith.constant 1 : index
    %c0_336 = arith.constant 0 : index
    %c0_337 = arith.constant 0 : index
    %523 = vector.load %arg2[%522, %c1_335, %c0_336, %c0_337] : memref<9x4x18x32xbf16, #tpu.memory_space<vmem>>, vector<1x1x18x32xbf16>
    %524 = vector.shape_cast %523 : vector<1x1x18x32xbf16> to vector<18x32xbf16>
    %525 = arith.extf %524 : vector<18x32xbf16> to vector<18x32xf32>
    %c1_338 = arith.constant 1 : index
    %c0_339 = arith.constant 0 : index
    %c0_340 = arith.constant 0 : index
    %526 = vector.load %arg3[%c1_338, %c0_339, %c0_340] : memref<4x32x32xbf16, #tpu.memory_space<vmem>>, vector<1x32x32xbf16>
    %527 = vector.shape_cast %526 : vector<1x32x32xbf16> to vector<32x32xbf16>
    %cst_341 = arith.constant dense<0.000000e+00> : vector<18x32xf32>
    %528 = tpu.matmul %508, %527, %cst_341 {dimension_numbers = #tpu.dot_dimension_numbers<[1], [0], [0], [1], [0, 0, 1, 1], [], []>} : vector<18x32xbf16>, vector<32x32xbf16>, vector<18x32xf32> -> vector<18x32xf32>
    %529 = arith.addf %525, %528 : vector<18x32xf32>
    %530 = arith.negf %529 : vector<18x32xf32>
    %531 = math.exp %530 : vector<18x32xf32>
    %cst_342 = arith.constant 1.000000e+00 : f32
    %532 = vector.broadcast %cst_342 : f32 to vector<18x32xf32>
    %533 = arith.addf %532, %531 : vector<18x32xf32>
    %534 = arith.divf %532, %533 : vector<18x32xf32>
    %535 = arith.index_cast %c8_i32 : i32 to index
    %c2_343 = arith.constant 2 : index
    %c0_344 = arith.constant 0 : index
    %c0_345 = arith.constant 0 : index
    %536 = vector.load %arg2[%535, %c2_343, %c0_344, %c0_345] : memref<9x4x18x32xbf16, #tpu.memory_space<vmem>>, vector<1x1x18x32xbf16>
    %537 = vector.shape_cast %536 : vector<1x1x18x32xbf16> to vector<18x32xbf16>
    %538 = arith.extf %537 : vector<18x32xbf16> to vector<18x32xf32>
    %c2_346 = arith.constant 2 : index
    %c0_347 = arith.constant 0 : index
    %c0_348 = arith.constant 0 : index
    %539 = vector.load %arg3[%c2_346, %c0_347, %c0_348] : memref<4x32x32xbf16, #tpu.memory_space<vmem>>, vector<1x32x32xbf16>
    %540 = vector.shape_cast %539 : vector<1x32x32xbf16> to vector<32x32xbf16>
    %cst_349 = arith.constant dense<0.000000e+00> : vector<18x32xf32>
    %541 = tpu.matmul %508, %540, %cst_349 {dimension_numbers = #tpu.dot_dimension_numbers<[1], [0], [0], [1], [0, 0, 1, 1], [], []>} : vector<18x32xbf16>, vector<32x32xbf16>, vector<18x32xf32> -> vector<18x32xf32>
    %542 = arith.addf %538, %541 : vector<18x32xf32>
    %543 = math.tanh %542 : vector<18x32xf32>
    %544 = arith.index_cast %c8_i32 : i32 to index
    %c3_350 = arith.constant 3 : index
    %c0_351 = arith.constant 0 : index
    %c0_352 = arith.constant 0 : index
    %545 = vector.load %arg2[%544, %c3_350, %c0_351, %c0_352] : memref<9x4x18x32xbf16, #tpu.memory_space<vmem>>, vector<1x1x18x32xbf16>
    %546 = vector.shape_cast %545 : vector<1x1x18x32xbf16> to vector<18x32xbf16>
    %547 = arith.extf %546 : vector<18x32xbf16> to vector<18x32xf32>
    %c3_353 = arith.constant 3 : index
    %c0_354 = arith.constant 0 : index
    %c0_355 = arith.constant 0 : index
    %548 = vector.load %arg3[%c3_353, %c0_354, %c0_355] : memref<4x32x32xbf16, #tpu.memory_space<vmem>>, vector<1x32x32xbf16>
    %549 = vector.shape_cast %548 : vector<1x32x32xbf16> to vector<32x32xbf16>
    %cst_356 = arith.constant dense<0.000000e+00> : vector<18x32xf32>
    %550 = tpu.matmul %508, %549, %cst_356 {dimension_numbers = #tpu.dot_dimension_numbers<[1], [0], [0], [1], [0, 0, 1, 1], [], []>} : vector<18x32xbf16>, vector<32x32xbf16>, vector<18x32xf32> -> vector<18x32xf32>
    %551 = arith.addf %547, %550 : vector<18x32xf32>
    %552 = arith.negf %551 : vector<18x32xf32>
    %553 = math.exp %552 : vector<18x32xf32>
    %cst_357 = arith.constant 1.000000e+00 : f32
    %554 = vector.broadcast %cst_357 : f32 to vector<18x32xf32>
    %555 = arith.addf %554, %553 : vector<18x32xf32>
    %556 = arith.divf %554, %555 : vector<18x32xf32>
    %c0_358 = arith.constant 0 : index
    %c0_359 = arith.constant 0 : index
    %557 = vector.load %arg6[%c0_358, %c0_359] : memref<18x32xf32, #tpu.memory_space<vmem>>, vector<18x32xf32>
    %558 = arith.mulf %534, %557 : vector<18x32xf32>
    %559 = arith.mulf %521, %543 : vector<18x32xf32>
    %560 = arith.addf %558, %559 : vector<18x32xf32>
    %561 = math.tanh %560 : vector<18x32xf32>
    %562 = arith.mulf %556, %561 : vector<18x32xf32>
    %c0_360 = arith.constant 0 : index
    %c0_361 = arith.constant 0 : index
    %563 = vector.load %arg6[%c0_360, %c0_361] : memref<18x32xf32, #tpu.memory_space<vmem>>, vector<18x32xf32>
    tpu.vector_store %arg6[%c0_360, %c0_361], %560 {strides = array<i32>} : memref<18x32xf32, #tpu.memory_space<vmem>>, vector<18x32xf32>,
    %c0_362 = arith.constant 0 : index
    %c0_363 = arith.constant 0 : index
    %564 = vector.load %arg5[%c0_362, %c0_363] : memref<18x32xf32, #tpu.memory_space<vmem>>, vector<18x32xf32>
    tpu.vector_store %arg5[%c0_362, %c0_363], %562 {strides = array<i32>} : memref<18x32xf32, #tpu.memory_space<vmem>>, vector<18x32xf32>,
    %565 = arith.truncf %562 : vector<18x32xf32> to vector<18x32xbf16>
    %566 = arith.index_cast %c8_i32 : i32 to index
    %c0_364 = arith.constant 0 : index
    %c0_365 = arith.constant 0 : index
    %567 = vector.load %arg4[%566, %c0_364, %c0_365] : memref<9x18x32xbf16, #tpu.memory_space<vmem>>, vector<1x18x32xbf16>
    %568 = vector.shape_cast %567 : vector<1x18x32xbf16> to vector<18x32xbf16>
    %569 = vector.shape_cast %565 : vector<18x32xbf16> to vector<1x18x32xbf16>
    tpu.vector_store %arg4[%566, %c0_364, %c0_365], %569 {strides = array<i32>} : memref<9x18x32xbf16, #tpu.memory_space<vmem>>, vector<1x18x32xbf16>,
    %c9_i32 = arith.constant 9 : i32
    return
  }
  func.func @transform_0(%arg0: i32, %arg1: i32) -> (i32, i32, i32, i32) {
    %c0_i32 = arith.constant 0 : i32
    %c0_i32_0 = arith.constant 0 : i32
    %c0_i32_1 = arith.constant 0 : i32
    return %arg1, %c0_i32, %arg0, %c0_i32_0 : i32, i32, i32, i32
  }
  func.func @transform_1(%arg0: i32, %arg1: i32) -> (i32, i32, i32) {
    %c0_i32 = arith.constant 0 : i32
    %c0_i32_0 = arith.constant 0 : i32
    %c0_i32_1 = arith.constant 0 : i32
    %c0_i32_2 = arith.constant 0 : i32
    return %c0_i32, %c0_i32_0, %c0_i32_1 : i32, i32, i32
  }
  func.func @transform_2(%arg0: i32, %arg1: i32) -> (i32, i32, i32) {
    %c0_i32 = arith.constant 0 : i32
    %c0_i32_0 = arith.constant 0 : i32
    return %arg1, %arg0, %c0_i32 : i32, i32, i32
  }
}

module attributes {stable_mosaic.version = 11 : i64} {
  func.func @_matmul_res_kernel(%arg0: i32, %arg1: memref<162x32xbf16, #tpu.memory_space<vmem>>, %arg2: memref<32x8xbf16, #tpu.memory_space<vmem>>, %arg3: memref<1x8xf32, #tpu.memory_space<vmem>>, %arg4: memref<162x8xf32, #tpu.memory_space<vmem>>, %arg5: memref<162x8xf32, #tpu.memory_space<vmem>>) attributes {dimension_semantics = [#tpu.dimension_semantics<parallel>], iteration_bounds = array<i64: 1>, scalar_prefetch = 0 : i64, scratch_operands = 0 : i64, tpu.core_type = #tpu.core_type<tc>, window_params = [{transform_indices = @transform_0, window_bounds = array<i64: 162, 32>}, {pipeline_mode = #tpu.pipeline_mode<synchronous>, transform_indices = @transform_1, window_bounds = array<i64: 32, 8>}, {pipeline_mode = #tpu.pipeline_mode<synchronous>, transform_indices = @transform_2, window_bounds = array<i64: 1, 8>}, {transform_indices = @transform_3, window_bounds = array<i64: 162, 8>}, {transform_indices = @transform_4, window_bounds = array<i64: 162, 8>}]} {
    %c0 = arith.constant 0 : index
    %c0_0 = arith.constant 0 : index
    %0 = vector.load %arg1[%c0, %c0_0] : memref<162x32xbf16, #tpu.memory_space<vmem>>, vector<162x32xbf16>
    %c0_1 = arith.constant 0 : index
    %c0_2 = arith.constant 0 : index
    %1 = vector.load %arg2[%c0_1, %c0_2] : memref<32x8xbf16, #tpu.memory_space<vmem>>, vector<32x8xbf16>
    %cst = arith.constant dense<0.000000e+00> : vector<162x8xf32>
    %2 = tpu.matmul %0, %1, %cst {dimension_numbers = #tpu.dot_dimension_numbers<[1], [0], [0], [1], [0, 0, 1, 1], [], []>} : vector<162x32xbf16>, vector<32x8xbf16>, vector<162x8xf32> -> vector<162x8xf32>
    %c0_3 = arith.constant 0 : index
    %c0_4 = arith.constant 0 : index
    %3 = vector.load %arg3[%c0_3, %c0_4] : memref<1x8xf32, #tpu.memory_space<vmem>>, vector<1x8xf32>
    %4 = vector.broadcast %3 : vector<1x8xf32> to vector<162x8xf32>
    %5 = arith.addf %2, %4 : vector<162x8xf32>
    %c0_5 = arith.constant 0 : index
    %c0_6 = arith.constant 0 : index
    %6 = vector.load %arg4[%c0_5, %c0_6] : memref<162x8xf32, #tpu.memory_space<vmem>>, vector<162x8xf32>
    %7 = arith.addf %5, %6 : vector<162x8xf32>
    %c0_7 = arith.constant 0 : index
    %c0_8 = arith.constant 0 : index
    %8 = vector.load %arg5[%c0_7, %c0_8] : memref<162x8xf32, #tpu.memory_space<vmem>>, vector<162x8xf32>
    tpu.vector_store %arg5[%c0_7, %c0_8], %7 {strides = array<i32>} : memref<162x8xf32, #tpu.memory_space<vmem>>, vector<162x8xf32>,
    return
  }
  func.func @transform_0(%arg0: i32) -> (i32, i32) {
    %c0_i32 = arith.constant 0 : i32
    %c0_i32_0 = arith.constant 0 : i32
    return %arg0, %c0_i32 : i32, i32
  }
  func.func @transform_1(%arg0: i32) -> (i32, i32) {
    %c0_i32 = arith.constant 0 : i32
    %c0_i32_0 = arith.constant 0 : i32
    %c0_i32_1 = arith.constant 0 : i32
    return %c0_i32, %c0_i32_0 : i32, i32
  }
  func.func @transform_2(%arg0: i32) -> (i32, i32) {
    %c0_i32 = arith.constant 0 : i32
    %c0_i32_0 = arith.constant 0 : i32
    %c0_i32_1 = arith.constant 0 : i32
    return %c0_i32, %c0_i32_0 : i32, i32
  }
  func.func @transform_3(%arg0: i32) -> (i32, i32) {
    %c0_i32 = arith.constant 0 : i32
    %c0_i32_0 = arith.constant 0 : i32
    return %arg0, %c0_i32 : i32, i32
  }
  func.func @transform_4(%arg0: i32) -> (i32, i32) {
    %c0_i32 = arith.constant 0 : i32
    %c0_i32_0 = arith.constant 0 : i32
    return %arg0, %c0_i32 : i32, i32
  }
}

module attributes {stable_mosaic.version = 11 : i64} {
  func.func @_matmul_kernel(%arg0: i32, %arg1: memref<162x8xf32, #tpu.memory_space<vmem>>, %arg2: memref<8x16xbf16, #tpu.memory_space<vmem>>, %arg3: memref<1x16xf32, #tpu.memory_space<vmem>>, %arg4: memref<162x16xbf16, #tpu.memory_space<vmem>>) attributes {dimension_semantics = [#tpu.dimension_semantics<parallel>], iteration_bounds = array<i64: 1>, scalar_prefetch = 0 : i64, scratch_operands = 0 : i64, tpu.core_type = #tpu.core_type<tc>, window_params = [{transform_indices = @transform_0, window_bounds = array<i64: 162, 8>}, {pipeline_mode = #tpu.pipeline_mode<synchronous>, transform_indices = @transform_1, window_bounds = array<i64: 8, 16>}, {pipeline_mode = #tpu.pipeline_mode<synchronous>, transform_indices = @transform_2, window_bounds = array<i64: 1, 16>}, {transform_indices = @transform_3, window_bounds = array<i64: 162, 16>}]} {
    %c0 = arith.constant 0 : index
    %c0_0 = arith.constant 0 : index
    %0 = vector.load %arg1[%c0, %c0_0] : memref<162x8xf32, #tpu.memory_space<vmem>>, vector<162x8xf32>
    %1 = arith.truncf %0 : vector<162x8xf32> to vector<162x8xbf16>
    %c0_1 = arith.constant 0 : index
    %c0_2 = arith.constant 0 : index
    %2 = vector.load %arg2[%c0_1, %c0_2] : memref<8x16xbf16, #tpu.memory_space<vmem>>, vector<8x16xbf16>
    %cst = arith.constant dense<0.000000e+00> : vector<162x16xf32>
    %3 = tpu.matmul %1, %2, %cst {dimension_numbers = #tpu.dot_dimension_numbers<[1], [0], [0], [1], [0, 0, 1, 1], [], []>} : vector<162x8xbf16>, vector<8x16xbf16>, vector<162x16xf32> -> vector<162x16xf32>
    %c0_3 = arith.constant 0 : index
    %c0_4 = arith.constant 0 : index
    %4 = vector.load %arg3[%c0_3, %c0_4] : memref<1x16xf32, #tpu.memory_space<vmem>>, vector<1x16xf32>
    %5 = vector.broadcast %4 : vector<1x16xf32> to vector<162x16xf32>
    %6 = arith.addf %3, %5 : vector<162x16xf32>
    %7 = arith.truncf %6 : vector<162x16xf32> to vector<162x16xbf16>
    %c0_5 = arith.constant 0 : index
    %c0_6 = arith.constant 0 : index
    %8 = vector.load %arg4[%c0_5, %c0_6] : memref<162x16xbf16, #tpu.memory_space<vmem>>, vector<162x16xbf16>
    tpu.vector_store %arg4[%c0_5, %c0_6], %7 {strides = array<i32>} : memref<162x16xbf16, #tpu.memory_space<vmem>>, vector<162x16xbf16>,
    return
  }
  func.func @transform_0(%arg0: i32) -> (i32, i32) {
    %c0_i32 = arith.constant 0 : i32
    %c0_i32_0 = arith.constant 0 : i32
    return %arg0, %c0_i32 : i32, i32
  }
  func.func @transform_1(%arg0: i32) -> (i32, i32) {
    %c0_i32 = arith.constant 0 : i32
    %c0_i32_0 = arith.constant 0 : i32
    %c0_i32_1 = arith.constant 0 : i32
    return %c0_i32, %c0_i32_0 : i32, i32
  }
  func.func @transform_2(%arg0: i32) -> (i32, i32) {
    %c0_i32 = arith.constant 0 : i32
    %c0_i32_0 = arith.constant 0 : i32
    %c0_i32_1 = arith.constant 0 : i32
    return %c0_i32, %c0_i32_0 : i32, i32
  }
  func.func @transform_3(%arg0: i32) -> (i32, i32) {
    %c0_i32 = arith.constant 0 : i32
    %c0_i32_0 = arith.constant 0 : i32
    return %arg0, %c0_i32 : i32, i32
  }
}

module attributes {stable_mosaic.version = 11 : i64} {
  func.func @_ln_kernel(%arg0: i32, %arg1: i32, %arg2: memref<1x1x9x18xbf16, #tpu.memory_space<vmem>>, %arg3: memref<1x1x1xf32, #tpu.memory_space<vmem>>, %arg4: memref<1x1x18xf32, #tpu.memory_space<vmem>>, %arg5: memref<1x1x18xf32, #tpu.memory_space<vmem>>, %arg6: memref<1x1x9x18xbf16, #tpu.memory_space<vmem>>) attributes {dimension_semantics = [#tpu.dimension_semantics<parallel>, #tpu.dimension_semantics<parallel>], iteration_bounds = array<i64: 2, 2>, scalar_prefetch = 0 : i64, scratch_operands = 0 : i64, tpu.core_type = #tpu.core_type<tc>, window_params = [{transform_indices = @transform_0, window_bounds = array<i64: 1, 1, 9, 18>}, {transform_indices = @transform_1, window_bounds = array<i64: 1, 1, 1>}, {transform_indices = @transform_2, window_bounds = array<i64: 1, 1, 18>}, {transform_indices = @transform_3, window_bounds = array<i64: 1, 1, 18>}, {transform_indices = @transform_4, window_bounds = array<i64: 1, 1, 9, 18>}]} {
    %c0 = arith.constant 0 : index
    %c0_0 = arith.constant 0 : index
    %c0_1 = arith.constant 0 : index
    %c0_2 = arith.constant 0 : index
    %0 = vector.load %arg2[%c0, %c0_0, %c0_1, %c0_2] : memref<1x1x9x18xbf16, #tpu.memory_space<vmem>>, vector<1x1x9x18xbf16>
    %1 = arith.extf %0 : vector<1x1x9x18xbf16> to vector<1x1x9x18xf32>
    %c0_3 = arith.constant 0 : index
    %c0_4 = arith.constant 0 : index
    %c0_5 = arith.constant 0 : index
    %2 = vector.load %arg3[%c0_3, %c0_4, %c0_5] : memref<1x1x1xf32, #tpu.memory_space<vmem>>, vector<1x1x1xf32>
    %cst = arith.constant 0.000000e+00 : f32
    %3 = vector.broadcast %cst : f32 to vector<1x1x9x18xf32>
    %4 = arith.cmpf oge, %1, %3 : vector<1x1x9x18xf32>
    %5 = vector.shape_cast %2 : vector<1x1x1xf32> to vector<1x1x1x1xf32>
    %6 = vector.broadcast %5 : vector<1x1x1x1xf32> to vector<1x1x9x18xf32>
    %7 = arith.mulf %6, %1 : vector<1x1x9x18xf32>
    %8 = arith.select %4, %1, %7 : vector<1x1x9x18xi1>, vector<1x1x9x18xf32>
    %cst_6 = arith.constant dense<0.000000e+00> : vector<1x1x9xf32>
    %9 = vector.multi_reduction <add>, %8, %cst_6 [3] : vector<1x1x9x18xf32> to vector<1x1x9xf32>
    %10 = vector.shape_cast %9 : vector<1x1x9xf32> to vector<1x1x9x1xf32>
    %cst_7 = arith.constant 1.800000e+01 : f32
    %11 = vector.broadcast %cst_7 : f32 to vector<1x1x9x1xf32>
    %12 = arith.divf %10, %11 : vector<1x1x9x1xf32>
    %13 = vector.broadcast %12 : vector<1x1x9x1xf32> to vector<1x1x9x18xf32>
    %14 = arith.subf %8, %13 : vector<1x1x9x18xf32>
    %15 = arith.mulf %14, %14 : vector<1x1x9x18xf32>
    %cst_8 = arith.constant dense<0.000000e+00> : vector<1x1x9xf32>
    %16 = vector.multi_reduction <add>, %15, %cst_8 [3] : vector<1x1x9x18xf32> to vector<1x1x9xf32>
    %17 = vector.shape_cast %16 : vector<1x1x9xf32> to vector<1x1x9x1xf32>
    %cst_9 = arith.constant 1.800000e+01 : f32
    %18 = vector.broadcast %cst_9 : f32 to vector<1x1x9x1xf32>
    %19 = arith.divf %17, %18 : vector<1x1x9x1xf32>
    %20 = vector.broadcast %12 : vector<1x1x9x1xf32> to vector<1x1x9x18xf32>
    %21 = arith.subf %8, %20 : vector<1x1x9x18xf32>
    %cst_10 = arith.constant 9.99999974E-6 : f32
    %22 = vector.broadcast %cst_10 : f32 to vector<1x1x9x1xf32>
    %23 = arith.addf %19, %22 : vector<1x1x9x1xf32>
    %24 = math.rsqrt %23 : vector<1x1x9x1xf32>
    %25 = vector.broadcast %24 : vector<1x1x9x1xf32> to vector<1x1x9x18xf32>
    %26 = arith.mulf %21, %25 : vector<1x1x9x18xf32>
    %c0_11 = arith.constant 0 : index
    %c0_12 = arith.constant 0 : index
    %c0_13 = arith.constant 0 : index
    %27 = vector.load %arg4[%c0_11, %c0_12, %c0_13] : memref<1x1x18xf32, #tpu.memory_space<vmem>>, vector<1x1x18xf32>
    %28 = vector.shape_cast %27 : vector<1x1x18xf32> to vector<1x1x1x18xf32>
    %29 = vector.broadcast %28 : vector<1x1x1x18xf32> to vector<1x1x9x18xf32>
    %30 = arith.mulf %26, %29 : vector<1x1x9x18xf32>
    %c0_14 = arith.constant 0 : index
    %c0_15 = arith.constant 0 : index
    %c0_16 = arith.constant 0 : index
    %31 = vector.load %arg5[%c0_14, %c0_15, %c0_16] : memref<1x1x18xf32, #tpu.memory_space<vmem>>, vector<1x1x18xf32>
    %32 = vector.shape_cast %31 : vector<1x1x18xf32> to vector<1x1x1x18xf32>
    %33 = vector.broadcast %32 : vector<1x1x1x18xf32> to vector<1x1x9x18xf32>
    %34 = arith.addf %30, %33 : vector<1x1x9x18xf32>
    %35 = arith.truncf %34 : vector<1x1x9x18xf32> to vector<1x1x9x18xbf16>
    %c0_17 = arith.constant 0 : index
    %c0_18 = arith.constant 0 : index
    %c0_19 = arith.constant 0 : index
    %c0_20 = arith.constant 0 : index
    %36 = vector.load %arg6[%c0_17, %c0_18, %c0_19, %c0_20] : memref<1x1x9x18xbf16, #tpu.memory_space<vmem>>, vector<1x1x9x18xbf16>
    tpu.vector_store %arg6[%c0_17, %c0_18, %c0_19, %c0_20], %35 {strides = array<i32>} : memref<1x1x9x18xbf16, #tpu.memory_space<vmem>>, vector<1x1x9x18xbf16>,
    return
  }
  func.func @transform_0(%arg0: i32, %arg1: i32) -> (i32, i32, i32, i32) {
    %c0_i32 = arith.constant 0 : i32
    %c0_i32_0 = arith.constant 0 : i32
    %c0_i32_1 = arith.constant 0 : i32
    return %arg0, %arg1, %c0_i32, %c0_i32_0 : i32, i32, i32, i32
  }
  func.func @transform_1(%arg0: i32, %arg1: i32) -> (i32, i32, i32) {
    %c0_i32 = arith.constant 0 : i32
    %c0_i32_0 = arith.constant 0 : i32
    %c0_i32_1 = arith.constant 0 : i32
    return %arg1, %c0_i32, %c0_i32_0 : i32, i32, i32
  }
  func.func @transform_2(%arg0: i32, %arg1: i32) -> (i32, i32, i32) {
    %c0_i32 = arith.constant 0 : i32
    %c0_i32_0 = arith.constant 0 : i32
    %c0_i32_1 = arith.constant 0 : i32
    return %arg1, %c0_i32, %c0_i32_0 : i32, i32, i32
  }
  func.func @transform_3(%arg0: i32, %arg1: i32) -> (i32, i32, i32) {
    %c0_i32 = arith.constant 0 : i32
    %c0_i32_0 = arith.constant 0 : i32
    %c0_i32_1 = arith.constant 0 : i32
    return %arg1, %c0_i32, %c0_i32_0 : i32, i32, i32
  }
  func.func @transform_4(%arg0: i32, %arg1: i32) -> (i32, i32, i32, i32) {
    %c0_i32 = arith.constant 0 : i32
    %c0_i32_0 = arith.constant 0 : i32
    %c0_i32_1 = arith.constant 0 : i32
    return %arg0, %arg1, %c0_i32, %c0_i32_0 : i32, i32, i32, i32
  }
}

module attributes {stable_mosaic.version = 11 : i64} {
  func.func @_attn_kernel(%arg0: i32, %arg1: i32, %arg2: memref<1x9x18xbf16, #tpu.memory_space<vmem>>, %arg3: memref<1x18x9xbf16, #tpu.memory_space<vmem>>, %arg4: memref<1x9x36xbf16, #tpu.memory_space<vmem>>, %arg5: memref<1x9x36xbf16, #tpu.memory_space<vmem>>) attributes {dimension_semantics = [#tpu.dimension_semantics<parallel>, #tpu.dimension_semantics<parallel>], iteration_bounds = array<i64: 4, 1>, scalar_prefetch = 0 : i64, scratch_operands = 0 : i64, tpu.core_type = #tpu.core_type<tc>, window_params = [{transform_indices = @transform_0, window_bounds = array<i64: 1, 9, 18>}, {transform_indices = @transform_1, window_bounds = array<i64: 1, 18, 9>}, {transform_indices = @transform_2, window_bounds = array<i64: 1, 9, 36>}, {transform_indices = @transform_3, window_bounds = array<i64: 1, 9, 36>}]} {
    %c0 = arith.constant 0 : index
    %c0_0 = arith.constant 0 : index
    %c0_1 = arith.constant 0 : index
    %0 = vector.load %arg2[%c0, %c0_0, %c0_1] : memref<1x9x18xbf16, #tpu.memory_space<vmem>>, vector<1x9x18xbf16>
    %1 = vector.shape_cast %0 : vector<1x9x18xbf16> to vector<9x18xbf16>
    %c0_2 = arith.constant 0 : index
    %c0_3 = arith.constant 0 : index
    %c0_4 = arith.constant 0 : index
    %2 = vector.load %arg3[%c0_2, %c0_3, %c0_4] : memref<1x18x9xbf16, #tpu.memory_space<vmem>>, vector<1x18x9xbf16>
    %3 = vector.shape_cast %2 : vector<1x18x9xbf16> to vector<18x9xbf16>
    %c0_5 = arith.constant 0 : index
    %c0_6 = arith.constant 0 : index
    %c0_7 = arith.constant 0 : index
    %4 = vector.load %arg4[%c0_5, %c0_6, %c0_7] : memref<1x9x36xbf16, #tpu.memory_space<vmem>>, vector<1x9x36xbf16>
    %5 = vector.shape_cast %4 : vector<1x9x36xbf16> to vector<9x36xbf16>
    %cst = arith.constant dense<0.000000e+00> : vector<9x9xf32>
    %6 = tpu.matmul %1, %3, %cst {dimension_numbers = #tpu.dot_dimension_numbers<[1], [0], [0], [1], [0, 0, 1, 1], [], []>} : vector<9x18xbf16>, vector<18x9xbf16>, vector<9x9xf32> -> vector<9x9xf32>
    %cst_8 = arith.constant 0.235702261 : f32
    %7 = vector.broadcast %cst_8 : f32 to vector<9x9xf32>
    %8 = arith.mulf %6, %7 : vector<9x9xf32>
    %cst_9 = arith.constant dense<0xFF800000> : vector<9xf32>
    %9 = vector.multi_reduction <maximumf>, %8, %cst_9 [1] : vector<9x9xf32> to vector<9xf32>
    %10 = vector.shape_cast %9 : vector<9xf32> to vector<9x1xf32>
    %11 = vector.broadcast %10 : vector<9x1xf32> to vector<9x9xf32>
    %12 = arith.subf %8, %11 : vector<9x9xf32>
    %13 = math.exp %12 : vector<9x9xf32>
    %cst_10 = arith.constant dense<0.000000e+00> : vector<9xf32>
    %14 = vector.multi_reduction <add>, %13, %cst_10 [1] : vector<9x9xf32> to vector<9xf32>
    %15 = vector.shape_cast %14 : vector<9xf32> to vector<9x1xf32>
    %16 = tpu.reciprocal %15 {approx = true} : vector<9x1xf32> -> vector<9x1xf32>
    %17 = vector.broadcast %16 : vector<9x1xf32> to vector<9x9xf32>
    %18 = arith.mulf %13, %17 : vector<9x9xf32>
    %19 = arith.truncf %18 : vector<9x9xf32> to vector<9x9xbf16>
    %cst_11 = arith.constant dense<0.000000e+00> : vector<9x36xf32>
    %20 = tpu.matmul %19, %5, %cst_11 {dimension_numbers = #tpu.dot_dimension_numbers<[1], [0], [0], [1], [0, 0, 1, 1], [], []>} : vector<9x9xbf16>, vector<9x36xbf16>, vector<9x36xf32> -> vector<9x36xf32>
    %21 = arith.truncf %20 : vector<9x36xf32> to vector<9x36xbf16>
    %c0_12 = arith.constant 0 : index
    %c0_13 = arith.constant 0 : index
    %c0_14 = arith.constant 0 : index
    %22 = vector.load %arg5[%c0_12, %c0_13, %c0_14] : memref<1x9x36xbf16, #tpu.memory_space<vmem>>, vector<1x9x36xbf16>
    %23 = vector.shape_cast %22 : vector<1x9x36xbf16> to vector<9x36xbf16>
    %24 = vector.shape_cast %21 : vector<9x36xbf16> to vector<1x9x36xbf16>
    tpu.vector_store %arg5[%c0_12, %c0_13, %c0_14], %24 {strides = array<i32>} : memref<1x9x36xbf16, #tpu.memory_space<vmem>>, vector<1x9x36xbf16>,
    return
  }
  func.func @transform_0(%arg0: i32, %arg1: i32) -> (i32, i32, i32) {
    %c0_i32 = arith.constant 0 : i32
    %c0_i32_0 = arith.constant 0 : i32
    return %arg0, %arg1, %c0_i32 : i32, i32, i32
  }
  func.func @transform_1(%arg0: i32, %arg1: i32) -> (i32, i32, i32) {
    %c0_i32 = arith.constant 0 : i32
    %c0_i32_0 = arith.constant 0 : i32
    %c0_i32_1 = arith.constant 0 : i32
    return %arg0, %c0_i32, %c0_i32_0 : i32, i32, i32
  }
  func.func @transform_2(%arg0: i32, %arg1: i32) -> (i32, i32, i32) {
    %c0_i32 = arith.constant 0 : i32
    %c0_i32_0 = arith.constant 0 : i32
    %c0_i32_1 = arith.constant 0 : i32
    return %arg0, %c0_i32, %c0_i32_0 : i32, i32, i32
  }
  func.func @transform_3(%arg0: i32, %arg1: i32) -> (i32, i32, i32) {
    %c0_i32 = arith.constant 0 : i32
    %c0_i32_0 = arith.constant 0 : i32
    return %arg0, %arg1, %c0_i32 : i32, i32, i32
  }
}

module attributes {stable_mosaic.version = 11 : i64} {
  func.func @_ln_kernel(%arg0: i32, %arg1: i32, %arg2: memref<1x1x9x36xbf16, #tpu.memory_space<vmem>>, %arg3: memref<1x1x1xf32, #tpu.memory_space<vmem>>, %arg4: memref<1x1x36xf32, #tpu.memory_space<vmem>>, %arg5: memref<1x1x36xf32, #tpu.memory_space<vmem>>, %arg6: memref<1x1x9x36xbf16, #tpu.memory_space<vmem>>) attributes {dimension_semantics = [#tpu.dimension_semantics<parallel>, #tpu.dimension_semantics<parallel>], iteration_bounds = array<i64: 2, 2>, scalar_prefetch = 0 : i64, scratch_operands = 0 : i64, tpu.core_type = #tpu.core_type<tc>, window_params = [{transform_indices = @transform_0, window_bounds = array<i64: 1, 1, 9, 36>}, {transform_indices = @transform_1, window_bounds = array<i64: 1, 1, 1>}, {transform_indices = @transform_2, window_bounds = array<i64: 1, 1, 36>}, {transform_indices = @transform_3, window_bounds = array<i64: 1, 1, 36>}, {transform_indices = @transform_4, window_bounds = array<i64: 1, 1, 9, 36>}]} {
    %c0 = arith.constant 0 : index
    %c0_0 = arith.constant 0 : index
    %c0_1 = arith.constant 0 : index
    %c0_2 = arith.constant 0 : index
    %0 = vector.load %arg2[%c0, %c0_0, %c0_1, %c0_2] : memref<1x1x9x36xbf16, #tpu.memory_space<vmem>>, vector<1x1x9x36xbf16>
    %1 = arith.extf %0 : vector<1x1x9x36xbf16> to vector<1x1x9x36xf32>
    %c0_3 = arith.constant 0 : index
    %c0_4 = arith.constant 0 : index
    %c0_5 = arith.constant 0 : index
    %2 = vector.load %arg3[%c0_3, %c0_4, %c0_5] : memref<1x1x1xf32, #tpu.memory_space<vmem>>, vector<1x1x1xf32>
    %cst = arith.constant 0.000000e+00 : f32
    %3 = vector.broadcast %cst : f32 to vector<1x1x9x36xf32>
    %4 = arith.cmpf oge, %1, %3 : vector<1x1x9x36xf32>
    %5 = vector.shape_cast %2 : vector<1x1x1xf32> to vector<1x1x1x1xf32>
    %6 = vector.broadcast %5 : vector<1x1x1x1xf32> to vector<1x1x9x36xf32>
    %7 = arith.mulf %6, %1 : vector<1x1x9x36xf32>
    %8 = arith.select %4, %1, %7 : vector<1x1x9x36xi1>, vector<1x1x9x36xf32>
    %cst_6 = arith.constant dense<0.000000e+00> : vector<1x1x9xf32>
    %9 = vector.multi_reduction <add>, %8, %cst_6 [3] : vector<1x1x9x36xf32> to vector<1x1x9xf32>
    %10 = vector.shape_cast %9 : vector<1x1x9xf32> to vector<1x1x9x1xf32>
    %cst_7 = arith.constant 3.600000e+01 : f32
    %11 = vector.broadcast %cst_7 : f32 to vector<1x1x9x1xf32>
    %12 = arith.divf %10, %11 : vector<1x1x9x1xf32>
    %13 = vector.broadcast %12 : vector<1x1x9x1xf32> to vector<1x1x9x36xf32>
    %14 = arith.subf %8, %13 : vector<1x1x9x36xf32>
    %15 = arith.mulf %14, %14 : vector<1x1x9x36xf32>
    %cst_8 = arith.constant dense<0.000000e+00> : vector<1x1x9xf32>
    %16 = vector.multi_reduction <add>, %15, %cst_8 [3] : vector<1x1x9x36xf32> to vector<1x1x9xf32>
    %17 = vector.shape_cast %16 : vector<1x1x9xf32> to vector<1x1x9x1xf32>
    %cst_9 = arith.constant 3.600000e+01 : f32
    %18 = vector.broadcast %cst_9 : f32 to vector<1x1x9x1xf32>
    %19 = arith.divf %17, %18 : vector<1x1x9x1xf32>
    %20 = vector.broadcast %12 : vector<1x1x9x1xf32> to vector<1x1x9x36xf32>
    %21 = arith.subf %8, %20 : vector<1x1x9x36xf32>
    %cst_10 = arith.constant 9.99999974E-6 : f32
    %22 = vector.broadcast %cst_10 : f32 to vector<1x1x9x1xf32>
    %23 = arith.addf %19, %22 : vector<1x1x9x1xf32>
    %24 = math.rsqrt %23 : vector<1x1x9x1xf32>
    %25 = vector.broadcast %24 : vector<1x1x9x1xf32> to vector<1x1x9x36xf32>
    %26 = arith.mulf %21, %25 : vector<1x1x9x36xf32>
    %c0_11 = arith.constant 0 : index
    %c0_12 = arith.constant 0 : index
    %c0_13 = arith.constant 0 : index
    %27 = vector.load %arg4[%c0_11, %c0_12, %c0_13] : memref<1x1x36xf32, #tpu.memory_space<vmem>>, vector<1x1x36xf32>
    %28 = vector.shape_cast %27 : vector<1x1x36xf32> to vector<1x1x1x36xf32>
    %29 = vector.broadcast %28 : vector<1x1x1x36xf32> to vector<1x1x9x36xf32>
    %30 = arith.mulf %26, %29 : vector<1x1x9x36xf32>
    %c0_14 = arith.constant 0 : index
    %c0_15 = arith.constant 0 : index
    %c0_16 = arith.constant 0 : index
    %31 = vector.load %arg5[%c0_14, %c0_15, %c0_16] : memref<1x1x36xf32, #tpu.memory_space<vmem>>, vector<1x1x36xf32>
    %32 = vector.shape_cast %31 : vector<1x1x36xf32> to vector<1x1x1x36xf32>
    %33 = vector.broadcast %32 : vector<1x1x1x36xf32> to vector<1x1x9x36xf32>
    %34 = arith.addf %30, %33 : vector<1x1x9x36xf32>
    %35 = arith.truncf %34 : vector<1x1x9x36xf32> to vector<1x1x9x36xbf16>
    %c0_17 = arith.constant 0 : index
    %c0_18 = arith.constant 0 : index
    %c0_19 = arith.constant 0 : index
    %c0_20 = arith.constant 0 : index
    %36 = vector.load %arg6[%c0_17, %c0_18, %c0_19, %c0_20] : memref<1x1x9x36xbf16, #tpu.memory_space<vmem>>, vector<1x1x9x36xbf16>
    tpu.vector_store %arg6[%c0_17, %c0_18, %c0_19, %c0_20], %35 {strides = array<i32>} : memref<1x1x9x36xbf16, #tpu.memory_space<vmem>>, vector<1x1x9x36xbf16>,
    return
  }
  func.func @transform_0(%arg0: i32, %arg1: i32) -> (i32, i32, i32, i32) {
    %c0_i32 = arith.constant 0 : i32
    %c0_i32_0 = arith.constant 0 : i32
    %c0_i32_1 = arith.constant 0 : i32
    return %arg0, %arg1, %c0_i32, %c0_i32_0 : i32, i32, i32, i32
  }
  func.func @transform_1(%arg0: i32, %arg1: i32) -> (i32, i32, i32) {
    %c0_i32 = arith.constant 0 : i32
    %c0_i32_0 = arith.constant 0 : i32
    %c0_i32_1 = arith.constant 0 : i32
    return %arg1, %c0_i32, %c0_i32_0 : i32, i32, i32
  }
  func.func @transform_2(%arg0: i32, %arg1: i32) -> (i32, i32, i32) {
    %c0_i32 = arith.constant 0 : i32
    %c0_i32_0 = arith.constant 0 : i32
    %c0_i32_1 = arith.constant 0 : i32
    return %arg1, %c0_i32, %c0_i32_0 : i32, i32, i32
  }
  func.func @transform_3(%arg0: i32, %arg1: i32) -> (i32, i32, i32) {
    %c0_i32 = arith.constant 0 : i32
    %c0_i32_0 = arith.constant 0 : i32
    %c0_i32_1 = arith.constant 0 : i32
    return %arg1, %c0_i32, %c0_i32_0 : i32, i32, i32
  }
  func.func @transform_4(%arg0: i32, %arg1: i32) -> (i32, i32, i32, i32) {
    %c0_i32 = arith.constant 0 : i32
    %c0_i32_0 = arith.constant 0 : i32
    %c0_i32_1 = arith.constant 0 : i32
    return %arg0, %arg1, %c0_i32, %c0_i32_0 : i32, i32, i32, i32
  }
}

module attributes {stable_mosaic.version = 11 : i64} {
  func.func @_matmul_kernel(%arg0: i32, %arg1: memref<162x8xbf16, #tpu.memory_space<vmem>>, %arg2: memref<8x8xbf16, #tpu.memory_space<vmem>>, %arg3: memref<1x8xf32, #tpu.memory_space<vmem>>, %arg4: memref<162x8xbf16, #tpu.memory_space<vmem>>) attributes {dimension_semantics = [#tpu.dimension_semantics<parallel>], iteration_bounds = array<i64: 1>, scalar_prefetch = 0 : i64, scratch_operands = 0 : i64, tpu.core_type = #tpu.core_type<tc>, window_params = [{transform_indices = @transform_0, window_bounds = array<i64: 162, 8>}, {pipeline_mode = #tpu.pipeline_mode<synchronous>, transform_indices = @transform_1, window_bounds = array<i64: 8, 8>}, {pipeline_mode = #tpu.pipeline_mode<synchronous>, transform_indices = @transform_2, window_bounds = array<i64: 1, 8>}, {transform_indices = @transform_3, window_bounds = array<i64: 162, 8>}]} {
    %c0 = arith.constant 0 : index
    %c0_0 = arith.constant 0 : index
    %0 = vector.load %arg1[%c0, %c0_0] : memref<162x8xbf16, #tpu.memory_space<vmem>>, vector<162x8xbf16>
    %c0_1 = arith.constant 0 : index
    %c0_2 = arith.constant 0 : index
    %1 = vector.load %arg2[%c0_1, %c0_2] : memref<8x8xbf16, #tpu.memory_space<vmem>>, vector<8x8xbf16>
    %cst = arith.constant dense<0.000000e+00> : vector<162x8xf32>
    %2 = tpu.matmul %0, %1, %cst {dimension_numbers = #tpu.dot_dimension_numbers<[1], [0], [0], [1], [0, 0, 1, 1], [], []>} : vector<162x8xbf16>, vector<8x8xbf16>, vector<162x8xf32> -> vector<162x8xf32>
    %c0_3 = arith.constant 0 : index
    %c0_4 = arith.constant 0 : index
    %3 = vector.load %arg3[%c0_3, %c0_4] : memref<1x8xf32, #tpu.memory_space<vmem>>, vector<1x8xf32>
    %4 = vector.broadcast %3 : vector<1x8xf32> to vector<162x8xf32>
    %5 = arith.addf %2, %4 : vector<162x8xf32>
    %6 = arith.truncf %5 : vector<162x8xf32> to vector<162x8xbf16>
    %c0_5 = arith.constant 0 : index
    %c0_6 = arith.constant 0 : index
    %7 = vector.load %arg4[%c0_5, %c0_6] : memref<162x8xbf16, #tpu.memory_space<vmem>>, vector<162x8xbf16>
    tpu.vector_store %arg4[%c0_5, %c0_6], %6 {strides = array<i32>} : memref<162x8xbf16, #tpu.memory_space<vmem>>, vector<162x8xbf16>,
    return
  }
  func.func @transform_0(%arg0: i32) -> (i32, i32) {
    %c0_i32 = arith.constant 0 : i32
    %c0_i32_0 = arith.constant 0 : i32
    return %arg0, %c0_i32 : i32, i32
  }
  func.func @transform_1(%arg0: i32) -> (i32, i32) {
    %c0_i32 = arith.constant 0 : i32
    %c0_i32_0 = arith.constant 0 : i32
    %c0_i32_1 = arith.constant 0 : i32
    return %c0_i32, %c0_i32_0 : i32, i32
  }
  func.func @transform_2(%arg0: i32) -> (i32, i32) {
    %c0_i32 = arith.constant 0 : i32
    %c0_i32_0 = arith.constant 0 : i32
    %c0_i32_1 = arith.constant 0 : i32
    return %c0_i32, %c0_i32_0 : i32, i32
  }
  func.func @transform_3(%arg0: i32) -> (i32, i32) {
    %c0_i32 = arith.constant 0 : i32
    %c0_i32_0 = arith.constant 0 : i32
    return %arg0, %c0_i32 : i32, i32
  }
}

module attributes {stable_mosaic.version = 11 : i64} {
  func.func @_ln_res_kernel(%arg0: i32, %arg1: memref<18x72xbf16, #tpu.memory_space<vmem>>, %arg2: memref<1x1xf32, #tpu.memory_space<vmem>>, %arg3: memref<1x72xf32, #tpu.memory_space<vmem>>, %arg4: memref<1x72xf32, #tpu.memory_space<vmem>>, %arg5: memref<18x72xf32, #tpu.memory_space<vmem>>, %arg6: memref<18x72xf32, #tpu.memory_space<vmem>>) attributes {dimension_semantics = [#tpu.dimension_semantics<parallel>], iteration_bounds = array<i64: 1>, scalar_prefetch = 0 : i64, scratch_operands = 0 : i64, tpu.core_type = #tpu.core_type<tc>, window_params = [{transform_indices = @transform_0, window_bounds = array<i64: 18, 72>}, {pipeline_mode = #tpu.pipeline_mode<synchronous>, transform_indices = @transform_1, window_bounds = array<i64: 1, 1>}, {pipeline_mode = #tpu.pipeline_mode<synchronous>, transform_indices = @transform_2, window_bounds = array<i64: 1, 72>}, {pipeline_mode = #tpu.pipeline_mode<synchronous>, transform_indices = @transform_3, window_bounds = array<i64: 1, 72>}, {transform_indices = @transform_4, window_bounds = array<i64: 18, 72>}, {transform_indices = @transform_5, window_bounds = array<i64: 18, 72>}]} {
    %c0 = arith.constant 0 : index
    %c0_0 = arith.constant 0 : index
    %0 = vector.load %arg1[%c0, %c0_0] : memref<18x72xbf16, #tpu.memory_space<vmem>>, vector<18x72xbf16>
    %1 = arith.extf %0 : vector<18x72xbf16> to vector<18x72xf32>
    %c0_1 = arith.constant 0 : index
    %c0_2 = arith.constant 0 : index
    %2 = vector.load %arg2[%c0_1, %c0_2] : memref<1x1xf32, #tpu.memory_space<vmem>>, vector<1x1xf32>
    %cst = arith.constant 0.000000e+00 : f32
    %3 = vector.broadcast %cst : f32 to vector<18x72xf32>
    %4 = arith.cmpf oge, %1, %3 : vector<18x72xf32>
    %5 = vector.broadcast %2 : vector<1x1xf32> to vector<18x72xf32>
    %6 = arith.mulf %5, %1 : vector<18x72xf32>
    %7 = arith.select %4, %1, %6 : vector<18x72xi1>, vector<18x72xf32>
    %cst_3 = arith.constant dense<0.000000e+00> : vector<18xf32>
    %8 = vector.multi_reduction <add>, %7, %cst_3 [1] : vector<18x72xf32> to vector<18xf32>
    %9 = vector.shape_cast %8 : vector<18xf32> to vector<18x1xf32>
    %cst_4 = arith.constant 7.200000e+01 : f32
    %10 = vector.broadcast %cst_4 : f32 to vector<18x1xf32>
    %11 = arith.divf %9, %10 : vector<18x1xf32>
    %12 = vector.broadcast %11 : vector<18x1xf32> to vector<18x72xf32>
    %13 = arith.subf %7, %12 : vector<18x72xf32>
    %14 = arith.mulf %13, %13 : vector<18x72xf32>
    %cst_5 = arith.constant dense<0.000000e+00> : vector<18xf32>
    %15 = vector.multi_reduction <add>, %14, %cst_5 [1] : vector<18x72xf32> to vector<18xf32>
    %16 = vector.shape_cast %15 : vector<18xf32> to vector<18x1xf32>
    %cst_6 = arith.constant 7.200000e+01 : f32
    %17 = vector.broadcast %cst_6 : f32 to vector<18x1xf32>
    %18 = arith.divf %16, %17 : vector<18x1xf32>
    %19 = vector.broadcast %11 : vector<18x1xf32> to vector<18x72xf32>
    %20 = arith.subf %7, %19 : vector<18x72xf32>
    %cst_7 = arith.constant 9.99999974E-6 : f32
    %21 = vector.broadcast %cst_7 : f32 to vector<18x1xf32>
    %22 = arith.addf %18, %21 : vector<18x1xf32>
    %23 = math.rsqrt %22 : vector<18x1xf32>
    %24 = vector.broadcast %23 : vector<18x1xf32> to vector<18x72xf32>
    %25 = arith.mulf %20, %24 : vector<18x72xf32>
    %c0_8 = arith.constant 0 : index
    %c0_9 = arith.constant 0 : index
    %26 = vector.load %arg3[%c0_8, %c0_9] : memref<1x72xf32, #tpu.memory_space<vmem>>, vector<1x72xf32>
    %27 = vector.broadcast %26 : vector<1x72xf32> to vector<18x72xf32>
    %28 = arith.mulf %25, %27 : vector<18x72xf32>
    %c0_10 = arith.constant 0 : index
    %c0_11 = arith.constant 0 : index
    %29 = vector.load %arg4[%c0_10, %c0_11] : memref<1x72xf32, #tpu.memory_space<vmem>>, vector<1x72xf32>
    %30 = vector.broadcast %29 : vector<1x72xf32> to vector<18x72xf32>
    %31 = arith.addf %28, %30 : vector<18x72xf32>
    %c0_12 = arith.constant 0 : index
    %c0_13 = arith.constant 0 : index
    %32 = vector.load %arg5[%c0_12, %c0_13] : memref<18x72xf32, #tpu.memory_space<vmem>>, vector<18x72xf32>
    %33 = arith.addf %31, %32 : vector<18x72xf32>
    %c0_14 = arith.constant 0 : index
    %c0_15 = arith.constant 0 : index
    %34 = vector.load %arg6[%c0_14, %c0_15] : memref<18x72xf32, #tpu.memory_space<vmem>>, vector<18x72xf32>
    tpu.vector_store %arg6[%c0_14, %c0_15], %33 {strides = array<i32>} : memref<18x72xf32, #tpu.memory_space<vmem>>, vector<18x72xf32>,
    return
  }
  func.func @transform_0(%arg0: i32) -> (i32, i32) {
    %c0_i32 = arith.constant 0 : i32
    %c0_i32_0 = arith.constant 0 : i32
    return %arg0, %c0_i32 : i32, i32
  }
  func.func @transform_1(%arg0: i32) -> (i32, i32) {
    %c0_i32 = arith.constant 0 : i32
    %c0_i32_0 = arith.constant 0 : i32
    %c0_i32_1 = arith.constant 0 : i32
    return %c0_i32, %c0_i32_0 : i32, i32
  }
  func.func @transform_2(%arg0: i32) -> (i32, i32) {
    %c0_i32 = arith.constant 0 : i32
    %c0_i32_0 = arith.constant 0 : i32
    %c0_i32_1 = arith.constant 0 : i32
    return %c0_i32, %c0_i32_0 : i32, i32
  }
  func.func @transform_3(%arg0: i32) -> (i32, i32) {
    %c0_i32 = arith.constant 0 : i32
    %c0_i32_0 = arith.constant 0 : i32
    %c0_i32_1 = arith.constant 0 : i32
    return %c0_i32, %c0_i32_0 : i32, i32
  }
  func.func @transform_4(%arg0: i32) -> (i32, i32) {
    %c0_i32 = arith.constant 0 : i32
    %c0_i32_0 = arith.constant 0 : i32
    return %arg0, %c0_i32 : i32, i32
  }
  func.func @transform_5(%arg0: i32) -> (i32, i32) {
    %c0_i32 = arith.constant 0 : i32
    %c0_i32_0 = arith.constant 0 : i32
    return %arg0, %c0_i32 : i32, i32
  }
}

module attributes {stable_mosaic.version = 11 : i64} {
  func.func @_matmul_kernel(%arg0: i32, %arg1: memref<162x72xf32, #tpu.memory_space<vmem>>, %arg2: memref<72x4xbf16, #tpu.memory_space<vmem>>, %arg3: memref<1x4xf32, #tpu.memory_space<vmem>>, %arg4: memref<162x4xf32, #tpu.memory_space<vmem>>) attributes {dimension_semantics = [#tpu.dimension_semantics<parallel>], iteration_bounds = array<i64: 1>, scalar_prefetch = 0 : i64, scratch_operands = 0 : i64, tpu.core_type = #tpu.core_type<tc>, window_params = [{transform_indices = @transform_0, window_bounds = array<i64: 162, 72>}, {pipeline_mode = #tpu.pipeline_mode<synchronous>, transform_indices = @transform_1, window_bounds = array<i64: 72, 4>}, {pipeline_mode = #tpu.pipeline_mode<synchronous>, transform_indices = @transform_2, window_bounds = array<i64: 1, 4>}, {transform_indices = @transform_3, window_bounds = array<i64: 162, 4>}]} {
    %c0 = arith.constant 0 : index
    %c0_0 = arith.constant 0 : index
    %0 = vector.load %arg1[%c0, %c0_0] : memref<162x72xf32, #tpu.memory_space<vmem>>, vector<162x72xf32>
    %1 = arith.truncf %0 : vector<162x72xf32> to vector<162x72xbf16>
    %c0_1 = arith.constant 0 : index
    %c0_2 = arith.constant 0 : index
    %2 = vector.load %arg2[%c0_1, %c0_2] : memref<72x4xbf16, #tpu.memory_space<vmem>>, vector<72x4xbf16>
    %cst = arith.constant dense<0.000000e+00> : vector<162x4xf32>
    %3 = tpu.matmul %1, %2, %cst {dimension_numbers = #tpu.dot_dimension_numbers<[1], [0], [0], [1], [0, 0, 1, 1], [], []>} : vector<162x72xbf16>, vector<72x4xbf16>, vector<162x4xf32> -> vector<162x4xf32>
    %c0_3 = arith.constant 0 : index
    %c0_4 = arith.constant 0 : index
    %4 = vector.load %arg3[%c0_3, %c0_4] : memref<1x4xf32, #tpu.memory_space<vmem>>, vector<1x4xf32>
    %5 = vector.broadcast %4 : vector<1x4xf32> to vector<162x4xf32>
    %6 = arith.addf %3, %5 : vector<162x4xf32>
    %c0_5 = arith.constant 0 : index
    %c0_6 = arith.constant 0 : index
    %7 = vector.load %arg4[%c0_5, %c0_6] : memref<162x4xf32, #tpu.memory_space<vmem>>, vector<162x4xf32>
    tpu.vector_store %arg4[%c0_5, %c0_6], %6 {strides = array<i32>} : memref<162x4xf32, #tpu.memory_space<vmem>>, vector<162x4xf32>,
    return
  }
  func.func @transform_0(%arg0: i32) -> (i32, i32) {
    %c0_i32 = arith.constant 0 : i32
    %c0_i32_0 = arith.constant 0 : i32
    return %arg0, %c0_i32 : i32, i32
  }
  func.func @transform_1(%arg0: i32) -> (i32, i32) {
    %c0_i32 = arith.constant 0 : i32
    %c0_i32_0 = arith.constant 0 : i32
    %c0_i32_1 = arith.constant 0 : i32
    return %c0_i32, %c0_i32_0 : i32, i32
  }
  func.func @transform_2(%arg0: i32) -> (i32, i32) {
    %c0_i32 = arith.constant 0 : i32
    %c0_i32_0 = arith.constant 0 : i32
    %c0_i32_1 = arith.constant 0 : i32
    return %c0_i32, %c0_i32_0 : i32, i32
  }
  func.func @transform_3(%arg0: i32) -> (i32, i32) {
    %c0_i32 = arith.constant 0 : i32
    %c0_i32_0 = arith.constant 0 : i32
    return %arg0, %c0_i32 : i32, i32
  }
}

module attributes {stable_mosaic.version = 11 : i64} {
  func.func @_matmul_kernel(%arg0: i32, %arg1: memref<36x18xf32, #tpu.memory_space<vmem>>, %arg2: memref<18x16xbf16, #tpu.memory_space<vmem>>, %arg3: memref<1x16xf32, #tpu.memory_space<vmem>>, %arg4: memref<36x16xf32, #tpu.memory_space<vmem>>) attributes {dimension_semantics = [#tpu.dimension_semantics<parallel>], iteration_bounds = array<i64: 1>, scalar_prefetch = 0 : i64, scratch_operands = 0 : i64, tpu.core_type = #tpu.core_type<tc>, window_params = [{transform_indices = @transform_0, window_bounds = array<i64: 36, 18>}, {pipeline_mode = #tpu.pipeline_mode<synchronous>, transform_indices = @transform_1, window_bounds = array<i64: 18, 16>}, {pipeline_mode = #tpu.pipeline_mode<synchronous>, transform_indices = @transform_2, window_bounds = array<i64: 1, 16>}, {transform_indices = @transform_3, window_bounds = array<i64: 36, 16>}]} {
    %c0 = arith.constant 0 : index
    %c0_0 = arith.constant 0 : index
    %0 = vector.load %arg1[%c0, %c0_0] : memref<36x18xf32, #tpu.memory_space<vmem>>, vector<36x18xf32>
    %1 = arith.truncf %0 : vector<36x18xf32> to vector<36x18xbf16>
    %c0_1 = arith.constant 0 : index
    %c0_2 = arith.constant 0 : index
    %2 = vector.load %arg2[%c0_1, %c0_2] : memref<18x16xbf16, #tpu.memory_space<vmem>>, vector<18x16xbf16>
    %cst = arith.constant dense<0.000000e+00> : vector<36x16xf32>
    %3 = tpu.matmul %1, %2, %cst {dimension_numbers = #tpu.dot_dimension_numbers<[1], [0], [0], [1], [0, 0, 1, 1], [], []>} : vector<36x18xbf16>, vector<18x16xbf16>, vector<36x16xf32> -> vector<36x16xf32>
    %c0_3 = arith.constant 0 : index
    %c0_4 = arith.constant 0 : index
    %4 = vector.load %arg3[%c0_3, %c0_4] : memref<1x16xf32, #tpu.memory_space<vmem>>, vector<1x16xf32>
    %5 = vector.broadcast %4 : vector<1x16xf32> to vector<36x16xf32>
    %6 = arith.addf %3, %5 : vector<36x16xf32>
    %c0_5 = arith.constant 0 : index
    %c0_6 = arith.constant 0 : index
    %7 = vector.load %arg4[%c0_5, %c0_6] : memref<36x16xf32, #tpu.memory_space<vmem>>, vector<36x16xf32>
    tpu.vector_store %arg4[%c0_5, %c0_6], %6 {strides = array<i32>} : memref<36x16xf32, #tpu.memory_space<vmem>>, vector<36x16xf32>,
    return
  }
  func.func @transform_0(%arg0: i32) -> (i32, i32) {
    %c0_i32 = arith.constant 0 : i32
    %c0_i32_0 = arith.constant 0 : i32
    return %arg0, %c0_i32 : i32, i32
  }
  func.func @transform_1(%arg0: i32) -> (i32, i32) {
    %c0_i32 = arith.constant 0 : i32
    %c0_i32_0 = arith.constant 0 : i32
    %c0_i32_1 = arith.constant 0 : i32
    return %c0_i32, %c0_i32_0 : i32, i32
  }
  func.func @transform_2(%arg0: i32) -> (i32, i32) {
    %c0_i32 = arith.constant 0 : i32
    %c0_i32_0 = arith.constant 0 : i32
    %c0_i32_1 = arith.constant 0 : i32
    return %c0_i32, %c0_i32_0 : i32, i32
  }
  func.func @transform_3(%arg0: i32) -> (i32, i32) {
    %c0_i32 = arith.constant 0 : i32
    %c0_i32_0 = arith.constant 0 : i32
    return %arg0, %c0_i32 : i32, i32
  }
}

</mosaic_0001>

<bundles_post_ra>
// kernel: _lambda_.31
= control target key start
LH: loop header
LB: loop body
LE: loop exit
PB: predicated region body
PF: predicated region fallthrough
CT: control target
= control target key end

     0   :  { %vm32_vm0 = vcmask 130048   ;;  %vm57_vm1 = vcmask 146432   ;;  %vm60_vm2 = vcmask 140288   ;;  %s119_s1 = inlined_call_operand.vmem [shape: bf16[16,18], index: 1, kind: input, shape index: {}]   ;;  %s120_s0 = inlined_call_operand.vmem [shape: f32[18,16], index: 0, kind: input, shape index: {}]   ;;  %s121_s2 = inlined_call_operand.vmem [shape: f32[1,18], index: 2, kind: input, shape index: {}]   ;;  %s122_s3 = inlined_call_operand.vmem [shape: f32[18,18], index: 3, kind: output, shape index: {}]  }
   0x1   :  { %v72_v0 = vld [vmem:[%s119_s1] sm:$0xff]  ;;  %v16_v2 = vld [vmem:[%s120_s0 + $0x8] sm:$0xff]  ;;  %v17_v4 = vld [vmem:[%s120_s0 + $0x10] sm:$0x3] }
   0x2   :  { %v15_v1 = vld [vmem:[%s120_s0] sm:$0xff]  ;;  %46 = vmatpush.bf16.msra.mxu0 %v72_v0  ;;  %73 = vmatpush.bf16.msra.mxu1 %v72_v0  ;;  %v19_v5 = vpack.c.bf16 %v17_v4, %v17_v4 }
   0x3   :  { %v18_v3 = vpack.c.bf16 %v16_v2, %v15_v1  ;;  %v74_v6 = vld [vmem:[%s121_s2] ss:$0 sm:$0xff] }
   0x5   :  { %70 = vmatmul.msk.bf16.vlgmr.msra.gmra.mxu0 %vm32_vm0, %v18_v3  ;;  %71 = vmatmul.msk.bf16.vlgmr.msra.gmra.mxu1 %vm32_vm0, %v19_v5 }
  0x82   :  { %v48_v7 = vpop.f32.mrf.mxu0  ;;  %v53_v8 = vpop.f32.mrf.mxu1 }
  0x83   :  { %v49_v9 = vadd.f32 %v74_v6, %v48_v7  ;;  %v54_v10 = vadd.f32 %v74_v6, %v53_v8 }
  0x85   :  { %58 = vst.msk [vmem:[%s122_s3] sm:$0xff] %vm57_vm1, %v49_v9 }
  0x86   :  { %61 = vst.msk [vmem:[%s122_s3 + $0x10] sm:$0x3] %vm60_vm2, %v54_v10 }
  0x8a   :  { %v50_v11 = vpop.f32.mrf.mxu0  ;;  %v55_v12 = vpop.f32.mrf.mxu1 }
  0x8b   :  { %v51_v13 = vadd.f32 %v74_v6, %v50_v11 }
  0x8d   :  { %59 = vst.msk [vmem:[%s122_s3 + $0x8] sm:$0xff] %vm57_vm1, %v51_v13 }

// kernel: _lambda_.33
= control target key start
LH: loop header
LB: loop body
LE: loop exit
PB: predicated region body
PF: predicated region fallthrough
CT: control target
= control target key end

     0   :  { %s468_s12 = smov 0   ;;  %s570_s0 = inlined_call_operand.vmem [shape: f32[2,81,8], index: 0, kind: input, shape index: {}]   ;;  %s571_s1 = inlined_call_operand.vmem [shape: f32[1,8], index: 1, kind: input, shape index: {}]   ;;  %s572_s2 = inlined_call_operand.vmem [shape: f32[1,8], index: 2, kind: input, shape index: {}]   ;;  %s573_s3 = inlined_call_operand.vmem [shape: f32[2,81,8], index: 3, kind: output, shape index: {}]  }
   0x1 LB: > { %s406_s13 = sadd.s32 4294967295, %s445_s12   ;;  %p410_p0 = scmp.ge.s32.totalorder %s445_s12, 1  ;;  %s445_s12 = sphi %s468_s12, %s13_s12  }
   0x2   : > { %p137_p1 = scmp.lt.s32.totalorder %s445_s12, 3 }
   0x4   : > { %p138_p2 = pnand %p410_p0, %p137_p1 }
   0x5   : > { %p161_p3 = scmp.lt.s32.totalorder (!%p138_p2), %s406_s13, 1 }
   0x6   : > { %141 = sbr.rel (%p138_p2) target bundleno = 513 (0x201), region = 32 }
   0xb   : > { %s575_s13 = smov (!%p161_p3, %s406_s13), 1  ;;  %vm182_vm0 = vcmask 64512   ;;  %vm202_vm1 = vcmask 57344   ;;  %v447_v32 = vmov 648.0  }
   0xc   : > { %s415_s14 = smul.u32 88, %s575_s13  ;;  %435 = vrcp.f32 %v447_v32 }
   0xe   : > { %s165_s17 = scalar_lea.vmem %s570_s0, %s415_s14  ;;  %s170_s4 = scalar_lea.vmem %s573_s3, %s415_s14 }
   0xf   : > { %v171_v0 = vld [vmem:[%s165_s17] sm:$0xff]  ;;  %v172_v1 = vld [vmem:[%s165_s17 + $0x8] sm:$0xff]  ;;  %v173_v2 = vld [vmem:[%s165_s17 + $0x10] sm:$0xff] }
  0x10   : > { %v174_v3 = vld [vmem:[%s165_s17 + $0x18] sm:$0xff]  ;;  %v183_v4 = vsel %vm182_vm0, %v171_v0, 0.0  ;;  %v184_v5 = vsel %vm182_vm0, %v172_v1, 0.0  ;;  %v186_v6 = vsel %vm182_vm0, %v173_v2, 0.0  ;;  %v175_v7 = vld [vmem:[%s165_s17 + $0x20] sm:$0xff]  ;;  %v176_v10 = vld [vmem:[%s165_s17 + $0x28] sm:$0xff] }
  0x11   : > { %v185_v8 = vadd.f32 %v184_v5, %v183_v4  ;;  %v188_v9 = vsel %vm182_vm0, %v174_v3, 0.0  ;;  %v190_v12 = vsel %vm182_vm0, %v175_v7, 0.0  ;;  %v177_v13 = vld [vmem:[%s165_s17 + $0x30] sm:$0xff]  ;;  %v192_v15 = vsel %vm182_vm0, %v176_v10, 0.0  ;;  %v178_v16 = vld [vmem:[%s165_s17 + $0x38] sm:$0xff]  ;;  %v179_v19 = vld [vmem:[%s165_s17 + $0x40] sm:$0xff] }
  0x12   : > { %v194_v18 = vsel %vm182_vm0, %v177_v13, 0.0  ;;  %v196_v21 = vsel %vm182_vm0, %v178_v16, 0.0  ;;  %v180_v22 = vld [vmem:[%s165_s17 + $0x48] sm:$0xff]  ;;  %v198_v24 = vsel %vm182_vm0, %v179_v19, 0.0  ;;  %v181_v25 = vld [vmem:[%s165_s17 + $0x50] sm:$0x1]  ;;  %v436_v33 = vpop.eup %435 }
  0x13   : > { %v187_v11 = vadd.f32 %v186_v6, %v185_v8  ;;  %v200_v27 = vsel %vm182_vm0, %v180_v22, 0.0  ;;  %v203_v29 = vsel %vm202_vm1, %v181_v25, 0.0  ;;  %v215_v34 = vmul.f32 648.0, %v436_v33 }
  0x14   : > { %vm219_vm2 = vweird.f32 %v436_v33 }
  0x15   : > { %v189_v14 = vadd.f32 %v188_v9, %v187_v11  ;;  %v216_v35 = vsub.f32 1.0, %v215_v34 }
  0x17   : > { %v191_v17 = vadd.f32 %v190_v12, %v189_v14  ;;  %v217_v39 = vmul.f32 %v436_v33, %v216_v35 }
  0x19   : > { %v193_v20 = vadd.f32 %v192_v15, %v191_v17  ;;  %v218_v42 = vadd.f32 %v436_v33, %v217_v39 }
  0x1b   : > { %v195_v23 = vadd.f32 %v194_v18, %v193_v20  ;;  %v220_v45 = vsel %vm219_vm2, %v436_v33, %v218_v42 }
  0x1d   : > { %v197_v26 = vadd.f32 %v196_v21, %v195_v23 }
  0x1f   : > { %v199_v28 = vadd.f32 %v198_v24, %v197_v26 }
  0x21   : > { %v201_v30 = vadd.f32 %v200_v27, %v199_v28 }
  0x23   : > { %v204_v31 = vadd.f32 %v203_v29, %v201_v30 }
  0x25   : > { %205 = vadd.xlane.f32.xlu0 %v204_v31 }
  0x98   : > { %v206_v36 = vpop.xlane.xlu0 %205 }
  0x99   : > { %v207_v37 = vrot.slane %v206_v36, 4 }
  0x9b   : > { %v208_v38 = vadd.f32 %v207_v37, %v206_v36 }
  0x9d   : > { %v209_v40 = vrot.slane %v208_v38, 2 }
  0x9f   : > { %v210_v41 = vadd.f32 %v209_v40, %v208_v38 }
  0xa1   : > { %v211_v43 = vrot.slane %v210_v41, 1 }
  0xa3   : > { %v212_v44 = vadd.f32 %v211_v43, %v210_v41  ;;  %v433_v41 = vld [vmem:[%s571_s1] ss:$0 sm:$0xff] }
  0xa5   : > { %416 = vpush %v212_v44 }
  0xa6   : > { %418 = vpush %v220_v45 }
  0xd6   : > { %s417_s18 = spop %416 }
  0xd7   : > { %s495_s19 = spop %418 }
  0xd8   : > { %s222_s20 = smul.f32 %s495_s19, %s417_s18 }
  0xda   : > { %v223_v46 = vstv %s222_s20 }
  0xdb   : > { %v498_v47 = vsub.f32 %v171_v0, %v223_v46  ;;  %v500_v48 = vsub.f32 %v172_v1, %v223_v46  ;;  %v502_v49 = vsub.f32 %v173_v2, %v223_v46  ;;  %v504_v50 = vsub.f32 %v174_v3, %v223_v46 }
  0xdc   : > { %v508_v52 = vsub.f32 %v175_v7, %v223_v46  ;;  %v514_v55 = vsub.f32 %v176_v10, %v223_v46  ;;  %v520_v60 = vsub.f32 %v177_v13, %v223_v46  ;;  %v231_v0 = vsub.f32 %v178_v16, %v223_v46 }
  0xdd   : > { %v235_v51 = vmul.f32 %v498_v47, %v498_v47  ;;  %v236_v53 = vmul.f32 %v500_v48, %v500_v48  ;;  %v237_v54 = vmul.f32 %v502_v49, %v502_v49  ;;  %v238_v56 = vmul.f32 %v504_v50, %v504_v50 }
  0xde   : > { %v239_v61 = vmul.f32 %v508_v52, %v508_v52  ;;  %v240_v1 = vmul.f32 %v514_v55, %v514_v55  ;;  %v232_v4 = vsub.f32 %v179_v19, %v223_v46  ;;  %v241_v5 = vmul.f32 %v520_v60, %v520_v60 }
  0xdf   : > { %v246_v57 = vsel %vm182_vm0, %v235_v51, 0.0  ;;  %v247_v58 = vsel %vm182_vm0, %v236_v53, 0.0  ;;  %v249_v62 = vsel %vm182_vm0, %v237_v54, 0.0  ;;  %v251_v2 = vsel %vm182_vm0, %v238_v56, 0.0  ;;  %v434_v56 = vld [vmem:[%s572_s2] ss:$0 sm:$0xff] }
  0xe0   : > { %v248_v59 = vadd.f32 %v247_v58, %v246_v57  ;;  %v253_v6 = vsel %vm182_vm0, %v239_v61, 0.0  ;;  %v233_v8 = vsub.f32 %v180_v22, %v223_v46  ;;  %v242_v9 = vmul.f32 %v231_v0, %v231_v0 }
  0xe1   : > { %v255_v10 = vsel %vm182_vm0, %v240_v1, 0.0  ;;  %v234_v12 = vsub.f32 %v181_v25, %v223_v46  ;;  %v243_v13 = vmul.f32 %v232_v4, %v232_v4  ;;  %v257_v14 = vsel %vm182_vm0, %v241_v5, 0.0 }
  0xe2   : > { %v250_v63 = vadd.f32 %v249_v62, %v248_v59  ;;  %v244_v16 = vmul.f32 %v233_v8, %v233_v8  ;;  %v259_v17 = vsel %vm182_vm0, %v242_v9, 0.0 }
  0xe3   : > { %v245_v19 = vmul.f32 %v234_v12, %v234_v12  ;;  %v261_v20 = vsel %vm182_vm0, %v243_v13, 0.0 }
  0xe4   : > { %v252_v3 = vadd.f32 %v251_v2, %v250_v63  ;;  %v263_v22 = vsel %vm182_vm0, %v244_v16, 0.0 }
  0xe5   : > { %v265_v24 = vsel %vm202_vm1, %v245_v19, 0.0 }
  0xe6   : > { %v254_v7 = vadd.f32 %v253_v6, %v252_v3 }
  0xe8   : > { %v256_v11 = vadd.f32 %v255_v10, %v254_v7 }
  0xea   : > { %v258_v15 = vadd.f32 %v257_v14, %v256_v11 }
  0xec   : > { %v260_v18 = vadd.f32 %v259_v17, %v258_v15 }
  0xee   : > { %v262_v21 = vadd.f32 %v261_v20, %v260_v18 }
  0xf0   : > { %v264_v23 = vadd.f32 %v263_v22, %v262_v21 }
  0xf2   : > { %v266_v26 = vadd.f32 %v265_v24, %v264_v23 }
  0xf4   : > { %267 = vadd.xlane.f32.xlu0 %v266_v26 }
 0x167   : > { %v268_v25 = vpop.xlane.xlu0 %267 }
 0x168   : > { %v269_v27 = vrot.slane %v268_v25, 4 }
 0x16a   : > { %v270_v28 = vadd.f32 %v269_v27, %v268_v25 }
 0x16c   : > { %v271_v29 = vrot.slane %v270_v28, 2 }
 0x16e   : > { %v272_v30 = vadd.f32 %v271_v29, %v270_v28 }
 0x170   : > { %v273_v31 = vrot.slane %v272_v30, 1 }
 0x172   : > { %v274_v32 = vadd.f32 %v273_v31, %v272_v30 }
 0x174   : > { %420 = vpush %v274_v32 }
 0x1a5   : > { %s421_s21 = spop %420 }
 0x1a6   : > { %s284_s22 = smul.f32 %s421_s21, %s495_s19 }
 0x1a8   : > { %s285_s23 = sadd.f32 1e-05, %s284_s22 }
 0x1aa   : > { %v286_v33 = vstv %s285_s23 }
 0x1ab   : > { %437 = vrsqrt.f32 %v286_v33  ;;  %vm293_vm4 = vweird.f32 %v286_v33 }
 0x1b1   : > { %v438_v34 = vpop.eup %437 }
 0x1b2   : > { %v288_v35 = vmul.f32 %v438_v34, %v286_v33  ;;  %vm294_vm3 = vweird.f32 %v438_v34 }
 0x1b3   : > { %vm295_vm5 = vmor %vm293_vm4, %vm294_vm3 }
 0x1b4   : > { %v289_v36 = vmul.f32 %v438_v34, %v288_v35 }
 0x1b6   : > { %v290_v37 = vmul.f32 0.5, %v289_v36 }
 0x1b8   : > { %v291_v38 = vsub.f32 1.5, %v290_v37 }
 0x1ba   : > { %v292_v39 = vmul.f32 %v438_v34, %v291_v38 }
 0x1bc   : > { %v296_v40 = vsel %vm295_vm5, %v438_v34, %v292_v39 }
 0x1bd   : > { %422 = vpush %v296_v40 }
 0x1ee   : > { %s423_s24 = spop %422 }
 0x1ef   : > { %v298_v42 = vstv %s423_s24 }
 0x1f0   : > { %v299_v43 = vmul.f32 %v298_v42, %v498_v47  ;;  %v300_v44 = vmul.f32 %v298_v42, %v500_v48  ;;  %v301_v45 = vmul.f32 %v298_v42, %v502_v49  ;;  %v302_v46 = vmul.f32 %v298_v42, %v504_v50 }
 0x1f1   : > { %v303_v51 = vmul.f32 %v298_v42, %v508_v52  ;;  %v304_v53 = vmul.f32 %v298_v42, %v514_v55  ;;  %v305_v54 = vmul.f32 %v298_v42, %v520_v60  ;;  %v306_v57 = vmul.f32 %v298_v42, %v231_v0 }
 0x1f2   : > { %v307_v58 = vmul.f32 %v298_v42, %v232_v4  ;;  %v314_v59 = vmul.f32 %v433_v41, %v299_v43  ;;  %v315_v47 = vmul.f32 %v433_v41, %v300_v44  ;;  %v316_v61 = vmul.f32 %v433_v41, %v301_v45 }
 0x1f3   : > { %v317_v48 = vmul.f32 %v433_v41, %v302_v46  ;;  %v318_v62 = vmul.f32 %v433_v41, %v303_v51  ;;  %v308_v49 = vmul.f32 %v298_v42, %v233_v8  ;;  %v319_v50 = vmul.f32 %v433_v41, %v304_v53 }
 0x1f4   : > { %v309_v52 = vmul.f32 %v298_v42, %v234_v12  ;;  %v320_v55 = vmul.f32 %v433_v41, %v305_v54  ;;  %v329_v60 = vadd.f32 %v434_v56, %v314_v59  ;;  %v330_v63 = vadd.f32 %v434_v56, %v315_v47 }
 0x1f5   : > { %v321_v1 = vmul.f32 %v433_v41, %v306_v57  ;;  %v331_v2 = vadd.f32 %v434_v56, %v316_v61  ;;  %v332_v0 = vadd.f32 %v434_v56, %v317_v48  ;;  %v322_v3 = vmul.f32 %v433_v41, %v307_v58 }
 0x1f6   : > { %v333_v4 = vadd.f32 %v434_v56, %v318_v62  ;;  %340 = vst.msk [vmem:[%s170_s4] sm:$0xff] %vm182_vm0, %v329_v60  ;;  %v323_v5 = vmul.f32 %v433_v41, %v308_v49  ;;  %v334_v6 = vadd.f32 %v434_v56, %v319_v50  ;;  %v324_v7 = vmul.f32 %v433_v41, %v309_v52 }
 0x1f7   : > { %341 = vst.msk [vmem:[%s170_s4 + $0x8] sm:$0xff] %vm182_vm0, %v330_v63  ;;  %v335_v9 = vadd.f32 %v434_v56, %v320_v55  ;;  %v336_v8 = vadd.f32 %v434_v56, %v321_v1  ;;  %v337_v10 = vadd.f32 %v434_v56, %v322_v3 }
 0x1f8   : > { %342 = vst.msk [vmem:[%s170_s4 + $0x10] sm:$0xff] %vm182_vm0, %v331_v2  ;;  %v338_v11 = vadd.f32 %v434_v56, %v323_v5  ;;  %v339_v12 = vadd.f32 %v434_v56, %v324_v7 }
 0x1f9   : > { %343 = vst.msk [vmem:[%s170_s4 + $0x18] sm:$0xff] %vm182_vm0, %v332_v0 }
 0x1fa   : > { %344 = vst.msk [vmem:[%s170_s4 + $0x20] sm:$0xff] %vm182_vm0, %v333_v4 }
 0x1fb   : > { %345 = vst.msk [vmem:[%s170_s4 + $0x28] sm:$0xff] %vm182_vm0, %v334_v6 }
 0x1fc   : > { %346 = vst.msk [vmem:[%s170_s4 + $0x30] sm:$0xff] %vm182_vm0, %v335_v9 }
 0x1fd   : > { %347 = vst.msk [vmem:[%s170_s4 + $0x38] sm:$0xff] %vm182_vm0, %v336_v8 }
 0x1fe   : > { %348 = vst.msk [vmem:[%s170_s4 + $0x40] sm:$0xff] %vm182_vm0, %v337_v10 }
 0x1ff   : > { %349 = vst.msk [vmem:[%s170_s4 + $0x48] sm:$0xff] %vm182_vm0, %v338_v11 }
 0x200   : > { %350 = vst.msk [vmem:[%s170_s4 + $0x50] sm:$0x1] %vm202_vm1, %v339_v12 }
 0x201 PF: > { %s13_s12 = sadd.s32 1, %s445_s12  }
 0x202   : > { %p10_p4 = scmp.ge.s32.totalorder %s13_s12, 4  }
 0x204   :  { %12 = sbr.rel (!%p10_p4) target bundleno = 1 (0x1), region = 62 }

// kernel: _lambda_.34
= control target key start
LH: loop header
LB: loop body
LE: loop exit
PB: predicated region body
PF: predicated region fallthrough
CT: control target
= control target key end

     0   :  { %vm42_vm0 = vcmask 64512   ;;  %vm103_vm1 = vcmask 58368   ;;  %v846_v42 = vmov 8.0   ;;  %vm612_vm3 = vcmask 1043456   ;;  %s1718_s0 = inlined_call_operand.vmem [shape: f32[162,8], index: 0, kind: input, shape index: {}]   ;;  %s1719_s1 = inlined_call_operand.vmem [shape: f32[1,8], index: 1, kind: input, shape index: {}]   ;;  %s1720_s2 = inlined_call_operand.vmem [shape: f32[1,8], index: 2, kind: input, shape index: {}]   ;;  %s1721_s4 = inlined_call_operand.vmem [shape: f32[1,128], index: 4, kind: input, shape index: {}]   ;;  %s1722_s3 = inlined_call_operand.vmem [shape: bf16[8,128], index: 3, kind: input, shape index: {}]   ;;  %s1723_s5 = inlined_call_operand.vmem [shape: bf16[162,128], index: 5, kind: output, shape index: {}]  }
   0x1   :  { %v880_v0 = vld [vmem:[%s1718_s0 + $0x60] sm:$0xff]  ;;  %v885_v1 = vld [vmem:[%s1718_s0 + $0x30] sm:$0xff]  ;;  %v901_v6 = vld [vmem:[%s1718_s0 + $0x68] sm:$0xff]  ;;  %802 = vrcp.f32 %v846_v42 }
   0x2   :  { %v890_v2 = vld [vmem:[%s1718_s0] sm:$0xff]  ;;  %v79_v3 = vsel %vm42_vm0, %v880_v0, 0.0  ;;  %v61_v4 = vsel %vm42_vm0, %v885_v1, 0.0  ;;  %v906_v7 = vld [vmem:[%s1718_s0 + $0x38] sm:$0xff]  ;;  %v911_v8 = vld [vmem:[%s1718_s0 + $0x8] sm:$0xff]  ;;  %v82_v9 = vsel %vm42_vm0, %v901_v6, 0.0 }
   0x3   :  { %v43_v5 = vsel %vm42_vm0, %v890_v2, 0.0  ;;  %80 = vadd.xlane.f32.xlu0 %v79_v3  ;;  %62 = vadd.xlane.f32.xlu2 %v61_v4  ;;  %v64_v10 = vsel %vm42_vm0, %v906_v7, 0.0  ;;  %v46_v11 = vsel %vm42_vm0, %v911_v8, 0.0  ;;  %v922_v12 = vld [vmem:[%s1718_s0 + $0x70] sm:$0xff]  ;;  %v932_v14 = vld [vmem:[%s1718_s0 + $0x78] sm:$0xff]  ;;  %v964_v24 = vld [vmem:[%s1718_s0 + $0x40] sm:$0xff] }
   0x4   :  { %44 = vadd.xlane.f32.xlu1 %v43_v5  ;;  %v927_v13 = vld [vmem:[%s1718_s0 + $0x90] sm:$0xff]  ;;  %v85_v15 = vsel %vm42_vm0, %v922_v12, 0.0  ;;  %v88_v17 = vsel %vm42_vm0, %v932_v14, 0.0  ;;  %v943_v18 = vld [vmem:[%s1718_s0 + $0x98] sm:$0xff]  ;;  %v969_v25 = vld [vmem:[%s1718_s0 + $0x80] sm:$0xff]  ;;  %v67_v27 = vsel %vm42_vm0, %v964_v24, 0.0 }
   0x5   :  { %v97_v16 = vsel %vm42_vm0, %v927_v13, 0.0  ;;  %v948_v19 = vld [vmem:[%s1718_s0 + $0x18] sm:$0xff]  ;;  %v953_v20 = vld [vmem:[%s1718_s0 + $0x10] sm:$0xff]  ;;  %v100_v21 = vsel %vm42_vm0, %v943_v18, 0.0  ;;  %v974_v26 = vld [vmem:[%s1718_s0 + $0x48] sm:$0xff]  ;;  %v91_v28 = vsel %vm42_vm0, %v969_v25, 0.0 }
   0x6   :  { %v52_v22 = vsel %vm42_vm0, %v948_v19, 0.0  ;;  %v49_v23 = vsel %vm42_vm0, %v953_v20, 0.0  ;;  %v70_v29 = vsel %vm42_vm0, %v974_v26, 0.0  ;;  %v985_v30 = vld [vmem:[%s1718_s0 + $0x88] sm:$0xff]  ;;  %v990_v31 = vld [vmem:[%s1718_s0 + $0x20] sm:$0xff]  ;;  %v1011_v37 = vld [vmem:[%s1718_s0 + $0x58] sm:$0xff] }
   0x7   :  { %v995_v32 = vld [vmem:[%s1718_s0 + $0xa0] sm:$0x3]  ;;  %v94_v33 = vsel %vm42_vm0, %v985_v30, 0.0  ;;  %v55_v34 = vsel %vm42_vm0, %v990_v31, 0.0  ;;  %v1006_v36 = vld [vmem:[%s1718_s0 + $0x28] sm:$0xff]  ;;  %v1016_v38 = vld [vmem:[%s1718_s0 + $0x50] sm:$0xff]  ;;  %v803_v43 = vpop.eup %802 }
   0x8   :  { %v104_v35 = vsel %vm103_vm1, %v995_v32, 0.0  ;;  %v58_v39 = vsel %vm42_vm0, %v1006_v36, 0.0  ;;  %v76_v40 = vsel %vm42_vm0, %v1011_v37, 0.0  ;;  %v73_v41 = vsel %vm42_vm0, %v1016_v38, 0.0 }
   0x9   :  { %v108_v44 = vmul.f32 8.0, %v803_v43  ;;  %vm112_vm2 = vweird.f32 %v803_v43 }
   0xb   :  { %83 = vadd.xlane.f32.xlu0 %v82_v9  ;;  %65 = vadd.xlane.f32.xlu2 %v64_v10  ;;  %v109_v45 = vsub.f32 1.0, %v108_v44 }
   0xc   :  { %47 = vadd.xlane.f32.xlu1 %v46_v11 }
   0xd   :  { %v110_v46 = vmul.f32 %v803_v43, %v109_v45 }
   0xf   :  { %v111_v47 = vadd.f32 %v803_v43, %v110_v46 }
  0x11   :  { %v1024_v48 = vsel %vm112_vm2, %v803_v43, %v111_v47 }
  0x13   :  { %86 = vadd.xlane.f32.xlu0 %v85_v15  ;;  %98 = vadd.xlane.f32.xlu2 %v97_v16 }
  0x14   :  { %89 = vadd.xlane.f32.xlu1 %v88_v17 }
  0x1b   :  { %101 = vadd.xlane.f32.xlu0 %v100_v21  ;;  %53 = vadd.xlane.f32.xlu2 %v52_v22 }
  0x1c   :  { %50 = vadd.xlane.f32.xlu1 %v49_v23 }
  0x23   :  { %68 = vadd.xlane.f32.xlu0 %v67_v27  ;;  %92 = vadd.xlane.f32.xlu2 %v91_v28 }
  0x24   :  { %71 = vadd.xlane.f32.xlu1 %v70_v29 }
  0x2b   :  { %95 = vadd.xlane.f32.xlu0 %v94_v33  ;;  %56 = vadd.xlane.f32.xlu2 %v55_v34 }
  0x2c   :  { %105 = vadd.xlane.f32.xlu1 %v104_v35 }
  0x33   :  { %59 = vadd.xlane.f32.xlu0 %v58_v39  ;;  %77 = vadd.xlane.f32.xlu2 %v76_v40 }
  0x34   :  { %74 = vadd.xlane.f32.xlu1 %v73_v41 }
  0x76   :  { %v81_v49 = vpop.xlane.xlu0 %80  ;;  %v63_v50 = vpop.xlane.xlu2 %62 }
  0x77   :  { %v126_v51 = vmul.f32 %v1024_v48, %v81_v49  ;;  %v45_v52 = vpop.xlane.xlu1 %44  ;;  %v120_v3 = vmul.f32 %v1024_v48, %v63_v50 }
  0x78   :  { %v114_v53 = vmul.f32 %v1024_v48, %v45_v52 }
  0x79   :  { %v1029_v54 = vsub.f32 %v880_v0, %v126_v51  ;;  %v1060_v16 = vsub.f32 %v885_v1, %v120_v3 }
  0x7a   :  { %v1032_v55 = vsub.f32 %v890_v2, %v114_v53 }
  0x7b   :  { %v168_v56 = vmul.f32 %v1029_v54, %v1029_v54  ;;  %v162_v33 = vmul.f32 %v1060_v16, %v1060_v16 }
  0x7c   :  { %v156_v57 = vmul.f32 %v1032_v55, %v1032_v55 }
  0x7d   :  { %v213_v58 = vsel %vm42_vm0, %v168_v56, 0.0  ;;  %v195_v40 = vsel %vm42_vm0, %v162_v33, 0.0 }
  0x7e   :  { %v84_v59 = vpop.xlane.xlu0 %83  ;;  %v66_v60 = vpop.xlane.xlu2 %65  ;;  %214 = vadd.xlane.f32.xlu0 %v213_v58  ;;  %v177_v61 = vsel %vm42_vm0, %v156_v57, 0.0 }
  0x7f   :  { %v127_v62 = vmul.f32 %v1024_v48, %v84_v59  ;;  %v121_v63 = vmul.f32 %v1024_v48, %v66_v60  ;;  %178 = vadd.xlane.f32.xlu2 %v177_v61  ;;  %v48_v0 = vpop.xlane.xlu1 %47 }
  0x80   :  { %v115_v2 = vmul.f32 %v1024_v48, %v48_v0 }
  0x81   :  { %v1045_v4 = vsub.f32 %v901_v6, %v127_v62  ;;  %v1048_v5 = vsub.f32 %v906_v7, %v121_v63 }
  0x82   :  { %v1051_v9 = vsub.f32 %v911_v8, %v115_v2 }
  0x83   :  { %v169_v10 = vmul.f32 %v1045_v4, %v1045_v4  ;;  %v163_v11 = vmul.f32 %v1048_v5, %v1048_v5 }
  0x84   :  { %v157_v15 = vmul.f32 %v1051_v9, %v1051_v9 }
  0x85   :  { %v216_v6 = vsel %vm42_vm0, %v169_v10, 0.0  ;;  %v198_v7 = vsel %vm42_vm0, %v163_v11, 0.0 }
  0x86   :  { %v87_v17 = vpop.xlane.xlu0 %86  ;;  %v99_v21 = vpop.xlane.xlu2 %98  ;;  %217 = vadd.xlane.f32.xlu1 %v216_v6  ;;  %v180_v8 = vsel %vm42_vm0, %v157_v15, 0.0 }
  0x87   :  { %v128_v22 = vmul.f32 %v1024_v48, %v87_v17  ;;  %v132_v23 = vmul.f32 %v1024_v48, %v99_v21  ;;  %199 = vadd.xlane.f32.xlu2 %v198_v7  ;;  %181 = vadd.xlane.f32.xlu0 %v180_v8  ;;  %v90_v27 = vpop.xlane.xlu1 %89 }
  0x88   :  { %v129_v28 = vmul.f32 %v1024_v48, %v90_v27 }
  0x89   :  { %v1069_v1 = vsub.f32 %v922_v12, %v128_v22  ;;  %v1072_v29 = vsub.f32 %v927_v13, %v132_v23 }
  0x8a   :  { %v1081_v39 = vsub.f32 %v932_v14, %v129_v28 }
  0x8b   :  { %v174_v34 = vmul.f32 %v1072_v29, %v1072_v29  ;;  %v170_v35 = vmul.f32 %v1069_v1, %v1069_v1 }
  0x8c   :  { %v171_v45 = vmul.f32 %v1081_v39, %v1081_v39 }
  0x8d   :  { %v231_v12 = vsel %vm42_vm0, %v174_v34, 0.0  ;;  %v219_v41 = vsel %vm42_vm0, %v170_v35, 0.0 }
  0x8e   :  { %v102_v13 = vpop.xlane.xlu0 %101  ;;  %v54_v42 = vpop.xlane.xlu2 %53  ;;  %196 = vadd.xlane.f32.xlu1 %v195_v40  ;;  %v222_v52 = vsel %vm42_vm0, %v171_v45, 0.0 }
  0x8f   :  { %v133_v43 = vmul.f32 %v1024_v48, %v102_v13  ;;  %v117_v44 = vmul.f32 %v1024_v48, %v54_v42  ;;  %232 = vadd.xlane.f32.xlu2 %v231_v12  ;;  %220 = vadd.xlane.f32.xlu0 %v219_v41  ;;  %v51_v14 = vpop.xlane.xlu1 %50 }
  0x90   :  { %v116_v46 = vmul.f32 %v1024_v48, %v51_v14 }
  0x91   :  { %v1092_v47 = vsub.f32 %v943_v18, %v133_v43  ;;  %v1095_v49 = vsub.f32 %v948_v19, %v117_v44 }
  0x92   :  { %v1103_v53 = vsub.f32 %v953_v20, %v116_v46 }
  0x93   :  { %v159_v50 = vmul.f32 %v1095_v49, %v1095_v49  ;;  %v175_v51 = vmul.f32 %v1092_v47, %v1092_v47 }
  0x94   :  { %v158_v60 = vmul.f32 %v1103_v53, %v1103_v53 }
  0x95   :  { %v186_v56 = vsel %vm42_vm0, %v159_v50, 0.0  ;;  %v234_v57 = vsel %vm42_vm0, %v175_v51, 0.0 }
  0x96   :  { %v69_v18 = vpop.xlane.xlu0 %68  ;;  %v93_v58 = vpop.xlane.xlu2 %92  ;;  %223 = vadd.xlane.f32.xlu1 %v222_v52  ;;  %v183_v3 = vsel %vm42_vm0, %v158_v60, 0.0 }
  0x97   :  { %v122_v19 = vmul.f32 %v1024_v48, %v69_v18  ;;  %v130_v59 = vmul.f32 %v1024_v48, %v93_v58  ;;  %187 = vadd.xlane.f32.xlu2 %v186_v56  ;;  %235 = vadd.xlane.f32.xlu0 %v234_v57  ;;  %v72_v61 = vpop.xlane.xlu1 %71 }
  0x98   :  { %v123_v20 = vmul.f32 %v1024_v48, %v72_v61 }
  0x99   :  { %v1113_v62 = vsub.f32 %v964_v24, %v122_v19  ;;  %v1116_v63 = vsub.f32 %v969_v25, %v130_v59 }
  0x9a   :  { %v1124_v10 = vsub.f32 %v974_v26, %v123_v20 }
  0x9b   :  { %v172_v0 = vmul.f32 %v1116_v63, %v1116_v63  ;;  %v164_v2 = vmul.f32 %v1113_v62, %v1113_v62 }
  0x9c   :  { %v165_v17 = vmul.f32 %v1124_v10, %v1124_v10 }
  0x9d   :  { %v225_v11 = vsel %vm42_vm0, %v172_v0, 0.0  ;;  %v201_v15 = vsel %vm42_vm0, %v164_v2, 0.0 }
  0x9e   :  { %v96_v24 = vpop.xlane.xlu0 %95  ;;  %v57_v6 = vpop.xlane.xlu2 %56  ;;  %184 = vadd.xlane.f32.xlu1 %v183_v3  ;;  %v204_v28 = vsel %vm42_vm0, %v165_v17, 0.0 }
  0x9f   :  { %v131_v25 = vmul.f32 %v1024_v48, %v96_v24  ;;  %v118_v7 = vmul.f32 %v1024_v48, %v57_v6  ;;  %226 = vadd.xlane.f32.xlu2 %v225_v11  ;;  %202 = vadd.xlane.f32.xlu0 %v201_v15  ;;  %v106_v21 = vpop.xlane.xlu1 %105  ;;  %v574_v11 = vld [vmem:[%s1722_s3] sm:$0xf] }
  0xa0   :  { %v134_v26 = vmul.f32 %v1024_v48, %v106_v21 }
  0xa1   :  { %v1134_v8 = vsub.f32 %v985_v30, %v131_v25  ;;  %v1137_v22 = vsub.f32 %v990_v31, %v118_v7 }
  0xa2   :  { %v1145_v33 = vsub.f32 %v995_v32, %v134_v26  ;;  %v614_v26 = vsel %vm612_vm3, %v574_v11, 0 }
  0xa3   :  { %v160_v23 = vmul.f32 %v1137_v22, %v1137_v22  ;;  %v173_v27 = vmul.f32 %v1134_v8, %v1134_v8  ;;  %623 = vmatpush.bf16.msra.mxu0 %v614_v26  ;;  %796 = vmatpush.bf16.msra.mxu2 %v614_v26 }
  0xa4   :  { %v176_v41 = vmul.f32 %v1145_v33, %v1145_v33  ;;  %795 = vmatpush.bf16.msra.mxu1 %v614_v26  ;;  %797 = vmatpush.bf16.msra.mxu3 %v614_v26 }
  0xa5   :  { %v189_v34 = vsel %vm42_vm0, %v160_v23, 0.0  ;;  %v228_v35 = vsel %vm42_vm0, %v173_v27, 0.0 }
  0xa6   :  { %v60_v30 = vpop.xlane.xlu0 %59  ;;  %v78_v40 = vpop.xlane.xlu2 %77  ;;  %205 = vadd.xlane.f32.xlu1 %v204_v28  ;;  %v237_v14 = vsel %vm103_vm1, %v176_v41, 0.0 }
  0xa7   :  { %v119_v31 = vmul.f32 %v1024_v48, %v60_v30  ;;  %v125_v12 = vmul.f32 %v1024_v48, %v78_v40  ;;  %190 = vadd.xlane.f32.xlu2 %v189_v34  ;;  %229 = vadd.xlane.f32.xlu0 %v228_v35  ;;  %v75_v13 = vpop.xlane.xlu1 %74 }
  0xa8   :  { %v124_v32 = vmul.f32 %v1024_v48, %v75_v13 }
  0xa9   :  { %v1155_v42 = vsub.f32 %v1006_v36, %v119_v31  ;;  %v1158_v43 = vsub.f32 %v1011_v37, %v125_v12 }
  0xaa   :  { %v1166_v46 = vsub.f32 %v1016_v38, %v124_v32 }
  0xab   :  { %v167_v44 = vmul.f32 %v1158_v43, %v1158_v43  ;;  %v161_v45 = vmul.f32 %v1155_v42, %v1155_v42 }
  0xac   :  { %v166_v36 = vmul.f32 %v1166_v46, %v1166_v46 }
  0xad   :  { %v210_v50 = vsel %vm42_vm0, %v167_v44, 0.0  ;;  %v192_v51 = vsel %vm42_vm0, %v161_v45, 0.0 }
  0xae   :  { %238 = vadd.xlane.f32.xlu1 %v237_v14  ;;  %v207_v37 = vsel %vm42_vm0, %v166_v36, 0.0 }
  0xaf   :  { %211 = vadd.xlane.f32.xlu2 %v210_v50  ;;  %193 = vadd.xlane.f32.xlu0 %v192_v51 }
  0xb6   :  { %208 = vadd.xlane.f32.xlu1 %v207_v37 }
  0xf1   :  { %v215_v52 = vpop.xlane.xlu0 %214 }
  0xf2   :  { %v252_v56 = vmul.f32 %v215_v52, %v1024_v48  ;;  %v179_v57 = vpop.xlane.xlu2 %178 }
  0xf3   :  { %v240_v38 = vmul.f32 %v179_v57, %v1024_v48 }
  0xf4   :  { %v1175_v18 = vadd.f32 1e-05, %v252_v56 }
  0xf5   :  { %v261_v58 = vadd.f32 1e-05, %v240_v38 }
  0xf6   :  { %804 = vrsqrt.f32 %v1175_v18  ;;  %vm408_vm8 = vweird.f32 %v1175_v18 }
  0xf7   :  { %806 = vrsqrt.f32 %v261_v58  ;;  %vm288_vm4 = vweird.f32 %v261_v58 }
  0xf9   :  { %v218_v19 = vpop.xlane.xlu1 %217 }
  0xfa   :  { %v200_v59 = vpop.xlane.xlu2 %199  ;;  %v182_v60 = vpop.xlane.xlu0 %181  ;;  %v253_v61 = vmul.f32 %v218_v19, %v1024_v48 }
  0xfb   :  { %v247_v20 = vmul.f32 %v200_v59, %v1024_v48  ;;  %v241_v0 = vmul.f32 %v182_v60, %v1024_v48 }
  0xfc   :  { %v1181_v2 = vpop.eup %804  ;;  %v1183_v3 = vadd.f32 1e-05, %v253_v61 }
  0xfd   :  { %v1188_v15 = vpop.eup %806  ;;  %v403_v24 = vmul.f32 %v1181_v2, %v1175_v18  ;;  %v1192_v6 = vadd.f32 1e-05, %v247_v20  ;;  %v1194_v25 = vadd.f32 1e-05, %v241_v0  ;;  %vm409_vm6 = vweird.f32 %v1181_v2 }
  0xfe   :  { %v283_v7 = vmul.f32 %v1188_v15, %v261_v58  ;;  %808 = vrsqrt.f32 %v1183_v3  ;;  %vm289_vm5 = vweird.f32 %v1188_v15  ;;  %vm1245_vm9 = vmor %vm408_vm8, %vm409_vm6  ;;  %vm418_vm10 = vweird.f32 %v1183_v3 }
  0xff   :  { %v404_v17 = vmul.f32 %v1181_v2, %v403_v24  ;;  %810 = vrsqrt.f32 %v1192_v6  ;;  %vm1232_vm7 = vmor %vm288_vm4, %vm289_vm5  ;;  %vm358_vm11 = vweird.f32 %v1192_v6  ;;  %vm298_vm12 = vweird.f32 %v1194_v25 }
 0x100   :  { %v284_v21 = vmul.f32 %v1188_v15, %v283_v7  ;;  %812 = vrsqrt.f32 %v1194_v25 }
 0x101   :  { %v197_v23 = vpop.xlane.xlu1 %196  ;;  %v405_v27 = vmul.f32 0.5, %v404_v17 }
 0x102   :  { %v285_v28 = vmul.f32 0.5, %v284_v21  ;;  %v233_v34 = vpop.xlane.xlu2 %232  ;;  %v221_v35 = vpop.xlane.xlu0 %220  ;;  %v246_v31 = vmul.f32 %v197_v23, %v1024_v48 }
 0x103   :  { %v258_v30 = vmul.f32 %v233_v34, %v1024_v48  ;;  %v254_v40 = vmul.f32 %v221_v35, %v1024_v48  ;;  %v406_v14 = vsub.f32 1.5, %v405_v27 }
 0x104   :  { %v1205_v12 = vpop.eup %808  ;;  %v286_v41 = vsub.f32 1.5, %v285_v28  ;;  %v1224_v56 = vadd.f32 1e-05, %v246_v31 }
 0x105   :  { %v1207_v13 = vpop.eup %810  ;;  %v413_v32 = vmul.f32 %v1205_v12, %v1183_v3  ;;  %v1211_v44 = vadd.f32 1e-05, %v258_v30  ;;  %v1218_v51 = vadd.f32 1e-05, %v254_v40  ;;  %v407_v60 = vmul.f32 %v1181_v2, %v406_v14  ;;  %v1263_v30 = vld [vmem:[%s1719_s1] ss:$0 sm:$0xff] }
 0x106   :  { %v1213_v45 = vpop.eup %812  ;;  %v353_v50 = vmul.f32 %v1207_v13, %v1192_v6  ;;  %v287_v36 = vmul.f32 %v1188_v15, %v286_v41  ;;  %vm419_vm14 = vweird.f32 %v1205_v12  ;;  %vm359_vm15 = vweird.f32 %v1207_v13 }
 0x107   :  { %v293_v37 = vmul.f32 %v1213_v45, %v1194_v25  ;;  %v414_v52 = vmul.f32 %v1205_v12, %v413_v32  ;;  %814 = vrsqrt.f32 %v1211_v44  ;;  %v411_v18 = vsel %vm1245_vm9, %v1181_v2, %v407_v60  ;;  %vm1303_vm3 = vmor %vm418_vm10, %vm419_vm14 }
 0x108   :  { %v354_v57 = vmul.f32 %v1207_v13, %v353_v50  ;;  %816 = vrsqrt.f32 %v1218_v51  ;;  %v291_v24 = vsel %vm1232_vm7, %v1188_v15, %v287_v36  ;;  %vm299_vm13 = vweird.f32 %v1213_v45  ;;  %vm1318_vm4 = vmor %vm358_vm11, %vm359_vm15 }
 0x109   :  { %v294_v38 = vmul.f32 %v1213_v45, %v293_v37  ;;  %v415_v19 = vmul.f32 0.5, %v414_v52  ;;  %v224_v59 = vpop.xlane.xlu1 %223  ;;  %818 = vrsqrt.f32 %v1224_v56  ;;  %v492_v35 = vmul.f32 %v291_v24, %v1032_v55  ;;  %vm1288_vm1 = vmor %vm298_vm12, %vm299_vm13 }
 0x10a   :  { %v355_v20 = vmul.f32 0.5, %v354_v57  ;;  %v188_v0 = vpop.xlane.xlu2 %187  ;;  %v236_v11 = vpop.xlane.xlu0 %235  ;;  %v255_v26 = vmul.f32 %v224_v59, %v1024_v48  ;;  %v504_v52 = vmul.f32 %v411_v18, %v1029_v54  ;;  %vm468_vm2 = vweird.f32 %v1211_v44 }
 0x10b   :  { %v295_v7 = vmul.f32 0.5, %v294_v38  ;;  %v243_v17 = vmul.f32 %v188_v0, %v1024_v48  ;;  %v416_v58 = vsub.f32 1.5, %v415_v19  ;;  %v259_v21 = vmul.f32 %v236_v11, %v1024_v48  ;;  %v1312_v11 = vld [vmem:[%s1720_s2] ss:$0 sm:$0xff] }
 0x10c   :  { %v356_v27 = vsub.f32 1.5, %v355_v20  ;;  %v1276_v32 = vadd.f32 1e-05, %v255_v26  ;;  %v517_v60 = vmul.f32 %v1263_v30, %v492_v35  ;;  %vm428_vm5 = vweird.f32 %v1218_v51 }
 0x10d   :  { %v296_v28 = vsub.f32 1.5, %v295_v7  ;;  %v1250_v15 = vadd.f32 1e-05, %v243_v17  ;;  %v1252_v34 = vpop.eup %814  ;;  %v1269_v41 = vadd.f32 1e-05, %v259_v21  ;;  %v417_v55 = vmul.f32 %v1205_v12, %v416_v58 }
 0x10e   :  { %v463_v31 = vmul.f32 %v1252_v34, %v1211_v44  ;;  %v1271_v2 = vpop.eup %816  ;;  %v357_v50 = vmul.f32 %v1207_v13, %v356_v27  ;;  %vm348_vm6 = vweird.f32 %v1224_v56  ;;  %vm469_vm7 = vweird.f32 %v1252_v34 }
 0x10f   :  { %v297_v40 = vmul.f32 %v1213_v45, %v296_v28  ;;  %820 = vrsqrt.f32 %v1250_v15  ;;  %v1278_v14 = vpop.eup %818  ;;  %v423_v37 = vmul.f32 %v1271_v2, %v1218_v51  ;;  %v542_v18 = vadd.f32 %v1312_v11, %v517_v60  ;;  %vm1375_vm11 = vmor %vm468_vm2, %vm469_vm7 }
 0x110   :  { %v464_v36 = vmul.f32 %v1252_v34, %v463_v31  ;;  %v343_v38 = vmul.f32 %v1278_v14, %v1224_v56  ;;  %822 = vrsqrt.f32 %v1269_v41  ;;  %v361_v17 = vsel %vm1318_vm4, %v1207_v13, %v357_v50 }
 0x111   :  { %v301_v61 = vsel %vm1288_vm1, %v1213_v45, %v297_v40  ;;  %v424_v20 = vmul.f32 %v1271_v2, %v423_v37  ;;  %v185_v0 = vpop.xlane.xlu1 %184  ;;  %v421_v45 = vsel %vm1303_vm3, %v1205_v12, %v417_v55  ;;  %824 = vrsqrt.f32 %v1276_v32 }
 0x112   :  { %v227_v19 = vpop.xlane.xlu2 %226  ;;  %v203_v59 = vpop.xlane.xlu0 %202  ;;  %v465_v25 = vmul.f32 0.5, %v464_v36  ;;  %v344_v24 = vmul.f32 %v1278_v14, %v343_v38  ;;  %v493_v12 = vmul.f32 %v301_v61, %v1051_v9  ;;  %v242_v28 = vmul.f32 %v185_v0, %v1024_v48 }
 0x113   :  { %v256_v7 = vmul.f32 %v227_v19, %v1024_v48  ;;  %v425_v6 = vmul.f32 0.5, %v424_v20  ;;  %v248_v21 = vmul.f32 %v203_v59, %v1024_v48  ;;  %v529_v35 = vmul.f32 %v1263_v30, %v504_v52 }
 0x114   :  { %v466_v58 = vsub.f32 1.5, %v465_v25  ;;  %v345_v23 = vmul.f32 0.5, %v344_v24  ;;  %v505_v40 = vmul.f32 %v421_v45, %v1045_v4  ;;  %v1352_v50 = vmul.f32 %v361_v17, %v1048_v5 }
 0x115   :  { %v1334_v26 = vpop.eup %820  ;;  %v1337_v27 = vadd.f32 1e-05, %v256_v7  ;;  %v1347_v9 = vadd.f32 1e-05, %v248_v21  ;;  %v426_v37 = vsub.f32 1.5, %v425_v6  ;;  %vm429_vm8 = vweird.f32 %v1271_v2 }
 0x116   :  { %v313_v13 = vmul.f32 %v1334_v26, %v1250_v15  ;;  %v346_v31 = vsub.f32 1.5, %v345_v23  ;;  %v1349_v55 = vpop.eup %822  ;;  %v1355_v36 = vmul.f32 %v1252_v34, %v466_v58  ;;  %vm318_vm9 = vweird.f32 %v1250_v15  ;;  %vm1411_vm2 = vmor %vm428_vm5, %vm429_vm8 }
 0x117   :  { %826 = vrsqrt.f32 %v1337_v27  ;;  %v1358_v38 = vpop.eup %824  ;;  %v473_v4 = vmul.f32 %v1349_v55, %v1269_v41  ;;  %v1364_v52 = vadd.f32 1e-05, %v242_v28  ;;  %v518_v5 = vmul.f32 %v1263_v30, %v493_v12 }
 0x118   :  { %v314_v57 = vmul.f32 %v1334_v26, %v313_v13  ;;  %v347_v19 = vmul.f32 %v1278_v14, %v346_v31  ;;  %vm349_vm10 = vweird.f32 %v1278_v14  ;;  %v433_v60 = vmul.f32 %v1358_v38, %v1276_v32 }
 0x119   :  { %v474_v54 = vmul.f32 %v1349_v55, %v473_v4  ;;  %vm478_vm12 = vweird.f32 %v1269_v41  ;;  %828 = vrsqrt.f32 %v1347_v9  ;;  %v530_v25 = vmul.f32 %v1263_v30, %v505_v40  ;;  %vm1394_vm14 = vmor %vm348_vm6, %vm349_vm10  ;;  %v206_v17 = vpop.xlane.xlu1 %205 }
 0x11a   :  { %v315_v59 = vmul.f32 0.5, %v314_v57  ;;  %v191_v20 = vpop.xlane.xlu2 %190  ;;  %v471_v0 = vsel %vm1375_vm11, %v1252_v34, %v1355_v36  ;;  %v427_v44 = vmul.f32 %v1271_v2, %v426_v37  ;;  %vm319_vm13 = vweird.f32 %v1334_v26  ;;  %v230_v12 = vpop.xlane.xlu0 %229 }
 0x11b   :  { %v434_v3 = vmul.f32 %v1358_v38, %v433_v60  ;;  %v475_v7 = vmul.f32 0.5, %v474_v54  ;;  %vm479_vm15 = vweird.f32 %v1349_v55  ;;  %vm438_vm1 = vweird.f32 %v1276_v32  ;;  %vm1450_vm5 = vmor %vm318_vm9, %vm319_vm13 }
 0x11c   :  { %830 = vrsqrt.f32 %v1364_v52  ;;  %v543_v34 = vadd.f32 %v1312_v11, %v518_v5  ;;  %v351_v58 = vsel %vm1394_vm14, %v1278_v14, %v347_v19  ;;  %v316_v6 = vsub.f32 1.5, %v315_v59  ;;  %vm1459_vm6 = vmor %vm478_vm12, %vm479_vm15 }
 0x11d   :  { %v1390_v45 = vpop.eup %826  ;;  %v435_v56 = vmul.f32 0.5, %v434_v3  ;;  %v476_v28 = vsub.f32 1.5, %v475_v7  ;;  %v554_v40 = vadd.f32 %v1312_v11, %v529_v35  ;;  %v555_v14 = vadd.f32 %v1312_v11, %v530_v25 }
 0x11e   :  { %v443_v21 = vmul.f32 %v1390_v45, %v1337_v27  ;;  %v563_v13 = vpack.c.bf16 %v543_v34, %v542_v18  ;;  %v431_v31 = vsel %vm1411_vm2, %v1271_v2, %v427_v44  ;;  %vm448_vm3 = vweird.f32 %v1337_v27 }
 0x11f   :  { %v436_v36 = vsub.f32 1.5, %v435_v56  ;;  %v244_v51 = vmul.f32 %v191_v20, %v1024_v48  ;;  %v1423_v57 = vpop.eup %828  ;;  %v498_v4 = vmul.f32 %v351_v58, %v1060_v16  ;;  %vm439_vm4 = vweird.f32 %v1358_v38 }
 0x120   :  { %v444_v37 = vmul.f32 %v1390_v45, %v443_v21  ;;  %725 = vmatmul.msk.bf16.vlgmr.msra.gmra.mxu0 %vm42_vm0, %v563_v13  ;;  %v569_v18 = vpack.c.bf16 %v555_v14, %v554_v40  ;;  %v257_v35 = vmul.f32 %v230_v12, %v1024_v48  ;;  %v317_v2 = vmul.f32 %v1334_v26, %v316_v6  ;;  %vm1478_vm9 = vmor %vm438_vm1, %vm439_vm4 }
 0x121   :  { %v477_v5 = vmul.f32 %v1349_v55, %v476_v28  ;;  %v363_v59 = vmul.f32 %v1423_v57, %v1347_v9  ;;  %v437_v61 = vmul.f32 %v1358_v38, %v436_v36  ;;  %v1437_v16 = vadd.f32 1e-05, %v244_v51  ;;  %v239_v32 = vpop.xlane.xlu1 %238 }
 0x122   :  { %v445_v19 = vmul.f32 0.5, %v444_v37  ;;  %v1433_v60 = vpop.eup %830  ;;  %731 = vmatmul.msk.bf16.vlgmr.msra.gmra.mxu2 %vm42_vm0, %v569_v18  ;;  %v1439_v54 = vadd.f32 1e-05, %v257_v35  ;;  %v249_v25 = vmul.f32 %v206_v17, %v1024_v48  ;;  %v1443_v20 = vmul.f32 %v471_v0, %v1072_v29  ;;  %v212_v15 = vpop.xlane.xlu2 %211 }
 0x123   :  { %v506_v44 = vmul.f32 %v431_v31, %v1069_v1  ;;  %v364_v7 = vmul.f32 %v1423_v57, %v363_v59  ;;  %vm449_vm7 = vweird.f32 %v1390_v45  ;;  %vm368_vm8 = vweird.f32 %v1347_v9  ;;  %v194_v28 = vpop.xlane.xlu0 %193 }
 0x124   :  { %v446_v24 = vsub.f32 1.5, %v445_v19  ;;  %v303_v1 = vmul.f32 %v1433_v60, %v1364_v52  ;;  %832 = vrsqrt.f32 %v1437_v16  ;;  %v321_v0 = vsel %vm1450_vm5, %v1334_v26, %v317_v2  ;;  %vm1512_vm12 = vmor %vm448_vm3, %vm449_vm7 }
 0x125   :  { %v481_v41 = vsel %vm1459_vm6, %v1349_v55, %v477_v5  ;;  %v365_v17 = vmul.f32 0.5, %v364_v7  ;;  %834 = vrsqrt.f32 %v1439_v54  ;;  %v441_v58 = vsel %vm1478_vm9, %v1358_v38, %v437_v61 }
 0x126   :  { %v304_v26 = vmul.f32 %v1433_v60, %v303_v1  ;;  %vm308_vm10 = vweird.f32 %v1364_v52  ;;  %v1488_v55 = vadd.f32 1e-05, %v249_v25  ;;  %v523_v6 = vmul.f32 %v1263_v30, %v498_v4 }
 0x127   :  { %v447_v56 = vmul.f32 %v1390_v45, %v446_v24  ;;  %v366_v21 = vsub.f32 1.5, %v365_v17  ;;  %v524_v12 = vmul.f32 %v1263_v30, %v1352_v50  ;;  %v251_v23 = vmul.f32 %v212_v15, %v1024_v48 }
 0x128   :  { %v1496_v38 = vmul.f32 %v321_v0, %v1095_v49  ;;  %vm369_vm11 = vweird.f32 %v1423_v57  ;;  %v305_v13 = vmul.f32 0.5, %v304_v26  ;;  %836 = vrsqrt.f32 %v1488_v55 }
 0x129   :  { %v511_v40 = vmul.f32 %v481_v41, %v1092_v47  ;;  %v548_v14 = vadd.f32 %v1312_v11, %v523_v6  ;;  %v549_v31 = vadd.f32 %v1312_v11, %v524_v12  ;;  %v1503_v36 = vadd.f32 1e-05, %v251_v23  ;;  %vm1546_vm15 = vmor %vm368_vm8, %vm369_vm11  ;;  %v209_v52 = vpop.xlane.xlu1 %208 }
 0x12a   :  { %v1505_v50 = vpop.eup %832  ;;  %v507_v37 = vmul.f32 %v441_v58, %v1081_v39  ;;  %v306_v51 = vsub.f32 1.5, %v305_v13  ;;  %v245_v47 = vmul.f32 %v194_v28, %v1024_v48  ;;  %v260_v4 = vmul.f32 %v239_v32, %v1024_v48 }
 0x12b   :  { %v1518_v18 = vpop.eup %834  ;;  %v451_v35 = vsel %vm1512_vm12, %v1390_v45, %v447_v56  ;;  %v367_v39 = vmul.f32 %v1423_v57, %v366_v21  ;;  %v323_v27 = vmul.f32 %v1505_v50, %v1437_v16  ;;  %v566_v2 = vpack.c.bf16 %v549_v31, %v548_v14 }
 0x12c   :  { %v307_v5 = vmul.f32 %v1433_v60, %v306_v51  ;;  %vm309_vm13 = vweird.f32 %v1433_v60  ;;  %v453_v19 = vmul.f32 %v1518_v18, %v1439_v54  ;;  %vm458_vm14 = vweird.f32 %v1439_v54 }
 0x12d   :  { %v324_v59 = vmul.f32 %v1505_v50, %v323_v27  ;;  %728 = vmatmul.msk.bf16.vlgmr.msra.gmra.mxu1 %vm42_vm0, %v566_v2  ;;  %838 = vrsqrt.f32 %v1503_v36  ;;  %v1534_v45 = vadd.f32 1e-05, %v245_v47  ;;  %v531_v61 = vmul.f32 %v1263_v30, %v506_v44  ;;  %vm1562_vm2 = vmor %vm308_vm10, %vm309_vm13 }
 0x12e   :  { %v1537_v25 = vpop.eup %836  ;;  %v1540_v3 = vmul.f32 %v451_v35, %v1116_v63  ;;  %vm328_vm1 = vweird.f32 %v1437_v16  ;;  %v454_v7 = vmul.f32 %v1518_v18, %v453_v19  ;;  %v1552_v29 = vadd.f32 1e-05, %v260_v4 }
 0x12f   :  { %v532_v44 = vmul.f32 %v1263_v30, %v507_v37  ;;  %v371_v63 = vsel %vm1546_vm15, %v1423_v57, %v367_v39  ;;  %v325_v1 = vmul.f32 0.5, %v324_v59  ;;  %v373_v15 = vmul.f32 %v1537_v25, %v1488_v55 }
 0x130   :  { %vm378_vm3 = vweird.f32 %v1488_v55  ;;  %v311_v0 = vsel %vm1562_vm2, %v1433_v60, %v307_v5  ;;  %v455_v41 = vmul.f32 0.5, %v454_v7  ;;  %vm459_vm4 = vweird.f32 %v1518_v18 }
 0x131   :  { %840 = vrsqrt.f32 %v1534_v45  ;;  %v326_v57 = vsub.f32 1.5, %v325_v1  ;;  %v374_v34 = vmul.f32 %v1537_v25, %v373_v15  ;;  %v556_v17 = vadd.f32 %v1312_v11, %v531_v61  ;;  %vm1595_vm6 = vmor %vm458_vm14, %vm459_vm4 }
 0x132   :  { %842 = vrsqrt.f32 %v1552_v29  ;;  %v456_v58 = vsub.f32 1.5, %v455_v41  ;;  %v557_v26 = vadd.f32 %v1312_v11, %v532_v44  ;;  %v535_v6 = vmul.f32 %v1263_v30, %v1443_v20 }
 0x133   :  { %v536_v60 = vmul.f32 %v1263_v30, %v511_v40  ;;  %v1581_v32 = vpop.eup %838  ;;  %v494_v56 = vmul.f32 %v311_v0, %v1103_v53  ;;  %vm329_vm5 = vweird.f32 %v1505_v50  ;;  %v375_v21 = vmul.f32 0.5, %v374_v34 }
 0x134   :  { %v250_v12 = vmul.f32 %v209_v52, %v1024_v48  ;;  %v500_v23 = vmul.f32 %v371_v63, %v1113_v62  ;;  %v457_v28 = vmul.f32 %v1518_v18, %v456_v58  ;;  %v393_v13 = vmul.f32 %v1581_v32, %v1503_v36  ;;  %vm1622_vm12 = vmor %vm328_vm1, %vm329_vm5 }
 0x135   :  { %v570_v14 = vpack.c.bf16 %v557_v26, %v556_v17  ;;  %v327_v20 = vmul.f32 %v1505_v50, %v326_v57  ;;  %v376_v40 = vsub.f32 1.5, %v375_v21  ;;  %vm379_vm7 = vweird.f32 %v1537_v25 }
 0x136   :  { %v561_v48 = vadd.f32 %v1312_v11, %v536_v60  ;;  %v461_v31 = vsel %vm1595_vm6, %v1518_v18, %v457_v28  ;;  %v394_v37 = vmul.f32 %v1581_v32, %v393_v13  ;;  %v560_v54 = vadd.f32 %v1312_v11, %v535_v6  ;;  %vm380_vm9 = vmor %vm378_vm3, %vm379_vm7 }
 0x137   :  { %v841_v62 = vpop.eup %840  ;;  %732 = vmatmul.msk.bf16.gmra.mxu2 %vm42_vm0, %v570_v14  ;;  %v1607_v49 = vadd.f32 1e-05, %v250_v12  ;;  %v377_v47 = vmul.f32 %v1537_v25, %v376_v40  ;;  %vm338_vm8 = vweird.f32 %v1534_v45  ;;  %v519_v35 = vmul.f32 %v1263_v30, %v494_v56 }
 0x138   :  { %v843_v51 = vpop.eup %842  ;;  %v333_v4 = vmul.f32 %v841_v62, %v1534_v45  ;;  %v395_v18 = vmul.f32 0.5, %v394_v37  ;;  %vm398_vm10 = vweird.f32 %v1503_v36  ;;  %vm488_vm11 = vweird.f32 %v1552_v29 }
 0x139   :  { %v483_v39 = vmul.f32 %v843_v51, %v1552_v29  ;;  %v572_v27 = vpack.c.bf16 %v561_v48, %v560_v54  ;;  %v509_v5 = vmul.f32 %v461_v31, %v1134_v8  ;;  %v381_v55 = vsel %vm380_vm9, %v1537_v25, %v377_v47 }
 0x13a   :  { %v334_v19 = vmul.f32 %v841_v62, %v333_v4  ;;  %844 = vrsqrt.f32 %v1607_v49  ;;  %v331_v59 = vsel %vm1622_vm12, %v1505_v50, %v327_v20  ;;  %v501_v61 = vmul.f32 %v381_v55, %v1124_v10 }
 0x13b   :  { %v484_v24 = vmul.f32 %v843_v51, %v483_v39  ;;  %734 = vmatmul.msk.bf16.vlgmr.msra.gmra.mxu3 %vm42_vm0, %v572_v27  ;;  %v520_v16 = vmul.f32 %v1263_v30, %v1496_v38  ;;  %v396_v7 = vsub.f32 1.5, %v395_v18  ;;  %v544_v8 = vadd.f32 %v1312_v11, %v519_v35 }
 0x13c   :  { %v335_v44 = vmul.f32 0.5, %v334_v19  ;;  %v525_v25 = vmul.f32 %v1263_v30, %v500_v23  ;;  %v526_v1 = vmul.f32 %v1263_v30, %v501_v61  ;;  %v533_v10 = vmul.f32 %v1263_v30, %v1540_v3 }
 0x13d   :  { %v485_v63 = vmul.f32 0.5, %v484_v24  ;;  %v545_v9 = vadd.f32 %v1312_v11, %v520_v16  ;;  %vm339_vm13 = vweird.f32 %v841_v62  ;;  %vm489_vm14 = vweird.f32 %v843_v51 }
 0x13e   :  { %v336_v50 = vsub.f32 1.5, %v335_v44  ;;  %v534_v15 = vmul.f32 %v1263_v30, %v509_v5  ;;  %v550_v41 = vadd.f32 %v1312_v11, %v525_v25  ;;  %v551_v52 = vadd.f32 %v1312_v11, %v526_v1  ;;  %vm340_vm1 = vmor %vm338_vm8, %vm339_vm13 }
 0x13f   :  { %v486_v38 = vsub.f32 1.5, %v485_v63  ;;  %v564_v0 = vpack.c.bf16 %v545_v9, %v544_v8  ;;  %v397_v34 = vmul.f32 %v1581_v32, %v396_v7  ;;  %vm399_vm15 = vweird.f32 %v1581_v32  ;;  %vm490_vm2 = vmor %vm488_vm11, %vm489_vm14 }
 0x140   :  { %v845_v57 = vpop.eup %844  ;;  %v337_v17 = vmul.f32 %v841_v62, %v336_v50  ;;  %v559_v58 = vadd.f32 %v1312_v11, %v534_v15  ;;  %v567_v6 = vpack.c.bf16 %v551_v52, %v550_v41  ;;  %v558_v60 = vadd.f32 %v1312_v11, %v533_v10  ;;  %vm400_vm3 = vmor %vm398_vm10, %vm399_vm15 }
 0x141   :  { %v487_v3 = vmul.f32 %v843_v51, %v486_v38  ;;  %v383_v26 = vmul.f32 %v845_v57, %v1607_v49  ;;  %726 = vmatmul.msk.bf16.gmra.mxu0 %vm42_vm0, %v564_v0  ;;  %v496_v56 = vmul.f32 %v331_v59, %v1137_v22  ;;  %v401_v22 = vsel %vm400_vm3, %v1581_v32, %v397_v34 }
 0x142   :  { %v341_v21 = vsel %vm340_vm1, %v841_v62, %v337_v17  ;;  %729 = vmatmul.msk.bf16.gmra.mxu1 %vm42_vm0, %v567_v6  ;;  %v571_v28 = vpack.c.bf16 %v559_v58, %v558_v60  ;;  %vm389_vm4 = vweird.f32 %v845_v57  ;;  %v503_v40 = vmul.f32 %v401_v22, %v1158_v43 }
 0x143   :  { %v497_v12 = vmul.f32 %v341_v21, %v1155_v42  ;;  %v491_v23 = vsel %vm490_vm2, %v843_v51, %v487_v3  ;;  %v384_v45 = vmul.f32 %v845_v57, %v383_v26  ;;  %v521_v53 = vmul.f32 %v1263_v30, %v496_v56 }
 0x144   :  { %v512_v13 = vmul.f32 %v491_v23, %v1145_v33  ;;  %vm388_vm5 = vweird.f32 %v1607_v49  ;;  %v528_v54 = vmul.f32 %v1263_v30, %v503_v40 }
 0x145   :  { %v385_v14 = vmul.f32 0.5, %v384_v45  ;;  %v522_v29 = vmul.f32 %v1263_v30, %v497_v12  ;;  %vm390_vm6 = vmor %vm388_vm5, %vm389_vm4  ;;  %v546_v31 = vadd.f32 %v1312_v11, %v521_v53 }
 0x146   :  { %v537_v20 = vmul.f32 %v1263_v30, %v512_v13  ;;  %v553_v49 = vadd.f32 %v1312_v11, %v528_v54 }
 0x147   :  { %v386_v42 = vsub.f32 1.5, %v385_v14  ;;  %733 = vmatmul.msk.bf16.gmra.mxu2 %vm42_vm0, %v571_v28  ;;  %v547_v33 = vadd.f32 %v1312_v11, %v522_v29 }
 0x148   :  { %v562_v36 = vadd.f32 %v1312_v11, %v537_v20 }
 0x149   :  { %v387_v48 = vmul.f32 %v845_v57, %v386_v42  ;;  %v565_v51 = vpack.c.bf16 %v547_v33, %v546_v31 }
 0x14a   :  { %v573_v32 = vpack.c.bf16 %v562_v36, %v562_v36 }
 0x14b   :  { %v391_v62 = vsel %vm390_vm6, %v845_v57, %v387_v48 }
 0x14c   :  { %v502_v37 = vmul.f32 %v391_v62, %v1166_v46  ;;  %735 = vmatmul.msk.bf16.gmra.mxu3 %vm42_vm0, %v573_v32  ;;  %v801_v46 = vld [vmem:[%s1721_s4] ss:$0 sm:$0xff] }
 0x14e   :  { %v527_v43 = vmul.f32 %v1263_v30, %v502_v37 }
 0x150   :  { %v552_v47 = vadd.f32 %v1312_v11, %v527_v43 }
 0x151   :  { %727 = vmatmul.msk.bf16.gmra.mxu0 %vm42_vm0, %v565_v51 }
 0x152   :  { %v568_v4 = vpack.c.bf16 %v553_v49, %v552_v47 }
 0x154   :  { %730 = vmatmul.msk.bf16.gmra.mxu1 %vm42_vm0, %v568_v4 }
 0x19d   :  { %v625_v35 = vpop.f32.mrf.mxu0 }
 0x19e   :  { %v626_v27 = vadd.f32 %v801_v46, %v625_v35 }
 0x1a5   :  { %v655_v18 = vpop.f32.mrf.mxu2  ;;  %v627_v39 = vpop.f32.mrf.mxu0 }
 0x1a6   :  { %v628_v2 = vadd.f32 %v801_v46, %v627_v39  ;;  %v656_v55 = vadd.f32 %v801_v46, %v655_v18 }
 0x1a8   :  { %v739_v5 = vpack.c.bf16 %v628_v2, %v626_v27 }
 0x1aa   :  { %740 = vst [vmem:[%s1723_s5] sm:$0xff] %v739_v5   ;;  %v640_v30 = vpop.f32.mrf.mxu1 }
 0x1ab   :  { %v641_v24 = vadd.f32 %v801_v46, %v640_v30 }
 0x1ad   :  { %v657_v11 = vpop.f32.mrf.mxu2 }
 0x1ae   :  { %v658_v19 = vadd.f32 %v801_v46, %v657_v11 }
 0x1b0   :  { %v769_v59 = vpack.c.bf16 %v658_v19, %v656_v55 }
 0x1b2   :  { %791 = vst [vmem:[%s1723_s5 + $0x30] sm:$0xff] %v769_v59   ;;  %v642_v61 = vpop.f32.mrf.mxu1 }
 0x1b3   :  { %v643_v16 = vadd.f32 %v801_v46, %v642_v61 }
 0x1b5   :  { %v754_v7 = vpack.c.bf16 %v643_v16, %v641_v24 }
 0x1b7   :  { %788 = vst [vmem:[%s1723_s5 + $0x18] sm:$0xff] %v754_v7  }
 0x1ba   :  { %v660_v44 = vpop.f32.mrf.mxu2 }
 0x1bb   :  { %v661_v1 = vadd.f32 %v801_v46, %v660_v44 }
 0x1be   :  { %v670_v8 = vpop.f32.mrf.mxu3  ;;  %v630_v25 = vpop.f32.mrf.mxu0 }
 0x1bf   :  { %v645_v63 = vpop.f32.mrf.mxu1  ;;  %v671_v0 = vadd.f32 %v801_v46, %v670_v8  ;;  %v631_v41 = vadd.f32 %v801_v46, %v630_v25 }
 0x1c0   :  { %v646_v3 = vadd.f32 %v801_v46, %v645_v63 }
 0x1c2   :  { %v662_v9 = vpop.f32.mrf.mxu2 }
 0x1c3   :  { %v663_v10 = vadd.f32 %v801_v46, %v662_v9 }
 0x1c5   :  { %v774_v50 = vpack.c.bf16 %v663_v10, %v661_v1 }
 0x1c6   :  { %v672_v15 = vpop.f32.mrf.mxu3  ;;  %v632_v38 = vpop.f32.mrf.mxu0 }
 0x1c7   :  { %792 = vst [vmem:[%s1723_s5 + $0x38] sm:$0xff] %v774_v50   ;;  %v673_v52 = vadd.f32 %v801_v46, %v672_v15  ;;  %v633_v57 = vadd.f32 %v801_v46, %v632_v38  ;;  %v647_v34 = vpop.f32.mrf.mxu1 }
 0x1c8   :  { %v648_v26 = vadd.f32 %v801_v46, %v647_v34 }
 0x1c9   :  { %v784_v17 = vpack.c.bf16 %v673_v52, %v671_v0  ;;  %v744_v58 = vpack.c.bf16 %v633_v57, %v631_v41 }
 0x1ca   :  { %v665_v6 = vpop.f32.mrf.mxu2  ;;  %v759_v60 = vpack.c.bf16 %v648_v26, %v646_v3 }
 0x1cb   :  { %794 = vst [vmem:[%s1723_s5 + $0x48] sm:$0xff] %v784_v17   ;;  %v666_v13 = vadd.f32 %v801_v46, %v665_v6 }
 0x1cc   :  { %786 = vst [vmem:[%s1723_s5 + $0x8] sm:$0xff] %v744_v58  }
 0x1cd   :  { %789 = vst [vmem:[%s1723_s5 + $0x20] sm:$0xff] %v759_v60  }
 0x1ce   :  { %v635_v56 = vpop.f32.mrf.mxu0 }
 0x1cf   :  { %v675_v21 = vpop.f32.mrf.mxu3  ;;  %v636_v20 = vadd.f32 %v801_v46, %v635_v56 }
 0x1d0   :  { %v676_v12 = vadd.f32 %v801_v46, %v675_v21 }
 0x1d1   :  { %v650_v23 = vpop.f32.mrf.mxu1 }
 0x1d2   :  { %v667_v45 = vpop.f32.mrf.mxu2  ;;  %v699_v28 = vpack.c.bf16 %v676_v12, %v676_v12  ;;  %v651_v48 = vadd.f32 %v801_v46, %v650_v23 }
 0x1d3   :  { %v668_v22 = vadd.f32 %v801_v46, %v667_v45 }
 0x1d4   :  { %720 = vst [vmem:[%s1723_s5 + $0x50] sm:$0x1] %v699_v28 }
 0x1d5   :  { %v779_v14 = vpack.c.bf16 %v668_v22, %v666_v13 }
 0x1d6   :  { %v637_v29 = vpop.f32.mrf.mxu0 }
 0x1d7   :  { %793 = vst [vmem:[%s1723_s5 + $0x40] sm:$0xff] %v779_v14   ;;  %v638_v42 = vadd.f32 %v801_v46, %v637_v29  ;;  %v677_v53 = vpop.f32.mrf.mxu3 }
 0x1d9   :  { %v749_v40 = vpack.c.bf16 %v638_v42, %v636_v20  ;;  %v652_v36 = vpop.f32.mrf.mxu1 }
 0x1da   :  { %v653_v33 = vadd.f32 %v801_v46, %v652_v36 }
 0x1db   :  { %787 = vst [vmem:[%s1723_s5 + $0x10] sm:$0xff] %v749_v40  }
 0x1dc   :  { %v764_v32 = vpack.c.bf16 %v653_v33, %v651_v48 }
 0x1de   :  { %790 = vst [vmem:[%s1723_s5 + $0x28] sm:$0xff] %v764_v32  }

// kernel: _lambda_.32
= control target key start
LH: loop header
LB: loop body
LE: loop exit
PB: predicated region body
PF: predicated region fallthrough
CT: control target
= control target key end

     0   :  { %vm105_vm0 = vcmask 1041408   ;;  %vm71_vm1 = vcmask 293888   ;;  %vm172_vm2 = vcmask 64512   ;;  %vm193_vm3 = vcmask 58368   ;;  %s442_s1 = inlined_call_operand.vmem [shape: bf16[36,8], index: 1, kind: input, shape index: {}]   ;;  %s443_s2 = inlined_call_operand.vmem [shape: f32[1,8], index: 2, kind: input, shape index: {}]   ;;  %s444_s0 = inlined_call_operand.vmem [shape: f32[162,36], index: 0, kind: input, shape index: {}]   ;;  %s445_s3 = inlined_call_operand.vmem [shape: f32[162,8], index: 3, kind: output, shape index: {}]  }
   0x1   :  { %v51_v0 = vld [vmem:[%s442_s1 + $0x10] sm:$0x3]  ;;  %v219_v4 = vld [vmem:[%s442_s1 + $0x8] sm:$0xff]  ;;  %v218_v5 = vld [vmem:[%s442_s1] sm:$0xff] }
   0x2   :  { %v65_v1 = vunpack.c.l.b16 %v51_v0  ;;  %v15_v6 = vld [vmem:[%s444_s0] sm:$0xff]  ;;  %v16_v7 = vld [vmem:[%s444_s0 + $0x8] sm:$0xff]  ;;  %v21_v8 = vld [vmem:[%s444_s0 + $0x30] sm:$0xff] }
   0x3   :  { %v22_v9 = vld [vmem:[%s444_s0 + $0x38] sm:$0xff]  ;;  %v27_v10 = vld [vmem:[%s444_s0 + $0x60] sm:$0xff]  ;;  %v28_v11 = vld [vmem:[%s444_s0 + $0x68] sm:$0xff]  ;;  %v36_v14 = vpack.c.bf16 %v16_v7, %v15_v6 }
   0x4   :  { %v68_v2 = vpack.c.b16 %v65_v1, %v65_v1  ;;  %v33_v12 = vld [vmem:[%s444_s0 + $0x90] sm:$0xff]  ;;  %v34_v13 = vld [vmem:[%s444_s0 + $0x98] sm:$0xff]  ;;  %v39_v15 = vpack.c.bf16 %v22_v9, %v21_v8  ;;  %v42_v16 = vpack.c.bf16 %v28_v11, %v27_v10  ;;  %v23_v20 = vld [vmem:[%s444_s0 + $0x40] sm:$0xff] }
   0x5   :  { %v45_v17 = vpack.c.bf16 %v34_v13, %v33_v12  ;;  %v17_v18 = vld [vmem:[%s444_s0 + $0x10] sm:$0xff]  ;;  %v18_v19 = vld [vmem:[%s444_s0 + $0x18] sm:$0xff]  ;;  %v24_v21 = vld [vmem:[%s444_s0 + $0x48] sm:$0xff] }
   0x6   :  { %v107_v3 = vsel %vm105_vm0, %v68_v2, 0  ;;  %v29_v22 = vld [vmem:[%s444_s0 + $0x70] sm:$0xff]  ;;  %v30_v23 = vld [vmem:[%s444_s0 + $0x78] sm:$0xff]  ;;  %v35_v24 = vld [vmem:[%s444_s0 + $0xa0] sm:$0x3]  ;;  %v37_v25 = vpack.c.bf16 %v18_v19, %v17_v18  ;;  %v40_v26 = vpack.c.bf16 %v24_v21, %v23_v20 }
   0x7   :  { %114 = vmatpush.bf16.msra.mxu0 %v107_v3  ;;  %220 = vmatpush.bf16.msra.mxu1 %v107_v3  ;;  %v43_v27 = vpack.c.bf16 %v30_v23, %v29_v22  ;;  %v46_v28 = vpack.c.bf16 %v35_v24, %v35_v24  ;;  %v19_v29 = vld [vmem:[%s444_s0 + $0x20] sm:$0xff]  ;;  %v20_v30 = vld [vmem:[%s444_s0 + $0x28] sm:$0xff]  ;;  %v25_v31 = vld [vmem:[%s444_s0 + $0x50] sm:$0xff] }
   0x8   :  { %221 = vmatpush.bf16.msra.mxu2 %v107_v3  ;;  %222 = vmatpush.bf16.msra.mxu3 %v107_v3  ;;  %v26_v32 = vld [vmem:[%s444_s0 + $0x58] sm:$0xff]  ;;  %v31_v33 = vld [vmem:[%s444_s0 + $0x80] sm:$0xff]  ;;  %v32_v34 = vld [vmem:[%s444_s0 + $0x88] sm:$0xff]  ;;  %v38_v35 = vpack.c.bf16 %v20_v30, %v19_v29 }
   0x9   :  { %v41_v36 = vpack.c.bf16 %v26_v32, %v25_v31  ;;  %v44_v37 = vpack.c.bf16 %v32_v34, %v31_v33  ;;  %v336_v38 = vld [vmem:[%s443_s2] ss:$0 sm:$0xff] }
   0xb   :  { %115 = vmatpush.bf16.msra.mxu0 %v219_v4  ;;  %223 = vmatpush.bf16.msra.mxu1 %v219_v4 }
   0xc   :  { %224 = vmatpush.bf16.msra.mxu2 %v219_v4  ;;  %225 = vmatpush.bf16.msra.mxu3 %v219_v4 }
   0xf   :  { %116 = vmatpush.bf16.msra.mxu0 %v218_v5  ;;  %226 = vmatpush.bf16.msra.mxu1 %v218_v5 }
  0x10   :  { %227 = vmatpush.bf16.msra.mxu2 %v218_v5  ;;  %228 = vmatpush.bf16.msra.mxu3 %v218_v5 }
  0x12   :  { %207 = vmatmul.msk.bf16.vlgmr.msra.gmra.mxu0 %vm71_vm1, %v36_v14  ;;  %210 = vmatmul.msk.bf16.vlgmr.msra.gmra.mxu1 %vm71_vm1, %v39_v15 }
  0x13   :  { %213 = vmatmul.msk.bf16.vlgmr.msra.gmra.mxu2 %vm71_vm1, %v42_v16  ;;  %216 = vmatmul.msk.bf16.vlgmr.msra.gmra.mxu3 %vm71_vm1, %v45_v17 }
  0x22   :  { %208 = vmatmul.msk.bf16.gmra.mxu0 %vm71_vm1, %v37_v25  ;;  %211 = vmatmul.msk.bf16.gmra.mxu1 %vm71_vm1, %v40_v26 }
  0x23   :  { %214 = vmatmul.msk.bf16.gmra.mxu2 %vm71_vm1, %v43_v27  ;;  %217 = vmatmul.msk.bf16.gmra.mxu3 %vm71_vm1, %v46_v28 }
  0x32   :  { %209 = vmatmul.msk.bf16.gmra.mxu0 %vm71_vm1, %v38_v35  ;;  %212 = vmatmul.msk.bf16.gmra.mxu1 %vm71_vm1, %v41_v36 }
  0x33   :  { %215 = vmatmul.msk.bf16.gmra.mxu2 %vm71_vm1, %v44_v37 }
  0x8f   :  { %v118_v39 = vpop.f32.mrf.mxu0  ;;  %v133_v40 = vpop.f32.mrf.mxu1 }
  0x90   :  { %v119_v41 = vadd.f32 %v336_v38, %v118_v39  ;;  %v134_v42 = vadd.f32 %v336_v38, %v133_v40 }
  0x92   :  { %173 = vst.msk [vmem:[%s445_s3] sm:$0xff] %vm172_vm2, %v119_v41 }
  0x93   :  { %179 = vst.msk [vmem:[%s445_s3 + $0x30] sm:$0xff] %vm172_vm2, %v134_v42 }
  0x96   :  { %v148_v43 = vpop.f32.mrf.mxu2  ;;  %v163_v44 = vpop.f32.mrf.mxu3 }
  0x97   :  { %v149_v45 = vadd.f32 %v336_v38, %v148_v43  ;;  %v120_v46 = vpop.f32.mrf.mxu0  ;;  %v135_v47 = vpop.f32.mrf.mxu1  ;;  %v164_v50 = vadd.f32 %v336_v38, %v163_v44 }
  0x98   :  { %v121_v48 = vadd.f32 %v336_v38, %v120_v46  ;;  %v136_v49 = vadd.f32 %v336_v38, %v135_v47 }
  0x99   :  { %185 = vst.msk [vmem:[%s445_s3 + $0x60] sm:$0xff] %vm172_vm2, %v149_v45 }
  0x9a   :  { %174 = vst.msk [vmem:[%s445_s3 + $0x8] sm:$0xff] %vm172_vm2, %v121_v48 }
  0x9b   :  { %180 = vst.msk [vmem:[%s445_s3 + $0x38] sm:$0xff] %vm172_vm2, %v136_v49 }
  0x9c   :  { %191 = vst.msk [vmem:[%s445_s3 + $0x90] sm:$0xff] %vm172_vm2, %v164_v50 }
  0x9e   :  { %v150_v51 = vpop.f32.mrf.mxu2  ;;  %v165_v52 = vpop.f32.mrf.mxu3 }
  0x9f   :  { %v151_v53 = vadd.f32 %v336_v38, %v150_v51  ;;  %v123_v54 = vpop.f32.mrf.mxu0  ;;  %v138_v55 = vpop.f32.mrf.mxu1  ;;  %v166_v58 = vadd.f32 %v336_v38, %v165_v52 }
  0xa0   :  { %v124_v56 = vadd.f32 %v336_v38, %v123_v54  ;;  %v139_v57 = vadd.f32 %v336_v38, %v138_v55 }
  0xa1   :  { %186 = vst.msk [vmem:[%s445_s3 + $0x68] sm:$0xff] %vm172_vm2, %v151_v53 }
  0xa2   :  { %175 = vst.msk [vmem:[%s445_s3 + $0x10] sm:$0xff] %vm172_vm2, %v124_v56 }
  0xa3   :  { %181 = vst.msk [vmem:[%s445_s3 + $0x40] sm:$0xff] %vm172_vm2, %v139_v57 }
  0xa4   :  { %192 = vst.msk [vmem:[%s445_s3 + $0x98] sm:$0xff] %vm172_vm2, %v166_v58 }
  0xa6   :  { %v153_v59 = vpop.f32.mrf.mxu2  ;;  %v168_v60 = vpop.f32.mrf.mxu3 }
  0xa7   :  { %v154_v61 = vadd.f32 %v336_v38, %v153_v59  ;;  %v125_v62 = vpop.f32.mrf.mxu0  ;;  %v140_v63 = vpop.f32.mrf.mxu1  ;;  %v169_v2 = vadd.f32 %v336_v38, %v168_v60 }
  0xa8   :  { %v126_v0 = vadd.f32 %v336_v38, %v125_v62  ;;  %v141_v1 = vadd.f32 %v336_v38, %v140_v63 }
  0xa9   :  { %187 = vst.msk [vmem:[%s445_s3 + $0x70] sm:$0xff] %vm172_vm2, %v154_v61 }
  0xaa   :  { %176 = vst.msk [vmem:[%s445_s3 + $0x18] sm:$0xff] %vm172_vm2, %v126_v0 }
  0xab   :  { %182 = vst.msk [vmem:[%s445_s3 + $0x48] sm:$0xff] %vm172_vm2, %v141_v1 }
  0xac   :  { %194 = vst.msk [vmem:[%s445_s3 + $0xa0] sm:$0x3] %vm193_vm3, %v169_v2 }
  0xae   :  { %v155_v3 = vpop.f32.mrf.mxu2  ;;  %v170_v4 = vpop.f32.mrf.mxu3 }
  0xaf   :  { %v156_v5 = vadd.f32 %v336_v38, %v155_v3  ;;  %v128_v6 = vpop.f32.mrf.mxu0  ;;  %v143_v7 = vpop.f32.mrf.mxu1 }
  0xb0   :  { %v129_v8 = vadd.f32 %v336_v38, %v128_v6  ;;  %v144_v9 = vadd.f32 %v336_v38, %v143_v7 }
  0xb1   :  { %188 = vst.msk [vmem:[%s445_s3 + $0x78] sm:$0xff] %vm172_vm2, %v156_v5 }
  0xb2   :  { %177 = vst.msk [vmem:[%s445_s3 + $0x20] sm:$0xff] %vm172_vm2, %v129_v8 }
  0xb3   :  { %183 = vst.msk [vmem:[%s445_s3 + $0x50] sm:$0xff] %vm172_vm2, %v144_v9 }
  0xb6   :  { %v158_v10 = vpop.f32.mrf.mxu2 }
  0xb7   :  { %v159_v11 = vadd.f32 %v336_v38, %v158_v10  ;;  %v130_v12 = vpop.f32.mrf.mxu0  ;;  %v145_v13 = vpop.f32.mrf.mxu1 }
  0xb8   :  { %v131_v14 = vadd.f32 %v336_v38, %v130_v12  ;;  %v146_v15 = vadd.f32 %v336_v38, %v145_v13 }
  0xb9   :  { %189 = vst.msk [vmem:[%s445_s3 + $0x80] sm:$0xff] %vm172_vm2, %v159_v11 }
  0xba   :  { %178 = vst.msk [vmem:[%s445_s3 + $0x28] sm:$0xff] %vm172_vm2, %v131_v14 }
  0xbb   :  { %184 = vst.msk [vmem:[%s445_s3 + $0x58] sm:$0xff] %vm172_vm2, %v146_v15 }
  0xbe   :  { %v160_v16 = vpop.f32.mrf.mxu2 }
  0xbf   :  { %v161_v17 = vadd.f32 %v336_v38, %v160_v16 }
  0xc1   :  { %190 = vst.msk [vmem:[%s445_s3 + $0x88] sm:$0xff] %vm172_vm2, %v161_v17 }

// kernel: _lambda_.36
= control target key start
LH: loop header
LB: loop body
LE: loop exit
PB: predicated region body
PF: predicated region fallthrough
CT: control target
= control target key end

     0   :  { %vm112_vm0 = vcmask 261120   ;;  %vm251_vm1 = vcmask 64512   ;;  %vm272_vm2 = vcmask 58368   ;;  %s603_s1 = inlined_call_operand.vmem [shape: bf16[32,8], index: 1, kind: input, shape index: {}]   ;;  %s604_s0 = inlined_call_operand.vmem [shape: bf16[162,32], index: 0, kind: input, shape index: {}]   ;;  %s605_s2 = inlined_call_operand.vmem [shape: f32[1,8], index: 2, kind: input, shape index: {}]   ;;  %s606_s3 = inlined_call_operand.vmem [shape: f32[162,8], index: 3, kind: input, shape index: {}]   ;;  %s607_s4 = inlined_call_operand.vmem [shape: f32[162,8], index: 4, kind: output, shape index: {}]  }
   0x1   :  { %v348_v0 = vld [vmem:[%s603_s1 + $0x8] sm:$0xff]  ;;  %v347_v1 = vld [vmem:[%s603_s1] sm:$0xff]  ;;  %v340_v3 = vld [vmem:[%s604_s0 + $0x18] sm:$0xff] }
   0x2   :  { %152 = vmatpush.bf16.msra.mxu0 %v348_v0  ;;  %349 = vmatpush.bf16.msra.mxu1 %v348_v0  ;;  %v337_v2 = vld [vmem:[%s604_s0] sm:$0xff]  ;;  %v343_v4 = vld [vmem:[%s604_s0 + $0x30] sm:$0xff]  ;;  %v346_v5 = vld [vmem:[%s604_s0 + $0x48] sm:$0xff] }
   0x3   :  { %350 = vmatpush.bf16.msra.mxu2 %v348_v0  ;;  %351 = vmatpush.bf16.msra.mxu3 %v348_v0  ;;  %v38_v6 = vld [vmem:[%s604_s0 + $0x50] sm:$0x1]  ;;  %v338_v8 = vld [vmem:[%s604_s0 + $0x8] sm:$0xff]  ;;  %v341_v9 = vld [vmem:[%s604_s0 + $0x20] sm:$0xff] }
   0x4   :  { %v88_v7 = vunpack.c.l.b16 %v38_v6  ;;  %v344_v10 = vld [vmem:[%s604_s0 + $0x38] sm:$0xff]  ;;  %v339_v12 = vld [vmem:[%s604_s0 + $0x10] sm:$0xff]  ;;  %v342_v13 = vld [vmem:[%s604_s0 + $0x28] sm:$0xff] }
   0x5   :  { %v345_v14 = vld [vmem:[%s604_s0 + $0x40] sm:$0xff]  ;;  %v215_v19 = vld [vmem:[%s606_s3 + $0x30] sm:$0xff]  ;;  %v210_v29 = vld [vmem:[%s606_s3 + $0x8] sm:$0xff] }
   0x6   :  { %153 = vmatpush.bf16.msra.mxu0 %v347_v1  ;;  %352 = vmatpush.bf16.msra.mxu1 %v347_v1  ;;  %v99_v11 = vpack.c.b16 %v88_v7, %v88_v7  ;;  %v434_v15 = vld [vmem:[%s605_s2] ss:$0 sm:$0xff]  ;;  %v216_v31 = vld [vmem:[%s606_s3 + $0x38] sm:$0xff]  ;;  %v227_v33 = vld [vmem:[%s606_s3 + $0x90] sm:$0xff] }
   0x7   :  { %353 = vmatpush.bf16.msra.mxu2 %v347_v1  ;;  %354 = vmatpush.bf16.msra.mxu3 %v347_v1  ;;  %v209_v17 = vld [vmem:[%s606_s3] sm:$0xff]  ;;  %v222_v41 = vld [vmem:[%s606_s3 + $0x68] sm:$0xff]  ;;  %v211_v45 = vld [vmem:[%s606_s3 + $0x10] sm:$0xff] }
   0x8   :  { %v221_v25 = vld [vmem:[%s606_s3 + $0x60] sm:$0xff]  ;;  %v228_v49 = vld [vmem:[%s606_s3 + $0x98] sm:$0xff]  ;;  %v223_v57 = vld [vmem:[%s606_s3 + $0x70] sm:$0xff] }
   0x9   :  { %326 = vmatmul.msk.bf16.vlgmr.msra.gmra.mxu0 %vm112_vm0, %v337_v2  ;;  %329 = vmatmul.msk.bf16.vlgmr.msra.gmra.mxu1 %vm112_vm0, %v340_v3  ;;  %v217_v47 = vld [vmem:[%s606_s3 + $0x40] sm:$0xff]  ;;  %v212_v61 = vld [vmem:[%s606_s3 + $0x18] sm:$0xff]  ;;  %v218_v63 = vld [vmem:[%s606_s3 + $0x48] sm:$0xff] }
   0xa   :  { %332 = vmatmul.msk.bf16.vlgmr.msra.gmra.mxu2 %vm112_vm0, %v343_v4  ;;  %335 = vmatmul.msk.bf16.vlgmr.msra.gmra.mxu3 %vm112_vm0, %v346_v5  ;;  %v229_v1 = vld [vmem:[%s606_s3 + $0xa0] sm:$0x3] }
  0x19   :  { %327 = vmatmul.msk.bf16.gmra.mxu0 %vm112_vm0, %v338_v8  ;;  %330 = vmatmul.msk.bf16.gmra.mxu1 %vm112_vm0, %v341_v9  ;;  %v224_v9 = vld [vmem:[%s606_s3 + $0x78] sm:$0xff] }
  0x1a   :  { %333 = vmatmul.msk.bf16.gmra.mxu2 %vm112_vm0, %v344_v10  ;;  %336 = vmatmul.msk.bf16.gmra.mxu3 %vm112_vm0, %v99_v11 }
  0x29   :  { %328 = vmatmul.msk.bf16.gmra.mxu0 %vm112_vm0, %v339_v12  ;;  %331 = vmatmul.msk.bf16.gmra.mxu1 %vm112_vm0, %v342_v13  ;;  %v213_v13 = vld [vmem:[%s606_s3 + $0x20] sm:$0xff] }
  0x2a   :  { %334 = vmatmul.msk.bf16.gmra.mxu2 %vm112_vm0, %v345_v14 }
  0x86   :  { %v155_v16 = vpop.f32.mrf.mxu0  ;;  %v170_v18 = vpop.f32.mrf.mxu1 }
  0x87   :  { %v156_v20 = vadd.f32 %v434_v15, %v155_v16  ;;  %v171_v21 = vadd.f32 %v434_v15, %v170_v18  ;;  %v219_v16 = vld [vmem:[%s606_s3 + $0x50] sm:$0xff] }
  0x89   :  { %v230_v22 = vadd.f32 %v209_v17, %v156_v20  ;;  %v236_v23 = vadd.f32 %v215_v19, %v171_v21 }
  0x8b   :  { %252 = vst.msk [vmem:[%s607_s4] sm:$0xff] %vm251_vm1, %v230_v22 }
  0x8c   :  { %258 = vst.msk [vmem:[%s607_s4 + $0x30] sm:$0xff] %vm251_vm1, %v236_v23  ;;  %v225_v23 = vld [vmem:[%s606_s3 + $0x80] sm:$0xff] }
  0x8d   :  { %v185_v24 = vpop.f32.mrf.mxu2  ;;  %v200_v26 = vpop.f32.mrf.mxu3 }
  0x8e   :  { %v186_v27 = vadd.f32 %v434_v15, %v185_v24  ;;  %v157_v28 = vpop.f32.mrf.mxu0  ;;  %v172_v30 = vpop.f32.mrf.mxu1  ;;  %v201_v32 = vadd.f32 %v434_v15, %v200_v26  ;;  %v214_v26 = vld [vmem:[%s606_s3 + $0x28] sm:$0xff] }
  0x8f   :  { %v158_v34 = vadd.f32 %v434_v15, %v157_v28  ;;  %v173_v35 = vadd.f32 %v434_v15, %v172_v30  ;;  %v220_v28 = vld [vmem:[%s606_s3 + $0x58] sm:$0xff] }
  0x90   :  { %v242_v36 = vadd.f32 %v221_v25, %v186_v27  ;;  %v248_v39 = vadd.f32 %v227_v33, %v201_v32 }
  0x91   :  { %v231_v37 = vadd.f32 %v210_v29, %v158_v34  ;;  %v237_v38 = vadd.f32 %v216_v31, %v173_v35  ;;  %v226_v35 = vld [vmem:[%s606_s3 + $0x88] sm:$0xff] }
  0x92   :  { %264 = vst.msk [vmem:[%s607_s4 + $0x60] sm:$0xff] %vm251_vm1, %v242_v36 }
  0x93   :  { %253 = vst.msk [vmem:[%s607_s4 + $0x8] sm:$0xff] %vm251_vm1, %v231_v37 }
  0x94   :  { %259 = vst.msk [vmem:[%s607_s4 + $0x38] sm:$0xff] %vm251_vm1, %v237_v38 }
  0x95   :  { %v187_v40 = vpop.f32.mrf.mxu2  ;;  %270 = vst.msk [vmem:[%s607_s4 + $0x90] sm:$0xff] %vm251_vm1, %v248_v39  ;;  %v202_v42 = vpop.f32.mrf.mxu3 }
  0x96   :  { %v188_v43 = vadd.f32 %v434_v15, %v187_v40  ;;  %v160_v44 = vpop.f32.mrf.mxu0  ;;  %v175_v46 = vpop.f32.mrf.mxu1  ;;  %v203_v48 = vadd.f32 %v434_v15, %v202_v42 }
  0x97   :  { %v161_v50 = vadd.f32 %v434_v15, %v160_v44  ;;  %v176_v51 = vadd.f32 %v434_v15, %v175_v46 }
  0x98   :  { %v243_v52 = vadd.f32 %v222_v41, %v188_v43  ;;  %v249_v55 = vadd.f32 %v228_v49, %v203_v48 }
  0x99   :  { %v232_v53 = vadd.f32 %v211_v45, %v161_v50  ;;  %v238_v54 = vadd.f32 %v217_v47, %v176_v51 }
  0x9a   :  { %265 = vst.msk [vmem:[%s607_s4 + $0x68] sm:$0xff] %vm251_vm1, %v243_v52 }
  0x9b   :  { %254 = vst.msk [vmem:[%s607_s4 + $0x10] sm:$0xff] %vm251_vm1, %v232_v53 }
  0x9c   :  { %260 = vst.msk [vmem:[%s607_s4 + $0x40] sm:$0xff] %vm251_vm1, %v238_v54 }
  0x9d   :  { %v190_v56 = vpop.f32.mrf.mxu2  ;;  %271 = vst.msk [vmem:[%s607_s4 + $0x98] sm:$0xff] %vm251_vm1, %v249_v55  ;;  %v205_v58 = vpop.f32.mrf.mxu3 }
  0x9e   :  { %v191_v59 = vadd.f32 %v434_v15, %v190_v56  ;;  %v162_v60 = vpop.f32.mrf.mxu0  ;;  %v177_v62 = vpop.f32.mrf.mxu1  ;;  %v206_v0 = vadd.f32 %v434_v15, %v205_v58 }
  0x9f   :  { %v163_v2 = vadd.f32 %v434_v15, %v162_v60  ;;  %v178_v3 = vadd.f32 %v434_v15, %v177_v62 }
  0xa0   :  { %v244_v4 = vadd.f32 %v223_v57, %v191_v59  ;;  %v250_v7 = vadd.f32 %v229_v1, %v206_v0 }
  0xa1   :  { %v233_v5 = vadd.f32 %v212_v61, %v163_v2  ;;  %v239_v6 = vadd.f32 %v218_v63, %v178_v3 }
  0xa2   :  { %266 = vst.msk [vmem:[%s607_s4 + $0x70] sm:$0xff] %vm251_vm1, %v244_v4 }
  0xa3   :  { %255 = vst.msk [vmem:[%s607_s4 + $0x18] sm:$0xff] %vm251_vm1, %v233_v5 }
  0xa4   :  { %261 = vst.msk [vmem:[%s607_s4 + $0x48] sm:$0xff] %vm251_vm1, %v239_v6 }
  0xa5   :  { %v192_v8 = vpop.f32.mrf.mxu2  ;;  %273 = vst.msk [vmem:[%s607_s4 + $0xa0] sm:$0x3] %vm272_vm2, %v250_v7  ;;  %v207_v10 = vpop.f32.mrf.mxu3 }
  0xa6   :  { %v193_v11 = vadd.f32 %v434_v15, %v192_v8  ;;  %v165_v12 = vpop.f32.mrf.mxu0  ;;  %v180_v14 = vpop.f32.mrf.mxu1 }
  0xa7   :  { %v166_v17 = vadd.f32 %v434_v15, %v165_v12  ;;  %v181_v18 = vadd.f32 %v434_v15, %v180_v14 }
  0xa8   :  { %v245_v19 = vadd.f32 %v224_v9, %v193_v11 }
  0xa9   :  { %v234_v20 = vadd.f32 %v213_v13, %v166_v17  ;;  %v240_v21 = vadd.f32 %v219_v16, %v181_v18 }
  0xaa   :  { %267 = vst.msk [vmem:[%s607_s4 + $0x78] sm:$0xff] %vm251_vm1, %v245_v19 }
  0xab   :  { %256 = vst.msk [vmem:[%s607_s4 + $0x20] sm:$0xff] %vm251_vm1, %v234_v20 }
  0xac   :  { %262 = vst.msk [vmem:[%s607_s4 + $0x50] sm:$0xff] %vm251_vm1, %v240_v21 }
  0xad   :  { %v195_v22 = vpop.f32.mrf.mxu2 }
  0xae   :  { %v196_v24 = vadd.f32 %v434_v15, %v195_v22  ;;  %v167_v25 = vpop.f32.mrf.mxu0  ;;  %v182_v27 = vpop.f32.mrf.mxu1 }
  0xaf   :  { %v168_v29 = vadd.f32 %v434_v15, %v167_v25  ;;  %v183_v30 = vadd.f32 %v434_v15, %v182_v27 }
  0xb0   :  { %v246_v31 = vadd.f32 %v225_v23, %v196_v24 }
  0xb1   :  { %v235_v32 = vadd.f32 %v214_v26, %v168_v29  ;;  %v241_v33 = vadd.f32 %v220_v28, %v183_v30 }
  0xb2   :  { %268 = vst.msk [vmem:[%s607_s4 + $0x80] sm:$0xff] %vm251_vm1, %v246_v31 }
  0xb3   :  { %257 = vst.msk [vmem:[%s607_s4 + $0x28] sm:$0xff] %vm251_vm1, %v235_v32 }
  0xb4   :  { %263 = vst.msk [vmem:[%s607_s4 + $0x58] sm:$0xff] %vm251_vm1, %v241_v33 }
  0xb5   :  { %v197_v34 = vpop.f32.mrf.mxu2 }
  0xb6   :  { %v198_v36 = vadd.f32 %v434_v15, %v197_v34 }
  0xb8   :  { %v247_v37 = vadd.f32 %v226_v35, %v198_v36 }
  0xba   :  { %269 = vst.msk [vmem:[%s607_s4 + $0x88] sm:$0xff] %vm251_vm1, %v247_v37 }

// kernel: _lambda_.40
= control target key start
LH: loop header
LB: loop body
LE: loop exit
PB: predicated region body
PF: predicated region fallthrough
CT: control target
= control target key end

     0   :  { %vm86_vm0 = vcmask 1043456   ;;  %vm52_vm1 = vcmask 64512   ;;  %vm174_vm2 = vcmask 125952   ;;  %vm195_vm3 = vcmask 122880   ;;  %s422_s1 = inlined_call_operand.vmem [shape: bf16[8,16], index: 1, kind: input, shape index: {}]   ;;  %s423_s0 = inlined_call_operand.vmem [shape: f32[162,8], index: 0, kind: input, shape index: {}]   ;;  %s424_s2 = inlined_call_operand.vmem [shape: f32[1,16], index: 2, kind: input, shape index: {}]   ;;  %s425_s3 = inlined_call_operand.vmem [shape: bf16[162,16], index: 3, kind: output, shape index: {}]  }
   0x1   :  { %v47_v0 = vld [vmem:[%s422_s1] sm:$0xf]  ;;  %v16_v2 = vld [vmem:[%s423_s0 + $0x8] sm:$0xff]  ;;  %v21_v5 = vld [vmem:[%s423_s0 + $0x30] sm:$0xff] }
   0x2   :  { %v15_v1 = vld [vmem:[%s423_s0] sm:$0xff]  ;;  %v88_v3 = vsel %vm86_vm0, %v47_v0, 0  ;;  %v22_v6 = vld [vmem:[%s423_s0 + $0x38] sm:$0xff]  ;;  %v28_v9 = vld [vmem:[%s423_s0 + $0x68] sm:$0xff] }
   0x3   :  { %v36_v4 = vpack.c.bf16 %v16_v2, %v15_v1  ;;  %v27_v7 = vld [vmem:[%s423_s0 + $0x60] sm:$0xff]  ;;  %97 = vmatpush.bf16.msra.mxu0 %v88_v3  ;;  %212 = vmatpush.bf16.msra.mxu1 %v88_v3  ;;  %v39_v8 = vpack.c.bf16 %v22_v6, %v21_v5  ;;  %v33_v10 = vld [vmem:[%s423_s0 + $0x90] sm:$0xff]  ;;  %v34_v11 = vld [vmem:[%s423_s0 + $0x98] sm:$0xff] }
   0x4   :  { %213 = vmatpush.bf16.msra.mxu2 %v88_v3  ;;  %v42_v12 = vpack.c.bf16 %v28_v9, %v27_v7  ;;  %214 = vmatpush.bf16.msra.mxu3 %v88_v3  ;;  %v45_v13 = vpack.c.bf16 %v34_v11, %v33_v10  ;;  %v17_v14 = vld [vmem:[%s423_s0 + $0x10] sm:$0xff]  ;;  %v18_v15 = vld [vmem:[%s423_s0 + $0x18] sm:$0xff]  ;;  %v23_v16 = vld [vmem:[%s423_s0 + $0x40] sm:$0xff] }
   0x5   :  { %v24_v17 = vld [vmem:[%s423_s0 + $0x48] sm:$0xff]  ;;  %v29_v18 = vld [vmem:[%s423_s0 + $0x70] sm:$0xff]  ;;  %v30_v19 = vld [vmem:[%s423_s0 + $0x78] sm:$0xff]  ;;  %v37_v21 = vpack.c.bf16 %v18_v15, %v17_v14 }
   0x6   :  { %201 = vmatmul.msk.bf16.vlgmr.msra.gmra.mxu0 %vm52_vm1, %v36_v4  ;;  %204 = vmatmul.msk.bf16.vlgmr.msra.gmra.mxu1 %vm52_vm1, %v39_v8  ;;  %v35_v20 = vld [vmem:[%s423_s0 + $0xa0] sm:$0x3]  ;;  %v40_v22 = vpack.c.bf16 %v24_v17, %v23_v16  ;;  %v43_v23 = vpack.c.bf16 %v30_v19, %v29_v18  ;;  %v20_v26 = vld [vmem:[%s423_s0 + $0x28] sm:$0xff]  ;;  %v25_v27 = vld [vmem:[%s423_s0 + $0x50] sm:$0xff] }
   0x7   :  { %207 = vmatmul.msk.bf16.vlgmr.msra.gmra.mxu2 %vm52_vm1, %v42_v12  ;;  %210 = vmatmul.msk.bf16.vlgmr.msra.gmra.mxu3 %vm52_vm1, %v45_v13  ;;  %v46_v24 = vpack.c.bf16 %v35_v20, %v35_v20  ;;  %v19_v25 = vld [vmem:[%s423_s0 + $0x20] sm:$0xff]  ;;  %v26_v28 = vld [vmem:[%s423_s0 + $0x58] sm:$0xff]  ;;  %v32_v30 = vld [vmem:[%s423_s0 + $0x88] sm:$0xff] }
   0x8   :  { %v31_v29 = vld [vmem:[%s423_s0 + $0x80] sm:$0xff]  ;;  %v38_v31 = vpack.c.bf16 %v20_v26, %v19_v25  ;;  %v41_v32 = vpack.c.bf16 %v26_v28, %v25_v27 }
   0x9   :  { %v44_v33 = vpack.c.bf16 %v32_v30, %v31_v29  ;;  %v316_v34 = vld [vmem:[%s424_s2] ss:$0 sm:$0xff] }
  0x16   :  { %202 = vmatmul.msk.bf16.gmra.mxu0 %vm52_vm1, %v37_v21  ;;  %205 = vmatmul.msk.bf16.gmra.mxu1 %vm52_vm1, %v40_v22 }
  0x17   :  { %208 = vmatmul.msk.bf16.gmra.mxu2 %vm52_vm1, %v43_v23  ;;  %211 = vmatmul.msk.bf16.gmra.mxu3 %vm52_vm1, %v46_v24 }
  0x26   :  { %203 = vmatmul.msk.bf16.gmra.mxu0 %vm52_vm1, %v38_v31  ;;  %206 = vmatmul.msk.bf16.gmra.mxu1 %vm52_vm1, %v41_v32 }
  0x27   :  { %209 = vmatmul.msk.bf16.gmra.mxu2 %vm52_vm1, %v44_v33 }
  0x83   :  { %v99_v35 = vpop.f32.mrf.mxu0  ;;  %v114_v36 = vpop.f32.mrf.mxu1 }
  0x84   :  { %v100_v37 = vadd.f32 %v316_v34, %v99_v35  ;;  %v115_v38 = vadd.f32 %v316_v34, %v114_v36 }
  0x86   :  { %v153_v39 = vpack.c.bf16 %v100_v37, %v100_v37  ;;  %v159_v40 = vpack.c.bf16 %v115_v38, %v115_v38 }
  0x88   :  { %175 = vst.msk [vmem:[%s425_s3] sm:$0xf] %vm174_vm2, %v153_v39 }
  0x89   :  { %181 = vst.msk [vmem:[%s425_s3 + $0x18] sm:$0xf] %vm174_vm2, %v159_v40 }
  0x8a   :  { %v129_v41 = vpop.f32.mrf.mxu2  ;;  %v144_v42 = vpop.f32.mrf.mxu3 }
  0x8b   :  { %v130_v43 = vadd.f32 %v316_v34, %v129_v41  ;;  %v101_v44 = vpop.f32.mrf.mxu0  ;;  %v116_v45 = vpop.f32.mrf.mxu1  ;;  %v145_v46 = vadd.f32 %v316_v34, %v144_v42 }
  0x8c   :  { %v102_v47 = vadd.f32 %v316_v34, %v101_v44  ;;  %v117_v48 = vadd.f32 %v316_v34, %v116_v45 }
  0x8d   :  { %v165_v49 = vpack.c.bf16 %v130_v43, %v130_v43  ;;  %v171_v52 = vpack.c.bf16 %v145_v46, %v145_v46 }
  0x8e   :  { %v154_v50 = vpack.c.bf16 %v102_v47, %v102_v47  ;;  %v160_v51 = vpack.c.bf16 %v117_v48, %v117_v48 }
  0x8f   :  { %187 = vst.msk [vmem:[%s425_s3 + $0x30] sm:$0xf] %vm174_vm2, %v165_v49 }
  0x90   :  { %176 = vst.msk [vmem:[%s425_s3 + $0x4] sm:$0xf] %vm174_vm2, %v154_v50 }
  0x91   :  { %182 = vst.msk [vmem:[%s425_s3 + $0x1c] sm:$0xf] %vm174_vm2, %v160_v51 }
  0x92   :  { %v131_v53 = vpop.f32.mrf.mxu2  ;;  %193 = vst.msk [vmem:[%s425_s3 + $0x48] sm:$0xf] %vm174_vm2, %v171_v52  ;;  %v146_v54 = vpop.f32.mrf.mxu3 }
  0x93   :  { %v132_v55 = vadd.f32 %v316_v34, %v131_v53  ;;  %v104_v56 = vpop.f32.mrf.mxu0  ;;  %v119_v57 = vpop.f32.mrf.mxu1  ;;  %v147_v58 = vadd.f32 %v316_v34, %v146_v54 }
  0x94   :  { %v105_v59 = vadd.f32 %v316_v34, %v104_v56  ;;  %v120_v60 = vadd.f32 %v316_v34, %v119_v57 }
  0x95   :  { %v166_v61 = vpack.c.bf16 %v132_v55, %v132_v55  ;;  %v172_v0 = vpack.c.bf16 %v147_v58, %v147_v58 }
  0x96   :  { %v155_v62 = vpack.c.bf16 %v105_v59, %v105_v59  ;;  %v161_v63 = vpack.c.bf16 %v120_v60, %v120_v60 }
  0x97   :  { %188 = vst.msk [vmem:[%s425_s3 + $0x34] sm:$0xf] %vm174_vm2, %v166_v61 }
  0x98   :  { %177 = vst.msk [vmem:[%s425_s3 + $0x8] sm:$0xf] %vm174_vm2, %v155_v62 }
  0x99   :  { %183 = vst.msk [vmem:[%s425_s3 + $0x20] sm:$0xf] %vm174_vm2, %v161_v63 }
  0x9a   :  { %v134_v1 = vpop.f32.mrf.mxu2  ;;  %194 = vst.msk [vmem:[%s425_s3 + $0x4c] sm:$0xf] %vm174_vm2, %v172_v0  ;;  %v149_v2 = vpop.f32.mrf.mxu3 }
  0x9b   :  { %v135_v3 = vadd.f32 %v316_v34, %v134_v1  ;;  %v106_v4 = vpop.f32.mrf.mxu0  ;;  %v121_v5 = vpop.f32.mrf.mxu1  ;;  %v150_v6 = vadd.f32 %v316_v34, %v149_v2 }
  0x9c   :  { %v107_v7 = vadd.f32 %v316_v34, %v106_v4  ;;  %v122_v8 = vadd.f32 %v316_v34, %v121_v5 }
  0x9d   :  { %v167_v9 = vpack.c.bf16 %v135_v3, %v135_v3  ;;  %v173_v12 = vpack.c.bf16 %v150_v6, %v150_v6 }
  0x9e   :  { %v156_v10 = vpack.c.bf16 %v107_v7, %v107_v7  ;;  %v162_v11 = vpack.c.bf16 %v122_v8, %v122_v8 }
  0x9f   :  { %189 = vst.msk [vmem:[%s425_s3 + $0x38] sm:$0xf] %vm174_vm2, %v167_v9 }
  0xa0   :  { %178 = vst.msk [vmem:[%s425_s3 + $0xc] sm:$0xf] %vm174_vm2, %v156_v10 }
  0xa1   :  { %184 = vst.msk [vmem:[%s425_s3 + $0x24] sm:$0xf] %vm174_vm2, %v162_v11 }
  0xa2   :  { %v136_v13 = vpop.f32.mrf.mxu2  ;;  %196 = vst.msk [vmem:[%s425_s3 + $0x50] sm:$0x1] %vm195_vm3, %v173_v12  ;;  %v151_v14 = vpop.f32.mrf.mxu3 }
  0xa3   :  { %v137_v15 = vadd.f32 %v316_v34, %v136_v13  ;;  %v109_v16 = vpop.f32.mrf.mxu0  ;;  %v124_v17 = vpop.f32.mrf.mxu1 }
  0xa4   :  { %v110_v18 = vadd.f32 %v316_v34, %v109_v16  ;;  %v125_v19 = vadd.f32 %v316_v34, %v124_v17 }
  0xa5   :  { %v168_v20 = vpack.c.bf16 %v137_v15, %v137_v15 }
  0xa6   :  { %v157_v21 = vpack.c.bf16 %v110_v18, %v110_v18  ;;  %v163_v22 = vpack.c.bf16 %v125_v19, %v125_v19 }
  0xa7   :  { %190 = vst.msk [vmem:[%s425_s3 + $0x3c] sm:$0xf] %vm174_vm2, %v168_v20 }
  0xa8   :  { %179 = vst.msk [vmem:[%s425_s3 + $0x10] sm:$0xf] %vm174_vm2, %v157_v21 }
  0xa9   :  { %185 = vst.msk [vmem:[%s425_s3 + $0x28] sm:$0xf] %vm174_vm2, %v163_v22 }
  0xaa   :  { %v139_v23 = vpop.f32.mrf.mxu2 }
  0xab   :  { %v140_v24 = vadd.f32 %v316_v34, %v139_v23  ;;  %v111_v25 = vpop.f32.mrf.mxu0  ;;  %v126_v26 = vpop.f32.mrf.mxu1 }
  0xac   :  { %v112_v27 = vadd.f32 %v316_v34, %v111_v25  ;;  %v127_v28 = vadd.f32 %v316_v34, %v126_v26 }
  0xad   :  { %v169_v29 = vpack.c.bf16 %v140_v24, %v140_v24 }
  0xae   :  { %v158_v30 = vpack.c.bf16 %v112_v27, %v112_v27  ;;  %v164_v31 = vpack.c.bf16 %v127_v28, %v127_v28 }
  0xaf   :  { %191 = vst.msk [vmem:[%s425_s3 + $0x40] sm:$0xf] %vm174_vm2, %v169_v29 }
  0xb0   :  { %180 = vst.msk [vmem:[%s425_s3 + $0x14] sm:$0xf] %vm174_vm2, %v158_v30 }
  0xb1   :  { %186 = vst.msk [vmem:[%s425_s3 + $0x2c] sm:$0xf] %vm174_vm2, %v164_v31 }
  0xb2   :  { %v141_v32 = vpop.f32.mrf.mxu2 }
  0xb3   :  { %v142_v33 = vadd.f32 %v316_v34, %v141_v32 }
  0xb5   :  { %v170_v35 = vpack.c.bf16 %v142_v33, %v142_v33 }
  0xb7   :  { %192 = vst.msk [vmem:[%s425_s3 + $0x44] sm:$0xf] %vm174_vm2, %v170_v35 }

// kernel: _lambda_.35
= control target key start
LH: loop header
LB: loop body
LE: loop exit
PB: predicated region body
PF: predicated region fallthrough
CT: control target
= control target key end

     0   :  { %vm16_vm0 = vcmask 261120   ;;  %vm19_vm1 = vcmask 254976   ;;  %v4833_v3 = vmov 0.0   ;;  %s6793_s1 = inlined_call_operand.vmem [shape: bf16[4,32,32], index: 1, kind: input, shape index: {}]   ;;  %s6794_s0 = inlined_call_operand.vmem [shape: bf16[9,4,18,32], index: 0, kind: input, shape index: {}]   ;;  %s6795_s2 = inlined_call_operand.vmem [shape: bf16[9,18,32], index: 2, kind: output, shape index: {}]  }
   0x1   :  { %v4240_v0 = vld [vmem:[%s6793_s1 + $0x8] sm:$0xff]  ;;  %v4242_v1 = vld [vmem:[%s6793_s1 + $0x18] sm:$0xff]  ;;  %17 = vst.msk [vmem:[#allocation2] sm:$0xff] %vm16_vm0, %v4833_v3  ;;  %v4239_v4 = vld [vmem:[%s6793_s1] sm:$0xff] }
   0x2   :  { %v4246_v2 = vld [vmem:[%s6793_s1 + $0x38] sm:$0xff]  ;;  %18 = vst.msk [vmem:[#allocation2 + $0x8] sm:$0xff] %vm16_vm0, %v4833_v3  ;;  %64 = vmatpush.bf16.msra.mxu0 %v4240_v0  ;;  %166 = vmatpush.bf16.msra.mxu1 %v4242_v1  ;;  %v4241_v5 = vld [vmem:[%s6793_s1 + $0x10] sm:$0xff]  ;;  %v4244_v6 = vld [vmem:[%s6793_s1 + $0x28] sm:$0xff] }
   0x3   :  { %20 = vst.msk [vmem:[#allocation2 + $0x10] sm:$0x3] %vm19_vm1, %v4833_v3  ;;  %316 = vmatpush.bf16.msra.mxu3 %v4246_v2  ;;  %v4245_v7 = vld [vmem:[%s6793_s1 + $0x30] sm:$0xff]  ;;  %268 = vmatpush.bf16.msra.mxu2 %v4244_v6  ;;  %v4243_v8 = vld [vmem:[%s6793_s1 + $0x20] sm:$0xff]  ;;  %v4383_v33 = vld [vmem:[%s6794_s0 + $0x18] sm:$0xff]  }
   0x4   :  { %21 = vst.msk [vmem:[#allocation3] sm:$0xff] %vm16_vm0, %v4833_v3  ;;  %v4312_v14 = vld [vmem:[%s6794_s0] sm:$0xff]   ;;  %v3574_v15 = vld [vmem:[%s6794_s0 + $0xc] sm:$0xff]   ;;  %v3612_v36 = vld [vmem:[%s6794_s0 + $0x28] sm:$0xf]  ;;  %v4317_v40 = vunpack.c.l.bf16 %v4383_v33  ;;  %v4318_v58 = vunpack.c.h.bf16 %v4383_v33 }
   0x5   :  { %22 = vst.msk [vmem:[#allocation3 + $0x8] sm:$0xff] %vm16_vm0, %v4833_v3  ;;  %v4313_v16 = vunpack.c.l.bf16 %v4312_v14  ;;  %v140_v17 = vunpack.c.l.bf16 %v3574_v15  ;;  %v3611_v22 = vld [vmem:[%s6794_s0 + $0x24] sm:$0xf]  ;;  %v4314_v26 = vunpack.c.h.bf16 %v4312_v14  ;;  %v141_v27 = vunpack.c.h.bf16 %v3574_v15  ;;  %v31_v45 = vld [vmem:[%s6794_s0 + $0x8] sm:$0x1] }
   0x6   :  { %23 = vst.msk [vmem:[#allocation3 + $0x10] sm:$0x3] %vm19_vm1, %v4833_v3  ;;  %65 = vmatpush.bf16.msra.mxu0 %v4239_v4  ;;  %167 = vmatpush.bf16.msra.mxu1 %v4241_v5  ;;  %v290_v25 = vunpack.c.l.bf16 %v3611_v22  ;;  %v291_v44 = vunpack.c.l.bf16 %v3612_v36  ;;  %v34_v50 = vunpack.c.l.bf16 %v31_v45  ;;  %v3576_v51 = vld [vmem:[%s6794_s0 + $0x14] sm:$0x1]  ;;  %v4917_v55 = vld [vmem:[%s6794_s0 + $0x2c] sm:$0x1] }
   0x7   :  { %317 = vmatpush.bf16.msra.mxu3 %v4245_v7  ;;  %269 = vmatpush.bf16.msra.mxu2 %v4243_v8  ;;  %v142_v59 = vunpack.c.l.bf16 %v3576_v51  ;;  %v292_v63 = vunpack.c.l.bf16 %v4917_v55  ;;  %v4254_v51 = vld [vmem:[%s6793_s1 + $0x38] sm:$0xff] }
   0x8   :  { %v24_v9 = vld [vmem:[#allocation2] sm:$0xff] }
   0x9   :  { %v25_v10 = vld [vmem:[#allocation2 + $0x8] sm:$0xff] }
   0xa   :  { %v27_v11 = vpack.c.bf16 %v25_v10, %v24_v9  ;;  %v26_v12 = vld [vmem:[#allocation2 + $0x10] sm:$0x3] }
   0xb   :  { %v28_v13 = vpack.c.bf16 %v26_v12, %v26_v12  ;;  %710 = vmatpush.bf16.msrb.mxu3 %v4254_v51 }
   0xc   :  { %3569 = vmatmul.msk.bf16.vlgmr.msra.gmra.mxu0 %vm16_vm0, %v27_v11  ;;  %3589 = vmatmul.msk.bf16.vlgmr.msra.gmra.mxu1 %vm16_vm0, %v27_v11 }
   0xd   :  { %3626 = vmatmul.msk.bf16.vlgmr.msra.gmra.mxu3 %vm16_vm0, %v27_v11  ;;  %3609 = vmatmul.msk.bf16.vlgmr.msra.gmra.mxu2 %vm16_vm0, %v27_v11 }
  0x1c   :  { %3570 = vmatmul.msk.bf16.gmra.mxu0 %vm16_vm0, %v28_v13  ;;  %3590 = vmatmul.msk.bf16.gmra.mxu1 %vm16_vm0, %v28_v13 }
  0x1d   :  { %3627 = vmatmul.msk.bf16.gmra.mxu3 %vm16_vm0, %v28_v13  ;;  %3610 = vmatmul.msk.bf16.gmra.mxu2 %vm16_vm0, %v28_v13 }
  0x89   :  { %v67_v18 = vpop.f32.mrf.mxu0  ;;  %v169_v19 = vpop.f32.mrf.mxu1 }
  0x8a   :  { %v76_v20 = vadd.f32 %v4313_v16, %v67_v18  ;;  %v178_v21 = vadd.f32 %v169_v19, %v140_v17 }
  0x8c   :  { %v3571_v23 = vmul.f32 -1.442695, %v76_v20  ;;  %v3591_v24 = vmul.f32 -1.442695, %v178_v21 }
  0x8e   :  { %4401 = vpow2.f32 %v3571_v23 }
  0x8f   :  { %4403 = vpow2.f32 %v3591_v24 }
  0x90   :  { %v319_v28 = vpop.f32.mrf.mxu3  ;;  %v271_v29 = vpop.f32.mrf.mxu2 }
  0x91   :  { %v328_v30 = vadd.f32 %v319_v28, %v290_v25  ;;  %v69_v31 = vpop.f32.mrf.mxu0  ;;  %v171_v32 = vpop.f32.mrf.mxu1  ;;  %v280_v47 = vadd.f32 %v4317_v40, %v271_v29  ;;  %v4248_v25 = vld [vmem:[%s6793_s1 + $0x8] sm:$0xff] }
  0x92   :  { %v77_v34 = vadd.f32 %v4314_v26, %v69_v31  ;;  %v179_v35 = vadd.f32 %v171_v32, %v141_v27  ;;  %v4250_v26 = vld [vmem:[%s6793_s1 + $0x18] sm:$0xff]  ;;  %461 = vmatpush.bf16.msrb.mxu0 %v4248_v25  ;;  %v389_v25 = vld [vmem:[#allocation3 + $0x8] sm:$0xff] }
  0x93   :  { %v3628_v37 = vmul.f32 -1.442695, %v328_v30  ;;  %562 = vmatpush.bf16.msrb.mxu1 %v4250_v26  ;;  %v3596_v26 = vld [vmem:[%s6794_s0 + $0x20] sm:$0x1] }
  0x94   :  { %v4402_v38 = vpop.eup %4401  ;;  %v3572_v39 = vmul.f32 -1.442695, %v77_v34  ;;  %v3592_v43 = vmul.f32 -1.442695, %v179_v35 }
  0x95   :  { %v4404_v41 = vpop.eup %4403  ;;  %v4902_v42 = vadd.f32 1.0, %v4402_v38  ;;  %4405 = vpow2.f32 %v3628_v37 }
  0x96   :  { %v4907_v46 = vadd.f32 1.0, %v4404_v41  ;;  %4407 = vpow2.f32 %v3572_v39  ;;  %v388_v41 = vld [vmem:[#allocation3] sm:$0xff] }
  0x97   :  { %4409 = vrcp.f32 %v4902_v42  ;;  %v100_v2 = vand.u32 2147483647, %v4902_v42  ;;  %v102_v3 = vand.u32 2147483648, %v4902_v42  ;;  %vm96_vm2 = vweird.f32 %v4902_v42 }
  0x98   :  { %4411 = vrcp.f32 %v4907_v46  ;;  %v321_v48 = vpop.f32.mrf.mxu3  ;;  %v273_v49 = vpop.f32.mrf.mxu2  ;;  %v204_v6 = vand.u32 2147483648, %v4907_v46  ;;  %v202_v9 = vand.u32 2147483647, %v4907_v46  ;;  %vm198_vm3 = vweird.f32 %v4907_v46 }
  0x99   :  { %4413 = vpow2.f32 %v3592_v43  ;;  %v329_v52 = vadd.f32 %v321_v48, %v291_v44  ;;  %v72_v53 = vpop.f32.mrf.mxu0  ;;  %v174_v54 = vpop.f32.mrf.mxu1  ;;  %v281_v10 = vadd.f32 %v4318_v58, %v273_v49  ;;  %vm4940_vm4 = vcmp.eq.f32.partialorder %v100_v2, 8.507059e+37 }
  0x9a   :  { %4415 = vtanh.f32 %v280_v47  ;;  %v78_v62 = vadd.f32 %v72_v53, %v34_v50  ;;  %v180_v14 = vadd.f32 %v174_v54, %v142_v59  ;;  %v103_v19 = vor.u32 1.1754944e-38, %v102_v3 }
  0x9b   :  { %v4406_v56 = vpop.eup %4405  ;;  %v3629_v57 = vmul.f32 -1.442695, %v329_v52  ;;  %v205_v23 = vor.u32 1.1754944e-38, %v204_v6  ;;  %vm4951_vm7 = vcmp.eq.f32.partialorder %v202_v9, 8.507059e+37  ;;  %v4252_v52 = vld [vmem:[%s6793_s1 + $0x28] sm:$0xff] }
  0x9c   :  { %v4408_v60 = vpop.eup %4407  ;;  %v4919_v61 = vadd.f32 1.0, %v4406_v56  ;;  %v3573_v13 = vmul.f32 -1.442695, %v78_v62  ;;  %v3593_v33 = vmul.f32 -1.442695, %v180_v14  ;;  %663 = vmatpush.bf16.msrb.mxu2 %v4252_v52  ;;  %v4253_v14 = vld [vmem:[%s6793_s1 + $0x30] sm:$0xff] }
  0x9d   :  { %v4410_v0 = vpop.eup %4409  ;;  %v4922_v1 = vadd.f32 1.0, %v4408_v60  ;;  %4417 = vpow2.f32 %v3629_v57  ;;  %711 = vmatpush.bf16.msrb.mxu3 %v4253_v14  ;;  %v390_v14 = vld [vmem:[#allocation3 + $0x10] sm:$0x3] }
  0x9e   :  { %v4412_v4 = vpop.eup %4411  ;;  %v92_v5 = vmul.f32 %v4410_v0, %v4902_v42  ;;  %4419 = vrcp.f32 %v4919_v61  ;;  %vm97_vm5 = vweird.f32 %v4410_v0  ;;  %v352_v36 = vand.u32 2147483647, %v4919_v61 }
  0x9f   :  { %v4414_v7 = vpop.eup %4413  ;;  %v194_v8 = vmul.f32 %v4412_v4, %v4907_v46  ;;  %4421 = vrcp.f32 %v4922_v1  ;;  %vm199_vm6 = vweird.f32 %v4412_v4  ;;  %v354_v37 = vand.u32 2147483648, %v4919_v61  ;;  %vm98_vm8 = vmor %vm96_vm2, %vm97_vm5 }
  0xa0   :  { %v93_v11 = vsub.f32 1.0, %v92_v5  ;;  %v4933_v12 = vadd.f32 1.0, %v4414_v7  ;;  %v4935_v15 = vpop.f32.mrf.mxu3  ;;  %v4937_v16 = vpop.f32.mrf.mxu2  ;;  %vm200_vm9 = vmor %vm198_vm3, %vm199_vm6  ;;  %vm348_vm10 = vweird.f32 %v4919_v61  ;;  %vm111_vm11 = vweird.f32 %v4922_v1 }
  0xa1   :  { %v195_v17 = vsub.f32 1.0, %v194_v8  ;;  %v74_v20 = vpop.f32.mrf.mxu0  ;;  %v176_v21 = vpop.f32.mrf.mxu1  ;;  %v117_v45 = vand.u32 2147483648, %v4922_v1  ;;  %v115_v50 = vand.u32 2147483647, %v4922_v1 }
  0xa2   :  { %v4416_v22 = vpop.eup %4415  ;;  %4423 = vrcp.f32 %v4933_v12  ;;  %v94_v24 = vmul.f32 %v4410_v0, %v93_v11  ;;  %v219_v59 = vand.u32 2147483648, %v4933_v12  ;;  %v217_v2 = vand.u32 2147483647, %v4933_v12  ;;  %v4247_v11 = vld [vmem:[%s6793_s1] sm:$0xff] }
  0xa3   :  { %v4418_v27 = vpop.eup %4417  ;;  %v196_v28 = vmul.f32 %v4412_v4, %v195_v17  ;;  %4425 = vtanh.f32 %v281_v10  ;;  %v118_v6 = vor.u32 1.1754944e-38, %v117_v45  ;;  %v330_v10 = vadd.f32 %v4935_v15, %v292_v63  ;;  %v4251_v63 = vld [vmem:[%s6793_s1 + $0x20] sm:$0xff]  ;;  %462 = vmatpush.bf16.msrb.mxu0 %v4247_v11 }
  0xa4   :  { %v4955_v30 = vpop.eup %4419  ;;  %v95_v31 = vadd.f32 %v4410_v0, %v94_v24  ;;  %v4957_v32 = vadd.f32 1.0, %v4418_v27  ;;  %4427 = vpow2.f32 %v3573_v13  ;;  %v4249_v13 = vld [vmem:[%s6793_s1 + $0x10] sm:$0xff]  ;;  %vm213_vm2 = vweird.f32 %v4933_v12  ;;  %664 = vmatpush.bf16.msrb.mxu2 %v4251_v63 }
  0xa5   :  { %v4959_v34 = vpop.eup %4421  ;;  %v344_v35 = vmul.f32 %v4955_v30, %v4919_v61  ;;  %v197_v38 = vadd.f32 %v4412_v4, %v196_v28  ;;  %vm349_vm12 = vweird.f32 %v4955_v30  ;;  %vm116_vm3 = vcmp.eq.f32.partialorder %v115_v50, 8.507059e+37  ;;  %563 = vmatpush.bf16.msrb.mxu1 %v4249_v13 }
  0xa6   :  { %v107_v39 = vmul.f32 %v4959_v34, %v4922_v1  ;;  %v99_v40 = vsel %vm98_vm8, %v4410_v0, %v95_v31  ;;  %4429 = vrcp.f32 %v4957_v32  ;;  %vm112_vm13 = vweird.f32 %v4959_v34 }
  0xa7   :  { %v345_v43 = vsub.f32 1.0, %v344_v35  ;;  %v104_v42 = vsel %vm4940_vm4, %v103_v19, %v99_v40  ;;  %v201_v44 = vsel %vm200_vm9, %v4412_v4, %v197_v38  ;;  %4431 = vpow2.f32 %v3593_v33  ;;  %vm113_vm15 = vmor %vm111_vm11, %vm112_vm13 }
  0xa8   :  { %v4979_v46 = vpop.eup %4423  ;;  %v108_v47 = vsub.f32 1.0, %v107_v39  ;;  %v206_v48 = vsel %vm4951_vm7, %v205_v23, %v201_v44  ;;  %v394_v49 = vmul.f32 %v4416_v22, %v104_v42  ;;  %v326_v53 = vpop.f32.mrf.mxu3  ;;  %vm5035_vm4 = vmor %vm348_vm10, %vm349_vm12  ;;  %v3630_v21 = vmul.f32 -1.442695, %v330_v10 }
  0xa9   :  { %v278_v54 = vpop.f32.mrf.mxu2  ;;  %v4426_v56 = vpop.eup %4425  ;;  %v346_v57 = vmul.f32 %v4955_v30, %v345_v43  ;;  %v209_v58 = vmul.f32 %v4979_v46, %v4933_v12  ;;  %v391_v60 = vmul.f32 %v388_v41, %v206_v48  ;;  %vm214_vm14 = vweird.f32 %v4979_v46 }
  0xaa   :  { %v4428_v62 = vpop.eup %4427  ;;  %v109_v0 = vmul.f32 %v4959_v34, %v108_v47  ;;  %v355_v23 = vor.u32 1.1754944e-38, %v354_v37  ;;  %vm215_vm5 = vmor %vm213_vm2, %vm214_vm14  ;;  %v220_v24 = vor.u32 1.1754944e-38, %v219_v59  ;;  %vm218_vm6 = vcmp.eq.f32.partialorder %v217_v2, 8.507059e+37 }
  0xab   :  { %v347_v3 = vadd.f32 %v4955_v30, %v346_v57  ;;  %v210_v4 = vsub.f32 1.0, %v209_v58  ;;  %v397_v5 = vadd.f32 %v394_v49, %v391_v60  ;;  %v5002_v9 = vadd.f32 1.0, %v4428_v62 }
  0xac   :  { %v4999_v7 = vpop.eup %4429  ;;  %v110_v8 = vadd.f32 %v4959_v34, %v109_v0  ;;  %vm353_vm7 = vcmp.eq.f32.partialorder %v352_v36, 8.507059e+37  ;;  %v244_v37 = vunpack.c.l.bf16 %v3596_v26  ;;  %vm416_vm8 = vcmask 257024  }
  0xad   :  { %v211_v17 = vmul.f32 %v4979_v46, %v210_v4  ;;  %4433 = vtanh.f32 %v397_v5  ;;  %406 = vst.msk [vmem:[#allocation3] sm:$0xff] %vm16_vm0, %v397_v5  ;;  %v359_v55 = vmul.f32 %v4999_v7, %v4957_v32  ;;  %v351_v22 = vsel %vm5035_vm4, %v4955_v30, %v347_v3  ;;  %v4432_v29 = vpop.eup %4431 }
  0xae   :  { %v114_v15 = vsel %vm113_vm15, %v4959_v34, %v110_v8  ;;  %4435 = vrcp.f32 %v5002_v9  ;;  %v356_v33 = vsel %vm353_vm7, %v355_v23, %v351_v22  ;;  %v192_v35 = vadd.f32 1.0, %v4432_v29 }
  0xaf   :  { %v360_v18 = vsub.f32 1.0, %v359_v55  ;;  %v119_v19 = vsel %vm116_vm3, %v118_v6, %v114_v15  ;;  %v212_v20 = vadd.f32 %v4979_v46, %v211_v17  ;;  %4437 = vpow2.f32 %v3630_v21 }
  0xb0   :  { %v395_v28 = vmul.f32 %v4426_v56, %v119_v19  ;;  %vm363_vm9 = vweird.f32 %v4957_v32  ;;  %v367_v40 = vand.u32 2147483647, %v4957_v32  ;;  %4439 = vrcp.f32 %v192_v35 }
  0xb1   :  { %v216_v27 = vsel %vm215_vm5, %v4979_v46, %v212_v20  ;;  %v361_v30 = vmul.f32 %v4999_v7, %v360_v18  ;;  %vm364_vm10 = vweird.f32 %v4999_v7  ;;  %v369_v42 = vand.u32 2147483648, %v4957_v32 }
  0xb2   :  { %v221_v31 = vsel %vm218_vm6, %v220_v24, %v216_v27  ;;  %vm126_vm11 = vweird.f32 %v5002_v9  ;;  %v282_v46 = vadd.f32 %v4937_v16, %v244_v37  ;;  %v130_v48 = vand.u32 2147483647, %v5002_v9  ;;  %vm365_vm13 = vmor %vm363_vm9, %vm364_vm10 }
  0xb3   :  { %v4434_v12 = vpop.eup %4433  ;;  %v392_v34 = vmul.f32 %v389_v25, %v221_v31  ;;  %v362_v36 = vadd.f32 %v4999_v7, %v361_v30  ;;  %v132_v49 = vand.u32 2147483648, %v5002_v9  ;;  %v370_v16 = vor.u32 1.1754944e-38, %v369_v42 }
  0xb4   :  { %v4436_v38 = vpop.eup %4435  ;;  %v403_v39 = vmul.f32 %v4434_v12, %v356_v33  ;;  %vm368_vm15 = vcmp.eq.f32.partialorder %v367_v40, 8.507059e+37  ;;  %vm5079_vm2 = vcmp.eq.f32.partialorder %v130_v48, 8.507059e+37  ;;  %vm228_vm3 = vweird.f32 %v192_v35  ;;  %v4384_v33 = vld [vmem:[%s6794_s0 + $0x30] sm:$0xff]   ;;  %v4385_v48 = vld [vmem:[%s6794_s0 + $0x48] sm:$0xff]  }
  0xb5   :  { %v398_v41 = vadd.f32 %v395_v28, %v392_v34  ;;  %v122_v43 = vmul.f32 %v4436_v38, %v5002_v9  ;;  %v4438_v44 = vpop.eup %4437  ;;  %vm127_vm12 = vweird.f32 %v4436_v38  ;;  %v366_v51 = vsel %vm365_vm13, %v4999_v7, %v362_v36  ;;  %v3647_v34 = vld [vmem:[%s6794_s0 + $0x3c] sm:$0xff]  }
  0xb6   :  { %410 = vst.msk [vmem:[#allocation2] sm:$0xff] %vm16_vm0, %v403_v39  ;;  %v413_v61 = vpack.c.bf16 %v403_v39, %v403_v39  ;;  %v342_v47 = vadd.f32 1.0, %v4438_v44  ;;  %v4440_v52 = vpop.eup %4439  ;;  %vm5075_vm14 = vmor %vm126_vm11, %vm127_vm12  ;;  %v133_v32 = vor.u32 1.1754944e-38, %v132_v49  ;;  %v371_v59 = vsel %vm368_vm15, %v370_v16, %v366_v51 }
  0xb7   :  { %4441 = vtanh.f32 %v398_v41  ;;  %407 = vst.msk [vmem:[#allocation3 + $0x8] sm:$0xff] %vm16_vm0, %v398_v41  ;;  %v123_v45 = vsub.f32 1.0, %v122_v43  ;;  %v224_v56 = vmul.f32 %v4440_v52, %v192_v35  ;;  %v234_v60 = vand.u32 2147483648, %v192_v35  ;;  %v3684_v43 = vld [vmem:[%s6794_s0 + $0x54] sm:$0xff]  }
  0xb8   :  { %417 = vst.msk [vmem:[%s6795_s2] sm:$0xf] %vm416_vm8, %v413_v61  ;;  %4443 = vrcp.f32 %v342_v47  ;;  %v232_v62 = vand.u32 2147483647, %v192_v35  ;;  %vm229_vm4 = vweird.f32 %v4440_v52  ;;  %vm378_vm7 = vweird.f32 %v342_v47 }
  0xb9   :  { %v124_v50 = vmul.f32 %v4436_v38, %v123_v45  ;;  %4445 = vtanh.f32 %v282_v46  ;;  %v225_v2 = vsub.f32 1.0, %v224_v56  ;;  %vm230_vm5 = vmor %vm228_vm3, %vm229_vm4  ;;  %v235_v8 = vor.u32 1.1754944e-38, %v234_v60 }
  0xba   :  { %vm233_vm6 = vcmp.eq.f32.partialorder %v232_v62, 8.507059e+37  ;;  %v384_v1 = vand.u32 2147483648, %v342_v47  ;;  %v382_v20 = vand.u32 2147483647, %v342_v47  ;;  %vm419_vm12 = vcmask 253952  }
  0xbb   :  { %v125_v53 = vadd.f32 %v4436_v38, %v124_v50  ;;  %v226_v6 = vmul.f32 %v4440_v52, %v225_v2  ;;  %v4321_v35 = vunpack.c.l.bf16 %v4384_v33  ;;  %v537_v37 = vunpack.c.l.bf16 %v3647_v34 }
  0xbc   :  { %v385_v25 = vor.u32 1.1754944e-38, %v384_v1  ;;  %vm383_vm11 = vcmp.eq.f32.partialorder %v382_v20, 8.507059e+37  ;;  %v685_v42 = vunpack.c.l.bf16 %v3684_v43  ;;  %v4322_v44 = vunpack.c.h.bf16 %v4384_v33 }
  0xbd   :  { %v4442_v58 = vpop.eup %4441  ;;  %v129_v3 = vsel %vm5075_vm14, %v4436_v38, %v125_v53  ;;  %v227_v11 = vadd.f32 %v4440_v52, %v226_v6  ;;  %v421_v21 = vld [vmem:[#allocation2] sm:$0xff]  ;;  %v538_v45 = vunpack.c.h.bf16 %v3647_v34  ;;  %v4325_v56 = vunpack.c.l.bf16 %v4385_v48 }
  0xbe   :  { %v404_v0 = vmul.f32 %v4442_v58, %v371_v59  ;;  %v4444_v4 = vpop.eup %4443  ;;  %v134_v10 = vsel %vm5079_vm2, %v133_v32, %v129_v3  ;;  %v686_v62 = vunpack.c.h.bf16 %v3684_v43  ;;  %v3633_v3 = vld [vmem:[%s6794_s0 + $0x38] sm:$0x1] }
  0xbf   :  { %v4446_v7 = vpop.eup %4445  ;;  %v374_v9 = vmul.f32 %v4444_v4, %v342_v47  ;;  %v231_v17 = vsel %vm230_vm5, %v4440_v52, %v227_v11  ;;  %vm379_vm9 = vweird.f32 %v4444_v4  ;;  %v432_v11 = vunpack.c.l.bf16 %v3633_v3 }
  0xc0   :  { %411 = vst.msk [vmem:[#allocation2 + $0x8] sm:$0xff] %vm16_vm0, %v404_v0  ;;  %v414_v5 = vpack.c.bf16 %v404_v0, %v404_v0  ;;  %v396_v55 = vmul.f32 %v4446_v7, %v134_v10  ;;  %v236_v15 = vsel %vm233_vm6, %v235_v8, %v231_v17  ;;  %vm380_vm10 = vmor %vm378_vm7, %vm379_vm9  ;;  %v4326_v8 = vunpack.c.h.bf16 %v4385_v48 }
  0xc1   :  { %v375_v13 = vsub.f32 1.0, %v374_v9  ;;  %v393_v18 = vmul.f32 %v390_v14, %v236_v15 }
  0xc2   :  { %418 = vst.msk [vmem:[%s6795_s2 + $0x4] sm:$0xf] %vm416_vm8, %v414_v5  ;;  %v5133_v5 = vld [vmem:[%s6794_s0 + $0x5c] sm:$0x1] }
  0xc3   :  { %v376_v63 = vmul.f32 %v4444_v4, %v375_v13  ;;  %v399_v23 = vadd.f32 %v396_v55, %v393_v18  ;;  %v687_v15 = vunpack.c.l.bf16 %v5133_v5 }
  0xc5   :  { %v377_v19 = vadd.f32 %v4444_v4, %v376_v63  ;;  %4447 = vtanh.f32 %v399_v23  ;;  %409 = vst.msk [vmem:[#allocation3 + $0x10] sm:$0x3] %vm19_vm1, %v399_v23 }
  0xc7   :  { %v422_v22 = vld [vmem:[#allocation2 + $0x8] sm:$0xff]  ;;  %v381_v26 = vsel %vm380_vm10, %v4444_v4, %v377_v19  ;;  %v3649_v4 = vld [vmem:[%s6794_s0 + $0x44] sm:$0x1] }
  0xc8   :  { %v424_v24 = vpack.c.bf16 %v422_v22, %v421_v21  ;;  %v386_v27 = vsel %vm383_vm11, %v385_v25, %v381_v26  ;;  %v539_v55 = vunpack.c.l.bf16 %v3649_v4 }
  0xca   :  { %3642 = vmatmul.msk.bf16.vlgmr.msrb.gmra.mxu0 %vm16_vm0, %v424_v24  ;;  %3662 = vmatmul.msk.bf16.vlgmr.msrb.gmra.mxu1 %vm16_vm0, %v424_v24 }
  0xcb   :  { %3682 = vmatmul.msk.bf16.vlgmr.msrb.gmra.mxu2 %vm16_vm0, %v424_v24  ;;  %3699 = vmatmul.msk.bf16.vlgmr.msrb.gmra.mxu3 %vm16_vm0, %v424_v24  ;;  %v4448_v28 = vpop.eup %4447 }
  0xcc   :  { %v405_v29 = vmul.f32 %v4448_v28, %v386_v27 }
  0xce   :  { %412 = vst.msk [vmem:[#allocation2 + $0x10] sm:$0x3] %vm19_vm1, %v405_v29  ;;  %v415_v30 = vpack.c.bf16 %v405_v29, %v405_v29 }
  0xd0   :  { %420 = vst.msk [vmem:[%s6795_s2 + $0x8] sm:$0x1] %vm419_vm12, %v415_v30 }
  0xd5   :  { %v423_v31 = vld [vmem:[#allocation2 + $0x10] sm:$0x3] }
  0xd6   :  { %v425_v12 = vpack.c.bf16 %v423_v31, %v423_v31 }
  0xda   :  { %3643 = vmatmul.msk.bf16.gmra.mxu0 %vm16_vm0, %v425_v12  ;;  %3663 = vmatmul.msk.bf16.gmra.mxu1 %vm16_vm0, %v425_v12 }
  0xdb   :  { %3700 = vmatmul.msk.bf16.gmra.mxu3 %vm16_vm0, %v425_v12  ;;  %3683 = vmatmul.msk.bf16.gmra.mxu2 %vm16_vm0, %v425_v12 }
 0x147   :  { %v464_v38 = vpop.f32.mrf.mxu0  ;;  %v565_v39 = vpop.f32.mrf.mxu1 }
 0x148   :  { %v473_v40 = vadd.f32 %v4321_v35, %v464_v38  ;;  %v574_v41 = vadd.f32 %v565_v39, %v537_v37  ;;  %v5159_v37 = vld [vmem:[%s6794_s0 + $0x50] sm:$0x1] }
 0x14a   :  { %v3644_v61 = vmul.f32 -1.442695, %v473_v40  ;;  %v3664_v36 = vmul.f32 -1.442695, %v574_v41 }
 0x14c   :  { %4449 = vpow2.f32 %v3644_v61 }
 0x14d   :  { %4451 = vpow2.f32 %v3664_v36 }
 0x14e   :  { %v666_v46 = vpop.f32.mrf.mxu2  ;;  %v713_v47 = vpop.f32.mrf.mxu3 }
 0x14f   :  { %v722_v49 = vadd.f32 %v713_v47, %v685_v42  ;;  %v466_v50 = vpop.f32.mrf.mxu0  ;;  %v567_v51 = vpop.f32.mrf.mxu1  ;;  %v675_v0 = vadd.f32 %v4325_v56, %v666_v46  ;;  %v640_v46 = vunpack.c.l.bf16 %v5159_v37 }
 0x150   :  { %v474_v52 = vadd.f32 %v4322_v44, %v466_v50  ;;  %v575_v16 = vadd.f32 %v567_v51, %v538_v45 }
 0x151   :  { %v3701_v53 = vmul.f32 -1.442695, %v722_v49 }
 0x152   :  { %v4450_v54 = vpop.eup %4449  ;;  %v3645_v57 = vmul.f32 -1.442695, %v474_v52  ;;  %v3665_v59 = vmul.f32 -1.442695, %v575_v16 }
 0x153   :  { %v4452_v32 = vpop.eup %4451  ;;  %v5118_v58 = vadd.f32 1.0, %v4450_v54  ;;  %4453 = vpow2.f32 %v3701_v53 }
 0x154   :  { %v5120_v60 = vadd.f32 1.0, %v4452_v32  ;;  %4455 = vpow2.f32 %v3645_v57 }
 0x155   :  { %4457 = vrcp.f32 %v5118_v58  ;;  %v497_v7 = vand.u32 2147483647, %v5118_v58  ;;  %vm493_vm13 = vweird.f32 %v5118_v58  ;;  %v499_v19 = vand.u32 2147483648, %v5118_v58 }
 0x156   :  { %4459 = vrcp.f32 %v5120_v60  ;;  %v715_v2 = vpop.f32.mrf.mxu3  ;;  %v668_v9 = vpop.f32.mrf.mxu2  ;;  %v600_v18 = vand.u32 2147483648, %v5120_v60  ;;  %vm594_vm14 = vweird.f32 %v5120_v60  ;;  %v598_v23 = vand.u32 2147483647, %v5120_v60 }
 0x157   :  { %4461 = vpow2.f32 %v3665_v59  ;;  %v723_v10 = vadd.f32 %v715_v2, %v686_v62  ;;  %v469_v17 = vpop.f32.mrf.mxu0  ;;  %v570_v63 = vpop.f32.mrf.mxu1  ;;  %vm5149_vm15 = vcmp.eq.f32.partialorder %v497_v7, 8.507059e+37  ;;  %v676_v27 = vadd.f32 %v4326_v8, %v668_v9  ;;  %v782_v62 = vld [vmem:[#allocation3] sm:$0xff]  ;;  %v4256_v9 = vld [vmem:[%s6793_s1 + $0x8] sm:$0xff] }
 0x158   :  { %4463 = vtanh.f32 %v675_v0  ;;  %v475_v31 = vadd.f32 %v469_v17, %v432_v11  ;;  %v601_v33 = vor.u32 1.1754944e-38, %v600_v18  ;;  %v500_v34 = vor.u32 1.1754944e-38, %v499_v19  ;;  %v4260_v18 = vld [vmem:[%s6793_s1 + $0x28] sm:$0xff]  ;;  %853 = vmatpush.bf16.msra.mxu0 %v4256_v9 }
 0x159   :  { %v4454_v6 = vpop.eup %4453  ;;  %v3702_v28 = vmul.f32 -1.442695, %v723_v10  ;;  %v576_v35 = vadd.f32 %v570_v63, %v539_v55  ;;  %vm5163_vm4 = vcmp.eq.f32.partialorder %v598_v23, 8.507059e+37  ;;  %v4258_v10 = vld [vmem:[%s6793_s1 + $0x18] sm:$0xff]  ;;  %1055 = vmatpush.bf16.msra.mxu2 %v4260_v18 }
 0x15a   :  { %v4456_v13 = vpop.eup %4455  ;;  %v5136_v14 = vadd.f32 1.0, %v4454_v6  ;;  %v3646_v45 = vmul.f32 -1.442695, %v475_v31  ;;  %954 = vmatpush.bf16.msra.mxu1 %v4258_v10  ;;  %v4257_v31 = vld [vmem:[%s6793_s1 + $0x10] sm:$0xff] }
 0x15b   :  { %v4458_v1 = vpop.eup %4457  ;;  %v5142_v20 = vadd.f32 1.0, %v4456_v13  ;;  %v3666_v54 = vmul.f32 -1.442695, %v576_v35  ;;  %v4259_v35 = vld [vmem:[%s6793_s1 + $0x20] sm:$0xff] }
 0x15c   :  { %v4460_v21 = vpop.eup %4459  ;;  %v489_v22 = vmul.f32 %v4458_v1, %v5118_v58  ;;  %4465 = vrcp.f32 %v5136_v14  ;;  %vm494_vm2 = vweird.f32 %v4458_v1  ;;  %v748_v40 = vand.u32 2147483648, %v5136_v14 }
 0x15d   :  { %v4462_v24 = vpop.eup %4461  ;;  %v590_v25 = vmul.f32 %v4460_v21, %v5120_v60  ;;  %4467 = vrcp.f32 %v5142_v20  ;;  %vm595_vm3 = vweird.f32 %v4460_v21  ;;  %vm495_vm5 = vmor %vm493_vm13, %vm494_vm2  ;;  %v746_v51 = vand.u32 2147483647, %v5136_v14  ;;  %1056 = vmatpush.bf16.msra.mxu2 %v4259_v35 }
 0x15e   :  { %v490_v29 = vsub.f32 1.0, %v489_v22  ;;  %v5154_v30 = vadd.f32 1.0, %v4462_v24  ;;  %v4464_v38 = vpop.eup %4463  ;;  %v718_v61 = vpop.f32.mrf.mxu3  ;;  %vm508_vm6 = vweird.f32 %v5142_v20  ;;  %vm596_vm7 = vmor %vm594_vm14, %vm595_vm3  ;;  %vm742_vm9 = vweird.f32 %v5136_v14  ;;  %955 = vmatpush.bf16.msra.mxu1 %v4257_v31 }
 0x15f   :  { %v591_v12 = vsub.f32 1.0, %v590_v25  ;;  %v5167_v36 = vpop.f32.mrf.mxu2  ;;  %v471_v47 = vpop.f32.mrf.mxu0  ;;  %v5185_v53 = vor.u32 1.1754944e-38, %v748_v40  ;;  %v512_v2 = vand.u32 2147483647, %v5142_v20  ;;  %v514_v17 = vand.u32 2147483648, %v5142_v20 }
 0x160   :  { %v491_v39 = vmul.f32 %v4458_v1, %v490_v29  ;;  %4469 = vrcp.f32 %v5154_v30  ;;  %v572_v48 = vpop.f32.mrf.mxu1  ;;  %v615_v13 = vand.u32 2147483648, %v5154_v30  ;;  %v613_v55 = vand.u32 2147483647, %v5154_v30  ;;  %v4255_v29 = vld [vmem:[%s6793_s1] sm:$0xff] }
 0x161   :  { %v592_v41 = vmul.f32 %v4460_v21, %v591_v12  ;;  %4471 = vtanh.f32 %v676_v27  ;;  %v724_v63 = vadd.f32 %v718_v61, %v687_v15  ;;  %v4261_v12 = vld [vmem:[%s6793_s1 + $0x30] sm:$0xff]  ;;  %vm609_vm14 = vweird.f32 %v5154_v30  ;;  %854 = vmatpush.bf16.msra.mxu0 %v4255_v29 }
 0x162   :  { %v5169_v42 = vpop.eup %4465  ;;  %v492_v44 = vadd.f32 %v4458_v1, %v491_v39  ;;  %4473 = vpow2.f32 %v3702_v28  ;;  %vm513_vm2 = vcmp.eq.f32.partialorder %v512_v2, 8.507059e+37  ;;  %v677_v48 = vadd.f32 %v5167_v36, %v640_v46 }
 0x163   :  { %v593_v49 = vadd.f32 %v4460_v21, %v592_v41  ;;  %v738_v50 = vmul.f32 %v5169_v42, %v5136_v14  ;;  %v5179_v52 = vpop.eup %4467  ;;  %4475 = vpow2.f32 %v3646_v45  ;;  %vm743_vm11 = vweird.f32 %v5169_v42 }
 0x164   :  { %v496_v16 = vsel %vm495_vm5, %v4458_v1, %v492_v44  ;;  %v504_v58 = vmul.f32 %v5179_v52, %v5142_v20  ;;  %4477 = vpow2.f32 %v3666_v54  ;;  %v4262_v1 = vld [vmem:[%s6793_s1 + $0x38] sm:$0xff]  ;;  %vm509_vm10 = vweird.f32 %v5179_v52  ;;  %vm5248_vm3 = vmor %vm742_vm9, %vm743_vm11 }
 0x165   :  { %v501_v56 = vsel %vm5149_vm15, %v500_v34, %v496_v16  ;;  %v597_v57 = vsel %vm596_vm7, %v4460_v21, %v593_v49  ;;  %v739_v32 = vsub.f32 1.0, %v738_v50  ;;  %v3703_v26 = vmul.f32 -1.442695, %v724_v63  ;;  %1102 = vmatpush.bf16.msra.mxu3 %v4262_v1  ;;  %vm510_vm15 = vmor %vm508_vm6, %vm509_vm10 }
 0x166   :  { %v5191_v59 = vpop.eup %4469  ;;  %v602_v60 = vsel %vm5163_vm4, %v601_v33, %v597_v57  ;;  %v788_v0 = vmul.f32 %v4464_v38, %v501_v56  ;;  %v505_v7 = vsub.f32 1.0, %v504_v58  ;;  %v720_v24 = vpop.f32.mrf.mxu3  ;;  %v515_v34 = vor.u32 1.1754944e-38, %v514_v17 }
 0x167   :  { %v4472_v3 = vpop.eup %4471  ;;  %v785_v4 = vmul.f32 %v782_v62, %v602_v60  ;;  %v740_v6 = vmul.f32 %v5169_v42, %v739_v32  ;;  %v605_v8 = vmul.f32 %v5191_v59, %v5154_v30  ;;  %v673_v23 = vpop.f32.mrf.mxu2  ;;  %vm610_vm13 = vweird.f32 %v5191_v59 }
 0x168   :  { %v4474_v11 = vpop.eup %4473  ;;  %v506_v22 = vmul.f32 %v5179_v52, %v505_v7  ;;  %v616_v30 = vor.u32 1.1754944e-38, %v615_v13  ;;  %vm611_vm4 = vmor %vm609_vm14, %vm610_vm13  ;;  %vm614_vm5 = vcmp.eq.f32.partialorder %v613_v55, 8.507059e+37  ;;  %vm747_vm6 = vcmp.eq.f32.partialorder %v746_v51, 8.507059e+37 }
 0x169   :  { %v791_v19 = vadd.f32 %v788_v0, %v785_v4  ;;  %v606_v21 = vsub.f32 1.0, %v605_v8  ;;  %v4476_v5 = vpop.eup %4475  ;;  %v741_v15 = vadd.f32 %v5169_v42, %v740_v6  ;;  %v5220_v25 = vadd.f32 1.0, %v4474_v11  ;;  %1103 = vmatpush.bf16.msra.mxu3 %v4261_v12  ;;  %v784_v12 = vld [vmem:[#allocation3 + $0x10] sm:$0x3] }
 0x16a   :  { %v507_v28 = vadd.f32 %v5179_v52, %v506_v22  ;;  %v4478_v33 = vpop.eup %4477  ;;  %v5254_v40 = vadd.f32 1.0, %v4476_v5 }
 0x16b   :  { %4479 = vtanh.f32 %v791_v19  ;;  %800 = vst.msk [vmem:[#allocation3] sm:$0xff] %vm16_vm0, %v791_v19  ;;  %v607_v27 = vmul.f32 %v5191_v59, %v606_v21  ;;  %v745_v41 = vsel %vm5248_vm3, %v5169_v42, %v741_v15  ;;  %v5261_v61 = vadd.f32 1.0, %v4478_v33  ;;  %v783_v42 = vld [vmem:[#allocation3 + $0x8] sm:$0xff] }
 0x16c   :  { %4481 = vrcp.f32 %v5220_v25  ;;  %v511_v20 = vsel %vm510_vm15, %v5179_v52, %v507_v28  ;;  %v750_v50 = vsel %vm747_vm6, %v5185_v53, %v745_v41  ;;  %vm757_vm7 = vweird.f32 %v5220_v25 }
 0x16d   :  { %v608_v39 = vadd.f32 %v5191_v59, %v607_v27  ;;  %v516_v43 = vsel %vm513_vm2, %v515_v34, %v511_v20  ;;  %4483 = vpow2.f32 %v3703_v26  ;;  %v761_v51 = vand.u32 2147483647, %v5220_v25 }
 0x16e   :  { %v789_v45 = vmul.f32 %v4472_v3, %v516_v43  ;;  %4485 = vrcp.f32 %v5254_v40  ;;  %v763_v46 = vand.u32 2147483648, %v5220_v25  ;;  %vm624_vm9 = vweird.f32 %v5261_v61 }
 0x16f   :  { %v612_v44 = vsel %vm611_vm4, %v5191_v59, %v608_v39  ;;  %4487 = vrcp.f32 %v5261_v61  ;;  %v630_v60 = vand.u32 2147483648, %v5261_v61  ;;  %v529_v62 = vand.u32 2147483648, %v5254_v40 }
 0x170   :  { %v617_v47 = vsel %vm614_vm5, %v616_v30, %v612_v44  ;;  %4489 = vtanh.f32 %v677_v48  ;;  %vm523_vm11 = vweird.f32 %v5254_v40  ;;  %v527_v4 = vand.u32 2147483647, %v5254_v40 }
 0x171   :  { %v4480_v49 = vpop.eup %4479  ;;  %v786_v52 = vmul.f32 %v783_v42, %v617_v47  ;;  %v628_v8 = vand.u32 2147483647, %v5261_v61  ;;  %v764_v10 = vor.u32 1.1754944e-38, %v763_v46  ;;  %vm762_vm2 = vcmp.eq.f32.partialorder %v761_v51, 8.507059e+37 }
 0x172   :  { %v4482_v16 = vpop.eup %4481  ;;  %v797_v54 = vmul.f32 %v4480_v49, %v750_v50  ;;  %v530_v1 = vor.u32 1.1754944e-38, %v529_v62  ;;  %v631_v21 = vor.u32 1.1754944e-38, %v630_v60  ;;  %vm528_vm5 = vcmp.eq.f32.partialorder %v527_v4, 8.507059e+37 }
 0x173   :  { %v792_v56 = vadd.f32 %v789_v45, %v786_v52  ;;  %v753_v57 = vmul.f32 %v4482_v16, %v5220_v25  ;;  %v4484_v32 = vpop.eup %4483  ;;  %vm758_vm10 = vweird.f32 %v4482_v16  ;;  %vm629_vm6 = vcmp.eq.f32.partialorder %v628_v8, 8.507059e+37  ;;  %v4386_v52 = vld [vmem:[%s6794_s0 + $0x60] sm:$0xff]  }
 0x174   :  { %803 = vst.msk [vmem:[#allocation2] sm:$0xff] %vm16_vm0, %v797_v54  ;;  %v806_v14 = vpack.c.bf16 %v797_v54, %v797_v54  ;;  %v4486_v37 = vpop.eup %4485  ;;  %v5278_v53 = vadd.f32 1.0, %v4484_v32  ;;  %vm759_vm15 = vmor %vm757_vm7, %vm758_vm10  ;;  %v4329_v54 = vunpack.c.l.bf16 %v4386_v52 }
 0x175   :  { %4491 = vtanh.f32 %v792_v56  ;;  %801 = vst.msk [vmem:[#allocation3 + $0x8] sm:$0xff] %vm16_vm0, %v792_v56  ;;  %v754_v36 = vsub.f32 1.0, %v753_v57  ;;  %v4488_v58 = vpop.eup %4487  ;;  %v519_v59 = vmul.f32 %v4486_v37, %v5254_v40  ;;  %vm524_vm13 = vweird.f32 %v4486_v37 }
 0x176   :  { %3704 = vst.msk [vmem:[%s6795_s2 + $0xc] sm:$0xf] %vm416_vm8, %v806_v14  ;;  %v620_v2 = vmul.f32 %v4488_v58, %v5261_v61  ;;  %4493 = vrcp.f32 %v5278_v53  ;;  %vm625_vm14 = vweird.f32 %v4488_v58  ;;  %v4490_v9 = vpop.eup %4489  ;;  %vm5297_vm3 = vmor %vm523_vm11, %vm524_vm13  ;;  %vm772_vm7 = vweird.f32 %v5278_v53 }
 0x177   :  { %v755_v0 = vmul.f32 %v4482_v16, %v754_v36  ;;  %v520_v3 = vsub.f32 1.0, %v519_v59  ;;  %vm5303_vm4 = vmor %vm624_vm9, %vm625_vm14  ;;  %v778_v34 = vand.u32 2147483648, %v5278_v53  ;;  %v776_v30 = vand.u32 2147483647, %v5278_v53 }
 0x178   :  { %v621_v7 = vsub.f32 1.0, %v620_v2 }
 0x179   :  { %v756_v6 = vadd.f32 %v4482_v16, %v755_v0  ;;  %v521_v11 = vmul.f32 %v4486_v37, %v520_v3  ;;  %v779_v40 = vor.u32 1.1754944e-38, %v778_v34  ;;  %vm777_vm11 = vcmp.eq.f32.partialorder %v776_v30, 8.507059e+37  ;;  %v4387_v0 = vld [vmem:[%s6794_s0 + $0x78] sm:$0xff]  }
 0x17a   :  { %v622_v55 = vmul.f32 %v4488_v58, %v621_v7 }
 0x17b   :  { %v4492_v13 = vpop.eup %4491  ;;  %v760_v17 = vsel %vm759_vm15, %v4482_v16, %v756_v6  ;;  %v522_v22 = vadd.f32 %v4486_v37, %v521_v11  ;;  %v813_v43 = vld [vmem:[#allocation2] sm:$0xff]  ;;  %v3723_v16 = vld [vmem:[%s6794_s0 + $0x6c] sm:$0xff]  }
 0x17c   :  { %v765_v18 = vsel %vm762_vm2, %v764_v10, %v760_v17  ;;  %v4494_v23 = vpop.eup %4493  ;;  %v623_v5 = vadd.f32 %v4488_v58, %v622_v55  ;;  %v929_v56 = vunpack.c.l.bf16 %v3723_v16  ;;  %v930_v59 = vunpack.c.h.bf16 %v3723_v16 }
 0x17d   :  { %v798_v24 = vmul.f32 %v4492_v13, %v765_v18  ;;  %v768_v15 = vmul.f32 %v4494_v23, %v5278_v53  ;;  %v526_v25 = vsel %vm5297_vm3, %v4486_v37, %v522_v22  ;;  %vm773_vm9 = vweird.f32 %v4494_v23  ;;  %v3760_v37 = vld [vmem:[%s6794_s0 + $0x84] sm:$0xff]  }
 0x17e   :  { %v531_v27 = vsel %vm528_vm5, %v530_v1, %v526_v25  ;;  %v627_v28 = vsel %vm5303_vm4, %v4488_v58, %v623_v5  ;;  %vm774_vm10 = vmor %vm772_vm7, %vm773_vm9  ;;  %v1077_v53 = vunpack.c.l.bf16 %v3760_v37  ;;  %v4330_v58 = vunpack.c.h.bf16 %v4386_v52  ;;  %v3709_v1 = vld [vmem:[%s6794_s0 + $0x68] sm:$0x1]  ;;  %v5366_v5 = vld [vmem:[%s6794_s0 + $0x8c] sm:$0x1] }
 0x17f   :  { %804 = vst.msk [vmem:[#allocation2 + $0x8] sm:$0xff] %vm16_vm0, %v798_v24  ;;  %v807_v26 = vpack.c.bf16 %v798_v24, %v798_v24  ;;  %v769_v29 = vsub.f32 1.0, %v768_v15  ;;  %v632_v31 = vsel %vm629_vm6, %v631_v21, %v627_v28  ;;  %v790_v33 = vmul.f32 %v4490_v9, %v531_v27  ;;  %v5361_v24 = vld [vmem:[%s6794_s0 + $0x80] sm:$0x1] }
 0x180   :  { %v787_v35 = vmul.f32 %v784_v12, %v632_v31  ;;  %v4333_v10 = vunpack.c.l.bf16 %v4387_v0  ;;  %v1078_v21 = vunpack.c.h.bf16 %v3760_v37  ;;  %v4334_v28 = vunpack.c.h.bf16 %v4387_v0 }
 0x181   :  { %3705 = vst.msk [vmem:[%s6795_s2 + $0x10] sm:$0xf] %vm416_vm8, %v807_v26  ;;  %v770_v38 = vmul.f32 %v4494_v23, %v769_v29  ;;  %v824_v26 = vunpack.c.l.bf16 %v3709_v1  ;;  %v1032_v31 = vunpack.c.l.bf16 %v5361_v24  ;;  %v1079_v12 = vunpack.c.l.bf16 %v5366_v5 }
 0x182   :  { %v793_v20 = vadd.f32 %v790_v33, %v787_v35 }
 0x183   :  { %v771_v39 = vadd.f32 %v4494_v23, %v770_v38 }
 0x184   :  { %4495 = vtanh.f32 %v793_v20  ;;  %802 = vst.msk [vmem:[#allocation3 + $0x10] sm:$0x3] %vm19_vm1, %v793_v20 }
 0x185   :  { %v775_v41 = vsel %vm774_vm10, %v4494_v23, %v771_v39  ;;  %v3725_v23 = vld [vmem:[%s6794_s0 + $0x74] sm:$0x1] }
 0x186   :  { %v814_v61 = vld [vmem:[#allocation2 + $0x8] sm:$0xff]  ;;  %v780_v45 = vsel %vm777_vm11, %v779_v40, %v775_v41  ;;  %v931_v29 = vunpack.c.l.bf16 %v3725_v23 }
 0x187   :  { %v816_v44 = vpack.c.bf16 %v814_v61, %v813_v43 }
 0x189   :  { %3718 = vmatmul.msk.bf16.vlgmr.msra.gmra.mxu0 %vm16_vm0, %v816_v44  ;;  %3738 = vmatmul.msk.bf16.vlgmr.msra.gmra.mxu1 %vm16_vm0, %v816_v44 }
 0x18a   :  { %3758 = vmatmul.msk.bf16.vlgmr.msra.gmra.mxu2 %vm16_vm0, %v816_v44  ;;  %3775 = vmatmul.msk.bf16.vlgmr.msra.gmra.mxu3 %vm16_vm0, %v816_v44  ;;  %v4496_v47 = vpop.eup %4495 }
 0x18b   :  { %v799_v42 = vmul.f32 %v4496_v47, %v780_v45 }
 0x18d   :  { %805 = vst.msk [vmem:[#allocation2 + $0x10] sm:$0x3] %vm19_vm1, %v799_v42  ;;  %v808_v48 = vpack.c.bf16 %v799_v42, %v799_v42 }
 0x18f   :  { %3706 = vst.msk [vmem:[%s6795_s2 + $0x14] sm:$0x1] %vm419_vm12, %v808_v48 }
 0x194   :  { %v815_v49 = vld [vmem:[#allocation2 + $0x10] sm:$0x3] }
 0x195   :  { %v817_v50 = vpack.c.bf16 %v815_v49, %v815_v49 }
 0x199   :  { %3719 = vmatmul.msk.bf16.gmra.mxu0 %vm16_vm0, %v817_v50  ;;  %3739 = vmatmul.msk.bf16.gmra.mxu1 %vm16_vm0, %v817_v50 }
 0x19a   :  { %3759 = vmatmul.msk.bf16.gmra.mxu2 %vm16_vm0, %v817_v50  ;;  %3776 = vmatmul.msk.bf16.gmra.mxu3 %vm16_vm0, %v817_v50 }
 0x206   :  { %v856_v57 = vpop.f32.mrf.mxu0  ;;  %v957_v32 = vpop.f32.mrf.mxu1 }
 0x207   :  { %v865_v14 = vadd.f32 %v4329_v54, %v856_v57  ;;  %v966_v51 = vadd.f32 %v957_v32, %v929_v56 }
 0x209   :  { %v3720_v36 = vmul.f32 -1.442695, %v865_v14  ;;  %v3740_v46 = vmul.f32 -1.442695, %v966_v51 }
 0x20b   :  { %4497 = vpow2.f32 %v3720_v36 }
 0x20c   :  { %4499 = vpow2.f32 %v3740_v46 }
 0x20d   :  { %v1058_v60 = vpop.f32.mrf.mxu2  ;;  %v1105_v62 = vpop.f32.mrf.mxu3 }
 0x20e   :  { %v1114_v2 = vadd.f32 %v1105_v62, %v1077_v53  ;;  %v858_v3 = vpop.f32.mrf.mxu0  ;;  %v959_v4 = vpop.f32.mrf.mxu1  ;;  %v1067_v18 = vadd.f32 %v4333_v10, %v1058_v60 }
 0x20f   :  { %v866_v6 = vadd.f32 %v4330_v58, %v858_v3  ;;  %v967_v7 = vadd.f32 %v959_v4, %v930_v59  ;;  %v4267_v59 = vld [vmem:[%s6793_s1 + $0x20] sm:$0xff] }
 0x210   :  { %v3777_v8 = vmul.f32 -1.442695, %v1114_v2 }
 0x211   :  { %v4498_v9 = vpop.eup %4497  ;;  %v3721_v11 = vmul.f32 -1.442695, %v866_v6  ;;  %v3741_v55 = vmul.f32 -1.442695, %v967_v7 }
 0x212   :  { %v4500_v13 = vpop.eup %4499  ;;  %v5346_v17 = vadd.f32 1.0, %v4498_v9  ;;  %4501 = vpow2.f32 %v3777_v8 }
 0x213   :  { %v5348_v63 = vadd.f32 1.0, %v4500_v13  ;;  %4503 = vpow2.f32 %v3721_v11 }
 0x214   :  { %4505 = vrcp.f32 %v5346_v17  ;;  %vm885_vm13 = vweird.f32 %v5346_v17  ;;  %v889_v20 = vand.u32 2147483647, %v5346_v17  ;;  %v891_v39 = vand.u32 2147483648, %v5346_v17 }
 0x215   :  { %4507 = vrcp.f32 %v5348_v63  ;;  %v1060_v19 = vpop.f32.mrf.mxu2  ;;  %v1107_v22 = vpop.f32.mrf.mxu3  ;;  %v992_v30 = vand.u32 2147483648, %v5348_v63  ;;  %vm986_vm14 = vweird.f32 %v5348_v63  ;;  %v990_v47 = vand.u32 2147483647, %v5348_v63 }
 0x216   :  { %4509 = vpow2.f32 %v3741_v55  ;;  %v861_v15 = vpop.f32.mrf.mxu0  ;;  %v962_v25 = vpop.f32.mrf.mxu1  ;;  %v1115_v35 = vadd.f32 %v1107_v22, %v1078_v21  ;;  %v1068_v42 = vadd.f32 %v4334_v28, %v1060_v19  ;;  %vm5388_vm15 = vcmp.eq.f32.partialorder %v889_v20, 8.507059e+37  ;;  %v4266_v20 = vld [vmem:[%s6793_s1 + $0x18] sm:$0xff] }
 0x217   :  { %4511 = vtanh.f32 %v1067_v18  ;;  %v867_v61 = vadd.f32 %v861_v15, %v824_v26  ;;  %v968_v48 = vadd.f32 %v962_v25, %v931_v29  ;;  %v993_v57 = vor.u32 1.1754944e-38, %v992_v30  ;;  %v4264_v30 = vld [vmem:[%s6793_s1 + $0x8] sm:$0xff]  ;;  %1346 = vmatpush.bf16.msrb.mxu1 %v4266_v20 }
 0x218   :  { %v4502_v27 = vpop.eup %4501  ;;  %v3778_v52 = vmul.f32 -1.442695, %v1115_v35  ;;  %v892_v14 = vor.u32 1.1754944e-38, %v891_v39  ;;  %vm5393_vm4 = vcmp.eq.f32.partialorder %v990_v47, 8.507059e+37  ;;  %1245 = vmatpush.bf16.msrb.mxu0 %v4264_v30 }
 0x219   :  { %v4504_v33 = vpop.eup %4503  ;;  %v5371_v34 = vadd.f32 1.0, %v4502_v27  ;;  %v3722_v53 = vmul.f32 -1.442695, %v867_v61  ;;  %v3742_v0 = vmul.f32 -1.442695, %v968_v48 }
 0x21a   :  { %v4506_v38 = vpop.eup %4505  ;;  %v5376_v40 = vadd.f32 1.0, %v4504_v33 }
 0x21b   :  { %v4508_v41 = vpop.eup %4507  ;;  %v881_v43 = vmul.f32 %v4506_v38, %v5346_v17  ;;  %4513 = vrcp.f32 %v5371_v34  ;;  %vm886_vm2 = vweird.f32 %v4506_v38  ;;  %vm1134_vm5 = vweird.f32 %v5371_v34 }
 0x21c   :  { %v4510_v44 = vpop.eup %4509  ;;  %v982_v45 = vmul.f32 %v4508_v41, %v5348_v63  ;;  %4515 = vrcp.f32 %v5376_v40  ;;  %vm987_vm3 = vweird.f32 %v4508_v41  ;;  %vm887_vm6 = vmor %vm885_vm13, %vm886_vm2  ;;  %v1138_v4 = vand.u32 2147483647, %v5371_v34  ;;  %v1174_v63 = vld [vmem:[#allocation3] sm:$0xff] }
 0x21d   :  { %v882_v49 = vsub.f32 1.0, %v881_v43  ;;  %v5384_v50 = vadd.f32 1.0, %v4510_v44  ;;  %v5386_v16 = vpop.f32.mrf.mxu2  ;;  %v1110_v54 = vpop.f32.mrf.mxu3  ;;  %v1140_v6 = vand.u32 2147483648, %v5371_v34  ;;  %vm988_vm7 = vmor %vm986_vm14, %vm987_vm3  ;;  %vm900_vm9 = vweird.f32 %v5376_v40  ;;  %v4270_v44 = vld [vmem:[%s6793_s1 + $0x38] sm:$0xff] }
 0x21e   :  { %v983_v56 = vsub.f32 1.0, %v982_v45  ;;  %v863_v51 = vpop.f32.mrf.mxu0  ;;  %v964_v37 = vpop.f32.mrf.mxu1  ;;  %v1116_v9 = vadd.f32 %v1110_v54, %v1079_v12  ;;  %v904_v19 = vand.u32 2147483647, %v5376_v40  ;;  %v906_v29 = vand.u32 2147483648, %v5376_v40  ;;  %v4268_v45 = vld [vmem:[%s6793_s1 + $0x28] sm:$0xff]  ;;  %1494 = vmatpush.bf16.msrb.mxu3 %v4270_v44 }
 0x21f   :  { %v4512_v36 = vpop.eup %4511  ;;  %v883_v46 = vmul.f32 %v4506_v38, %v882_v49  ;;  %4517 = vrcp.f32 %v5384_v50  ;;  %v1007_v28 = vand.u32 2147483648, %v5384_v50  ;;  %v1005_v43 = vand.u32 2147483647, %v5384_v50  ;;  %1447 = vmatpush.bf16.msrb.mxu2 %v4268_v45  ;;  %v4265_v51 = vld [vmem:[%s6793_s1 + $0x10] sm:$0xff]  ;;  %v1176_v54 = vld [vmem:[#allocation3 + $0x10] sm:$0x3] }
 0x220   :  { %v984_v58 = vmul.f32 %v4508_v41, %v983_v56  ;;  %4519 = vtanh.f32 %v1068_v42  ;;  %v3779_v12 = vmul.f32 -1.442695, %v1116_v9  ;;  %v907_v56 = vor.u32 1.1754944e-38, %v906_v29  ;;  %v4269_v37 = vld [vmem:[%s6793_s1 + $0x30] sm:$0xff]  ;;  %1347 = vmatpush.bf16.msrb.mxu1 %v4265_v51 }
 0x221   :  { %v5397_v60 = vpop.eup %4513  ;;  %v884_v62 = vadd.f32 %v4506_v38, %v883_v46  ;;  %4521 = vpow2.f32 %v3778_v52  ;;  %v1141_v52 = vor.u32 1.1754944e-38, %v1140_v6  ;;  %vm905_vm3 = vcmp.eq.f32.partialorder %v904_v19, 8.507059e+37 }
 0x222   :  { %v985_v2 = vadd.f32 %v4508_v41, %v984_v58  ;;  %v1130_v3 = vmul.f32 %v5397_v60, %v5371_v34  ;;  %v5406_v7 = vpop.eup %4515  ;;  %4523 = vpow2.f32 %v3722_v53  ;;  %vm1135_vm10 = vweird.f32 %v5397_v60  ;;  %1495 = vmatpush.bf16.msrb.mxu3 %v4269_v37 }
 0x223   :  { %v888_v8 = vsel %vm887_vm6, %v4506_v38, %v884_v62  ;;  %v896_v17 = vmul.f32 %v5406_v7, %v5376_v40  ;;  %4525 = vpow2.f32 %v3742_v0  ;;  %vm901_vm11 = vweird.f32 %v5406_v7  ;;  %vm5449_vm13 = vmor %vm1134_vm5, %vm1135_vm10  ;;  %v4263_v40 = vld [vmem:[%s6793_s1] sm:$0xff]  ;;  %1448 = vmatpush.bf16.msrb.mxu2 %v4267_v59 }
 0x224   :  { %v893_v10 = vsel %vm5388_vm15, %v892_v14, %v888_v8  ;;  %v989_v11 = vsel %vm988_vm7, %v4508_v41, %v985_v2  ;;  %v1131_v13 = vsub.f32 1.0, %v1130_v3  ;;  %4527 = vpow2.f32 %v3779_v12  ;;  %vm5461_vm2 = vmor %vm900_vm9, %vm901_vm11  ;;  %1246 = vmatpush.bf16.msrb.mxu0 %v4263_v40  ;;  %v1175_v2 = vld [vmem:[#allocation3 + $0x8] sm:$0xff] }
 0x225   :  { %v5415_v55 = vpop.eup %4517  ;;  %v994_v1 = vsel %vm5393_vm4, %v993_v57, %v989_v11  ;;  %v1180_v18 = vmul.f32 %v4512_v36, %v893_v10  ;;  %v1065_v21 = vpop.f32.mrf.mxu2  ;;  %v897_v25 = vsub.f32 1.0, %v896_v17  ;;  %vm1001_vm15 = vweird.f32 %v5384_v50 }
 0x226   :  { %v1112_v22 = vpop.f32.mrf.mxu3  ;;  %v4520_v23 = vpop.eup %4519  ;;  %v1177_v5 = vmul.f32 %v1174_v63, %v994_v1  ;;  %v1132_v15 = vmul.f32 %v5397_v60, %v1131_v13  ;;  %v997_v26 = vmul.f32 %v5415_v55, %v5384_v50  ;;  %vm1002_vm14 = vweird.f32 %v5415_v55 }
 0x227   :  { %v4522_v27 = vpop.eup %4521  ;;  %v898_v38 = vmul.f32 %v5406_v7, %v897_v25  ;;  %vm1003_vm4 = vmor %vm1001_vm15, %vm1002_vm14  ;;  %v1008_v46 = vor.u32 1.1754944e-38, %v1007_v28  ;;  %vm1006_vm5 = vcmp.eq.f32.partialorder %v1005_v43, 8.507059e+37  ;;  %vm1139_vm6 = vcmp.eq.f32.partialorder %v1138_v4, 8.507059e+37 }
 0x228   :  { %v1183_v33 = vadd.f32 %v1180_v18, %v1177_v5  ;;  %v998_v35 = vsub.f32 1.0, %v997_v26  ;;  %v4524_v39 = vpop.eup %4523  ;;  %v1133_v41 = vadd.f32 %v5397_v60, %v1132_v15  ;;  %v5436_v61 = vadd.f32 1.0, %v4522_v27 }
 0x229   :  { %v899_v48 = vadd.f32 %v5406_v7, %v898_v38  ;;  %v4526_v49 = vpop.eup %4525  ;;  %v5470_v14 = vadd.f32 1.0, %v4524_v39  ;;  %v1069_v34 = vadd.f32 %v5386_v16, %v1032_v31 }
 0x22a   :  { %4529 = vtanh.f32 %v1183_v33  ;;  %1192 = vst.msk [vmem:[#allocation3] sm:$0xff] %vm16_vm0, %v1183_v33  ;;  %v999_v42 = vmul.f32 %v5415_v55, %v998_v35  ;;  %v1137_v36 = vsel %vm5449_vm13, %v5397_v60, %v1133_v41  ;;  %v5488_v58 = vadd.f32 1.0, %v4526_v49  ;;  %v4528_v60 = vpop.eup %4527 }
 0x22b   :  { %4531 = vrcp.f32 %v5436_v61  ;;  %v903_v57 = vsel %vm5461_vm2, %v5406_v7, %v899_v48  ;;  %v1142_v6 = vsel %vm1139_vm6, %v1141_v52, %v1137_v36  ;;  %v5498_v10 = vadd.f32 1.0, %v4528_v60 }
 0x22c   :  { %v1000_v32 = vadd.f32 %v5415_v55, %v999_v42  ;;  %v908_v53 = vsel %vm905_vm3, %v907_v56, %v903_v57  ;;  %4533 = vrcp.f32 %v5470_v14  ;;  %v1153_v17 = vand.u32 2147483647, %v5436_v61 }
 0x22d   :  { %v1181_v0 = vmul.f32 %v4520_v23, %v908_v53  ;;  %4535 = vrcp.f32 %v5488_v58  ;;  %vm1149_vm9 = vweird.f32 %v5436_v61  ;;  %v1022_v15 = vand.u32 2147483648, %v5488_v58 }
 0x22e   :  { %v1004_v62 = vsel %vm1003_vm4, %v5415_v55, %v1000_v32  ;;  %v1155_v55 = vand.u32 2147483648, %v5436_v61  ;;  %4537 = vrcp.f32 %v5498_v10  ;;  %vm5516_vm10 = vcmp.eq.f32.partialorder %v1153_v17, 8.507059e+37 }
 0x22f   :  { %v1009_v50 = vsel %vm1006_vm5, %v1008_v46, %v1004_v62  ;;  %v921_v25 = vand.u32 2147483648, %v5470_v14  ;;  %v919_v28 = vand.u32 2147483647, %v5470_v14  ;;  %v1020_v29 = vand.u32 2147483647, %v5488_v58 }
 0x230   :  { %v4530_v3 = vpop.eup %4529  ;;  %v1178_v7 = vmul.f32 %v1175_v2, %v1009_v50  ;;  %v1156_v21 = vor.u32 1.1754944e-38, %v1155_v55  ;;  %vm1016_vm15 = vweird.f32 %v5488_v58  ;;  %vm915_vm2 = vweird.f32 %v5470_v14 }
 0x231   :  { %v4532_v8 = vpop.eup %4531  ;;  %v1189_v9 = vmul.f32 %v4530_v3, %v1142_v6  ;;  %v922_v43 = vor.u32 1.1754944e-38, %v921_v25  ;;  %v1023_v45 = vor.u32 1.1754944e-38, %v1022_v15  ;;  %vm920_vm5 = vcmp.eq.f32.partialorder %v919_v28, 8.507059e+37  ;;  %v4388_v6 = vld [vmem:[%s6794_s0 + $0x90] sm:$0xff]  }
 0x232   :  { %v1184_v11 = vadd.f32 %v1181_v0, %v1178_v7  ;;  %v1145_v13 = vmul.f32 %v4532_v8, %v5436_v61  ;;  %v4534_v1 = vpop.eup %4533  ;;  %vm1150_vm7 = vweird.f32 %v4532_v8  ;;  %vm1021_vm6 = vcmp.eq.f32.partialorder %v1020_v29, 8.507059e+37  ;;  %v3799_v7 = vld [vmem:[%s6794_s0 + $0x9c] sm:$0xff]  }
 0x233   :  { %1195 = vst.msk [vmem:[#allocation2] sm:$0xff] %vm16_vm0, %v1189_v9  ;;  %v1198_v4 = vpack.c.bf16 %v1189_v9, %v1189_v9  ;;  %v4536_v18 = vpop.eup %4535  ;;  %v911_v24 = vmul.f32 %v4534_v1, %v5470_v14  ;;  %vm1151_vm11 = vmor %vm1149_vm9, %vm1150_vm7  ;;  %vm916_vm13 = vweird.f32 %v4534_v1  ;;  %v1170_v51 = vand.u32 2147483648, %v5498_v10 }
 0x234   :  { %4539 = vtanh.f32 %v1184_v11  ;;  %1193 = vst.msk [vmem:[#allocation3 + $0x8] sm:$0xff] %vm16_vm0, %v1184_v11  ;;  %v1146_v63 = vsub.f32 1.0, %v1145_v13  ;;  %v1012_v16 = vmul.f32 %v4536_v18, %v5488_v58  ;;  %v4538_v26 = vpop.eup %4537  ;;  %vm1017_vm14 = vweird.f32 %v4536_v18  ;;  %vm917_vm3 = vmor %vm915_vm2, %vm916_vm13 }
 0x235   :  { %3780 = vst.msk [vmem:[%s6795_s2 + $0x18] sm:$0xf] %vm416_vm8, %v1198_v4  ;;  %4541 = vtanh.f32 %v1069_v34  ;;  %v912_v22 = vsub.f32 1.0, %v911_v24  ;;  %v1160_v38 = vmul.f32 %v4538_v26, %v5498_v10  ;;  %vm1018_vm4 = vmor %vm1016_vm15, %vm1017_vm14  ;;  %vm1165_vm7 = vweird.f32 %v4538_v26  ;;  %v3836_v4 = vld [vmem:[%s6794_s0 + $0xb4] sm:$0xff]  }
 0x236   :  { %v1147_v31 = vmul.f32 %v4532_v8, %v1146_v63  ;;  %v1013_v5 = vsub.f32 1.0, %v1012_v16  ;;  %vm1164_vm9 = vweird.f32 %v5498_v10  ;;  %v1168_v37 = vand.u32 2147483647, %v5498_v10  ;;  %v4389_v16 = vld [vmem:[%s6794_s0 + $0xa8] sm:$0xff]  }
 0x237   :  { %v913_v27 = vmul.f32 %v4534_v1, %v912_v22  ;;  %v1161_v44 = vsub.f32 1.0, %v1160_v38  ;;  %v1171_v59 = vor.u32 1.1754944e-38, %v1170_v51  ;;  %v1321_v9 = vunpack.c.l.bf16 %v3799_v7 }
 0x238   :  { %v1148_v23 = vadd.f32 %v4532_v8, %v1147_v31  ;;  %v1014_v35 = vmul.f32 %v4536_v18, %v1013_v5  ;;  %v4338_v63 = vunpack.c.h.bf16 %v4388_v6 }
 0x239   :  { %v914_v20 = vadd.f32 %v4534_v1, %v913_v27  ;;  %v1162_v57 = vmul.f32 %v4538_v26, %v1161_v44 }
 0x23a   :  { %v4540_v12 = vpop.eup %4539  ;;  %v1152_v33 = vsel %vm1151_vm11, %v4532_v8, %v1148_v23  ;;  %v1015_v61 = vadd.f32 %v4536_v18, %v1014_v35  ;;  %v1205_v36 = vld [vmem:[#allocation2] sm:$0xff]  ;;  %vm1169_vm11 = vcmp.eq.f32.partialorder %v1168_v37, 8.507059e+37  ;;  %v4337_v8 = vunpack.c.l.bf16 %v4388_v6  ;;  %v3785_v35 = vld [vmem:[%s6794_s0 + $0x98] sm:$0x1] }
 0x23b   :  { %v1157_v30 = vsel %vm5516_vm10, %v1156_v21, %v1152_v33  ;;  %v4542_v39 = vpop.eup %4541  ;;  %v918_v47 = vsel %vm917_vm3, %v4534_v1, %v914_v20  ;;  %v1163_v40 = vadd.f32 %v4538_v26, %v1162_v57  ;;  %vm1166_vm10 = vmor %vm1164_vm9, %vm1165_vm7  ;;  %v1469_v1 = vunpack.c.l.bf16 %v3836_v4 }
 0x23c   :  { %v1190_v41 = vmul.f32 %v4540_v12, %v1157_v30  ;;  %v923_v48 = vsel %vm920_vm5, %v922_v43, %v918_v47  ;;  %v1019_v49 = vsel %vm1018_vm4, %v4536_v18, %v1015_v61  ;;  %v1322_v18 = vunpack.c.h.bf16 %v3799_v7  ;;  %v5578_v43 = vld [vmem:[%s6794_s0 + $0xb0] sm:$0x1]  ;;  %v5583_v61 = vld [vmem:[%s6794_s0 + $0xbc] sm:$0x1] }
 0x23d   :  { %v1024_v52 = vsel %vm1021_vm6, %v1023_v45, %v1019_v49  ;;  %v1182_v56 = vmul.f32 %v4542_v39, %v923_v48  ;;  %v1167_v58 = vsel %vm1166_vm10, %v4538_v26, %v1163_v40  ;;  %v4341_v26 = vunpack.c.l.bf16 %v4389_v16 }
 0x23e   :  { %1196 = vst.msk [vmem:[#allocation2 + $0x8] sm:$0xff] %vm16_vm0, %v1190_v41  ;;  %v1199_v42 = vpack.c.bf16 %v1190_v41, %v1190_v41  ;;  %v1179_v32 = vmul.f32 %v1176_v54, %v1024_v52  ;;  %v1172_v0 = vsel %vm1169_vm11, %v1171_v59, %v1167_v58  ;;  %v1470_v20 = vunpack.c.h.bf16 %v3836_v4  ;;  %v3801_v41 = vld [vmem:[%s6794_s0 + $0xa4] sm:$0x1] }
 0x23f   :  { %v1216_v47 = vunpack.c.l.bf16 %v3785_v35  ;;  %v4342_v48 = vunpack.c.h.bf16 %v4389_v16  ;;  %v1323_v49 = vunpack.c.l.bf16 %v3801_v41  ;;  %v1424_v52 = vunpack.c.l.bf16 %v5578_v43 }
 0x240   :  { %3781 = vst.msk [vmem:[%s6795_s2 + $0x1c] sm:$0xf] %vm416_vm8, %v1199_v42  ;;  %v1185_v14 = vadd.f32 %v1182_v56, %v1179_v32  ;;  %v1471_v54 = vunpack.c.l.bf16 %v5583_v61 }
 0x242   :  { %4543 = vtanh.f32 %v1185_v14  ;;  %1194 = vst.msk [vmem:[#allocation3 + $0x10] sm:$0x3] %vm19_vm1, %v1185_v14 }
 0x245   :  { %v1206_v46 = vld [vmem:[#allocation2 + $0x8] sm:$0xff] }
 0x246   :  { %v1208_v53 = vpack.c.bf16 %v1206_v46, %v1205_v36 }
 0x248   :  { %3794 = vmatmul.msk.bf16.vlgmr.msrb.gmra.mxu0 %vm16_vm0, %v1208_v53  ;;  %3814 = vmatmul.msk.bf16.vlgmr.msrb.gmra.mxu1 %vm16_vm0, %v1208_v53  ;;  %v4544_v62 = vpop.eup %4543 }
 0x249   :  { %3834 = vmatmul.msk.bf16.vlgmr.msrb.gmra.mxu2 %vm16_vm0, %v1208_v53  ;;  %3851 = vmatmul.msk.bf16.vlgmr.msrb.gmra.mxu3 %vm16_vm0, %v1208_v53  ;;  %v1191_v60 = vmul.f32 %v4544_v62, %v1172_v0 }
 0x24b   :  { %1197 = vst.msk [vmem:[#allocation2 + $0x10] sm:$0x3] %vm19_vm1, %v1191_v60  ;;  %v1200_v50 = vpack.c.bf16 %v1191_v60, %v1191_v60 }
 0x24d   :  { %3782 = vst.msk [vmem:[%s6795_s2 + $0x20] sm:$0x1] %vm419_vm12, %v1200_v50 }
 0x252   :  { %v1207_v2 = vld [vmem:[#allocation2 + $0x10] sm:$0x3] }
 0x253   :  { %v1209_v3 = vpack.c.bf16 %v1207_v2, %v1207_v2 }
 0x258   :  { %3795 = vmatmul.msk.bf16.gmra.mxu0 %vm16_vm0, %v1209_v3  ;;  %3815 = vmatmul.msk.bf16.gmra.mxu1 %vm16_vm0, %v1209_v3 }
 0x259   :  { %3835 = vmatmul.msk.bf16.gmra.mxu2 %vm16_vm0, %v1209_v3  ;;  %3852 = vmatmul.msk.bf16.gmra.mxu3 %vm16_vm0, %v1209_v3 }
 0x2c5   :  { %v1248_v10 = vpop.f32.mrf.mxu0  ;;  %v1349_v11 = vpop.f32.mrf.mxu1 }
 0x2c6   :  { %v1257_v13 = vadd.f32 %v4337_v8, %v1248_v10  ;;  %v1358_v34 = vadd.f32 %v1349_v11, %v1321_v9 }
 0x2c8   :  { %v3796_v17 = vmul.f32 -1.442695, %v1257_v13  ;;  %v3816_v55 = vmul.f32 -1.442695, %v1358_v34 }
 0x2ca   :  { %4545 = vpow2.f32 %v3796_v17 }
 0x2cb   :  { %4547 = vpow2.f32 %v3816_v55 }
 0x2cc   :  { %v1450_v24 = vpop.f32.mrf.mxu2  ;;  %v1497_v31 = vpop.f32.mrf.mxu3 }
 0x2cd   :  { %v1506_v19 = vadd.f32 %v1497_v31, %v1469_v1  ;;  %v1250_v21 = vpop.f32.mrf.mxu0  ;;  %v1351_v22 = vpop.f32.mrf.mxu1  ;;  %v1459_v38 = vadd.f32 %v4341_v26, %v1450_v24 }
 0x2ce   :  { %v1258_v23 = vadd.f32 %v4338_v63, %v1250_v21  ;;  %v1359_v5 = vadd.f32 %v1351_v22, %v1322_v18  ;;  %v4275_v18 = vld [vmem:[%s6793_s1 + $0x20] sm:$0xff] }
 0x2cf   :  { %v3853_v15 = vmul.f32 -1.442695, %v1506_v19 }
 0x2d0   :  { %v4546_v25 = vpop.eup %4545  ;;  %v3797_v27 = vmul.f32 -1.442695, %v1258_v23  ;;  %v3817_v12 = vmul.f32 -1.442695, %v1359_v5 }
 0x2d1   :  { %v4548_v28 = vpop.eup %4547  ;;  %v5563_v29 = vadd.f32 1.0, %v4546_v25  ;;  %4549 = vpow2.f32 %v3853_v15 }
 0x2d2   :  { %v5565_v33 = vadd.f32 1.0, %v4548_v28  ;;  %4551 = vpow2.f32 %v3797_v27 }
 0x2d3   :  { %4553 = vrcp.f32 %v5563_v29  ;;  %vm1277_vm13 = vweird.f32 %v5563_v29  ;;  %v1281_v51 = vand.u32 2147483647, %v5563_v29  ;;  %v1283_v37 = vand.u32 2147483648, %v5563_v29 }
 0x2d4   :  { %4555 = vrcp.f32 %v5565_v33  ;;  %v1452_v30 = vpop.f32.mrf.mxu2  ;;  %v1499_v39 = vpop.f32.mrf.mxu3  ;;  %v1384_v40 = vand.u32 2147483648, %v5565_v33  ;;  %vm1378_vm14 = vweird.f32 %v5565_v33  ;;  %v1382_v0 = vand.u32 2147483647, %v5565_v33 }
 0x2d5   :  { %4557 = vpow2.f32 %v3817_v12  ;;  %v1253_v44 = vpop.f32.mrf.mxu0  ;;  %v1354_v45 = vpop.f32.mrf.mxu1  ;;  %v1507_v32 = vadd.f32 %v1499_v39, %v1470_v20  ;;  %v1460_v60 = vadd.f32 %v4342_v48, %v1452_v30  ;;  %vm5605_vm15 = vcmp.eq.f32.partialorder %v1281_v51, 8.507059e+37  ;;  %v4274_v51 = vld [vmem:[%s6793_s1 + $0x18] sm:$0xff] }
 0x2d6   :  { %4559 = vtanh.f32 %v1459_v38  ;;  %v1259_v58 = vadd.f32 %v1253_v44, %v1216_v47  ;;  %v1360_v50 = vadd.f32 %v1354_v45, %v1323_v49  ;;  %v1385_v10 = vor.u32 1.1754944e-38, %v1384_v40  ;;  %v4272_v40 = vld [vmem:[%s6793_s1 + $0x8] sm:$0xff]  ;;  %1738 = vmatpush.bf16.msra.mxu1 %v4274_v51 }
 0x2d7   :  { %v4550_v42 = vpop.eup %4549  ;;  %v3854_v6 = vmul.f32 -1.442695, %v1507_v32  ;;  %v1284_v13 = vor.u32 1.1754944e-38, %v1283_v37  ;;  %vm5610_vm4 = vcmp.eq.f32.partialorder %v1382_v0, 8.507059e+37  ;;  %1637 = vmatpush.bf16.msra.mxu0 %v4272_v40 }
 0x2d8   :  { %v4552_v56 = vpop.eup %4551  ;;  %v5588_v57 = vadd.f32 1.0, %v4550_v42  ;;  %v3798_v1 = vmul.f32 -1.442695, %v1259_v58  ;;  %v3818_v16 = vmul.f32 -1.442695, %v1360_v50 }
 0x2d9   :  { %v4554_v14 = vpop.eup %4553  ;;  %v5593_v36 = vadd.f32 1.0, %v4552_v56 }
 0x2da   :  { %v4556_v46 = vpop.eup %4555  ;;  %v1273_v53 = vmul.f32 %v4554_v14, %v5563_v29  ;;  %4561 = vrcp.f32 %v5588_v57  ;;  %vm1278_vm2 = vweird.f32 %v4554_v14  ;;  %vm1526_vm5 = vweird.f32 %v5588_v57 }
 0x2db   :  { %v4558_v59 = vpop.eup %4557  ;;  %v1374_v62 = vmul.f32 %v4556_v46, %v5565_v33  ;;  %4563 = vrcp.f32 %v5593_v36  ;;  %vm1379_vm3 = vweird.f32 %v4556_v46  ;;  %vm1279_vm6 = vmor %vm1277_vm13, %vm1278_vm2  ;;  %v1530_v22 = vand.u32 2147483647, %v5588_v57  ;;  %v1566_v33 = vld [vmem:[#allocation3] sm:$0xff] }
 0x2dc   :  { %v1274_v2 = vsub.f32 1.0, %v1273_v53  ;;  %v5601_v3 = vadd.f32 1.0, %v4558_v59  ;;  %v5603_v7 = vpop.f32.mrf.mxu2  ;;  %v1502_v8 = vpop.f32.mrf.mxu3  ;;  %v1532_v23 = vand.u32 2147483648, %v5588_v57  ;;  %vm1380_vm7 = vmor %vm1378_vm14, %vm1379_vm3  ;;  %vm1292_vm9 = vweird.f32 %v5593_v36  ;;  %v4278_v59 = vld [vmem:[%s6793_s1 + $0x38] sm:$0xff] }
 0x2dd   :  { %v1375_v9 = vsub.f32 1.0, %v1374_v62  ;;  %v1255_v34 = vpop.f32.mrf.mxu0  ;;  %v1356_v4 = vpop.f32.mrf.mxu1  ;;  %v1508_v25 = vadd.f32 %v1502_v8, %v1471_v54  ;;  %v1296_v30 = vand.u32 2147483647, %v5593_v36  ;;  %v1298_v49 = vand.u32 2147483648, %v5593_v36  ;;  %v4276_v62 = vld [vmem:[%s6793_s1 + $0x28] sm:$0xff]  ;;  %1886 = vmatpush.bf16.msra.mxu3 %v4278_v59 }
 0x2de   :  { %v4560_v17 = vpop.eup %4559  ;;  %v1275_v55 = vmul.f32 %v4554_v14, %v1274_v2  ;;  %4565 = vrcp.f32 %v5601_v3  ;;  %v1399_v48 = vand.u32 2147483648, %v5601_v3  ;;  %v1397_v53 = vand.u32 2147483647, %v5601_v3  ;;  %1839 = vmatpush.bf16.msra.mxu2 %v4276_v62  ;;  %v4273_v34 = vld [vmem:[%s6793_s1 + $0x10] sm:$0xff]  ;;  %v1568_v8 = vld [vmem:[#allocation3 + $0x10] sm:$0x3] }
 0x2df   :  { %v1376_v63 = vmul.f32 %v4556_v46, %v1375_v9  ;;  %4567 = vtanh.f32 %v1460_v60  ;;  %v3855_v54 = vmul.f32 -1.442695, %v1508_v25  ;;  %v1299_v9 = vor.u32 1.1754944e-38, %v1298_v49  ;;  %v4277_v4 = vld [vmem:[%s6793_s1 + $0x30] sm:$0xff]  ;;  %1739 = vmatpush.bf16.msra.mxu1 %v4273_v34 }
 0x2e0   :  { %v5614_v24 = vpop.eup %4561  ;;  %v1276_v31 = vadd.f32 %v4554_v14, %v1275_v55  ;;  %4569 = vpow2.f32 %v3854_v6  ;;  %v1533_v6 = vor.u32 1.1754944e-38, %v1532_v23  ;;  %vm1297_vm3 = vcmp.eq.f32.partialorder %v1296_v30, 8.507059e+37 }
 0x2e1   :  { %v1377_v19 = vadd.f32 %v4556_v46, %v1376_v63  ;;  %v1522_v21 = vmul.f32 %v5614_v24, %v5588_v57  ;;  %v5623_v5 = vpop.eup %4563  ;;  %4571 = vpow2.f32 %v3798_v1  ;;  %vm1527_vm10 = vweird.f32 %v5614_v24  ;;  %1887 = vmatpush.bf16.msra.mxu3 %v4277_v4 }
 0x2e2   :  { %v1280_v15 = vsel %vm1279_vm6, %v4554_v14, %v1276_v31  ;;  %v1288_v29 = vmul.f32 %v5623_v5, %v5593_v36  ;;  %4573 = vpow2.f32 %v3818_v16  ;;  %vm1293_vm11 = vweird.f32 %v5623_v5  ;;  %vm5666_vm13 = vmor %vm1526_vm5, %vm1527_vm10  ;;  %v4271_v36 = vld [vmem:[%s6793_s1] sm:$0xff]  ;;  %1840 = vmatpush.bf16.msra.mxu2 %v4275_v18 }
 0x2e3   :  { %v1285_v26 = vsel %vm5605_vm15, %v1284_v13, %v1280_v15  ;;  %v1381_v27 = vsel %vm1380_vm7, %v4556_v46, %v1377_v19  ;;  %v1523_v28 = vsub.f32 1.0, %v1522_v21  ;;  %4575 = vpow2.f32 %v3855_v54  ;;  %vm5678_vm2 = vmor %vm1292_vm9, %vm1293_vm11  ;;  %1638 = vmatpush.bf16.msra.mxu0 %v4271_v36  ;;  %v1567_v19 = vld [vmem:[#allocation3 + $0x8] sm:$0xff] }
 0x2e4   :  { %v5632_v12 = vpop.eup %4565  ;;  %v1386_v35 = vsel %vm5610_vm4, %v1385_v10, %v1381_v27  ;;  %v1572_v38 = vmul.f32 %v4560_v17, %v1285_v26  ;;  %v1457_v20 = vpop.f32.mrf.mxu2  ;;  %v1289_v45 = vsub.f32 1.0, %v1288_v29  ;;  %vm1393_vm15 = vweird.f32 %v5601_v3 }
 0x2e5   :  { %v1504_v39 = vpop.f32.mrf.mxu3  ;;  %v4568_v41 = vpop.eup %4567  ;;  %v1569_v61 = vmul.f32 %v1566_v33, %v1386_v35  ;;  %v1524_v44 = vmul.f32 %v5614_v24, %v1523_v28  ;;  %v1389_v47 = vmul.f32 %v5632_v12, %v5601_v3  ;;  %vm1394_vm14 = vweird.f32 %v5632_v12 }
 0x2e6   :  { %v4570_v42 = vpop.eup %4569  ;;  %v1290_v14 = vmul.f32 %v5623_v5, %v1289_v45  ;;  %vm1395_vm4 = vmor %vm1393_vm15, %vm1394_vm14  ;;  %v1400_v55 = vor.u32 1.1754944e-38, %v1399_v48  ;;  %vm1398_vm5 = vcmp.eq.f32.partialorder %v1397_v53, 8.507059e+37  ;;  %vm1531_vm6 = vcmp.eq.f32.partialorder %v1530_v22, 8.507059e+37 }
 0x2e7   :  { %v1575_v56 = vadd.f32 %v1572_v38, %v1569_v61  ;;  %v1390_v32 = vsub.f32 1.0, %v1389_v47  ;;  %v4572_v37 = vpop.eup %4571  ;;  %v1525_v46 = vadd.f32 %v5614_v24, %v1524_v44  ;;  %v5653_v58 = vadd.f32 1.0, %v4570_v42 }
 0x2e8   :  { %v1291_v50 = vadd.f32 %v5623_v5, %v1290_v14  ;;  %v4574_v2 = vpop.eup %4573  ;;  %v5687_v13 = vadd.f32 1.0, %v4572_v37  ;;  %v1461_v57 = vadd.f32 %v5603_v7, %v1424_v52 }
 0x2e9   :  { %4577 = vtanh.f32 %v1575_v56  ;;  %1584 = vst.msk [vmem:[#allocation3] sm:$0xff] %vm16_vm0, %v1575_v56  ;;  %v1391_v60 = vmul.f32 %v5632_v12, %v1390_v32  ;;  %v1529_v17 = vsel %vm5666_vm13, %v5614_v24, %v1525_v46  ;;  %v5705_v63 = vadd.f32 1.0, %v4574_v2  ;;  %v4576_v24 = vpop.eup %4575 }
 0x2ea   :  { %4579 = vrcp.f32 %v5653_v58  ;;  %v1295_v10 = vsel %vm5678_vm2, %v5623_v5, %v1291_v50  ;;  %v1534_v23 = vsel %vm1531_vm6, %v1533_v6, %v1529_v17  ;;  %v5715_v26 = vadd.f32 1.0, %v4576_v24 }
 0x2eb   :  { %v1392_v11 = vadd.f32 %v5632_v12, %v1391_v60  ;;  %v1300_v1 = vsel %vm1297_vm3, %v1299_v9, %v1295_v10  ;;  %4581 = vrcp.f32 %v5687_v13  ;;  %v1545_v29 = vand.u32 2147483647, %v5653_v58 }
 0x2ec   :  { %v1573_v16 = vmul.f32 %v4568_v41, %v1300_v1  ;;  %4583 = vrcp.f32 %v5705_v63  ;;  %vm1541_vm9 = vweird.f32 %v5653_v58  ;;  %v1414_v44 = vand.u32 2147483648, %v5705_v63 }
 0x2ed   :  { %v1396_v31 = vsel %vm1395_vm4, %v5632_v12, %v1392_v11  ;;  %v1547_v12 = vand.u32 2147483648, %v5653_v58  ;;  %4585 = vrcp.f32 %v5715_v26  ;;  %vm5733_vm10 = vcmp.eq.f32.partialorder %v1545_v29, 8.507059e+37 }
 0x2ee   :  { %v1401_v3 = vsel %vm1398_vm5, %v1400_v55, %v1396_v31  ;;  %v1313_v45 = vand.u32 2147483648, %v5687_v13  ;;  %v1311_v48 = vand.u32 2147483647, %v5687_v13  ;;  %v1412_v49 = vand.u32 2147483647, %v5705_v63 }
 0x2ef   :  { %v4578_v21 = vpop.eup %4577  ;;  %v1570_v5 = vmul.f32 %v1567_v19, %v1401_v3  ;;  %v1548_v20 = vor.u32 1.1754944e-38, %v1547_v12  ;;  %vm1408_vm15 = vweird.f32 %v5705_v63  ;;  %vm1307_vm2 = vweird.f32 %v5687_v13 }
 0x2f0   :  { %v4580_v15 = vpop.eup %4579  ;;  %v1581_v25 = vmul.f32 %v4578_v21, %v1534_v23  ;;  %v1314_v53 = vor.u32 1.1754944e-38, %v1313_v45  ;;  %v1415_v62 = vor.u32 1.1754944e-38, %v1414_v44  ;;  %vm1312_vm5 = vcmp.eq.f32.partialorder %v1311_v48, 8.507059e+37  ;;  %v4390_v23 = vld [vmem:[%s6794_s0 + $0xc0] sm:$0xff]  }
 0x2f1   :  { %v1576_v27 = vadd.f32 %v1573_v16, %v1570_v5  ;;  %v1537_v28 = vmul.f32 %v4580_v15, %v5653_v58  ;;  %v4582_v35 = vpop.eup %4581  ;;  %vm1542_vm7 = vweird.f32 %v4580_v15  ;;  %vm1413_vm6 = vcmp.eq.f32.partialorder %v1412_v49, 8.507059e+37  ;;  %v3875_v5 = vld [vmem:[%s6794_s0 + $0xcc] sm:$0xff]  }
 0x2f2   :  { %1587 = vst.msk [vmem:[#allocation2] sm:$0xff] %vm16_vm0, %v1581_v25  ;;  %v1590_v22 = vpack.c.bf16 %v1581_v25, %v1581_v25  ;;  %v4584_v38 = vpop.eup %4583  ;;  %v1303_v43 = vmul.f32 %v4582_v35, %v5687_v13  ;;  %vm1543_vm11 = vmor %vm1541_vm9, %vm1542_vm7  ;;  %vm1308_vm13 = vweird.f32 %v4582_v35  ;;  %v1562_v34 = vand.u32 2147483648, %v5715_v26 }
 0x2f3   :  { %4587 = vtanh.f32 %v1576_v27  ;;  %1585 = vst.msk [vmem:[#allocation3 + $0x8] sm:$0xff] %vm16_vm0, %v1576_v27  ;;  %v1538_v33 = vsub.f32 1.0, %v1537_v28  ;;  %v1404_v7 = vmul.f32 %v4584_v38, %v5705_v63  ;;  %v4586_v47 = vpop.eup %4585  ;;  %vm1409_vm14 = vweird.f32 %v4584_v38  ;;  %vm1309_vm3 = vmor %vm1307_vm2, %vm1308_vm13 }
 0x2f4   :  { %3856 = vst.msk [vmem:[%s6795_s2 + $0x24] sm:$0xf] %vm416_vm8, %v1590_v22  ;;  %4589 = vtanh.f32 %v1461_v57  ;;  %v1304_v39 = vsub.f32 1.0, %v1303_v43  ;;  %v1552_v14 = vmul.f32 %v4586_v47, %v5715_v26  ;;  %vm1410_vm4 = vmor %vm1408_vm15, %vm1409_vm14  ;;  %vm1557_vm7 = vweird.f32 %v4586_v47  ;;  %v3912_v22 = vld [vmem:[%s6794_s0 + $0xe4] sm:$0xff]  }
 0x2f5   :  { %v1539_v52 = vmul.f32 %v4580_v15, %v1538_v33  ;;  %v1405_v61 = vsub.f32 1.0, %v1404_v7  ;;  %vm1556_vm9 = vweird.f32 %v5715_v26  ;;  %v1560_v4 = vand.u32 2147483647, %v5715_v26  ;;  %v4391_v7 = vld [vmem:[%s6794_s0 + $0xd8] sm:$0xff]  }
 0x2f6   :  { %v1305_v42 = vmul.f32 %v4582_v35, %v1304_v39  ;;  %v1553_v59 = vsub.f32 1.0, %v1552_v14  ;;  %v1563_v18 = vor.u32 1.1754944e-38, %v1562_v34  ;;  %v1713_v25 = vunpack.c.l.bf16 %v3875_v5 }
 0x2f7   :  { %v1540_v41 = vadd.f32 %v4580_v15, %v1539_v52  ;;  %v1406_v32 = vmul.f32 %v4584_v38, %v1405_v61  ;;  %v4346_v33 = vunpack.c.h.bf16 %v4390_v23 }
 0x2f8   :  { %v1306_v51 = vadd.f32 %v4582_v35, %v1305_v42  ;;  %v1554_v10 = vmul.f32 %v4586_v47, %v1553_v59 }
 0x2f9   :  { %v4588_v54 = vpop.eup %4587  ;;  %v1544_v56 = vsel %vm1543_vm11, %v4580_v15, %v1540_v41  ;;  %v1407_v58 = vadd.f32 %v4584_v38, %v1406_v32  ;;  %v1597_v17 = vld [vmem:[#allocation2] sm:$0xff]  ;;  %vm1561_vm11 = vcmp.eq.f32.partialorder %v1560_v4, 8.507059e+37  ;;  %v4345_v15 = vunpack.c.l.bf16 %v4390_v23  ;;  %v3861_v32 = vld [vmem:[%s6794_s0 + $0xc8] sm:$0x1] }
 0x2fa   :  { %v1549_v40 = vsel %vm5733_vm10, %v1548_v20, %v1544_v56  ;;  %v4590_v37 = vpop.eup %4589  ;;  %v1310_v0 = vsel %vm1309_vm3, %v4582_v35, %v1306_v51  ;;  %v1555_v36 = vadd.f32 %v4586_v47, %v1554_v10  ;;  %vm1558_vm10 = vmor %vm1556_vm9, %vm1557_vm7  ;;  %v1861_v35 = vunpack.c.l.bf16 %v3912_v22 }
 0x2fb   :  { %v1582_v46 = vmul.f32 %v4588_v54, %v1549_v40  ;;  %v1315_v50 = vsel %vm1312_vm5, %v1314_v53, %v1310_v0  ;;  %v1411_v2 = vsel %vm1410_vm4, %v4584_v38, %v1407_v58  ;;  %v1714_v38 = vunpack.c.h.bf16 %v3875_v5  ;;  %v5795_v53 = vld [vmem:[%s6794_s0 + $0xe0] sm:$0x1]  ;;  %v5800_v58 = vld [vmem:[%s6794_s0 + $0xec] sm:$0x1] }
 0x2fc   :  { %v1416_v6 = vsel %vm1413_vm6, %v1415_v62, %v1411_v2  ;;  %v1574_v9 = vmul.f32 %v4590_v37, %v1315_v50  ;;  %v1559_v63 = vsel %vm1558_vm10, %v4586_v47, %v1555_v36  ;;  %v4349_v47 = vunpack.c.l.bf16 %v4391_v7 }
 0x2fd   :  { %1588 = vst.msk [vmem:[#allocation2 + $0x8] sm:$0xff] %vm16_vm0, %v1582_v46  ;;  %v1591_v60 = vpack.c.bf16 %v1582_v46, %v1582_v46  ;;  %v1571_v11 = vmul.f32 %v1568_v8, %v1416_v6  ;;  %v1564_v16 = vsel %vm1561_vm11, %v1563_v18, %v1559_v63  ;;  %v1862_v51 = vunpack.c.h.bf16 %v3912_v22  ;;  %v3877_v46 = vld [vmem:[%s6794_s0 + $0xd4] sm:$0x1] }
 0x2fe   :  { %v1608_v0 = vunpack.c.l.bf16 %v3861_v32  ;;  %v4350_v50 = vunpack.c.h.bf16 %v4391_v7  ;;  %v1715_v2 = vunpack.c.l.bf16 %v3877_v46  ;;  %v1816_v6 = vunpack.c.l.bf16 %v5795_v53 }
 0x2ff   :  { %3857 = vst.msk [vmem:[%s6795_s2 + $0x28] sm:$0xf] %vm416_vm8, %v1591_v60  ;;  %v1577_v13 = vadd.f32 %v1574_v9, %v1571_v11  ;;  %v1863_v8 = vunpack.c.l.bf16 %v5800_v58 }
 0x301   :  { %4591 = vtanh.f32 %v1577_v13  ;;  %1586 = vst.msk [vmem:[#allocation3 + $0x10] sm:$0x3] %vm19_vm1, %v1577_v13 }
 0x304   :  { %v1598_v55 = vld [vmem:[#allocation2 + $0x8] sm:$0xff] }
 0x305   :  { %v1600_v1 = vpack.c.bf16 %v1598_v55, %v1597_v17 }
 0x307   :  { %3870 = vmatmul.msk.bf16.vlgmr.msra.gmra.mxu0 %vm16_vm0, %v1600_v1  ;;  %3890 = vmatmul.msk.bf16.vlgmr.msra.gmra.mxu1 %vm16_vm0, %v1600_v1  ;;  %v4592_v31 = vpop.eup %4591 }
 0x308   :  { %3910 = vmatmul.msk.bf16.vlgmr.msra.gmra.mxu2 %vm16_vm0, %v1600_v1  ;;  %3927 = vmatmul.msk.bf16.vlgmr.msra.gmra.mxu3 %vm16_vm0, %v1600_v1  ;;  %v1583_v24 = vmul.f32 %v4592_v31, %v1564_v16 }
 0x30a   :  { %1589 = vst.msk [vmem:[#allocation2 + $0x10] sm:$0x3] %vm19_vm1, %v1583_v24  ;;  %v1592_v3 = vpack.c.bf16 %v1583_v24, %v1583_v24 }
 0x30c   :  { %3858 = vst.msk [vmem:[%s6795_s2 + $0x2c] sm:$0x1] %vm419_vm12, %v1592_v3 }
 0x311   :  { %v1599_v19 = vld [vmem:[#allocation2 + $0x10] sm:$0x3] }
 0x312   :  { %v1601_v21 = vpack.c.bf16 %v1599_v19, %v1599_v19 }
 0x317   :  { %3871 = vmatmul.msk.bf16.gmra.mxu0 %vm16_vm0, %v1601_v21  ;;  %3891 = vmatmul.msk.bf16.gmra.mxu1 %vm16_vm0, %v1601_v21 }
 0x318   :  { %3911 = vmatmul.msk.bf16.gmra.mxu2 %vm16_vm0, %v1601_v21  ;;  %3928 = vmatmul.msk.bf16.gmra.mxu3 %vm16_vm0, %v1601_v21 }
 0x384   :  { %v1640_v26 = vpop.f32.mrf.mxu0  ;;  %v1741_v27 = vpop.f32.mrf.mxu1 }
 0x385   :  { %v1649_v28 = vadd.f32 %v4345_v15, %v1640_v26  ;;  %v1750_v57 = vadd.f32 %v1741_v27, %v1713_v25 }
 0x387   :  { %v3872_v29 = vmul.f32 -1.442695, %v1649_v28  ;;  %v3892_v12 = vmul.f32 -1.442695, %v1750_v57 }
 0x389   :  { %4593 = vpow2.f32 %v3872_v29 }
 0x38a   :  { %4595 = vpow2.f32 %v3892_v12 }
 0x38b   :  { %v1842_v43 = vpop.f32.mrf.mxu2  ;;  %v1889_v52 = vpop.f32.mrf.mxu3 }
 0x38c   :  { %v1898_v30 = vadd.f32 %v1889_v52, %v1861_v35  ;;  %v1642_v20 = vpop.f32.mrf.mxu0  ;;  %v1743_v39 = vpop.f32.mrf.mxu1  ;;  %v1851_v14 = vadd.f32 %v4349_v47, %v1842_v43 }
 0x38d   :  { %v1650_v41 = vadd.f32 %v4346_v33, %v1642_v20  ;;  %v1751_v61 = vadd.f32 %v1743_v39, %v1714_v38  ;;  %v4283_v38 = vld [vmem:[%s6793_s1 + $0x20] sm:$0xff] }
 0x38e   :  { %v3929_v44 = vmul.f32 -1.442695, %v1898_v30 }
 0x38f   :  { %v4594_v45 = vpop.eup %4593  ;;  %v3873_v42 = vmul.f32 -1.442695, %v1650_v41  ;;  %v3893_v54 = vmul.f32 -1.442695, %v1751_v61 }
 0x390   :  { %v4596_v48 = vpop.eup %4595  ;;  %v5780_v49 = vadd.f32 1.0, %v4594_v45  ;;  %4597 = vpow2.f32 %v3929_v44 }
 0x391   :  { %v5782_v56 = vadd.f32 1.0, %v4596_v48  ;;  %4599 = vpow2.f32 %v3873_v42 }
 0x392   :  { %4601 = vrcp.f32 %v5780_v49  ;;  %vm1669_vm13 = vweird.f32 %v5780_v49  ;;  %v1673_v34 = vand.u32 2147483647, %v5780_v49  ;;  %v1675_v4 = vand.u32 2147483648, %v5780_v49 }
 0x393   :  { %4603 = vrcp.f32 %v5782_v56  ;;  %v1844_v40 = vpop.f32.mrf.mxu2  ;;  %v1891_v37 = vpop.f32.mrf.mxu3  ;;  %v1776_v36 = vand.u32 2147483648, %v5782_v56  ;;  %vm1770_vm14 = vweird.f32 %v5782_v56  ;;  %v1774_v16 = vand.u32 2147483647, %v5782_v56 }
 0x394   :  { %4605 = vpow2.f32 %v3893_v54  ;;  %v1645_v59 = vpop.f32.mrf.mxu0  ;;  %v1746_v62 = vpop.f32.mrf.mxu1  ;;  %v1899_v11 = vadd.f32 %v1891_v37, %v1862_v51  ;;  %v1852_v24 = vadd.f32 %v4350_v50, %v1844_v40  ;;  %vm5822_vm15 = vcmp.eq.f32.partialorder %v1673_v34, 8.507059e+37  ;;  %v4282_v34 = vld [vmem:[%s6793_s1 + $0x18] sm:$0xff] }
 0x395   :  { %4607 = vtanh.f32 %v1851_v14  ;;  %v1651_v63 = vadd.f32 %v1645_v59, %v1608_v0  ;;  %v1752_v3 = vadd.f32 %v1746_v62, %v1715_v2  ;;  %v1777_v26 = vor.u32 1.1754944e-38, %v1776_v36  ;;  %v4280_v36 = vld [vmem:[%s6793_s1 + $0x8] sm:$0xff]  ;;  %2130 = vmatpush.bf16.msrb.mxu1 %v4282_v34 }
 0x396   :  { %v4598_v60 = vpop.eup %4597  ;;  %v3930_v23 = vmul.f32 -1.442695, %v1899_v11  ;;  %v1676_v28 = vor.u32 1.1754944e-38, %v1675_v4  ;;  %vm5827_vm4 = vcmp.eq.f32.partialorder %v1774_v16, 8.507059e+37  ;;  %2029 = vmatpush.bf16.msrb.mxu0 %v4280_v36 }
 0x397   :  { %v4600_v9 = vpop.eup %4599  ;;  %v5805_v10 = vadd.f32 1.0, %v4598_v60  ;;  %v3874_v35 = vmul.f32 -1.442695, %v1651_v63  ;;  %v3894_v7 = vmul.f32 -1.442695, %v1752_v3 }
 0x398   :  { %v4602_v13 = vpop.eup %4601  ;;  %v5810_v17 = vadd.f32 1.0, %v4600_v9 }
 0x399   :  { %v4604_v55 = vpop.eup %4603  ;;  %v1665_v1 = vmul.f32 %v4602_v13, %v5780_v49  ;;  %4609 = vrcp.f32 %v5805_v10  ;;  %vm1670_vm2 = vweird.f32 %v4602_v13  ;;  %vm1918_vm5 = vweird.f32 %v5805_v10 }
 0x39a   :  { %v4606_v18 = vpop.eup %4605  ;;  %v1766_v31 = vmul.f32 %v4604_v55, %v5782_v56  ;;  %4611 = vrcp.f32 %v5810_v17  ;;  %vm1771_vm3 = vweird.f32 %v4604_v55  ;;  %vm1671_vm6 = vmor %vm1669_vm13, %vm1670_vm2  ;;  %v1922_v39 = vand.u32 2147483647, %v5805_v10  ;;  %v1958_v56 = vld [vmem:[#allocation3] sm:$0xff] }
 0x39b   :  { %v1666_v19 = vsub.f32 1.0, %v1665_v1  ;;  %v5818_v21 = vadd.f32 1.0, %v4606_v18  ;;  %v5820_v5 = vpop.f32.mrf.mxu2  ;;  %v1894_v15 = vpop.f32.mrf.mxu3  ;;  %v1924_v41 = vand.u32 2147483648, %v5805_v10  ;;  %vm1772_vm7 = vmor %vm1770_vm14, %vm1771_vm3  ;;  %vm1684_vm9 = vweird.f32 %v5810_v17  ;;  %v4286_v18 = vld [vmem:[%s6793_s1 + $0x38] sm:$0xff] }
 0x39c   :  { %v1767_v25 = vsub.f32 1.0, %v1766_v31  ;;  %v1647_v57 = vpop.f32.mrf.mxu0  ;;  %v1748_v22 = vpop.f32.mrf.mxu1  ;;  %v1900_v45 = vadd.f32 %v1894_v15, %v1863_v8  ;;  %v1688_v40 = vand.u32 2147483647, %v5810_v17  ;;  %v1690_v2 = vand.u32 2147483648, %v5810_v17  ;;  %v4284_v31 = vld [vmem:[%s6793_s1 + $0x28] sm:$0xff]  ;;  %2278 = vmatpush.bf16.msrb.mxu3 %v4286_v18 }
 0x39d   :  { %v4608_v29 = vpop.eup %4607  ;;  %v1667_v12 = vmul.f32 %v4602_v13, %v1666_v19  ;;  %4613 = vrcp.f32 %v5818_v21  ;;  %v1791_v50 = vand.u32 2147483648, %v5818_v21  ;;  %v1789_v1 = vand.u32 2147483647, %v5818_v21  ;;  %2231 = vmatpush.bf16.msrb.mxu2 %v4284_v31  ;;  %v4281_v57 = vld [vmem:[%s6793_s1 + $0x10] sm:$0xff]  ;;  %v1960_v15 = vld [vmem:[#allocation3 + $0x10] sm:$0x3] }
 0x39e   :  { %v1768_v33 = vmul.f32 %v4604_v55, %v1767_v25  ;;  %4615 = vtanh.f32 %v1852_v24  ;;  %v3931_v8 = vmul.f32 -1.442695, %v1900_v45  ;;  %v1691_v25 = vor.u32 1.1754944e-38, %v1690_v2  ;;  %v4285_v22 = vld [vmem:[%s6793_s1 + $0x30] sm:$0xff]  ;;  %2131 = vmatpush.bf16.msrb.mxu1 %v4281_v57 }
 0x39f   :  { %v5831_v43 = vpop.eup %4609  ;;  %v1668_v52 = vadd.f32 %v4602_v13, %v1667_v12  ;;  %4617 = vpow2.f32 %v3930_v23  ;;  %v1925_v23 = vor.u32 1.1754944e-38, %v1924_v41  ;;  %vm1689_vm3 = vcmp.eq.f32.partialorder %v1688_v40, 8.507059e+37 }
 0x3a0   :  { %v1769_v30 = vadd.f32 %v4604_v55, %v1768_v33  ;;  %v1914_v20 = vmul.f32 %v5831_v43, %v5805_v10  ;;  %v5840_v61 = vpop.eup %4611  ;;  %4619 = vpow2.f32 %v3874_v35  ;;  %vm1919_vm10 = vweird.f32 %v5831_v43  ;;  %2279 = vmatpush.bf16.msrb.mxu3 %v4285_v22 }
 0x3a1   :  { %v1672_v44 = vsel %vm1671_vm6, %v4602_v13, %v1668_v52  ;;  %v1680_v49 = vmul.f32 %v5840_v61, %v5810_v17  ;;  %4621 = vpow2.f32 %v3894_v7  ;;  %vm1685_vm11 = vweird.f32 %v5840_v61  ;;  %vm5883_vm13 = vmor %vm1918_vm5, %vm1919_vm10  ;;  %v4279_v17 = vld [vmem:[%s6793_s1] sm:$0xff]  ;;  %2232 = vmatpush.bf16.msrb.mxu2 %v4283_v38 }
 0x3a2   :  { %v1677_v47 = vsel %vm5822_vm15, %v1676_v28, %v1672_v44  ;;  %v1773_v42 = vsel %vm1772_vm7, %v4604_v55, %v1769_v30  ;;  %v1915_v48 = vsub.f32 1.0, %v1914_v20  ;;  %4623 = vpow2.f32 %v3931_v8  ;;  %vm5895_vm2 = vmor %vm1684_vm9, %vm1685_vm11  ;;  %2030 = vmatpush.bf16.msrb.mxu0 %v4279_v17  ;;  %v1959_v30 = vld [vmem:[#allocation3 + $0x8] sm:$0xff] }
 0x3a3   :  { %v5849_v54 = vpop.eup %4613  ;;  %v1778_v32 = vsel %vm5827_vm4, %v1777_v26, %v1773_v42  ;;  %v1964_v14 = vmul.f32 %v4608_v29, %v1677_v47  ;;  %v1849_v51 = vpop.f32.mrf.mxu2  ;;  %v1681_v62 = vsub.f32 1.0, %v1680_v49  ;;  %vm1785_vm15 = vweird.f32 %v5818_v21 }
 0x3a4   :  { %v1896_v37 = vpop.f32.mrf.mxu3  ;;  %v4616_v46 = vpop.eup %4615  ;;  %v1961_v58 = vmul.f32 %v1958_v56, %v1778_v32  ;;  %v1916_v59 = vmul.f32 %v5831_v43, %v1915_v48  ;;  %v1781_v0 = vmul.f32 %v5849_v54, %v5818_v21  ;;  %vm1786_vm14 = vweird.f32 %v5849_v54 }
 0x3a5   :  { %v4618_v60 = vpop.eup %4617  ;;  %v1682_v13 = vmul.f32 %v5840_v61, %v1681_v62  ;;  %vm1787_vm4 = vmor %vm1785_vm15, %vm1786_vm14  ;;  %v1792_v12 = vor.u32 1.1754944e-38, %v1791_v50  ;;  %vm1790_vm5 = vcmp.eq.f32.partialorder %v1789_v1, 8.507059e+37  ;;  %vm1923_vm6 = vcmp.eq.f32.partialorder %v1922_v39, 8.507059e+37 }
 0x3a6   :  { %v1967_v9 = vadd.f32 %v1964_v14, %v1961_v58  ;;  %v1782_v11 = vsub.f32 1.0, %v1781_v0  ;;  %v4620_v4 = vpop.eup %4619  ;;  %v1917_v55 = vadd.f32 %v5831_v43, %v1916_v59  ;;  %v5870_v63 = vadd.f32 1.0, %v4618_v60 }
 0x3a7   :  { %v1683_v3 = vadd.f32 %v5840_v61, %v1682_v13  ;;  %v4622_v19 = vpop.eup %4621  ;;  %v5904_v28 = vadd.f32 1.0, %v4620_v4  ;;  %v1853_v10 = vadd.f32 %v5820_v5, %v1816_v6 }
 0x3a8   :  { %4625 = vtanh.f32 %v1967_v9  ;;  %1976 = vst.msk [vmem:[#allocation3] sm:$0xff] %vm16_vm0, %v1967_v9  ;;  %v1783_v24 = vmul.f32 %v5849_v54, %v1782_v11  ;;  %v1921_v29 = vsel %vm5883_vm13, %v5831_v43, %v1917_v55  ;;  %v5922_v33 = vadd.f32 1.0, %v4622_v19  ;;  %v4624_v43 = vpop.eup %4623 }
 0x3a9   :  { %4627 = vrcp.f32 %v5870_v63  ;;  %v1687_v26 = vsel %vm5895_vm2, %v5840_v61, %v1683_v3  ;;  %v1926_v41 = vsel %vm1923_vm6, %v1925_v23, %v1921_v29  ;;  %v5932_v47 = vadd.f32 1.0, %v4624_v43 }
 0x3aa   :  { %v1784_v27 = vadd.f32 %v5849_v54, %v1783_v24  ;;  %v1692_v35 = vsel %vm1689_vm3, %v1691_v25, %v1687_v26  ;;  %4629 = vrcp.f32 %v5904_v28  ;;  %v1937_v49 = vand.u32 2147483647, %v5870_v63 }
 0x3ab   :  { %v1965_v7 = vmul.f32 %v4616_v46, %v1692_v35  ;;  %4631 = vrcp.f32 %v5922_v33  ;;  %vm1933_vm9 = vweird.f32 %v5870_v63  ;;  %v1806_v59 = vand.u32 2147483648, %v5922_v33 }
 0x3ac   :  { %v1788_v52 = vsel %vm1787_vm4, %v5849_v54, %v1784_v27  ;;  %v1939_v54 = vand.u32 2147483648, %v5870_v63  ;;  %4633 = vrcp.f32 %v5932_v47  ;;  %vm5950_vm10 = vcmp.eq.f32.partialorder %v1937_v49, 8.507059e+37 }
 0x3ad   :  { %v1793_v21 = vsel %vm1790_vm5, %v1792_v12, %v1788_v52  ;;  %v1705_v62 = vand.u32 2147483648, %v5904_v28  ;;  %v1703_v50 = vand.u32 2147483647, %v5904_v28  ;;  %v1804_v2 = vand.u32 2147483647, %v5922_v33 }
 0x3ae   :  { %v4626_v20 = vpop.eup %4625  ;;  %v1962_v61 = vmul.f32 %v1959_v30, %v1793_v21  ;;  %v1940_v51 = vor.u32 1.1754944e-38, %v1939_v54  ;;  %vm1800_vm15 = vweird.f32 %v5922_v33  ;;  %vm1699_vm2 = vweird.f32 %v5904_v28 }
 0x3af   :  { %v4628_v44 = vpop.eup %4627  ;;  %v1973_v45 = vmul.f32 %v4626_v20, %v1926_v41  ;;  %v1706_v1 = vor.u32 1.1754944e-38, %v1705_v62  ;;  %v1807_v31 = vor.u32 1.1754944e-38, %v1806_v59  ;;  %vm1704_vm5 = vcmp.eq.f32.partialorder %v1703_v50, 8.507059e+37  ;;  %v4392_v41 = vld [vmem:[%s6794_s0 + $0xf0] sm:$0xff]  }
 0x3b0   :  { %v1968_v42 = vadd.f32 %v1965_v7, %v1962_v61  ;;  %v1929_v48 = vmul.f32 %v4628_v44, %v5870_v63  ;;  %v4630_v32 = vpop.eup %4629  ;;  %vm1934_vm7 = vweird.f32 %v4628_v44  ;;  %vm1805_vm6 = vcmp.eq.f32.partialorder %v1804_v2, 8.507059e+37  ;;  %v3951_v61 = vld [vmem:[%s6794_s0 + $0xfc] sm:$0xff]  }
 0x3b1   :  { %1979 = vst.msk [vmem:[#allocation2] sm:$0xff] %vm16_vm0, %v1973_v45  ;;  %v1982_v39 = vpack.c.bf16 %v1973_v45, %v1973_v45  ;;  %v4632_v14 = vpop.eup %4631  ;;  %v1695_v53 = vmul.f32 %v4630_v32, %v5904_v28  ;;  %vm1935_vm11 = vmor %vm1933_vm9, %vm1934_vm7  ;;  %vm1700_vm13 = vweird.f32 %v4630_v32  ;;  %v1954_v57 = vand.u32 2147483648, %v5932_v47 }
 0x3b2   :  { %4635 = vtanh.f32 %v1968_v42  ;;  %1977 = vst.msk [vmem:[#allocation3 + $0x8] sm:$0xff] %vm16_vm0, %v1968_v42  ;;  %v1930_v56 = vsub.f32 1.0, %v1929_v48  ;;  %v1796_v5 = vmul.f32 %v4632_v14, %v5922_v33  ;;  %v4634_v0 = vpop.eup %4633  ;;  %vm1801_vm14 = vweird.f32 %v4632_v14  ;;  %vm1701_vm3 = vmor %vm1699_vm2, %vm1700_vm13 }
 0x3b3   :  { %3932 = vst.msk [vmem:[%s6795_s2 + $0x30] sm:$0xf] %vm416_vm8, %v1982_v39  ;;  %4637 = vtanh.f32 %v1853_v10  ;;  %v1696_v37 = vsub.f32 1.0, %v1695_v53  ;;  %v1944_v13 = vmul.f32 %v4634_v0, %v5932_v47  ;;  %vm1802_vm4 = vmor %vm1800_vm15, %vm1801_vm14  ;;  %vm1949_vm7 = vweird.f32 %v4634_v0  ;;  %v3988_v39 = vld [vmem:[%s6794_s0 + $0x114] sm:$0xff]  }
 0x3b4   :  { %v1931_v6 = vmul.f32 %v4628_v44, %v1930_v56  ;;  %v1797_v58 = vsub.f32 1.0, %v1796_v5  ;;  %vm1948_vm9 = vweird.f32 %v5932_v47  ;;  %v1952_v22 = vand.u32 2147483647, %v5932_v47  ;;  %v4393_v5 = vld [vmem:[%s6794_s0 + $0x108] sm:$0xff]  }
 0x3b5   :  { %v1697_v60 = vmul.f32 %v4630_v32, %v1696_v37  ;;  %v1945_v18 = vsub.f32 1.0, %v1944_v13  ;;  %v1955_v38 = vor.u32 1.1754944e-38, %v1954_v57  ;;  %v2105_v45 = vunpack.c.l.bf16 %v3951_v61 }
 0x3b6   :  { %v1932_v46 = vadd.f32 %v4628_v44, %v1931_v6  ;;  %v1798_v11 = vmul.f32 %v4632_v14, %v1797_v58  ;;  %v4354_v56 = vunpack.c.h.bf16 %v4392_v41 }
 0x3b7   :  { %v1698_v34 = vadd.f32 %v4630_v32, %v1697_v60  ;;  %v1946_v26 = vmul.f32 %v4634_v0, %v1945_v18 }
 0x3b8   :  { %v4636_v8 = vpop.eup %4635  ;;  %v1936_v9 = vsel %vm1935_vm11, %v4628_v44, %v1932_v46  ;;  %v1799_v63 = vadd.f32 %v4632_v14, %v1798_v11  ;;  %v1989_v29 = vld [vmem:[#allocation2] sm:$0xff]  ;;  %vm1953_vm11 = vcmp.eq.f32.partialorder %v1952_v22, 8.507059e+37  ;;  %v4353_v44 = vunpack.c.l.bf16 %v4392_v41  ;;  %v3937_v11 = vld [vmem:[%s6794_s0 + $0xf8] sm:$0x1] }
 0x3b9   :  { %v1941_v36 = vsel %vm5950_vm10, %v1940_v51, %v1936_v9  ;;  %v4638_v4 = vpop.eup %4637  ;;  %v1702_v16 = vsel %vm1701_vm3, %v4630_v32, %v1698_v34  ;;  %v1947_v17 = vadd.f32 %v4634_v0, %v1946_v26  ;;  %vm1950_vm10 = vmor %vm1948_vm9, %vm1949_vm7  ;;  %v2253_v32 = vunpack.c.l.bf16 %v3988_v39 }
 0x3ba   :  { %v1974_v55 = vmul.f32 %v4636_v8, %v1941_v36  ;;  %v1707_v3 = vsel %vm1704_vm5, %v1706_v1, %v1702_v16  ;;  %v1803_v19 = vsel %vm1802_vm4, %v4632_v14, %v1799_v63  ;;  %v2106_v14 = vunpack.c.h.bf16 %v3951_v61  ;;  %v6012_v1 = vld [vmem:[%s6794_s0 + $0x110] sm:$0x1]  ;;  %v6017_v63 = vld [vmem:[%s6794_s0 + $0x11c] sm:$0x1] }
 0x3bb   :  { %v1808_v23 = vsel %vm1805_vm6, %v1807_v31, %v1803_v19  ;;  %v1966_v25 = vmul.f32 %v4638_v4, %v1707_v3  ;;  %v1951_v33 = vsel %vm1950_vm10, %v4634_v0, %v1947_v17  ;;  %v4357_v0 = vunpack.c.l.bf16 %v4393_v5 }
 0x3bc   :  { %1980 = vst.msk [vmem:[#allocation2 + $0x8] sm:$0xff] %vm16_vm0, %v1974_v55  ;;  %v1983_v24 = vpack.c.bf16 %v1974_v55, %v1974_v55  ;;  %v1963_v27 = vmul.f32 %v1960_v15, %v1808_v23  ;;  %v1956_v7 = vsel %vm1953_vm11, %v1955_v38, %v1951_v33  ;;  %v2254_v34 = vunpack.c.h.bf16 %v3988_v39  ;;  %v3953_v55 = vld [vmem:[%s6794_s0 + $0x104] sm:$0x1] }
 0x3bd   :  { %v2000_v16 = vunpack.c.l.bf16 %v3937_v11  ;;  %v4358_v3 = vunpack.c.h.bf16 %v4393_v5  ;;  %v2107_v19 = vunpack.c.l.bf16 %v3953_v55  ;;  %v2208_v23 = vunpack.c.l.bf16 %v6012_v1 }
 0x3be   :  { %3933 = vst.msk [vmem:[%s6795_s2 + $0x34] sm:$0xf] %vm416_vm8, %v1983_v24  ;;  %v1969_v28 = vadd.f32 %v1966_v25, %v1963_v27  ;;  %v2255_v15 = vunpack.c.l.bf16 %v6017_v63 }
 0x3c0   :  { %4639 = vtanh.f32 %v1969_v28  ;;  %1978 = vst.msk [vmem:[#allocation3 + $0x10] sm:$0x3] %vm19_vm1, %v1969_v28 }
 0x3c3   :  { %v1990_v12 = vld [vmem:[#allocation2 + $0x8] sm:$0xff] }
 0x3c4   :  { %v1992_v35 = vpack.c.bf16 %v1990_v12, %v1989_v29 }
 0x3c6   :  { %3946 = vmatmul.msk.bf16.vlgmr.msrb.gmra.mxu0 %vm16_vm0, %v1992_v35  ;;  %3966 = vmatmul.msk.bf16.vlgmr.msrb.gmra.mxu1 %vm16_vm0, %v1992_v35  ;;  %v4640_v52 = vpop.eup %4639 }
 0x3c7   :  { %3986 = vmatmul.msk.bf16.vlgmr.msrb.gmra.mxu2 %vm16_vm0, %v1992_v35  ;;  %4003 = vmatmul.msk.bf16.vlgmr.msrb.gmra.mxu3 %vm16_vm0, %v1992_v35  ;;  %v1975_v43 = vmul.f32 %v4640_v52, %v1956_v7 }
 0x3c9   :  { %v1984_v21 = vpack.c.bf16 %v1975_v43, %v1975_v43  ;;  %1981 = vst.msk [vmem:[#allocation2 + $0x10] sm:$0x3] %vm19_vm1, %v1975_v43 }
 0x3cb   :  { %3934 = vst.msk [vmem:[%s6795_s2 + $0x38] sm:$0x1] %vm419_vm12, %v1984_v21 }
 0x3d0   :  { %v1991_v30 = vld [vmem:[#allocation2 + $0x10] sm:$0x3] }
 0x3d1   :  { %v1993_v20 = vpack.c.bf16 %v1991_v30, %v1991_v30 }
 0x3d6   :  { %3947 = vmatmul.msk.bf16.gmra.mxu0 %vm16_vm0, %v1993_v20  ;;  %3967 = vmatmul.msk.bf16.gmra.mxu1 %vm16_vm0, %v1993_v20 }
 0x3d7   :  { %3987 = vmatmul.msk.bf16.gmra.mxu2 %vm16_vm0, %v1993_v20  ;;  %4004 = vmatmul.msk.bf16.gmra.mxu3 %vm16_vm0, %v1993_v20 }
 0x443   :  { %v2032_v47 = vpop.f32.mrf.mxu0  ;;  %v2133_v42 = vpop.f32.mrf.mxu1 }
 0x444   :  { %v2041_v48 = vadd.f32 %v4353_v44, %v2032_v47  ;;  %v2142_v10 = vadd.f32 %v2133_v42, %v2105_v45 }
 0x446   :  { %v3948_v49 = vmul.f32 -1.442695, %v2041_v48  ;;  %v3968_v54 = vmul.f32 -1.442695, %v2142_v10 }
 0x448   :  { %4641 = vpow2.f32 %v3948_v49 }
 0x449   :  { %4643 = vpow2.f32 %v3968_v54 }
 0x44a   :  { %v2234_v53 = vpop.f32.mrf.mxu2  ;;  %v2281_v6 = vpop.f32.mrf.mxu3 }
 0x44b   :  { %v2290_v40 = vadd.f32 %v2281_v6, %v2253_v32  ;;  %v2034_v51 = vpop.f32.mrf.mxu0  ;;  %v2135_v37 = vpop.f32.mrf.mxu1  ;;  %v2243_v13 = vadd.f32 %v4357_v0, %v2234_v53 }
 0x44c   :  { %v2042_v46 = vadd.f32 %v4354_v56, %v2034_v51  ;;  %v2143_v58 = vadd.f32 %v2135_v37, %v2106_v14  ;;  %v4291_v14 = vld [vmem:[%s6793_s1 + $0x20] sm:$0xff] }
 0x44d   :  { %v4005_v59 = vmul.f32 -1.442695, %v2290_v40 }
 0x44e   :  { %v4642_v62 = vpop.eup %4641  ;;  %v3949_v60 = vmul.f32 -1.442695, %v2042_v46  ;;  %v3969_v8 = vmul.f32 -1.442695, %v2143_v58 }
 0x44f   :  { %v4644_v50 = vpop.eup %4643  ;;  %v5997_v2 = vadd.f32 1.0, %v4642_v62  ;;  %4645 = vpow2.f32 %v4005_v59 }
 0x450   :  { %v5999_v9 = vadd.f32 1.0, %v4644_v50  ;;  %4647 = vpow2.f32 %v3949_v60 }
 0x451   :  { %4649 = vrcp.f32 %v5997_v2  ;;  %vm2061_vm13 = vweird.f32 %v5997_v2  ;;  %v2065_v57 = vand.u32 2147483647, %v5997_v2  ;;  %v2067_v22 = vand.u32 2147483648, %v5997_v2 }
 0x452   :  { %4651 = vrcp.f32 %v5999_v9  ;;  %v2236_v36 = vpop.f32.mrf.mxu2  ;;  %v2283_v4 = vpop.f32.mrf.mxu3  ;;  %v2168_v17 = vand.u32 2147483648, %v5999_v9  ;;  %vm2162_vm14 = vweird.f32 %v5999_v9  ;;  %v2166_v7 = vand.u32 2147483647, %v5999_v9 }
 0x453   :  { %4653 = vpow2.f32 %v3969_v8  ;;  %v2037_v18 = vpop.f32.mrf.mxu0  ;;  %v2138_v31 = vpop.f32.mrf.mxu1  ;;  %v2291_v27 = vadd.f32 %v2283_v4, %v2254_v34  ;;  %v2244_v43 = vadd.f32 %v4358_v3, %v2236_v36  ;;  %vm6039_vm15 = vcmp.eq.f32.partialorder %v2065_v57, 8.507059e+37  ;;  %v4290_v57 = vld [vmem:[%s6793_s1 + $0x18] sm:$0xff] }
 0x454   :  { %4655 = vtanh.f32 %v2243_v13  ;;  %v2043_v33 = vadd.f32 %v2037_v18, %v2000_v16  ;;  %v2144_v21 = vadd.f32 %v2138_v31, %v2107_v19  ;;  %v2169_v47 = vor.u32 1.1754944e-38, %v2168_v17  ;;  %v4288_v17 = vld [vmem:[%s6793_s1 + $0x8] sm:$0xff]  ;;  %2522 = vmatpush.bf16.msra.mxu1 %v4290_v57 }
 0x455   :  { %v4646_v24 = vpop.eup %4645  ;;  %v4006_v41 = vmul.f32 -1.442695, %v2291_v27  ;;  %v2068_v48 = vor.u32 1.1754944e-38, %v2067_v22  ;;  %vm6044_vm4 = vcmp.eq.f32.partialorder %v2166_v7, 8.507059e+37  ;;  %2421 = vmatpush.bf16.msra.mxu0 %v4288_v17 }
 0x456   :  { %v4648_v25 = vpop.eup %4647  ;;  %v6022_v26 = vadd.f32 1.0, %v4646_v24  ;;  %v3950_v32 = vmul.f32 -1.442695, %v2043_v33  ;;  %v3970_v5 = vmul.f32 -1.442695, %v2144_v21 }
 0x457   :  { %v4650_v28 = vpop.eup %4649  ;;  %v6027_v29 = vadd.f32 1.0, %v4648_v25 }
 0x458   :  { %v4652_v12 = vpop.eup %4651  ;;  %v2057_v35 = vmul.f32 %v4650_v28, %v5997_v2  ;;  %4657 = vrcp.f32 %v6022_v26  ;;  %vm2062_vm2 = vweird.f32 %v4650_v28  ;;  %vm2310_vm5 = vweird.f32 %v6022_v26 }
 0x459   :  { %v4654_v38 = vpop.eup %4653  ;;  %v2158_v52 = vmul.f32 %v4652_v12, %v5999_v9  ;;  %4659 = vrcp.f32 %v6027_v29  ;;  %vm2163_vm3 = vweird.f32 %v4652_v12  ;;  %vm2063_vm6 = vmor %vm2061_vm13, %vm2062_vm2  ;;  %v2314_v37 = vand.u32 2147483647, %v6022_v26  ;;  %v2350_v9 = vld [vmem:[#allocation3] sm:$0xff] }
 0x45a   :  { %v2058_v30 = vsub.f32 1.0, %v2057_v35  ;;  %v6035_v20 = vadd.f32 1.0, %v4654_v38  ;;  %v6037_v61 = vpop.f32.mrf.mxu2  ;;  %v2286_v44 = vpop.f32.mrf.mxu3  ;;  %v2316_v46 = vand.u32 2147483648, %v6022_v26  ;;  %vm2164_vm7 = vmor %vm2162_vm14, %vm2163_vm3  ;;  %vm2076_vm9 = vweird.f32 %v6027_v29  ;;  %v4294_v38 = vld [vmem:[%s6793_s1 + $0x38] sm:$0xff] }
 0x45b   :  { %v2159_v45 = vsub.f32 1.0, %v2158_v52  ;;  %v2039_v10 = vpop.f32.mrf.mxu0  ;;  %v2140_v39 = vpop.f32.mrf.mxu1  ;;  %v2292_v62 = vadd.f32 %v2286_v44, %v2255_v15  ;;  %v2080_v36 = vand.u32 2147483647, %v6027_v29  ;;  %v2082_v19 = vand.u32 2147483648, %v6027_v29  ;;  %v4292_v52 = vld [vmem:[%s6793_s1 + $0x28] sm:$0xff]  ;;  %2670 = vmatpush.bf16.msra.mxu3 %v4294_v38 }
 0x45c   :  { %v4656_v49 = vpop.eup %4655  ;;  %v2059_v54 = vmul.f32 %v4650_v28, %v2058_v30  ;;  %4661 = vrcp.f32 %v6035_v20  ;;  %v2183_v3 = vand.u32 2147483648, %v6035_v20  ;;  %v2181_v35 = vand.u32 2147483647, %v6035_v20  ;;  %2623 = vmatpush.bf16.msra.mxu2 %v4292_v52  ;;  %v4289_v10 = vld [vmem:[%s6793_s1 + $0x10] sm:$0xff]  ;;  %v2352_v44 = vld [vmem:[#allocation3 + $0x10] sm:$0x3] }
 0x45d   :  { %v2160_v56 = vmul.f32 %v4652_v12, %v2159_v45  ;;  %4663 = vtanh.f32 %v2244_v43  ;;  %v4007_v15 = vmul.f32 -1.442695, %v2292_v62  ;;  %v2083_v45 = vor.u32 1.1754944e-38, %v2082_v19  ;;  %v4293_v39 = vld [vmem:[%s6793_s1 + $0x30] sm:$0xff]  ;;  %2523 = vmatpush.bf16.msra.mxu1 %v4289_v10 }
 0x45e   :  { %v6048_v53 = vpop.eup %4657  ;;  %v2060_v6 = vadd.f32 %v4650_v28, %v2059_v54  ;;  %4665 = vpow2.f32 %v4006_v41  ;;  %v2317_v41 = vor.u32 1.1754944e-38, %v2316_v46  ;;  %vm2081_vm3 = vcmp.eq.f32.partialorder %v2080_v36, 8.507059e+37 }
 0x45f   :  { %v2161_v40 = vadd.f32 %v4652_v12, %v2160_v56  ;;  %v2306_v51 = vmul.f32 %v6048_v53, %v6022_v26  ;;  %v6057_v58 = vpop.eup %4659  ;;  %4667 = vpow2.f32 %v3950_v32  ;;  %vm2311_vm10 = vweird.f32 %v6048_v53  ;;  %2671 = vmatpush.bf16.msra.mxu3 %v4293_v39 }
 0x460   :  { %v2064_v59 = vsel %vm2063_vm6, %v4650_v28, %v2060_v6  ;;  %v2072_v2 = vmul.f32 %v6057_v58, %v6027_v29  ;;  %4669 = vpow2.f32 %v3970_v5  ;;  %vm2077_vm11 = vweird.f32 %v6057_v58  ;;  %vm6100_vm13 = vmor %vm2310_vm5, %vm2311_vm10  ;;  %v4287_v29 = vld [vmem:[%s6793_s1] sm:$0xff]  ;;  %2624 = vmatpush.bf16.msra.mxu2 %v4291_v14 }
 0x461   :  { %v2069_v0 = vsel %vm6039_vm15, %v2068_v48, %v2064_v59  ;;  %v2165_v60 = vsel %vm2164_vm7, %v4652_v12, %v2161_v40  ;;  %v2307_v50 = vsub.f32 1.0, %v2306_v51  ;;  %4671 = vpow2.f32 %v4007_v15  ;;  %vm6112_vm2 = vmor %vm2076_vm9, %vm2077_vm11  ;;  %2422 = vmatpush.bf16.msra.mxu0 %v4287_v29  ;;  %v2351_v40 = vld [vmem:[#allocation3 + $0x8] sm:$0xff] }
 0x462   :  { %v6066_v8 = vpop.eup %4661  ;;  %v2170_v11 = vsel %vm6044_vm4, %v2169_v47, %v2165_v60  ;;  %v2356_v13 = vmul.f32 %v4656_v49, %v2069_v0  ;;  %v2241_v34 = vpop.f32.mrf.mxu2  ;;  %v2073_v31 = vsub.f32 1.0, %v2072_v2  ;;  %vm2177_vm15 = vweird.f32 %v6035_v20 }
 0x463   :  { %v2288_v4 = vpop.f32.mrf.mxu3  ;;  %v4664_v55 = vpop.eup %4663  ;;  %v2353_v63 = vmul.f32 %v2350_v9, %v2170_v11  ;;  %v2308_v18 = vmul.f32 %v6048_v53, %v2307_v50  ;;  %v2173_v16 = vmul.f32 %v6066_v8, %v6035_v20  ;;  %vm2178_vm14 = vweird.f32 %v6066_v8 }
 0x464   :  { %v4666_v24 = vpop.eup %4665  ;;  %v2074_v28 = vmul.f32 %v6057_v58, %v2073_v31  ;;  %vm2179_vm4 = vmor %vm2177_vm15, %vm2178_vm14  ;;  %v2184_v54 = vor.u32 1.1754944e-38, %v2183_v3  ;;  %vm2182_vm5 = vcmp.eq.f32.partialorder %v2181_v35, 8.507059e+37  ;;  %vm2315_vm6 = vcmp.eq.f32.partialorder %v2314_v37, 8.507059e+37 }
 0x465   :  { %v2359_v25 = vadd.f32 %v2356_v13, %v2353_v63  ;;  %v2174_v27 = vsub.f32 1.0, %v2173_v16  ;;  %v4668_v22 = vpop.eup %4667  ;;  %v2309_v12 = vadd.f32 %v6048_v53, %v2308_v18  ;;  %v6087_v33 = vadd.f32 1.0, %v4666_v24 }
 0x466   :  { %v2075_v21 = vadd.f32 %v6057_v58, %v2074_v28  ;;  %v4670_v30 = vpop.eup %4669  ;;  %v6121_v48 = vadd.f32 1.0, %v4668_v22  ;;  %v2245_v26 = vadd.f32 %v6037_v61, %v2208_v23 }
 0x467   :  { %4673 = vtanh.f32 %v2359_v25  ;;  %2368 = vst.msk [vmem:[#allocation3] sm:$0xff] %vm16_vm0, %v2359_v25  ;;  %v2175_v43 = vmul.f32 %v6066_v8, %v2174_v27  ;;  %v2313_v49 = vsel %vm6100_vm13, %v6048_v53, %v2309_v12  ;;  %v6139_v56 = vadd.f32 1.0, %v4670_v30  ;;  %v4672_v53 = vpop.eup %4671 }
 0x468   :  { %4675 = vrcp.f32 %v6087_v33  ;;  %v2079_v47 = vsel %vm6112_vm2, %v6057_v58, %v2075_v21  ;;  %v2318_v46 = vsel %vm2315_vm6, %v2317_v41, %v2313_v49  ;;  %v6149_v0 = vadd.f32 1.0, %v4672_v53 }
 0x469   :  { %v2176_v42 = vadd.f32 %v6066_v8, %v2175_v43  ;;  %v2084_v32 = vsel %vm2081_vm3, %v2083_v45, %v2079_v47  ;;  %4677 = vrcp.f32 %v6121_v48  ;;  %v2329_v2 = vand.u32 2147483647, %v6087_v33 }
 0x46a   :  { %v2357_v5 = vmul.f32 %v4664_v55, %v2084_v32  ;;  %4679 = vrcp.f32 %v6139_v56  ;;  %vm2325_vm9 = vweird.f32 %v6087_v33  ;;  %v2198_v18 = vand.u32 2147483648, %v6139_v56 }
 0x46b   :  { %v2180_v6 = vsel %vm2179_vm4, %v6066_v8, %v2176_v42  ;;  %v2331_v8 = vand.u32 2147483648, %v6087_v33  ;;  %4681 = vrcp.f32 %v6149_v0  ;;  %vm6167_vm10 = vcmp.eq.f32.partialorder %v2329_v2, 8.507059e+37 }
 0x46c   :  { %v2185_v20 = vsel %vm2182_vm5, %v2184_v54, %v2180_v6  ;;  %v2097_v31 = vand.u32 2147483648, %v6121_v48  ;;  %v2095_v3 = vand.u32 2147483647, %v6121_v48  ;;  %v2196_v19 = vand.u32 2147483647, %v6139_v56 }
 0x46d   :  { %v4674_v51 = vpop.eup %4673  ;;  %v2354_v58 = vmul.f32 %v2351_v40, %v2185_v20  ;;  %v2332_v34 = vor.u32 1.1754944e-38, %v2331_v8  ;;  %vm2192_vm15 = vweird.f32 %v6139_v56  ;;  %vm2091_vm2 = vweird.f32 %v6121_v48 }
 0x46e   :  { %v4676_v59 = vpop.eup %4675  ;;  %v2365_v62 = vmul.f32 %v4674_v51, %v2318_v46  ;;  %v2098_v35 = vor.u32 1.1754944e-38, %v2097_v31  ;;  %v2199_v52 = vor.u32 1.1754944e-38, %v2198_v18  ;;  %vm2096_vm5 = vcmp.eq.f32.partialorder %v2095_v3, 8.507059e+37  ;;  %v4394_v46 = vld [vmem:[%s6794_s0 + $0x120] sm:$0xff]  }
 0x46f   :  { %v2360_v60 = vadd.f32 %v2357_v5, %v2354_v58  ;;  %v2321_v50 = vmul.f32 %v4676_v59, %v6087_v33  ;;  %v4678_v11 = vpop.eup %4677  ;;  %vm2326_vm7 = vweird.f32 %v4676_v59  ;;  %vm2197_vm6 = vcmp.eq.f32.partialorder %v2196_v19, 8.507059e+37  ;;  %v4027_v58 = vld [vmem:[%s6794_s0 + $0x12c] sm:$0xff]  }
 0x470   :  { %2371 = vst.msk [vmem:[#allocation2] sm:$0xff] %vm16_vm0, %v2365_v62  ;;  %v2374_v37 = vpack.c.bf16 %v2365_v62, %v2365_v62  ;;  %v4680_v13 = vpop.eup %4679  ;;  %v2087_v1 = vmul.f32 %v4678_v11, %v6121_v48  ;;  %vm2327_vm11 = vmor %vm2325_vm9, %vm2326_vm7  ;;  %vm2092_vm13 = vweird.f32 %v4678_v11  ;;  %v2346_v10 = vand.u32 2147483648, %v6149_v0 }
 0x471   :  { %4683 = vtanh.f32 %v2360_v60  ;;  %2369 = vst.msk [vmem:[#allocation3 + $0x8] sm:$0xff] %vm16_vm0, %v2360_v60  ;;  %v2322_v9 = vsub.f32 1.0, %v2321_v50  ;;  %v2188_v61 = vmul.f32 %v4680_v13, %v6139_v56  ;;  %v4682_v16 = vpop.eup %4681  ;;  %vm2193_vm14 = vweird.f32 %v4680_v13  ;;  %vm2093_vm3 = vmor %vm2091_vm2, %vm2092_vm13 }
 0x472   :  { %4008 = vst.msk [vmem:[%s6795_s2 + $0x3c] sm:$0xf] %vm416_vm8, %v2374_v37  ;;  %4685 = vtanh.f32 %v2245_v26  ;;  %v2088_v4 = vsub.f32 1.0, %v2087_v1  ;;  %v2336_v28 = vmul.f32 %v4682_v16, %v6149_v0  ;;  %vm2194_vm4 = vmor %vm2192_vm15, %vm2193_vm14  ;;  %vm2341_vm7 = vweird.f32 %v4682_v16  ;;  %v4064_v37 = vld [vmem:[%s6794_s0 + $0x144] sm:$0xff]  }
 0x473   :  { %v2323_v23 = vmul.f32 %v4676_v59, %v2322_v9  ;;  %v2189_v63 = vsub.f32 1.0, %v2188_v61  ;;  %vm2340_vm9 = vweird.f32 %v6149_v0  ;;  %v2344_v39 = vand.u32 2147483647, %v6149_v0  ;;  %v4395_v61 = vld [vmem:[%s6794_s0 + $0x138] sm:$0xff]  }
 0x474   :  { %v2089_v24 = vmul.f32 %v4678_v11, %v2088_v4  ;;  %v2337_v38 = vsub.f32 1.0, %v2336_v28  ;;  %v2347_v14 = vor.u32 1.1754944e-38, %v2346_v10  ;;  %v2497_v62 = vunpack.c.l.bf16 %v4027_v58 }
 0x475   :  { %v2324_v55 = vadd.f32 %v4676_v59, %v2323_v23  ;;  %v2190_v27 = vmul.f32 %v4680_v13, %v2189_v63  ;;  %v4362_v9 = vunpack.c.h.bf16 %v4394_v46 }
 0x476   :  { %v2090_v57 = vadd.f32 %v4678_v11, %v2089_v24  ;;  %v2338_v47 = vmul.f32 %v4682_v16, %v2337_v38 }
 0x477   :  { %v4684_v15 = vpop.eup %4683  ;;  %v2328_v25 = vsel %vm2327_vm11, %v4676_v59, %v2324_v55  ;;  %v2191_v33 = vadd.f32 %v4680_v13, %v2190_v27  ;;  %v2381_v49 = vld [vmem:[#allocation2] sm:$0xff]  ;;  %vm2345_vm11 = vcmp.eq.f32.partialorder %v2344_v39, 8.507059e+37  ;;  %v4361_v59 = vunpack.c.l.bf16 %v4394_v46  ;;  %v4013_v27 = vld [vmem:[%s6794_s0 + $0x128] sm:$0x1] }
 0x478   :  { %v2333_v17 = vsel %vm6167_vm10, %v2332_v34, %v2328_v25  ;;  %v4686_v22 = vpop.eup %4685  ;;  %v2094_v7 = vsel %vm2093_vm3, %v4678_v11, %v2090_v57  ;;  %v2339_v29 = vadd.f32 %v4682_v16, %v2338_v47  ;;  %vm2342_vm10 = vmor %vm2340_vm9, %vm2341_vm7  ;;  %v2645_v11 = vunpack.c.l.bf16 %v4064_v37 }
 0x479   :  { %v2366_v12 = vmul.f32 %v4684_v15, %v2333_v17  ;;  %v2099_v21 = vsel %vm2096_vm5, %v2098_v35, %v2094_v7  ;;  %v2195_v30 = vsel %vm2194_vm4, %v4680_v13, %v2191_v33  ;;  %v2498_v13 = vunpack.c.h.bf16 %v4027_v58  ;;  %v6229_v35 = vld [vmem:[%s6794_s0 + $0x140] sm:$0x1]  ;;  %v6234_v33 = vld [vmem:[%s6794_s0 + $0x14c] sm:$0x1] }
 0x47a   :  { %v2200_v41 = vsel %vm2197_vm6, %v2199_v52, %v2195_v30  ;;  %v2358_v45 = vmul.f32 %v4686_v22, %v2099_v21  ;;  %v2343_v56 = vsel %vm2342_vm10, %v4682_v16, %v2339_v29  ;;  %v4365_v16 = vunpack.c.l.bf16 %v4395_v61 }
 0x47b   :  { %2372 = vst.msk [vmem:[#allocation2 + $0x8] sm:$0xff] %vm16_vm0, %v2366_v12  ;;  %v2375_v43 = vpack.c.bf16 %v2366_v12, %v2366_v12  ;;  %v2355_v42 = vmul.f32 %v2352_v44, %v2200_v41  ;;  %v2348_v5 = vsel %vm2345_vm11, %v2347_v14, %v2343_v56  ;;  %v2646_v57 = vunpack.c.h.bf16 %v4064_v37  ;;  %v4029_v12 = vld [vmem:[%s6794_s0 + $0x134] sm:$0x1] }
 0x47c   :  { %v2392_v7 = vunpack.c.l.bf16 %v4013_v27  ;;  %v4366_v21 = vunpack.c.h.bf16 %v4395_v61  ;;  %v2499_v30 = vunpack.c.l.bf16 %v4029_v12  ;;  %v2600_v41 = vunpack.c.l.bf16 %v6229_v35 }
 0x47d   :  { %4009 = vst.msk [vmem:[%s6795_s2 + $0x40] sm:$0xf] %vm416_vm8, %v2375_v43  ;;  %v2361_v48 = vadd.f32 %v2358_v45, %v2355_v42  ;;  %v2647_v44 = vunpack.c.l.bf16 %v6234_v33 }
 0x47f   :  { %4687 = vtanh.f32 %v2361_v48  ;;  %2370 = vst.msk [vmem:[#allocation3 + $0x10] sm:$0x3] %vm19_vm1, %v2361_v48 }
 0x482   :  { %v2382_v54 = vld [vmem:[#allocation2 + $0x8] sm:$0xff] }
 0x483   :  { %v2384_v32 = vpack.c.bf16 %v2382_v54, %v2381_v49 }
 0x485   :  { %4022 = vmatmul.msk.bf16.vlgmr.msra.gmra.mxu0 %vm16_vm0, %v2384_v32  ;;  %4042 = vmatmul.msk.bf16.vlgmr.msra.gmra.mxu1 %vm16_vm0, %v2384_v32  ;;  %v4688_v6 = vpop.eup %4687 }
 0x486   :  { %4062 = vmatmul.msk.bf16.vlgmr.msra.gmra.mxu2 %vm16_vm0, %v2384_v32  ;;  %4079 = vmatmul.msk.bf16.vlgmr.msra.gmra.mxu3 %vm16_vm0, %v2384_v32  ;;  %v2367_v53 = vmul.f32 %v4688_v6, %v2348_v5 }
 0x488   :  { %v2376_v20 = vpack.c.bf16 %v2367_v53, %v2367_v53  ;;  %2373 = vst.msk [vmem:[#allocation2 + $0x10] sm:$0x3] %vm19_vm1, %v2367_v53 }
 0x48a   :  { %4010 = vst.msk [vmem:[%s6795_s2 + $0x44] sm:$0x1] %vm419_vm12, %v2376_v20 }
 0x48f   :  { %v2383_v40 = vld [vmem:[#allocation2 + $0x10] sm:$0x3] }
 0x490   :  { %v2385_v51 = vpack.c.bf16 %v2383_v40, %v2383_v40 }
 0x495   :  { %4023 = vmatmul.msk.bf16.gmra.mxu0 %vm16_vm0, %v2385_v51  ;;  %4043 = vmatmul.msk.bf16.gmra.mxu1 %vm16_vm0, %v2385_v51 }
 0x496   :  { %4063 = vmatmul.msk.bf16.gmra.mxu2 %vm16_vm0, %v2385_v51  ;;  %4080 = vmatmul.msk.bf16.gmra.mxu3 %vm16_vm0, %v2385_v51 }
 0x502   :  { %v2424_v0 = vpop.f32.mrf.mxu0  ;;  %v2525_v60 = vpop.f32.mrf.mxu1 }
 0x503   :  { %v2433_v50 = vadd.f32 %v4361_v59, %v2424_v0  ;;  %v2534_v26 = vadd.f32 %v2525_v60, %v2497_v62 }
 0x505   :  { %v4024_v2 = vmul.f32 -1.442695, %v2433_v50  ;;  %v4044_v8 = vmul.f32 -1.442695, %v2534_v26 }
 0x507   :  { %4689 = vpow2.f32 %v4024_v2 }
 0x508   :  { %4691 = vpow2.f32 %v4044_v8 }
 0x509   :  { %v2626_v1 = vpop.f32.mrf.mxu2  ;;  %v2673_v23 = vpop.f32.mrf.mxu3 }
 0x50a   :  { %v2682_v36 = vadd.f32 %v2673_v23, %v2645_v11  ;;  %v2426_v34 = vpop.f32.mrf.mxu0  ;;  %v2527_v4 = vpop.f32.mrf.mxu1  ;;  %v2635_v28 = vadd.f32 %v4365_v16, %v2626_v1 }
 0x50b   :  { %v2434_v55 = vadd.f32 %v4362_v9, %v2426_v34  ;;  %v2535_v63 = vadd.f32 %v2527_v4, %v2498_v13  ;;  %v4299_v13 = vld [vmem:[%s6793_s1 + $0x20] sm:$0xff] }
 0x50c   :  { %v4081_v18 = vmul.f32 -1.442695, %v2682_v36 }
 0x50d   :  { %v4690_v31 = vpop.eup %4689  ;;  %v4025_v24 = vmul.f32 -1.442695, %v2434_v55  ;;  %v4045_v15 = vmul.f32 -1.442695, %v2535_v63 }
 0x50e   :  { %v4692_v3 = vpop.eup %4691  ;;  %v6214_v19 = vadd.f32 1.0, %v4690_v31  ;;  %4693 = vpow2.f32 %v4081_v18 }
 0x50f   :  { %v6216_v25 = vadd.f32 1.0, %v4692_v3  ;;  %4695 = vpow2.f32 %v4025_v24 }
 0x510   :  { %4697 = vrcp.f32 %v6214_v19  ;;  %vm2453_vm13 = vweird.f32 %v6214_v19  ;;  %v2457_v10 = vand.u32 2147483647, %v6214_v19  ;;  %v2459_v39 = vand.u32 2147483648, %v6214_v19 }
 0x511   :  { %4699 = vrcp.f32 %v6216_v25  ;;  %v2628_v17 = vpop.f32.mrf.mxu2  ;;  %v2675_v22 = vpop.f32.mrf.mxu3  ;;  %v2560_v29 = vand.u32 2147483648, %v6216_v25  ;;  %vm2554_vm14 = vweird.f32 %v6216_v25  ;;  %v2558_v5 = vand.u32 2147483647, %v6216_v25 }
 0x512   :  { %4701 = vpow2.f32 %v4045_v15  ;;  %v2429_v38 = vpop.f32.mrf.mxu0  ;;  %v2530_v52 = vpop.f32.mrf.mxu1  ;;  %v2683_v42 = vadd.f32 %v2675_v22, %v2646_v57  ;;  %v2636_v53 = vadd.f32 %v4366_v21, %v2628_v17  ;;  %vm6256_vm15 = vcmp.eq.f32.partialorder %v2457_v10, 8.507059e+37  ;;  %v4298_v10 = vld [vmem:[%s6793_s1 + $0x18] sm:$0xff] }
 0x513   :  { %4703 = vtanh.f32 %v2635_v28  ;;  %v2435_v56 = vadd.f32 %v2429_v38, %v2392_v7  ;;  %v2536_v20 = vadd.f32 %v2530_v52, %v2499_v30  ;;  %v2561_v0 = vor.u32 1.1754944e-38, %v2560_v29  ;;  %v4296_v29 = vld [vmem:[%s6793_s1 + $0x8] sm:$0xff]  ;;  %2914 = vmatpush.bf16.msrb.mxu1 %v4298_v10 }
 0x514   :  { %v4694_v43 = vpop.eup %4693  ;;  %v4082_v46 = vmul.f32 -1.442695, %v2683_v42  ;;  %v2460_v50 = vor.u32 1.1754944e-38, %v2459_v39  ;;  %vm6261_vm4 = vcmp.eq.f32.partialorder %v2558_v5, 8.507059e+37  ;;  %2813 = vmatpush.bf16.msrb.mxu0 %v4296_v29 }
 0x515   :  { %v4696_v45 = vpop.eup %4695  ;;  %v6239_v47 = vadd.f32 1.0, %v4694_v43  ;;  %v4026_v11 = vmul.f32 -1.442695, %v2435_v56  ;;  %v4046_v61 = vmul.f32 -1.442695, %v2536_v20 }
 0x516   :  { %v4698_v48 = vpop.eup %4697  ;;  %v6244_v49 = vadd.f32 1.0, %v4696_v45 }
 0x517   :  { %v4700_v54 = vpop.eup %4699  ;;  %v2449_v32 = vmul.f32 %v4698_v48, %v6214_v19  ;;  %4705 = vrcp.f32 %v6239_v47  ;;  %vm2454_vm2 = vweird.f32 %v4698_v48  ;;  %vm2702_vm5 = vweird.f32 %v6239_v47 }
 0x518   :  { %v4702_v14 = vpop.eup %4701  ;;  %v2550_v6 = vmul.f32 %v4700_v54, %v6216_v25  ;;  %4707 = vrcp.f32 %v6244_v49  ;;  %vm2555_vm3 = vweird.f32 %v4700_v54  ;;  %vm2455_vm6 = vmor %vm2453_vm13, %vm2454_vm2  ;;  %v2706_v4 = vand.u32 2147483647, %v6239_v47  ;;  %v2742_v25 = vld [vmem:[#allocation3] sm:$0xff] }
 0x519   :  { %v2450_v40 = vsub.f32 1.0, %v2449_v32  ;;  %v6252_v51 = vadd.f32 1.0, %v4702_v14  ;;  %v6254_v58 = vpop.f32.mrf.mxu2  ;;  %v2678_v59 = vpop.f32.mrf.mxu3  ;;  %v2708_v55 = vand.u32 2147483648, %v6239_v47  ;;  %vm2556_vm7 = vmor %vm2554_vm14, %vm2555_vm3  ;;  %vm2468_vm9 = vweird.f32 %v6244_v49  ;;  %v4302_v14 = vld [vmem:[%s6793_s1 + $0x38] sm:$0xff] }
 0x51a   :  { %v2551_v62 = vsub.f32 1.0, %v2550_v6  ;;  %v2431_v26 = vpop.f32.mrf.mxu0  ;;  %v2532_v37 = vpop.f32.mrf.mxu1  ;;  %v2684_v31 = vadd.f32 %v2678_v59, %v2647_v44  ;;  %v2472_v17 = vand.u32 2147483647, %v6244_v49  ;;  %v2474_v30 = vand.u32 2147483648, %v6244_v49  ;;  %v4300_v6 = vld [vmem:[%s6793_s1 + $0x28] sm:$0xff]  ;;  %3062 = vmatpush.bf16.msrb.mxu3 %v4302_v14 }
 0x51b   :  { %v4704_v2 = vpop.eup %4703  ;;  %v2451_v8 = vmul.f32 %v4698_v48, %v2450_v40  ;;  %4709 = vrcp.f32 %v6252_v51  ;;  %v2575_v21 = vand.u32 2147483648, %v6252_v51  ;;  %v2573_v32 = vand.u32 2147483647, %v6252_v51  ;;  %3015 = vmatpush.bf16.msrb.mxu2 %v4300_v6  ;;  %v4297_v26 = vld [vmem:[%s6793_s1 + $0x10] sm:$0xff]  ;;  %v2744_v59 = vld [vmem:[#allocation3 + $0x10] sm:$0x3] }
 0x51c   :  { %v2552_v9 = vmul.f32 %v4700_v54, %v2551_v62  ;;  %4711 = vtanh.f32 %v2636_v53  ;;  %v4083_v44 = vmul.f32 -1.442695, %v2684_v31  ;;  %v2475_v62 = vor.u32 1.1754944e-38, %v2474_v30  ;;  %v4301_v37 = vld [vmem:[%s6793_s1 + $0x30] sm:$0xff]  ;;  %2915 = vmatpush.bf16.msrb.mxu1 %v4297_v26 }
 0x51d   :  { %v6265_v1 = vpop.eup %4705  ;;  %v2452_v23 = vadd.f32 %v4698_v48, %v2451_v8  ;;  %4713 = vpow2.f32 %v4082_v46  ;;  %v2709_v46 = vor.u32 1.1754944e-38, %v2708_v55  ;;  %vm2473_vm3 = vcmp.eq.f32.partialorder %v2472_v17, 8.507059e+37 }
 0x51e   :  { %v2553_v36 = vadd.f32 %v4700_v54, %v2552_v9  ;;  %v2698_v34 = vmul.f32 %v6265_v1, %v6239_v47  ;;  %v6274_v63 = vpop.eup %4707  ;;  %4715 = vpow2.f32 %v4026_v11  ;;  %vm2703_vm10 = vweird.f32 %v6265_v1  ;;  %3063 = vmatpush.bf16.msrb.mxu3 %v4301_v37 }
 0x51f   :  { %v2456_v18 = vsel %vm2455_vm6, %v4698_v48, %v2452_v23  ;;  %v2464_v19 = vmul.f32 %v6274_v63, %v6244_v49  ;;  %4717 = vpow2.f32 %v4046_v61  ;;  %vm2469_vm11 = vweird.f32 %v6274_v63  ;;  %vm6317_vm13 = vmor %vm2702_vm5, %vm2703_vm10  ;;  %v4295_v49 = vld [vmem:[%s6793_s1] sm:$0xff]  ;;  %3016 = vmatpush.bf16.msrb.mxu2 %v4299_v13 }
 0x520   :  { %v2461_v16 = vsel %vm6256_vm15, %v2460_v50, %v2456_v18  ;;  %v2557_v24 = vsel %vm2556_vm7, %v4700_v54, %v2553_v36  ;;  %v2699_v3 = vsub.f32 1.0, %v2698_v34  ;;  %4719 = vpow2.f32 %v4083_v44  ;;  %vm6329_vm2 = vmor %vm2468_vm9, %vm2469_vm11  ;;  %2814 = vmatpush.bf16.msrb.mxu0 %v4295_v49  ;;  %v2743_v36 = vld [vmem:[#allocation3 + $0x8] sm:$0xff] }
 0x521   :  { %v6283_v15 = vpop.eup %4709  ;;  %v2562_v27 = vsel %vm6261_vm4, %v2561_v0, %v2557_v24  ;;  %v2748_v28 = vmul.f32 %v4704_v2, %v2461_v16  ;;  %v2633_v57 = vpop.f32.mrf.mxu2  ;;  %v2465_v52 = vsub.f32 1.0, %v2464_v19  ;;  %vm2569_vm15 = vweird.f32 %v6252_v51 }
 0x522   :  { %v2680_v22 = vpop.f32.mrf.mxu3  ;;  %v4712_v12 = vpop.eup %4711  ;;  %v2745_v33 = vmul.f32 %v2742_v25, %v2562_v27  ;;  %v2700_v38 = vmul.f32 %v6265_v1, %v2699_v3  ;;  %v2565_v7 = vmul.f32 %v6283_v15, %v6252_v51  ;;  %vm2570_vm14 = vweird.f32 %v6283_v15 }
 0x523   :  { %v4714_v43 = vpop.eup %4713  ;;  %v2466_v48 = vmul.f32 %v6274_v63, %v2465_v52  ;;  %vm2571_vm4 = vmor %vm2569_vm15, %vm2570_vm14  ;;  %v2576_v8 = vor.u32 1.1754944e-38, %v2575_v21  ;;  %vm2574_vm5 = vcmp.eq.f32.partialorder %v2573_v32, 8.507059e+37  ;;  %vm2707_vm6 = vcmp.eq.f32.partialorder %v2706_v4, 8.507059e+37 }
 0x524   :  { %v2751_v45 = vadd.f32 %v2748_v28, %v2745_v33  ;;  %v2566_v42 = vsub.f32 1.0, %v2565_v7  ;;  %v4716_v39 = vpop.eup %4715  ;;  %v2701_v54 = vadd.f32 %v6265_v1, %v2700_v38  ;;  %v6304_v56 = vadd.f32 1.0, %v4714_v43 }
 0x525   :  { %v2467_v20 = vadd.f32 %v6274_v63, %v2466_v48  ;;  %v4718_v40 = vpop.eup %4717  ;;  %v6338_v50 = vadd.f32 1.0, %v4716_v39  ;;  %v2637_v47 = vadd.f32 %v6254_v58, %v2600_v41 }
 0x526   :  { %4721 = vtanh.f32 %v2751_v45  ;;  %2760 = vst.msk [vmem:[#allocation3] sm:$0xff] %vm16_vm0, %v2751_v45  ;;  %v2567_v53 = vmul.f32 %v6283_v15, %v2566_v42  ;;  %v2705_v2 = vsel %vm6317_vm13, %v6265_v1, %v2701_v54  ;;  %v6356_v9 = vadd.f32 1.0, %v4718_v40  ;;  %v4720_v1 = vpop.eup %4719 }
 0x527   :  { %4723 = vrcp.f32 %v6304_v56  ;;  %v2471_v0 = vsel %vm6329_vm2, %v6274_v63, %v2467_v20  ;;  %v2710_v55 = vsel %vm2707_vm6, %v2709_v46, %v2705_v2  ;;  %v6366_v16 = vadd.f32 1.0, %v4720_v1 }
 0x528   :  { %v2568_v60 = vadd.f32 %v6283_v15, %v2567_v53  ;;  %v2476_v11 = vsel %vm2473_vm3, %v2475_v62, %v2471_v0  ;;  %4725 = vrcp.f32 %v6338_v50  ;;  %v2721_v19 = vand.u32 2147483647, %v6304_v56 }
 0x529   :  { %v2749_v61 = vmul.f32 %v4712_v12, %v2476_v11  ;;  %4727 = vrcp.f32 %v6356_v9  ;;  %vm2717_vm9 = vweird.f32 %v6304_v56  ;;  %v2590_v38 = vand.u32 2147483648, %v6356_v9 }
 0x52a   :  { %v2572_v23 = vsel %vm2571_vm4, %v6283_v15, %v2568_v60  ;;  %v2723_v15 = vand.u32 2147483648, %v6304_v56  ;;  %4729 = vrcp.f32 %v6366_v16  ;;  %vm6384_vm10 = vcmp.eq.f32.partialorder %v2721_v19, 8.507059e+37 }
 0x52b   :  { %v2577_v51 = vsel %vm2574_vm5, %v2576_v8, %v2572_v23  ;;  %v2489_v52 = vand.u32 2147483648, %v6338_v50  ;;  %v2487_v21 = vand.u32 2147483647, %v6338_v50  ;;  %v2588_v30 = vand.u32 2147483647, %v6356_v9 }
 0x52c   :  { %v4722_v34 = vpop.eup %4721  ;;  %v2746_v63 = vmul.f32 %v2743_v36, %v2577_v51  ;;  %v2724_v57 = vor.u32 1.1754944e-38, %v2723_v15  ;;  %vm2584_vm15 = vweird.f32 %v6356_v9  ;;  %vm2483_vm2 = vweird.f32 %v6338_v50 }
 0x52d   :  { %v4724_v18 = vpop.eup %4723  ;;  %v2757_v31 = vmul.f32 %v4722_v34, %v2710_v55  ;;  %v2490_v32 = vor.u32 1.1754944e-38, %v2489_v52  ;;  %v2591_v6 = vor.u32 1.1754944e-38, %v2590_v38  ;;  %vm2488_vm5 = vcmp.eq.f32.partialorder %v2487_v21, 8.507059e+37  ;;  %v4396_v55 = vld [vmem:[%s6794_s0 + $0x150] sm:$0xff]  }
 0x52e   :  { %v2752_v24 = vadd.f32 %v2749_v61, %v2746_v63  ;;  %v2713_v3 = vmul.f32 %v4724_v18, %v6304_v56  ;;  %v4726_v27 = vpop.eup %4725  ;;  %vm2718_vm7 = vweird.f32 %v4724_v18  ;;  %vm2589_vm6 = vcmp.eq.f32.partialorder %v2588_v30, 8.507059e+37  ;;  %v4103_v63 = vld [vmem:[%s6794_s0 + $0x15c] sm:$0xff]  }
 0x52f   :  { %2763 = vst.msk [vmem:[#allocation2] sm:$0xff] %vm16_vm0, %v2757_v31  ;;  %v2766_v4 = vpack.c.bf16 %v2757_v31, %v2757_v31  ;;  %v4728_v28 = vpop.eup %4727  ;;  %v2479_v35 = vmul.f32 %v4726_v27, %v6338_v50  ;;  %vm2719_vm11 = vmor %vm2717_vm9, %vm2718_vm7  ;;  %vm2484_vm13 = vweird.f32 %v4726_v27  ;;  %v2738_v26 = vand.u32 2147483648, %v6366_v16 }
 0x530   :  { %4731 = vtanh.f32 %v2752_v24  ;;  %2761 = vst.msk [vmem:[#allocation3 + $0x8] sm:$0xff] %vm16_vm0, %v2752_v24  ;;  %v2714_v25 = vsub.f32 1.0, %v2713_v3  ;;  %v2580_v58 = vmul.f32 %v4728_v28, %v6356_v9  ;;  %v4730_v7 = vpop.eup %4729  ;;  %vm2585_vm14 = vweird.f32 %v4728_v28  ;;  %vm2485_vm3 = vmor %vm2483_vm2, %vm2484_vm13 }
 0x531   :  { %4084 = vst.msk [vmem:[%s6795_s2 + $0x48] sm:$0xf] %vm416_vm8, %v2766_v4  ;;  %4733 = vtanh.f32 %v2637_v47  ;;  %v2480_v22 = vsub.f32 1.0, %v2479_v35  ;;  %v2728_v48 = vmul.f32 %v4730_v7, %v6366_v16  ;;  %vm2586_vm4 = vmor %vm2584_vm15, %vm2585_vm14  ;;  %vm2733_vm7 = vweird.f32 %v4730_v7  ;;  %v4140_v4 = vld [vmem:[%s6794_s0 + $0x174] sm:$0xff]  }
 0x532   :  { %v2715_v41 = vmul.f32 %v4724_v18, %v2714_v25  ;;  %v2581_v33 = vsub.f32 1.0, %v2580_v58  ;;  %vm2732_vm9 = vweird.f32 %v6366_v16  ;;  %v2736_v37 = vand.u32 2147483647, %v6366_v16  ;;  %v4397_v58 = vld [vmem:[%s6794_s0 + $0x168] sm:$0xff]  }
 0x533   :  { %v2481_v43 = vmul.f32 %v4726_v27, %v2480_v22  ;;  %v2729_v14 = vsub.f32 1.0, %v2728_v48  ;;  %v2739_v13 = vor.u32 1.1754944e-38, %v2738_v26  ;;  %v2889_v31 = vunpack.c.l.bf16 %v4103_v63 }
 0x534   :  { %v2716_v12 = vadd.f32 %v4724_v18, %v2715_v41  ;;  %v2582_v42 = vmul.f32 %v4728_v28, %v2581_v33  ;;  %v4370_v25 = vunpack.c.h.bf16 %v4396_v55 }
 0x535   :  { %v2482_v10 = vadd.f32 %v4726_v27, %v2481_v43  ;;  %v2730_v0 = vmul.f32 %v4730_v7, %v2729_v14 }
 0x536   :  { %v4732_v44 = vpop.eup %4731  ;;  %v2720_v45 = vsel %vm2719_vm11, %v4724_v18, %v2716_v12  ;;  %v2583_v56 = vadd.f32 %v4728_v28, %v2582_v42  ;;  %v2773_v2 = vld [vmem:[#allocation2] sm:$0xff]  ;;  %vm2737_vm11 = vcmp.eq.f32.partialorder %v2736_v37, 8.507059e+37  ;;  %v4369_v18 = vunpack.c.l.bf16 %v4396_v55  ;;  %v4089_v42 = vld [vmem:[%s6794_s0 + $0x158] sm:$0x1] }
 0x537   :  { %v2725_v29 = vsel %vm6384_vm10, %v2724_v57, %v2720_v45  ;;  %v4734_v39 = vpop.eup %4733  ;;  %v2486_v5 = vsel %vm2485_vm3, %v4726_v27, %v2482_v10  ;;  %v2731_v49 = vadd.f32 %v4730_v7, %v2730_v0  ;;  %vm2734_vm10 = vmor %vm2732_vm9, %vm2733_vm7  ;;  %v3037_v27 = vunpack.c.l.bf16 %v4140_v4 }
 0x538   :  { %v2758_v54 = vmul.f32 %v4732_v44, %v2725_v29  ;;  %v2491_v20 = vsel %vm2488_vm5, %v2490_v32, %v2486_v5  ;;  %v2587_v40 = vsel %vm2586_vm4, %v4728_v28, %v2583_v56  ;;  %v2890_v28 = vunpack.c.h.bf16 %v4103_v63  ;;  %v6446_v32 = vld [vmem:[%s6794_s0 + $0x170] sm:$0x1]  ;;  %v6451_v56 = vld [vmem:[%s6794_s0 + $0x17c] sm:$0x1] }
 0x539   :  { %v2592_v46 = vsel %vm2589_vm6, %v2591_v6, %v2587_v40  ;;  %v2750_v62 = vmul.f32 %v4734_v39, %v2491_v20  ;;  %v2735_v9 = vsel %vm2734_vm10, %v4730_v7, %v2731_v49  ;;  %v4373_v7 = vunpack.c.l.bf16 %v4397_v58 }
 0x53a   :  { %2764 = vst.msk [vmem:[#allocation2 + $0x8] sm:$0xff] %vm16_vm0, %v2758_v54  ;;  %v2767_v53 = vpack.c.bf16 %v2758_v54, %v2758_v54  ;;  %v2747_v60 = vmul.f32 %v2744_v59, %v2592_v46  ;;  %v2740_v61 = vsel %vm2737_vm11, %v2739_v13, %v2735_v9  ;;  %v3038_v10 = vunpack.c.h.bf16 %v4140_v4  ;;  %v4105_v54 = vld [vmem:[%s6794_s0 + $0x164] sm:$0x1] }
 0x53b   :  { %v2784_v5 = vunpack.c.l.bf16 %v4089_v42  ;;  %v4374_v20 = vunpack.c.h.bf16 %v4397_v58  ;;  %v2891_v40 = vunpack.c.l.bf16 %v4105_v54  ;;  %v2992_v46 = vunpack.c.l.bf16 %v6446_v32 }
 0x53c   :  { %4085 = vst.msk [vmem:[%s6795_s2 + $0x4c] sm:$0xf] %vm416_vm8, %v2767_v53  ;;  %v2753_v50 = vadd.f32 %v2750_v62, %v2747_v60  ;;  %v3039_v59 = vunpack.c.l.bf16 %v6451_v56 }
 0x53e   :  { %4735 = vtanh.f32 %v2753_v50  ;;  %2762 = vst.msk [vmem:[#allocation3 + $0x10] sm:$0x3] %vm19_vm1, %v2753_v50 }
 0x541   :  { %v2774_v8 = vld [vmem:[#allocation2 + $0x8] sm:$0xff] }
 0x542   :  { %v2776_v11 = vpack.c.bf16 %v2774_v8, %v2773_v2 }
 0x544   :  { %4098 = vmatmul.msk.bf16.vlgmr.msrb.gmra.mxu0 %vm16_vm0, %v2776_v11  ;;  %4118 = vmatmul.msk.bf16.vlgmr.msrb.gmra.mxu1 %vm16_vm0, %v2776_v11  ;;  %v4736_v23 = vpop.eup %4735 }
 0x545   :  { %4138 = vmatmul.msk.bf16.vlgmr.msrb.gmra.mxu2 %vm16_vm0, %v2776_v11  ;;  %4155 = vmatmul.msk.bf16.vlgmr.msrb.gmra.mxu3 %vm16_vm0, %v2776_v11  ;;  %v2759_v1 = vmul.f32 %v4736_v23, %v2740_v61 }
 0x547   :  { %v2768_v51 = vpack.c.bf16 %v2759_v1, %v2759_v1  ;;  %2765 = vst.msk [vmem:[#allocation2 + $0x10] sm:$0x3] %vm19_vm1, %v2759_v1 }
 0x549   :  { %4086 = vst.msk [vmem:[%s6795_s2 + $0x50] sm:$0x1] %vm419_vm12, %v2768_v51 }
 0x54e   :  { %v2775_v36 = vld [vmem:[#allocation2 + $0x10] sm:$0x3] }
 0x54f   :  { %v2777_v34 = vpack.c.bf16 %v2775_v36, %v2775_v36 }
 0x554   :  { %4099 = vmatmul.msk.bf16.gmra.mxu0 %vm16_vm0, %v2777_v34  ;;  %4119 = vmatmul.msk.bf16.gmra.mxu1 %vm16_vm0, %v2777_v34 }
 0x555   :  { %4139 = vmatmul.msk.bf16.gmra.mxu2 %vm16_vm0, %v2777_v34  ;;  %4156 = vmatmul.msk.bf16.gmra.mxu3 %vm16_vm0, %v2777_v34 }
 0x5c1   :  { %v2816_v16 = vpop.f32.mrf.mxu0  ;;  %v2917_v24 = vpop.f32.mrf.mxu1 }
 0x5c2   :  { %v2825_v3 = vadd.f32 %v4369_v18, %v2816_v16  ;;  %v2926_v47 = vadd.f32 %v2917_v24, %v2889_v31 }
 0x5c4   :  { %v4100_v19 = vmul.f32 -1.442695, %v2825_v3  ;;  %v4120_v15 = vmul.f32 -1.442695, %v2926_v47 }
 0x5c6   :  { %4737 = vpow2.f32 %v4100_v19 }
 0x5c7   :  { %4739 = vpow2.f32 %v4120_v15 }
 0x5c8   :  { %v3018_v35 = vpop.f32.mrf.mxu2  ;;  %v3065_v41 = vpop.f32.mrf.mxu3 }
 0x5c9   :  { %v3074_v17 = vadd.f32 %v3065_v41, %v3037_v27  ;;  %v2818_v57 = vpop.f32.mrf.mxu0  ;;  %v2919_v22 = vpop.f32.mrf.mxu1  ;;  %v3027_v48 = vadd.f32 %v4373_v7, %v3018_v35 }
 0x5ca   :  { %v2826_v12 = vadd.f32 %v4370_v25, %v2818_v57  ;;  %v2927_v33 = vadd.f32 %v2919_v22, %v2890_v28  ;;  %v4307_v28 = vld [vmem:[%s6793_s1 + $0x20] sm:$0xff] }
 0x5cb   :  { %v4157_v38 = vmul.f32 -1.442695, %v3074_v17 }
 0x5cc   :  { %v4738_v52 = vpop.eup %4737  ;;  %v4101_v43 = vmul.f32 -1.442695, %v2826_v12  ;;  %v4121_v44 = vmul.f32 -1.442695, %v2927_v33 }
 0x5cd   :  { %v4740_v21 = vpop.eup %4739  ;;  %v6431_v30 = vadd.f32 1.0, %v4738_v52  ;;  %4741 = vpow2.f32 %v4157_v38 }
 0x5ce   :  { %v6433_v45 = vadd.f32 1.0, %v4740_v21  ;;  %4743 = vpow2.f32 %v4101_v43 }
 0x5cf   :  { %4745 = vrcp.f32 %v6431_v30  ;;  %vm2845_vm13 = vweird.f32 %v6431_v30  ;;  %v2849_v26 = vand.u32 2147483647, %v6431_v30  ;;  %v2851_v37 = vand.u32 2147483648, %v6431_v30 }
 0x5d0   :  { %4747 = vrcp.f32 %v6433_v45  ;;  %v3020_v29 = vpop.f32.mrf.mxu2  ;;  %v3067_v39 = vpop.f32.mrf.mxu3  ;;  %v2952_v49 = vand.u32 2147483648, %v6433_v45  ;;  %vm2946_vm14 = vweird.f32 %v6433_v45  ;;  %v2950_v61 = vand.u32 2147483647, %v6433_v45 }
 0x5d1   :  { %4749 = vpow2.f32 %v4121_v44  ;;  %v2821_v14 = vpop.f32.mrf.mxu0  ;;  %v2922_v6 = vpop.f32.mrf.mxu1  ;;  %v3075_v60 = vadd.f32 %v3067_v39, %v3038_v10  ;;  %v3028_v1 = vadd.f32 %v4374_v20, %v3020_v29  ;;  %vm6473_vm15 = vcmp.eq.f32.partialorder %v2849_v26, 8.507059e+37  ;;  %v4306_v26 = vld [vmem:[%s6793_s1 + $0x18] sm:$0xff] }
 0x5d2   :  { %4751 = vtanh.f32 %v3027_v48  ;;  %v2827_v9 = vadd.f32 %v2821_v14, %v2784_v5  ;;  %v2928_v51 = vadd.f32 %v2922_v6, %v2891_v40  ;;  %v2953_v16 = vor.u32 1.1754944e-38, %v2952_v49  ;;  %v4304_v49 = vld [vmem:[%s6793_s1 + $0x8] sm:$0xff]  ;;  %3306 = vmatpush.bf16.msra.mxu1 %v4306_v26 }
 0x5d3   :  { %v4742_v53 = vpop.eup %4741  ;;  %v4158_v55 = vmul.f32 -1.442695, %v3075_v60  ;;  %v2852_v3 = vor.u32 1.1754944e-38, %v2851_v37  ;;  %vm6478_vm4 = vcmp.eq.f32.partialorder %v2950_v61, 8.507059e+37  ;;  %3205 = vmatpush.bf16.msra.mxu0 %v4304_v49 }
 0x5d4   :  { %v4744_v62 = vpop.eup %4743  ;;  %v6456_v0 = vadd.f32 1.0, %v4742_v53  ;;  %v4102_v27 = vmul.f32 -1.442695, %v2827_v9  ;;  %v4122_v58 = vmul.f32 -1.442695, %v2928_v51 }
 0x5d5   :  { %v4746_v50 = vpop.eup %4745  ;;  %v6461_v2 = vadd.f32 1.0, %v4744_v62 }
 0x5d6   :  { %v4748_v8 = vpop.eup %4747  ;;  %v2841_v11 = vmul.f32 %v4746_v50, %v6431_v30  ;;  %4753 = vrcp.f32 %v6456_v0  ;;  %vm2846_vm2 = vweird.f32 %v4746_v50  ;;  %vm3094_vm5 = vweird.f32 %v6456_v0 }
 0x5d7   :  { %v4750_v13 = vpop.eup %4749  ;;  %v2942_v23 = vmul.f32 %v4748_v8, %v6433_v45  ;;  %4755 = vrcp.f32 %v6461_v2  ;;  %vm2947_vm3 = vweird.f32 %v4748_v8  ;;  %vm2847_vm6 = vmor %vm2845_vm13, %vm2846_vm2  ;;  %v3098_v22 = vand.u32 2147483647, %v6456_v0  ;;  %v3134_v45 = vld [vmem:[#allocation3] sm:$0xff] }
 0x5d8   :  { %v2842_v36 = vsub.f32 1.0, %v2841_v11  ;;  %v6469_v34 = vadd.f32 1.0, %v4750_v13  ;;  %v6471_v63 = vpop.f32.mrf.mxu2  ;;  %v3070_v18 = vpop.f32.mrf.mxu3  ;;  %v3100_v12 = vand.u32 2147483648, %v6456_v0  ;;  %vm2948_vm7 = vmor %vm2946_vm14, %vm2947_vm3  ;;  %vm2860_vm9 = vweird.f32 %v6461_v2  ;;  %v4310_v13 = vld [vmem:[%s6793_s1 + $0x38] sm:$0xff] }
 0x5d9   :  { %v2943_v31 = vsub.f32 1.0, %v2942_v23  ;;  %v2823_v47 = vpop.f32.mrf.mxu0  ;;  %v2924_v4 = vpop.f32.mrf.mxu1  ;;  %v3076_v52 = vadd.f32 %v3070_v18, %v3039_v59  ;;  %v2864_v29 = vand.u32 2147483647, %v6461_v2  ;;  %v2866_v40 = vand.u32 2147483648, %v6461_v2  ;;  %v4308_v23 = vld [vmem:[%s6793_s1 + $0x28] sm:$0xff]  ;;  %3454 = vmatpush.bf16.msra.mxu3 %v4310_v13 }
 0x5da   :  { %v4752_v19 = vpop.eup %4751  ;;  %v2843_v15 = vmul.f32 %v4746_v50, %v2842_v36  ;;  %4757 = vrcp.f32 %v6469_v34  ;;  %v2967_v20 = vand.u32 2147483648, %v6469_v34  ;;  %v2965_v11 = vand.u32 2147483647, %v6469_v34  ;;  %3407 = vmatpush.bf16.msra.mxu2 %v4308_v23  ;;  %v4305_v47 = vld [vmem:[%s6793_s1 + $0x10] sm:$0xff]  ;;  %v3136_v18 = vld [vmem:[#allocation3 + $0x10] sm:$0x3] }
 0x5db   :  { %v2944_v25 = vmul.f32 %v4748_v8, %v2943_v31  ;;  %4759 = vtanh.f32 %v3028_v1  ;;  %v4159_v59 = vmul.f32 -1.442695, %v3076_v52  ;;  %v2867_v31 = vor.u32 1.1754944e-38, %v2866_v40  ;;  %v4309_v4 = vld [vmem:[%s6793_s1 + $0x30] sm:$0xff]  ;;  %3307 = vmatpush.bf16.msra.mxu1 %v4305_v47 }
 0x5dc   :  { %v6482_v35 = vpop.eup %4753  ;;  %v2844_v41 = vadd.f32 %v4746_v50, %v2843_v15  ;;  %4761 = vpow2.f32 %v4158_v55  ;;  %v3101_v55 = vor.u32 1.1754944e-38, %v3100_v12  ;;  %vm2865_vm3 = vcmp.eq.f32.partialorder %v2864_v29, 8.507059e+37 }
 0x5dd   :  { %v2945_v17 = vadd.f32 %v4748_v8, %v2944_v25  ;;  %v3090_v57 = vmul.f32 %v6482_v35, %v6456_v0  ;;  %v6491_v33 = vpop.eup %4755  ;;  %4763 = vpow2.f32 %v4102_v27  ;;  %vm3095_vm10 = vweird.f32 %v6482_v35  ;;  %3455 = vmatpush.bf16.msra.mxu3 %v4309_v4 }
 0x5de   :  { %v2848_v38 = vsel %vm2847_vm6, %v4746_v50, %v2844_v41  ;;  %v2856_v30 = vmul.f32 %v6491_v33, %v6461_v2  ;;  %4765 = vpow2.f32 %v4122_v58  ;;  %vm2861_vm11 = vweird.f32 %v6491_v33  ;;  %vm6534_vm13 = vmor %vm3094_vm5, %vm3095_vm10  ;;  %v4303_v2 = vld [vmem:[%s6793_s1] sm:$0xff]  ;;  %3408 = vmatpush.bf16.msra.mxu2 %v4307_v28 }
 0x5df   :  { %v2853_v7 = vsel %vm6473_vm15, %v2852_v3, %v2848_v38  ;;  %v2949_v43 = vsel %vm2948_vm7, %v4748_v8, %v2945_v17  ;;  %v3091_v21 = vsub.f32 1.0, %v3090_v57  ;;  %4767 = vpow2.f32 %v4159_v59  ;;  %vm6546_vm2 = vmor %vm2860_vm9, %vm2861_vm11  ;;  %3206 = vmatpush.bf16.msra.mxu0 %v4303_v2  ;;  %v3135_v17 = vld [vmem:[#allocation3 + $0x8] sm:$0xff] }
 0x5e0   :  { %v6500_v44 = vpop.eup %4757  ;;  %v2954_v42 = vsel %vm6478_vm4, %v2953_v16, %v2949_v43  ;;  %v3140_v48 = vmul.f32 %v4752_v19, %v2853_v7  ;;  %v3025_v10 = vpop.f32.mrf.mxu2  ;;  %v2857_v6 = vsub.f32 1.0, %v2856_v30  ;;  %vm2961_vm15 = vweird.f32 %v6469_v34 }
 0x5e1   :  { %v3072_v39 = vpop.f32.mrf.mxu3  ;;  %v4760_v54 = vpop.eup %4759  ;;  %v3137_v56 = vmul.f32 %v3134_v45, %v2954_v42  ;;  %v3092_v14 = vmul.f32 %v6482_v35, %v3091_v21  ;;  %v2957_v5 = vmul.f32 %v6500_v44, %v6469_v34  ;;  %vm2962_vm14 = vweird.f32 %v6500_v44 }
 0x5e2   :  { %v4762_v53 = vpop.eup %4761  ;;  %v2858_v50 = vmul.f32 %v6491_v33, %v2857_v6  ;;  %vm2963_vm4 = vmor %vm2961_vm15, %vm2962_vm14  ;;  %v2968_v15 = vor.u32 1.1754944e-38, %v2967_v20  ;;  %vm2966_vm5 = vcmp.eq.f32.partialorder %v2965_v11, 8.507059e+37  ;;  %vm3099_vm6 = vcmp.eq.f32.partialorder %v3098_v22, 8.507059e+37 }
 0x5e3   :  { %v3143_v62 = vadd.f32 %v3140_v48, %v3137_v56  ;;  %v2958_v60 = vsub.f32 1.0, %v2957_v5  ;;  %v4764_v37 = vpop.eup %4763  ;;  %v3093_v8 = vadd.f32 %v6482_v35, %v3092_v14  ;;  %v6521_v9 = vadd.f32 1.0, %v4762_v53 }
 0x5e4   :  { %v2859_v51 = vadd.f32 %v6491_v33, %v2858_v50  ;;  %v4766_v36 = vpop.eup %4765  ;;  %v6555_v3 = vadd.f32 1.0, %v4764_v37  ;;  %v3029_v0 = vadd.f32 %v6471_v63, %v2992_v46 }
 0x5e5   :  { %4769 = vtanh.f32 %v3143_v62  ;;  %3152 = vst.msk [vmem:[#allocation3] sm:$0xff] %vm16_vm0, %v3143_v62  ;;  %v2959_v1 = vmul.f32 %v6500_v44, %v2958_v60  ;;  %v3097_v19 = vsel %vm6534_vm13, %v6482_v35, %v3093_v8  ;;  %v6573_v25 = vadd.f32 1.0, %v4766_v36  ;;  %v4768_v35 = vpop.eup %4767 }
 0x5e6   :  { %4771 = vrcp.f32 %v6521_v9  ;;  %v2863_v16 = vsel %vm6546_vm2, %v6491_v33, %v2859_v51  ;;  %v3102_v12 = vsel %vm3099_vm6, %v3101_v55, %v3097_v19  ;;  %v6583_v7 = vadd.f32 1.0, %v4768_v35 }
 0x5e7   :  { %v2960_v24 = vadd.f32 %v6500_v44, %v2959_v1  ;;  %v2868_v27 = vsel %vm2865_vm3, %v2867_v31, %v2863_v16  ;;  %4773 = vrcp.f32 %v6555_v3  ;;  %v3113_v30 = vand.u32 2147483647, %v6521_v9 }
 0x5e8   :  { %v3141_v58 = vmul.f32 %v4760_v54, %v2868_v27  ;;  %4775 = vrcp.f32 %v6573_v25  ;;  %vm3109_vm9 = vweird.f32 %v6521_v9  ;;  %v2982_v14 = vand.u32 2147483648, %v6573_v25 }
 0x5e9   :  { %v2964_v41 = vsel %vm2963_vm4, %v6500_v44, %v2960_v24  ;;  %v3115_v44 = vand.u32 2147483648, %v6521_v9  ;;  %4777 = vrcp.f32 %v6583_v7  ;;  %vm6601_vm10 = vcmp.eq.f32.partialorder %v3113_v30, 8.507059e+37 }
 0x5ea   :  { %v2969_v34 = vsel %vm2966_vm5, %v2968_v15, %v2964_v41  ;;  %v2881_v6 = vand.u32 2147483648, %v6555_v3  ;;  %v2879_v20 = vand.u32 2147483647, %v6555_v3  ;;  %v2980_v40 = vand.u32 2147483647, %v6573_v25 }
 0x5eb   :  { %v4770_v57 = vpop.eup %4769  ;;  %v3138_v33 = vmul.f32 %v3135_v17, %v2969_v34  ;;  %v3116_v10 = vor.u32 1.1754944e-38, %v3115_v44  ;;  %vm2976_vm15 = vweird.f32 %v6573_v25  ;;  %vm2875_vm2 = vweird.f32 %v6555_v3 }
 0x5ec   :  { %v4772_v38 = vpop.eup %4771  ;;  %v3149_v52 = vmul.f32 %v4770_v57, %v3102_v12  ;;  %v2882_v11 = vor.u32 1.1754944e-38, %v2881_v6  ;;  %v2983_v23 = vor.u32 1.1754944e-38, %v2982_v14  ;;  %vm2880_vm5 = vcmp.eq.f32.partialorder %v2879_v20, 8.507059e+37  ;;  %v4398_v12 = vld [vmem:[%s6794_s0 + $0x180] sm:$0xff]  }
 0x5ed   :  { %v3144_v43 = vadd.f32 %v3141_v58, %v3138_v33  ;;  %v3105_v21 = vmul.f32 %v4772_v38, %v6521_v9  ;;  %v4774_v42 = vpop.eup %4773  ;;  %vm3110_vm7 = vweird.f32 %v4772_v38  ;;  %vm2981_vm6 = vcmp.eq.f32.partialorder %v2980_v40, 8.507059e+37  ;;  %v4179_v33 = vld [vmem:[%s6794_s0 + $0x18c] sm:$0xff]  }
 0x5ee   :  { %3155 = vst.msk [vmem:[#allocation2] sm:$0xff] %vm16_vm0, %v3149_v52  ;;  %v3158_v22 = vpack.c.bf16 %v3149_v52, %v3149_v52  ;;  %v4776_v48 = vpop.eup %4775  ;;  %v2871_v32 = vmul.f32 %v4774_v42, %v6555_v3  ;;  %vm3111_vm11 = vmor %vm3109_vm9, %vm3110_vm7  ;;  %vm2876_vm13 = vweird.f32 %v4774_v42  ;;  %v3130_v47 = vand.u32 2147483648, %v6583_v7 }
 0x5ef   :  { %4779 = vtanh.f32 %v3144_v43  ;;  %3153 = vst.msk [vmem:[#allocation3 + $0x8] sm:$0xff] %vm16_vm0, %v3144_v43  ;;  %v3106_v45 = vsub.f32 1.0, %v3105_v21  ;;  %v2972_v63 = vmul.f32 %v4776_v48, %v6573_v25  ;;  %v4778_v5 = vpop.eup %4777  ;;  %vm2977_vm14 = vweird.f32 %v4776_v48  ;;  %vm2877_vm3 = vmor %vm2875_vm2, %vm2876_vm13 }
 0x5f0   :  { %4160 = vst.msk [vmem:[%s6795_s2 + $0x54] sm:$0xf] %vm416_vm8, %v3158_v22  ;;  %4781 = vtanh.f32 %v3029_v0  ;;  %v2872_v39 = vsub.f32 1.0, %v2871_v32  ;;  %v3120_v50 = vmul.f32 %v4778_v5, %v6583_v7  ;;  %vm2978_vm4 = vmor %vm2976_vm15, %vm2977_vm14  ;;  %vm3125_vm7 = vweird.f32 %v4778_v5  ;;  %v4216_v22 = vld [vmem:[%s6794_s0 + $0x1a4] sm:$0xff]  }
 0x5f1   :  { %v3107_v46 = vmul.f32 %v4772_v38, %v3106_v45  ;;  %v2973_v56 = vsub.f32 1.0, %v2972_v63  ;;  %vm3124_vm9 = vweird.f32 %v6583_v7  ;;  %v3128_v4 = vand.u32 2147483647, %v6583_v7  ;;  %v4399_v63 = vld [vmem:[%s6794_s0 + $0x198] sm:$0xff]  }
 0x5f2   :  { %v2873_v53 = vmul.f32 %v4774_v42, %v2872_v39  ;;  %v3121_v13 = vsub.f32 1.0, %v3120_v50  ;;  %v3131_v28 = vor.u32 1.1754944e-38, %v3130_v47  ;;  %v3281_v52 = vunpack.c.l.bf16 %v4179_v33 }
 0x5f3   :  { %v3108_v54 = vadd.f32 %v4772_v38, %v3107_v46  ;;  %v2974_v60 = vmul.f32 %v4776_v48, %v2973_v56  ;;  %v4378_v45 = vunpack.c.h.bf16 %v4398_v12 }
 0x5f4   :  { %v2874_v26 = vadd.f32 %v4774_v42, %v2873_v53  ;;  %v3122_v16 = vmul.f32 %v4778_v5, %v3121_v13 }
 0x5f5   :  { %v4780_v59 = vpop.eup %4779  ;;  %v3112_v62 = vsel %vm3111_vm11, %v4772_v38, %v3108_v54  ;;  %v2975_v9 = vadd.f32 %v4776_v48, %v2974_v60  ;;  %v3165_v19 = vld [vmem:[#allocation2] sm:$0xff]  ;;  %vm3129_vm11 = vcmp.eq.f32.partialorder %v3128_v4, 8.507059e+37  ;;  %v4377_v38 = vunpack.c.l.bf16 %v4398_v12  ;;  %v4165_v60 = vld [vmem:[%s6794_s0 + $0x188] sm:$0x1] }
 0x5f6   :  { %v3117_v49 = vsel %vm6601_vm10, %v3116_v10, %v3112_v62  ;;  %v4782_v37 = vpop.eup %4781  ;;  %v2878_v61 = vsel %vm2877_vm3, %v4774_v42, %v2874_v26  ;;  %v3123_v2 = vadd.f32 %v4778_v5, %v3122_v16  ;;  %vm3126_vm10 = vmor %vm3124_vm9, %vm3125_vm7  ;;  %v3429_v42 = vunpack.c.l.bf16 %v4216_v22 }
 0x5f7   :  { %v3150_v8 = vmul.f32 %v4780_v59, %v3117_v49  ;;  %v2883_v51 = vsel %vm2880_vm5, %v2882_v11, %v2878_v61  ;;  %v2979_v36 = vsel %vm2978_vm4, %v4776_v48, %v2975_v9  ;;  %v3282_v48 = vunpack.c.h.bf16 %v4179_v33  ;;  %v6663_v11 = vld [vmem:[%s6794_s0 + $0x1a0] sm:$0x1] }
 0x5f8   :  { %v2984_v55 = vsel %vm2981_vm6, %v2983_v23, %v2979_v36  ;;  %v3142_v31 = vmul.f32 %v4782_v37, %v2883_v51  ;;  %v3127_v25 = vsel %vm3126_vm10, %v4778_v5, %v3123_v2  ;;  %v4381_v5 = vunpack.c.l.bf16 %v4399_v63  ;;  %v6668_v23 = vld [vmem:[%s6794_s0 + $0x1ac] sm:$0x1] }
 0x5f9   :  { %3156 = vst.msk [vmem:[#allocation2 + $0x8] sm:$0xff] %vm16_vm0, %v3150_v8  ;;  %v3159_v1 = vpack.c.bf16 %v3150_v8, %v3150_v8  ;;  %v3139_v24 = vmul.f32 %v3136_v18, %v2984_v55  ;;  %v3132_v58 = vsel %vm3129_vm11, %v3131_v28, %v3127_v25  ;;  %v3430_v26 = vunpack.c.h.bf16 %v4216_v22  ;;  %v4181_v8 = vld [vmem:[%s6794_s0 + $0x194] sm:$0x1] }
 0x5fa   :  { %v3176_v61 = vunpack.c.l.bf16 %v4165_v60  ;;  %v4382_v51 = vunpack.c.h.bf16 %v4399_v63  ;;  %v3283_v36 = vunpack.c.l.bf16 %v4181_v8  ;;  %v3384_v55 = vunpack.c.l.bf16 %v6663_v11 }
 0x5fb   :  { %4161 = vst.msk [vmem:[%s6795_s2 + $0x58] sm:$0xf] %vm416_vm8, %v3159_v1  ;;  %v3145_v3 = vadd.f32 %v3142_v31, %v3139_v24  ;;  %v3431_v24 = vunpack.c.l.bf16 %v6668_v23 }
 0x5fd   :  { %4783 = vtanh.f32 %v3145_v3  ;;  %3154 = vst.msk [vmem:[#allocation3 + $0x10] sm:$0x3] %vm19_vm1, %v3145_v3 }
 0x600   :  { %v3166_v15 = vld [vmem:[#allocation2 + $0x8] sm:$0xff] }
 0x601   :  { %v3168_v27 = vpack.c.bf16 %v3166_v15, %v3165_v19 }
 0x603   :  { %4174 = vmatmul.msk.bf16.vlgmr.msra.gmra.mxu0 %vm16_vm0, %v3168_v27  ;;  %4194 = vmatmul.msk.bf16.vlgmr.msra.gmra.mxu1 %vm16_vm0, %v3168_v27  ;;  %v4784_v41 = vpop.eup %4783 }
 0x604   :  { %4214 = vmatmul.msk.bf16.vlgmr.msra.gmra.mxu2 %vm16_vm0, %v3168_v27  ;;  %4231 = vmatmul.msk.bf16.vlgmr.msra.gmra.mxu3 %vm16_vm0, %v3168_v27  ;;  %v3151_v35 = vmul.f32 %v4784_v41, %v3132_v58 }
 0x606   :  { %v3160_v34 = vpack.c.bf16 %v3151_v35, %v3151_v35  ;;  %3157 = vst.msk [vmem:[#allocation2 + $0x10] sm:$0x3] %vm19_vm1, %v3151_v35 }
 0x608   :  { %4162 = vst.msk [vmem:[%s6795_s2 + $0x5c] sm:$0x1] %vm419_vm12, %v3160_v34 }
 0x60d   :  { %v3167_v17 = vld [vmem:[#allocation2 + $0x10] sm:$0x3] }
 0x60e   :  { %v3169_v57 = vpack.c.bf16 %v3167_v17, %v3167_v17 }
 0x613   :  { %4175 = vmatmul.msk.bf16.gmra.mxu0 %vm16_vm0, %v3169_v57  ;;  %4195 = vmatmul.msk.bf16.gmra.mxu1 %vm16_vm0, %v3169_v57 }
 0x614   :  { %4215 = vmatmul.msk.bf16.gmra.mxu2 %vm16_vm0, %v3169_v57  ;;  %4232 = vmatmul.msk.bf16.gmra.mxu3 %vm16_vm0, %v3169_v57 }
 0x680   :  { %v3208_v7 = vpop.f32.mrf.mxu0  ;;  %v3309_v43 = vpop.f32.mrf.mxu1 }
 0x681   :  { %v3217_v21 = vadd.f32 %v4377_v38, %v3208_v7  ;;  %v3318_v0 = vadd.f32 %v3309_v43, %v3281_v52 }
 0x683   :  { %v4176_v30 = vmul.f32 -1.442695, %v3217_v21  ;;  %v4196_v44 = vmul.f32 -1.442695, %v3318_v0 }
 0x685   :  { %4785 = vpow2.f32 %v4176_v30 }
 0x686   :  { %4787 = vpow2.f32 %v4196_v44 }
 0x687   :  { %v3410_v32 = vpop.f32.mrf.mxu2  ;;  %v3457_v46 = vpop.f32.mrf.mxu3 }
 0x688   :  { %v3466_v29 = vadd.f32 %v3457_v46, %v3429_v42  ;;  %v3210_v10 = vpop.f32.mrf.mxu0  ;;  %v3311_v39 = vpop.f32.mrf.mxu1  ;;  %v3419_v50 = vadd.f32 %v4381_v5, %v3410_v32 }
 0x689   :  { %v3218_v54 = vadd.f32 %v4378_v45, %v3210_v10  ;;  %v3319_v56 = vadd.f32 %v3311_v39, %v3282_v48 }
 0x68a   :  { %v4233_v14 = vmul.f32 -1.442695, %v3466_v29 }
 0x68b   :  { %v4786_v6 = vpop.eup %4785  ;;  %v4177_v53 = vmul.f32 -1.442695, %v3218_v54  ;;  %v4197_v59 = vmul.f32 -1.442695, %v3319_v56 }
 0x68c   :  { %v4788_v20 = vpop.eup %4787  ;;  %v6648_v40 = vadd.f32 1.0, %v4786_v6  ;;  %4789 = vpow2.f32 %v4233_v14 }
 0x68d   :  { %v6650_v62 = vadd.f32 1.0, %v4788_v20  ;;  %4791 = vpow2.f32 %v4177_v53 }
 0x68e   :  { %4793 = vrcp.f32 %v6648_v40  ;;  %vm3237_vm13 = vweird.f32 %v6648_v40  ;;  %v3241_v2 = vand.u32 2147483647, %v6648_v40  ;;  %v3243_v47 = vand.u32 2147483648, %v6648_v40 }
 0x68f   :  { %4795 = vrcp.f32 %v6650_v62  ;;  %v3412_v49 = vpop.f32.mrf.mxu2  ;;  %v3459_v37 = vpop.f32.mrf.mxu3  ;;  %v3344_v27 = vand.u32 2147483648, %v6650_v62  ;;  %v3342_v58 = vand.u32 2147483647, %v6650_v62  ;;  %vm3338_vm14 = vweird.f32 %v6650_v62 }
 0x690   :  { %4797 = vpow2.f32 %v4197_v59  ;;  %v3213_v9 = vpop.f32.mrf.mxu0  ;;  %v3314_v13 = vpop.f32.mrf.mxu1  ;;  %v3467_v16 = vadd.f32 %v3459_v37, %v3430_v26  ;;  %v3420_v35 = vadd.f32 %v4382_v51, %v3412_v49  ;;  %vm6690_vm15 = vcmp.eq.f32.partialorder %v3241_v2, 8.507059e+37 }
 0x691   :  { %4799 = vtanh.f32 %v3419_v50  ;;  %v3219_v25 = vadd.f32 %v3213_v9, %v3176_v61  ;;  %v3320_v34 = vadd.f32 %v3314_v13, %v3283_v36  ;;  %v3244_v43 = vor.u32 1.1754944e-38, %v3243_v47 }
 0x692   :  { %v4790_v1 = vpop.eup %4789  ;;  %v4234_v12 = vmul.f32 -1.442695, %v3467_v16  ;;  %v3345_v45 = vor.u32 1.1754944e-38, %v3344_v27  ;;  %vm6697_vm4 = vcmp.eq.f32.partialorder %v3342_v58, 8.507059e+37 }
 0x693   :  { %v4792_v18 = vpop.eup %4791  ;;  %v6671_v31 = vadd.f32 1.0, %v4790_v1  ;;  %v4178_v44 = vmul.f32 -1.442695, %v3219_v25  ;;  %v4198_v63 = vmul.f32 -1.442695, %v3320_v34 }
 0x694   :  { %v4794_v3 = vpop.eup %4793  ;;  %v6677_v4 = vadd.f32 1.0, %v4792_v18 }
 0x695   :  { %v4796_v19 = vpop.eup %4795  ;;  %v3233_v15 = vmul.f32 %v4794_v3, %v6648_v40  ;;  %4801 = vrcp.f32 %v6671_v31  ;;  %vm3238_vm2 = vweird.f32 %v4794_v3  ;;  %v3490_v39 = vand.u32 2147483647, %v6671_v31 }
 0x696   :  { %v4798_v28 = vpop.eup %4797  ;;  %v3334_v41 = vmul.f32 %v4796_v19, %v6650_v62  ;;  %4803 = vrcp.f32 %v6677_v4  ;;  %vm3339_vm3 = vweird.f32 %v4796_v19  ;;  %vm3239_vm5 = vmor %vm3237_vm13, %vm3238_vm2  ;;  %v3492_v54 = vand.u32 2147483648, %v6671_v31  ;;  %v3526_v62 = vld [vmem:[#allocation3] sm:$0xff] }
 0x697   :  { %v3234_v17 = vsub.f32 1.0, %v3233_v15  ;;  %v6685_v57 = vadd.f32 1.0, %v4798_v28  ;;  %v6687_v33 = vpop.f32.mrf.mxu2  ;;  %v3462_v38 = vpop.f32.mrf.mxu3  ;;  %vm3340_vm6 = vmor %vm3338_vm14, %vm3339_vm3  ;;  %vm3486_vm7 = vweird.f32 %v6671_v31  ;;  %vm3252_vm9 = vweird.f32 %v6677_v4 }
 0x698   :  { %v3335_v52 = vsub.f32 1.0, %v3334_v41  ;;  %v3215_v21 = vpop.f32.mrf.mxu0  ;;  %v3316_v0 = vpop.f32.mrf.mxu1  ;;  %v3468_v6 = vadd.f32 %v3462_v38, %v3431_v24  ;;  %v3256_v49 = vand.u32 2147483647, %v6677_v4  ;;  %v3258_v36 = vand.u32 2147483648, %v6677_v4 }
 0x699   :  { %v4800_v22 = vpop.eup %4799  ;;  %v3235_v30 = vmul.f32 %v4794_v3, %v3234_v17  ;;  %4805 = vrcp.f32 %v6685_v57  ;;  %v3359_v51 = vand.u32 2147483648, %v6685_v57  ;;  %v3357_v18 = vand.u32 2147483647, %v6685_v57 }
 0x69a   :  { %v3336_v42 = vmul.f32 %v4796_v19, %v3335_v52  ;;  %4807 = vtanh.f32 %v3420_v35  ;;  %v4235_v16 = vmul.f32 -1.442695, %v3468_v6  ;;  %v3493_v41 = vor.u32 1.1754944e-38, %v3492_v54 }
 0x69b   :  { %v6695_v48 = vpop.eup %4801  ;;  %v3236_v32 = vadd.f32 %v4794_v3, %v3235_v30  ;;  %4809 = vpow2.f32 %v4234_v12  ;;  %vm3353_vm14 = vweird.f32 %v6685_v57  ;;  %v3259_v58 = vor.u32 1.1754944e-38, %v3258_v36 }
 0x69c   :  { %v3337_v29 = vadd.f32 %v4796_v19, %v3336_v42  ;;  %v3482_v10 = vmul.f32 %v6695_v48, %v6671_v31  ;;  %v4804_v56 = vpop.eup %4803  ;;  %4811 = vpow2.f32 %v4178_v44  ;;  %vm3487_vm11 = vweird.f32 %v6695_v48 }
 0x69d   :  { %v3240_v14 = vsel %vm3239_vm5, %v4794_v3, %v3236_v32  ;;  %v3248_v40 = vmul.f32 %v4804_v56, %v6677_v4  ;;  %4813 = vpow2.f32 %v4198_v63  ;;  %vm3253_vm10 = vweird.f32 %v4804_v56  ;;  %vm6733_vm2 = vmor %vm3486_vm7, %vm3487_vm11 }
 0x69e   :  { %v3245_v5 = vsel %vm6690_vm15, %v3244_v43, %v3240_v14  ;;  %v3341_v53 = vsel %vm3340_vm6, %v4796_v19, %v3337_v29  ;;  %v3483_v20 = vsub.f32 1.0, %v3482_v10  ;;  %4815 = vpow2.f32 %v4235_v16  ;;  %vm3254_vm15 = vmor %vm3252_vm9, %vm3253_vm10 }
 0x69f   :  { %v4806_v59 = vpop.eup %4805  ;;  %v3346_v60 = vsel %vm6697_vm4, %v3345_v45, %v3341_v53  ;;  %v3532_v50 = vmul.f32 %v4800_v22, %v3245_v5  ;;  %v3417_v26 = vpop.f32.mrf.mxu2  ;;  %v3249_v23 = vsub.f32 1.0, %v3248_v40  ;;  %vm3257_vm3 = vcmp.eq.f32.partialorder %v3256_v49, 8.507059e+37  ;;  %v3527_v22 = vld [vmem:[#allocation3 + $0x8] sm:$0xff] }
 0x6a0   :  { %v3464_v37 = vpop.f32.mrf.mxu3  ;;  %v4808_v8 = vpop.eup %4807  ;;  %v3529_v9 = vmul.f32 %v3526_v62, %v3346_v60  ;;  %v3484_v13 = vmul.f32 %v6695_v48, %v3483_v20  ;;  %v3349_v61 = vmul.f32 %v4806_v59, %v6685_v57  ;;  %vm3354_vm13 = vweird.f32 %v4806_v59 }
 0x6a1   :  { %v4810_v1 = vpop.eup %4809  ;;  %v3250_v2 = vmul.f32 %v4804_v56, %v3249_v23  ;;  %vm3355_vm4 = vmor %vm3353_vm14, %vm3354_vm13  ;;  %v3360_v4 = vor.u32 1.1754944e-38, %v3359_v51  ;;  %vm3358_vm5 = vcmp.eq.f32.partialorder %v3357_v18, 8.507059e+37  ;;  %vm3491_vm6 = vcmp.eq.f32.partialorder %v3490_v39, 8.507059e+37 }
 0x6a2   :  { %v3535_v24 = vadd.f32 %v3532_v50, %v3529_v9  ;;  %v3350_v3 = vsub.f32 1.0, %v3349_v61  ;;  %v4812_v47 = vpop.eup %4811  ;;  %v3485_v19 = vadd.f32 %v6695_v48, %v3484_v13  ;;  %v6724_v15 = vadd.f32 1.0, %v4810_v1 }
 0x6a3   :  { %v3251_v25 = vadd.f32 %v4804_v56, %v3250_v2  ;;  %v4814_v28 = vpop.eup %4813  ;;  %v6737_v12 = vadd.f32 1.0, %v4812_v47  ;;  %v3421_v29 = vadd.f32 %v6687_v33, %v3384_v55 }
 0x6a4   :  { %4817 = vtanh.f32 %v3535_v24  ;;  %3544 = vst.msk [vmem:[#allocation3] sm:$0xff] %vm16_vm0, %v3535_v24  ;;  %v3351_v27 = vmul.f32 %v4806_v59, %v3350_v3  ;;  %v3489_v57 = vsel %vm6733_vm2, %v6695_v48, %v3485_v19  ;;  %v6742_v52 = vadd.f32 1.0, %v4814_v28  ;;  %v4816_v21 = vpop.eup %4815 }
 0x6a5   :  { %4819 = vrcp.f32 %v6724_v15  ;;  %v3255_v34 = vsel %vm3254_vm15, %v4804_v56, %v3251_v25  ;;  %v3494_v44 = vsel %vm3491_vm6, %v3493_v41, %v3489_v57  ;;  %v6748_v32 = vadd.f32 1.0, %v4816_v21 }
 0x6a6   :  { %v3352_v17 = vadd.f32 %v4806_v59, %v3351_v27  ;;  %v3260_v38 = vsel %vm3257_vm3, %v3259_v58, %v3255_v34  ;;  %4821 = vrcp.f32 %v6737_v12  ;;  %v3505_v10 = vand.u32 2147483647, %v6724_v15  ;;  %v3528_v27 = vld [vmem:[#allocation3 + $0x10] sm:$0x3] }
 0x6a7   :  { %v3533_v43 = vmul.f32 %v4808_v8, %v3260_v38  ;;  %4823 = vrcp.f32 %v6742_v52  ;;  %v3507_v39 = vand.u32 2147483648, %v6724_v15  ;;  %vm3501_vm9 = vweird.f32 %v6724_v15 }
 0x6a8   :  { %v3356_v7 = vsel %vm3355_vm4, %v4806_v59, %v3352_v17  ;;  %4825 = vrcp.f32 %v6748_v32  ;;  %vm6766_vm10 = vcmp.eq.f32.partialorder %v3505_v10, 8.507059e+37  ;;  %v3374_v59 = vand.u32 2147483648, %v6742_v52 }
 0x6a9   :  { %v3361_v0 = vsel %vm3358_vm5, %v3360_v4, %v3356_v7  ;;  %v3508_v5 = vor.u32 1.1754944e-38, %v3507_v39  ;;  %v3273_v60 = vand.u32 2147483648, %v6737_v12  ;;  %v3271_v49 = vand.u32 2147483647, %v6737_v12 }
 0x6aa   :  { %v4818_v30 = vpop.eup %4817  ;;  %v3530_v42 = vmul.f32 %v3527_v22, %v3361_v0  ;;  %v3372_v26 = vand.u32 2147483647, %v6742_v52  ;;  %vm3368_vm15 = vweird.f32 %v6742_v52  ;;  %vm3267_vm2 = vweird.f32 %v6737_v12 }
 0x6ab   :  { %v4820_v45 = vpop.eup %4819  ;;  %v3541_v48 = vmul.f32 %v4818_v30, %v3494_v44  ;;  %v3274_v36 = vor.u32 1.1754944e-38, %v3273_v60  ;;  %v3375_v24 = vor.u32 1.1754944e-38, %v3374_v59  ;;  %vm3272_vm5 = vcmp.eq.f32.partialorder %v3271_v49, 8.507059e+37 }
 0x6ac   :  { %v3536_v46 = vadd.f32 %v3533_v43, %v3530_v42  ;;  %v3497_v63 = vmul.f32 %v4820_v45, %v6724_v15  ;;  %v4822_v54 = vpop.eup %4821  ;;  %vm3502_vm7 = vweird.f32 %v4820_v45  ;;  %vm3373_vm6 = vcmp.eq.f32.partialorder %v3372_v26, 8.507059e+37 }
 0x6ad   :  { %3547 = vst.msk [vmem:[#allocation2] sm:$0xff] %vm16_vm0, %v3541_v48  ;;  %v3550_v31 = vpack.c.bf16 %v3541_v48, %v3541_v48  ;;  %v4824_v14 = vpop.eup %4823  ;;  %v3263_v11 = vmul.f32 %v4822_v54, %v6737_v12  ;;  %vm3503_vm11 = vmor %vm3501_vm9, %vm3502_vm7  ;;  %vm3268_vm13 = vweird.f32 %v4822_v54  ;;  %v3522_v34 = vand.u32 2147483648, %v6748_v32 }
 0x6ae   :  { %4827 = vtanh.f32 %v3536_v46  ;;  %3545 = vst.msk [vmem:[#allocation3 + $0x8] sm:$0xff] %vm16_vm0, %v3536_v46  ;;  %v3498_v56 = vsub.f32 1.0, %v3497_v63  ;;  %v3364_v33 = vmul.f32 %v4824_v14, %v6742_v52  ;;  %v4826_v62 = vpop.eup %4825  ;;  %vm3369_vm14 = vweird.f32 %v4824_v14  ;;  %vm3269_vm3 = vmor %vm3267_vm2, %vm3268_vm13 }
 0x6af   :  { %4236 = vst.msk [vmem:[%s6795_s2 + $0x60] sm:$0xf] %vm416_vm8, %v3550_v31  ;;  %4829 = vtanh.f32 %v3421_v29  ;;  %v3264_v53 = vsub.f32 1.0, %v3263_v11  ;;  %v3512_v13 = vmul.f32 %v4826_v62, %v6748_v32  ;;  %vm3370_vm4 = vmor %vm3368_vm15, %vm3369_vm14  ;;  %vm3517_vm7 = vweird.f32 %v4826_v62 }
 0x6b0   :  { %v3499_v55 = vmul.f32 %v4820_v45, %v3498_v56  ;;  %v3365_v40 = vsub.f32 1.0, %v3364_v33  ;;  %v3520_v17 = vand.u32 2147483647, %v6748_v32  ;;  %v3523_v57 = vor.u32 1.1754944e-38, %v3522_v34 }
 0x6b1   :  { %v3265_v50 = vmul.f32 %v4822_v54, %v3264_v53  ;;  %v3513_v16 = vsub.f32 1.0, %v3512_v13 }
 0x6b2   :  { %v3500_v20 = vadd.f32 %v4820_v45, %v3499_v55  ;;  %v3366_v9 = vmul.f32 %v4824_v14, %v3365_v40 }
 0x6b3   :  { %v3266_v61 = vadd.f32 %v4822_v54, %v3265_v50  ;;  %v3514_v28 = vmul.f32 %v4826_v62, %v3513_v16 }
 0x6b4   :  { %v4828_v37 = vpop.eup %4827  ;;  %v3504_v8 = vsel %vm3503_vm11, %v4820_v45, %v3500_v20  ;;  %v3367_v18 = vadd.f32 %v4824_v14, %v3366_v9 }
 0x6b5   :  { %v3509_v23 = vsel %vm6766_vm10, %v3508_v5, %v3504_v8  ;;  %v4830_v1 = vpop.eup %4829  ;;  %v3270_v3 = vsel %vm3269_vm3, %v4822_v54, %v3266_v61  ;;  %v3515_v35 = vadd.f32 %v4826_v62, %v3514_v28  ;;  %vm3521_vm10 = vcmp.eq.f32.partialorder %v3520_v17, 8.507059e+37 }
 0x6b6   :  { %v3542_v51 = vmul.f32 %v4828_v37, %v3509_v23  ;;  %v3275_v47 = vsel %vm3272_vm5, %v3274_v36, %v3270_v3  ;;  %v3371_v19 = vsel %vm3370_vm4, %v4824_v14, %v3367_v18 }
 0x6b7   :  { %v3376_v15 = vsel %vm3373_vm6, %v3375_v24, %v3371_v19  ;;  %v3534_v25 = vmul.f32 %v4830_v1, %v3275_v47 }
 0x6b8   :  { %3548 = vst.msk [vmem:[#allocation2 + $0x8] sm:$0xff] %vm16_vm0, %v3542_v51  ;;  %v3551_v2 = vpack.c.bf16 %v3542_v51, %v3542_v51  ;;  %v3531_v41 = vmul.f32 %v3528_v27, %v3376_v15  ;;  %vm3516_vm0 = vweird.f32 %v6748_v32 }
 0x6b9   :  { %vm3518_vm9 = vmor %vm3516_vm0, %vm3517_vm7 }
 0x6ba   :  { %4237 = vst.msk [vmem:[%s6795_s2 + $0x64] sm:$0xf] %vm416_vm8, %v3551_v2  ;;  %v3537_v58 = vadd.f32 %v3534_v25, %v3531_v41  ;;  %v3519_v12 = vsel %vm3518_vm9, %v4826_v62, %v3515_v35 }
 0x6bb   :  { %v3524_v38 = vsel %vm3521_vm10, %v3523_v57, %v3519_v12 }
 0x6bc   :  { %4831 = vtanh.f32 %v3537_v58  ;;  %3546 = vst.msk [vmem:[#allocation3 + $0x10] sm:$0x3] %vm19_vm1, %v3537_v58 }
 0x6c2   :  { %v4832_v4 = vpop.eup %4831 }
 0x6c3   :  { %v3543_v52 = vmul.f32 %v4832_v4, %v3524_v38 }
 0x6c5   :  { %3549 = vst.msk [vmem:[#allocation2 + $0x10] sm:$0x3] %vm19_vm1, %v3543_v52  ;;  %v3552_v7 = vpack.c.bf16 %v3543_v52, %v3543_v52 }
 0x6c7   :  { %4238 = vst.msk [vmem:[%s6795_s2 + $0x68] sm:$0x1] %vm419_vm12, %v3552_v7 }

// kernel: _lambda_.42
= control target key start
LH: loop header
LB: loop body
LE: loop exit
PB: predicated region body
PF: predicated region fallthrough
CT: control target
= control target key end

     0   :  { %s622_s15 = smov 0   ;;  %s624_s16 = smov 0   ;;  %s710_s0 = inlined_call_operand.vmem [shape: bf16[2,2,9,18], index: 0, kind: input, shape index: {}]   ;;  %s711_s1 = inlined_call_operand.vmem [shape: f32[2,1,1], index: 1, kind: input, shape index: {}]   ;;  %s712_s2 = inlined_call_operand.vmem [shape: f32[2,1,18], index: 2, kind: input, shape index: {}]   ;;  %s713_s3 = inlined_call_operand.vmem [shape: f32[2,1,18], index: 3, kind: input, shape index: {}]   ;;  %s714_s4 = inlined_call_operand.vmem [shape: bf16[2,2,9,18], index: 4, kind: output, shape index: {}]  }
   0x1   :  { %s626_s17 = smov 0   ;;  %s628_s18 = smov 0  }
   0x2   :  { %s630_s19 = smov 0  }
   0x3 LB: > { %s23_s20 = sadd.s32 1, %s585_s17  ;;  %s26_s21 = sadd.s32 1, %s589_s18  ;;  %s593_s19 = sphi %s630_s19, %s14_s19   ;;  %s589_s18 = sphi %s628_s18, %s718_s18   ;;  %s585_s17 = sphi %s626_s17, %s717_s17   ;;  %s581_s16 = sphi %s624_s16, %s716_s16   ;;  %s577_s15 = sphi %s622_s15, %s715_s15  }
   0x4   : > { %p24_p0 = scmp.ge.s32.totalorder %s23_s20, 2  ;;  %p494_p1 = scmp.ge.s32.totalorder %s593_s19, 1 }
   0x5   : > { %p206_p2 = scmp.lt.s32.totalorder %s593_s19, 5 }
   0x6   : > { %s720_s20 = smov (%p24_p0, %s23_s20), 0  ;;  %s722_s21 = smov (!%p24_p0, %s26_s21), %s589_s18 }
   0x7   : > { %p207_p3 = pnand %p494_p1, %p206_p2  ;;  %p28_p4 = scmp.ge.s32.totalorder %s722_s21, 2 }
   0x8   : > { %p251_p5 = scmp.lt.s32.totalorder (!%p207_p3), %s577_s15, 1  ;;  %p249_p6 = scmp.lt.s32.totalorder (!%p207_p3), %s581_s16, 1 }
   0x9   : > { %s724_s21 = smov (%p28_p4, %s722_s21), 0  ;;  %210 = sbr.rel (%p207_p3) target bundleno = 408 (0x198), region = 36 }
   0xe   : > { %v595_v0 = vmov 0   ;;  %s726_s15 = smov (!%p251_p5, %s577_s15), 1  ;;  %s728_s16 = smov (!%p249_p6, %s581_s16), 1  ;;  %vm297_vm2 = vcmask 139264   ;;  %vm293_vm3 = vcmask 146432   ;;  %v596_v13 = vmov 18.0  }
   0xf   : > { %545 = vset.pattern.permute.xlu0 %v595_v0  ;;  %s260_s24 = scalar_lea.vmem %s711_s1, %s726_s15  ;;  %s495_s25 = sshll.u32 %s726_s15, 1  ;;  %549 = vrcp.f32 %v596_v13  ;;  %vm363_vm11 = vsmask.f32 256  ;;  %vm360_vm12 = vcmask 142336  }
  0x10   : > { %v546_v1 = vld [vmem:[%s260_s24] ss:$0 sm:$0xff]  ;;  %s496_s26 = sshll.u32 %s728_s16, 2  ;;  %s263_s8 = scalar_lea.vmem %s712_s2, %s726_s15  ;;  %vm364_vm13 = vmand %vm297_vm2, %vm363_vm11 }
  0x11   : > { %286 = vperm.xlu0 %545, %v546_v1   ;;  %s659_s27 = sadd.s32 %s496_s26, %s495_s25  ;;  %s266_s11 = scalar_lea.vmem %s713_s3, %s726_s15  ;;  %v547_v47 = vld [vmem:[%s263_s8] ss:$0 sm:$0xff] }
  0x12   : > { %s497_s28 = sshll.u32 %s659_s27, 2  ;;  %v548_v50 = vld [vmem:[%s266_s11] ss:$0 sm:$0xff] }
  0x13   : > { %s257_s5 = scalar_lea.vmem %s710_s0, %s497_s28  ;;  %s275_s24 = scalar_lea.vmem %s714_s4, %s497_s28 }
  0x14   : > { %v276_v2 = vld [vmem:[%s257_s5] sm:$0xf]  ;;  %v277_v3 = vld [vmem:[%s257_s5 + $0x4] sm:$0x1] }
  0x15   : > { %v278_v4 = vunpack.c.l.bf16 %v276_v2  ;;  %v279_v5 = vunpack.c.l.bf16 %v277_v3  ;;  %v550_v14 = vpop.eup %549  ;;  %v365_v58 = vld [vmem:[%s275_s24 + $0x4] sm:$0x1] }
  0x16   : > { %v302_v15 = vmul.f32 18.0, %v550_v14  ;;  %vm306_vm4 = vweird.f32 %v550_v14 }
  0x17   : > { %vm282_vm0 = vcmp.ge.f32.partialorder %v279_v5, 0.0  ;;  %vm281_vm1 = vcmp.ge.f32.partialorder %v278_v4, 0.0 }
  0x18   : > { %v303_v16 = vsub.f32 1.0, %v302_v15 }
  0x1a   : > { %v304_v17 = vmul.f32 %v550_v14, %v303_v16 }
  0x1c   : > { %v305_v18 = vadd.f32 %v550_v14, %v304_v17 }
  0x1e   : > { %v307_v19 = vsel %vm306_vm4, %v550_v14, %v305_v18 }
  0x83   : > { %v287_v6 = vpop.permute.xlu0 %286 }
  0x84   : > { %v289_v7 = vmul.f32 %v287_v6, %v278_v4  ;;  %v290_v8 = vmul.f32 %v287_v6, %v279_v5 }
  0x86   : > { %v292_v9 = vsel %vm282_vm0, %v279_v5, %v290_v8  ;;  %v291_v10 = vsel %vm281_vm1, %v278_v4, %v289_v7 }
  0x87   : > { %v298_v11 = vsel %vm297_vm2, %v292_v9, 0.0  ;;  %v294_v12 = vsel %vm293_vm3, %v291_v10, 0.0 }
  0x88   : > { %299 = vadd.xlane.f32.xlu0 %v298_v11  ;;  %295 = vadd.xlane.f32.xlu1 %v294_v12 }
  0xfb   : > { %v300_v20 = vpop.xlane.xlu0 %299  ;;  %v296_v21 = vpop.xlane.xlu1 %295 }
  0xfc   : > { %v309_v22 = vmul.f32 %v307_v19, %v300_v20  ;;  %v308_v23 = vmul.f32 %v307_v19, %v296_v21 }
  0xfe   : > { %v311_v24 = vsub.f32 %v292_v9, %v309_v22  ;;  %v310_v25 = vsub.f32 %v291_v10, %v308_v23 }
 0x100   : > { %v313_v26 = vmul.f32 %v311_v24, %v311_v24  ;;  %v312_v27 = vmul.f32 %v310_v25, %v310_v25 }
 0x102   : > { %v317_v28 = vsel %vm297_vm2, %v313_v26, 0.0  ;;  %v314_v29 = vsel %vm293_vm3, %v312_v27, 0.0 }
 0x103   : > { %318 = vadd.xlane.f32.xlu1 %v317_v28  ;;  %315 = vadd.xlane.f32.xlu2 %v314_v29 }
 0x176   : > { %v316_v30 = vpop.xlane.xlu2 %315  ;;  %v319_v31 = vpop.xlane.xlu1 %318 }
 0x177   : > { %v320_v32 = vmul.f32 %v316_v30, %v307_v19  ;;  %v321_v33 = vmul.f32 %v319_v31, %v307_v19 }
 0x179   : > { %v322_v34 = vadd.f32 1e-05, %v320_v32  ;;  %v323_v35 = vadd.f32 1e-05, %v321_v33 }
 0x17b   : > { %551 = vrsqrt.f32 %v322_v34  ;;  %vm330_vm7 = vweird.f32 %v322_v34  ;;  %vm340_vm9 = vweird.f32 %v323_v35 }
 0x17c   : > { %553 = vrsqrt.f32 %v323_v35 }
 0x181   : > { %v552_v36 = vpop.eup %551 }
 0x182   : > { %v554_v37 = vpop.eup %553  ;;  %v325_v38 = vmul.f32 %v552_v36, %v322_v34  ;;  %vm331_vm5 = vweird.f32 %v552_v36 }
 0x183   : > { %v335_v39 = vmul.f32 %v554_v37, %v323_v35  ;;  %vm341_vm6 = vweird.f32 %v554_v37  ;;  %vm332_vm8 = vmor %vm330_vm7, %vm331_vm5 }
 0x184   : > { %v326_v40 = vmul.f32 %v552_v36, %v325_v38  ;;  %vm342_vm10 = vmor %vm340_vm9, %vm341_vm6 }
 0x185   : > { %v336_v41 = vmul.f32 %v554_v37, %v335_v39 }
 0x186   : > { %v327_v42 = vmul.f32 0.5, %v326_v40 }
 0x187   : > { %v337_v43 = vmul.f32 0.5, %v336_v41 }
 0x188   : > { %v328_v44 = vsub.f32 1.5, %v327_v42 }
 0x189   : > { %v338_v45 = vsub.f32 1.5, %v337_v43 }
 0x18a   : > { %v329_v46 = vmul.f32 %v552_v36, %v328_v44 }
 0x18b   : > { %v339_v48 = vmul.f32 %v554_v37, %v338_v45 }
 0x18c   : > { %v333_v49 = vsel %vm332_vm8, %v552_v36, %v329_v46 }
 0x18d   : > { %v344_v51 = vmul.f32 %v333_v49, %v310_v25  ;;  %v343_v52 = vsel %vm342_vm10, %v554_v37, %v339_v48 }
 0x18e   : > { %v345_v53 = vmul.f32 %v343_v52, %v311_v24 }
 0x18f   : > { %v350_v54 = vmul.f32 %v547_v47, %v344_v51 }
 0x190   : > { %v351_v55 = vmul.f32 %v547_v47, %v345_v53 }
 0x191   : > { %v356_v56 = vadd.f32 %v548_v50, %v350_v54 }
 0x192   : > { %v357_v57 = vadd.f32 %v548_v50, %v351_v55 }
 0x193   : > { %v358_v59 = vpack.c.bf16 %v356_v56, %v356_v56 }
 0x194   : > { %v359_v60 = vpack.c.bf16 %v357_v57, %v357_v57 }
 0x195   : > { %361 = vst.msk [vmem:[%s275_s24] sm:$0xf] %vm360_vm12, %v358_v59 }
 0x196   : > { %v366_v61 = vsel %vm364_vm13, %v359_v60, %v365_v58 }
 0x197   : > { %367 = vst [vmem:[%s275_s24 + $0x4] sm:$0x1] %v366_v61 }
 0x198 PF: > { %s14_s19 = sadd.s32 1, %s593_s19   ;;  %s715_s15 = smov %s585_s17 }
 0x199   : > { %p11_p7 = scmp.ge.s32.totalorder %s14_s19, 6   ;;  %s716_s16 = smov %s589_s18 }
 0x19a   : > { %s717_s17 = smov %s720_s20  ;;  %s718_s18 = smov %s724_s21 }
 0x19b   :  { %13 = sbr.rel (!%p11_p7) target bundleno = 3 (0x3), region = 75 }

// kernel: _lambda_.44
= control target key start
LH: loop header
LB: loop body
LE: loop exit
PB: predicated region body
PF: predicated region fallthrough
CT: control target
= control target key end

     0   :  { %s584_s12 = smov 0   ;;  %s586_s13 = smov 0   ;;  %s633_s0 = inlined_call_operand.vmem [shape: bf16[4,9,18], index: 0, kind: input, shape index: {}]   ;;  %s634_s1 = inlined_call_operand.vmem [shape: bf16[4,18,9], index: 1, kind: input, shape index: {}]   ;;  %s635_s2 = inlined_call_operand.vmem [shape: bf16[4,9,36], index: 2, kind: input, shape index: {}]   ;;  %s636_s3 = inlined_call_operand.vmem [shape: bf16[4,9,36], index: 3, kind: output, shape index: {}]  }
   0x1   :  { %s588_s14 = smov 0  }
   0x2 LB: > { %s25_s15 = sadd.s32 1, %s557_s13  ;;  %p475_p0 = scmp.ge.s32.totalorder %s561_s14, 1  ;;  %s561_s14 = sphi %s588_s14, %s13_s14   ;;  %s557_s13 = sphi %s586_s13, %s638_s13   ;;  %s553_s12 = sphi %s584_s12, %s637_s12  }
   0x3   : > { %p27_p1 = scmp.ge.s32.totalorder %s25_s15, 4  ;;  %p178_p2 = scmp.lt.s32.totalorder %s561_s14, 5 }
   0x5   : > { %s640_s15 = smov (%p27_p1, %s25_s15), 0  ;;  %p179_p3 = pnand %p475_p0, %p178_p2 }
   0x6   : > { %p221_p4 = scmp.lt.s32.totalorder (!%p179_p3), %s553_s12, 3 }
   0x7   : > { %182 = sbr.rel (%p179_p3) target bundleno = 559 (0x22f), region = 32 }
   0xc   : > { %s642_s12 = smov (!%p221_p4, %s553_s12), 3  ;;  %vm276_vm0 = vcmask 1040384   ;;  %vm272_vm1 = vcmask 146432   ;;  %vm296_vm2 = vcmask 72704   ;;  %vm300_vm3 = vcmask 65536  }
   0xd   : > { %s505_s16 = smul.u32 12, %s642_s12  ;;  %s605_s20 = sshll.u32 %s642_s12, 3  ;;  %vm329_vm4 = vcmask 1043456   ;;  %vm330_vm5 = vcmask 1044480   ;;  %v563_v27 = vmov 65535   ;;  %vm352_vm6 = vcmask 289792  }
   0xe   : > { %s228_s23 = scalar_lea.vmem %s633_s0, %s605_s20  ;;  %s239_s26 = scalar_lea.vmem %s635_s2, %s605_s20  ;;  %v331_v28 = vsel %vm329_vm4, 4294967295, %v563_v27  ;;  %vm354_vm7 = vcmask 286720   ;;  %vm355_vm8 = vsmask.f32 256 }
   0xf   : > { %s234_s19 = scalar_lea.vmem %s634_s1, %s505_s16  ;;  %v485_v5 = vld [vmem:[%s228_s23] sm:$0xf]  ;;  %v502_v6 = vld [vmem:[%s228_s23] sm:$0x10]  ;;  %v332_v29 = vsel %vm330_vm5, %v331_v28, 0  ;;  %s248_s29 = scalar_lea.vmem %s636_s3, %s605_s20  ;;  %vm356_vm9 = vmand %vm354_vm7, %vm355_vm8 }
  0x10   : > { %v255_v0 = vld [vmem:[%s234_s19 + $0x8] sm:$0x1]  ;;  %v503_v4 = vld [vmem:[%s234_s19] sm:$0xff]  ;;  %v486_v7 = vor.u32 %v502_v6, %v485_v5 }
  0x11   : > { %v268_v1 = vunpack.c.l.b16 %v255_v0  ;;  %v494_v24 = vld [vmem:[%s239_s26] sm:$0xf]  ;;  %v504_v25 = vld [vmem:[%s239_s26] sm:$0x10] }
  0x12   : > { %v495_v26 = vor.u32 %v504_v25, %v494_v24  ;;  %v357_v41 = vld [vmem:[%s248_s29 + $0x4] sm:$0x1] }
  0x13   : > { %v270_v2 = vpack.c.b16 %v268_v1, %v268_v1 }
  0x14   : > { %v334_v30 = vand.u32 %v495_v26, %v332_v29 }
  0x15   : > { %v278_v3 = vsel %vm276_vm0, %v270_v2, 0 }
  0x16   : > { %286 = vmatpush.bf16.msra.mxu0 %v278_v3  ;;  %343 = vmatpush.bf16.msra.mxu1 %v334_v30 }
  0x1a   : > { %287 = vmatpush.bf16.msra.mxu0 %v503_v4 }
  0x1d   : > { %491 = vmatmul.msk.bf16.vlgmr.msra.gmra.mxu0 %vm272_vm1, %v486_v7 }
  0x9a   : > { %v289_v8 = vpop.f32.mrf.mxu0 }
  0x9b   : > { %v294_v9 = vmul.f32 0.23570226, %v289_v8 }
  0x9d   : > { %v297_v10 = vsel %vm296_vm2, %v294_v9, -inf }
  0x9e   : > { %298 = vmax.xlane.f32.xlu0 %v297_v10 }
  0xa2   : > { %v291_v11 = vpop.f32.mrf.mxu0 }
  0xa3   : > { %v295_v12 = vmul.f32 0.23570226, %v291_v11 }
  0xa5   : > { %v301_v13 = vsel %vm300_vm3, %v295_v12, -inf }
  0xa6   : > { %302 = vmax.xlane.f32.xlu0 %v301_v13 }
 0x111   : > { %v299_v14 = vpop.xlane.xlu0 %298 }
 0x112   : > { %v304_v15 = vsub.f32 %v294_v9, %v299_v14 }
 0x114   : > { %v306_v16 = vmul.f32 1.442695, %v304_v15 }
 0x116   : > { %531 = vpow2.f32 %v306_v16 }
 0x119   : > { %v303_v17 = vpop.xlane.xlu0 %302 }
 0x11a   : > { %v305_v18 = vsub.f32 %v295_v12, %v303_v17 }
 0x11c   : > { %v532_v19 = vpop.eup %531  ;;  %v308_v20 = vmul.f32 1.442695, %v305_v18 }
 0x11d   : > { %v310_v21 = vsel %vm296_vm2, %v532_v19, 0.0 }
 0x11e   : > { %533 = vpow2.f32 %v308_v20  ;;  %311 = vadd.xlane.f32.xlu1 %v310_v21 }
 0x124   : > { %v534_v22 = vpop.eup %533 }
 0x125   : > { %v313_v23 = vsel %vm300_vm3, %v534_v22, 0.0 }
 0x126   : > { %314 = vadd.xlane.f32.xlu1 %v313_v23 }
 0x191   : > { %v312_v31 = vpop.xlane.xlu1 %311 }
 0x192   : > { %535 = vrcp.f32 %v312_v31 }
 0x198   : > { %v536_v33 = vpop.eup %535 }
 0x199   : > { %v315_v32 = vpop.xlane.xlu1 %314  ;;  %v318_v35 = vmul.f32 %v536_v33, %v532_v19 }
 0x19a   : > { %537 = vrcp.f32 %v315_v32 }
 0x1a0   : > { %v538_v34 = vpop.eup %537 }
 0x1a1   : > { %v319_v36 = vmul.f32 %v538_v34, %v534_v22 }
 0x1a3   : > { %v320_v37 = vpack.c.bf16 %v319_v36, %v318_v35 }
 0x1a5   : > { %496 = vmatmul.msk.bf16.vlgmr.msra.gmra.mxu1 %vm296_vm2, %v320_v37 }
 0x222   : > { %v345_v38 = vpop.f32.mrf.mxu1 }
 0x223   : > { %v350_v39 = vpack.c.bf16 %v345_v38, %v345_v38 }
 0x225   : > { %353 = vst.msk [vmem:[%s248_s29] sm:$0xf] %vm352_vm6, %v350_v39 }
 0x22a   : > { %v347_v40 = vpop.f32.mrf.mxu1 }
 0x22b   : > { %v351_v42 = vpack.c.bf16 %v347_v40, %v347_v40 }
 0x22d   : > { %v358_v43 = vsel %vm356_vm9, %v351_v42, %v357_v41 }
 0x22e   : > { %359 = vst [vmem:[%s248_s29 + $0x4] sm:$0x1] %v358_v43 }
 0x22f PF: > { %s13_s14 = sadd.s32 1, %s561_s14   ;;  %s637_s12 = smov %s557_s13 }
 0x230   : > { %p10_p5 = scmp.ge.s32.totalorder %s13_s14, 6   ;;  %s638_s13 = smov %s640_s15 }
 0x232   :  { %12 = sbr.rel (!%p10_p5) target bundleno = 2 (0x2), region = 68 }

// kernel: _lambda_.43
= control target key start
LH: loop header
LB: loop body
LE: loop exit
PB: predicated region body
PF: predicated region fallthrough
CT: control target
= control target key end

     0   :  { %s622_s15 = smov 0   ;;  %s624_s16 = smov 0   ;;  %s710_s0 = inlined_call_operand.vmem [shape: bf16[2,2,9,36], index: 0, kind: input, shape index: {}]   ;;  %s711_s1 = inlined_call_operand.vmem [shape: f32[2,1,1], index: 1, kind: input, shape index: {}]   ;;  %s712_s2 = inlined_call_operand.vmem [shape: f32[2,1,36], index: 2, kind: input, shape index: {}]   ;;  %s713_s3 = inlined_call_operand.vmem [shape: f32[2,1,36], index: 3, kind: input, shape index: {}]   ;;  %s714_s4 = inlined_call_operand.vmem [shape: bf16[2,2,9,36], index: 4, kind: output, shape index: {}]  }
   0x1   :  { %s626_s17 = smov 0   ;;  %s628_s18 = smov 0  }
   0x2   :  { %s630_s19 = smov 0  }
   0x3 LB: > { %s23_s20 = sadd.s32 1, %s585_s17  ;;  %s26_s21 = sadd.s32 1, %s589_s18  ;;  %s593_s19 = sphi %s630_s19, %s14_s19   ;;  %s589_s18 = sphi %s628_s18, %s718_s18   ;;  %s585_s17 = sphi %s626_s17, %s717_s17   ;;  %s581_s16 = sphi %s624_s16, %s716_s16   ;;  %s577_s15 = sphi %s622_s15, %s715_s15  }
   0x4   : > { %p24_p0 = scmp.ge.s32.totalorder %s23_s20, 2  ;;  %p494_p1 = scmp.ge.s32.totalorder %s593_s19, 1 }
   0x5   : > { %p206_p2 = scmp.lt.s32.totalorder %s593_s19, 5 }
   0x6   : > { %s720_s20 = smov (%p24_p0, %s23_s20), 0  ;;  %s722_s21 = smov (!%p24_p0, %s26_s21), %s589_s18 }
   0x7   : > { %p207_p3 = pnand %p494_p1, %p206_p2  ;;  %p28_p4 = scmp.ge.s32.totalorder %s722_s21, 2 }
   0x8   : > { %p251_p5 = scmp.lt.s32.totalorder (!%p207_p3), %s577_s15, 1  ;;  %p249_p6 = scmp.lt.s32.totalorder (!%p207_p3), %s581_s16, 1 }
   0x9   : > { %s724_s21 = smov (%p28_p4, %s722_s21), 0  ;;  %210 = sbr.rel (%p207_p3) target bundleno = 408 (0x198), region = 36 }
   0xe   : > { %v595_v0 = vmov 0   ;;  %s726_s15 = smov (!%p251_p5, %s577_s15), 1  ;;  %s728_s16 = smov (!%p249_p6, %s581_s16), 1  ;;  %vm297_vm2 = vcmask 286720   ;;  %vm293_vm3 = vcmask 293888   ;;  %v596_v13 = vmov 36.0  }
   0xf   : > { %545 = vset.pattern.permute.xlu0 %v595_v0  ;;  %s260_s24 = scalar_lea.vmem %s711_s1, %s726_s15  ;;  %s495_s25 = sshll.u32 %s726_s15, 1  ;;  %549 = vrcp.f32 %v596_v13  ;;  %vm363_vm11 = vsmask.f32 256  ;;  %vm360_vm12 = vcmask 289792  }
  0x10   : > { %v546_v1 = vld [vmem:[%s260_s24] ss:$0 sm:$0xff]  ;;  %s496_s26 = sshll.u32 %s728_s16, 2  ;;  %s263_s8 = scalar_lea.vmem %s712_s2, %s726_s15  ;;  %vm364_vm13 = vmand %vm297_vm2, %vm363_vm11 }
  0x11   : > { %286 = vperm.xlu0 %545, %v546_v1   ;;  %s659_s27 = sadd.s32 %s496_s26, %s495_s25  ;;  %s266_s11 = scalar_lea.vmem %s713_s3, %s726_s15  ;;  %v547_v47 = vld [vmem:[%s263_s8] ss:$0 sm:$0xff] }
  0x12   : > { %s497_s28 = sshll.u32 %s659_s27, 2  ;;  %v548_v50 = vld [vmem:[%s266_s11] ss:$0 sm:$0xff] }
  0x13   : > { %s257_s5 = scalar_lea.vmem %s710_s0, %s497_s28  ;;  %s275_s24 = scalar_lea.vmem %s714_s4, %s497_s28 }
  0x14   : > { %v276_v2 = vld [vmem:[%s257_s5] sm:$0xf]  ;;  %v277_v3 = vld [vmem:[%s257_s5 + $0x4] sm:$0x1] }
  0x15   : > { %v278_v4 = vunpack.c.l.bf16 %v276_v2  ;;  %v279_v5 = vunpack.c.l.bf16 %v277_v3  ;;  %v550_v14 = vpop.eup %549  ;;  %v365_v58 = vld [vmem:[%s275_s24 + $0x4] sm:$0x1] }
  0x16   : > { %v302_v15 = vmul.f32 36.0, %v550_v14  ;;  %vm306_vm4 = vweird.f32 %v550_v14 }
  0x17   : > { %vm282_vm0 = vcmp.ge.f32.partialorder %v279_v5, 0.0  ;;  %vm281_vm1 = vcmp.ge.f32.partialorder %v278_v4, 0.0 }
  0x18   : > { %v303_v16 = vsub.f32 1.0, %v302_v15 }
  0x1a   : > { %v304_v17 = vmul.f32 %v550_v14, %v303_v16 }
  0x1c   : > { %v305_v18 = vadd.f32 %v550_v14, %v304_v17 }
  0x1e   : > { %v307_v19 = vsel %vm306_vm4, %v550_v14, %v305_v18 }
  0x83   : > { %v287_v6 = vpop.permute.xlu0 %286 }
  0x84   : > { %v289_v7 = vmul.f32 %v287_v6, %v278_v4  ;;  %v290_v8 = vmul.f32 %v287_v6, %v279_v5 }
  0x86   : > { %v292_v9 = vsel %vm282_vm0, %v279_v5, %v290_v8  ;;  %v291_v10 = vsel %vm281_vm1, %v278_v4, %v289_v7 }
  0x87   : > { %v298_v11 = vsel %vm297_vm2, %v292_v9, 0.0  ;;  %v294_v12 = vsel %vm293_vm3, %v291_v10, 0.0 }
  0x88   : > { %299 = vadd.xlane.f32.xlu0 %v298_v11  ;;  %295 = vadd.xlane.f32.xlu1 %v294_v12 }
  0xfb   : > { %v300_v20 = vpop.xlane.xlu0 %299  ;;  %v296_v21 = vpop.xlane.xlu1 %295 }
  0xfc   : > { %v309_v22 = vmul.f32 %v307_v19, %v300_v20  ;;  %v308_v23 = vmul.f32 %v307_v19, %v296_v21 }
  0xfe   : > { %v311_v24 = vsub.f32 %v292_v9, %v309_v22  ;;  %v310_v25 = vsub.f32 %v291_v10, %v308_v23 }
 0x100   : > { %v313_v26 = vmul.f32 %v311_v24, %v311_v24  ;;  %v312_v27 = vmul.f32 %v310_v25, %v310_v25 }
 0x102   : > { %v317_v28 = vsel %vm297_vm2, %v313_v26, 0.0  ;;  %v314_v29 = vsel %vm293_vm3, %v312_v27, 0.0 }
 0x103   : > { %318 = vadd.xlane.f32.xlu1 %v317_v28  ;;  %315 = vadd.xlane.f32.xlu2 %v314_v29 }
 0x176   : > { %v316_v30 = vpop.xlane.xlu2 %315  ;;  %v319_v31 = vpop.xlane.xlu1 %318 }
 0x177   : > { %v320_v32 = vmul.f32 %v316_v30, %v307_v19  ;;  %v321_v33 = vmul.f32 %v319_v31, %v307_v19 }
 0x179   : > { %v322_v34 = vadd.f32 1e-05, %v320_v32  ;;  %v323_v35 = vadd.f32 1e-05, %v321_v33 }
 0x17b   : > { %551 = vrsqrt.f32 %v322_v34  ;;  %vm330_vm7 = vweird.f32 %v322_v34  ;;  %vm340_vm9 = vweird.f32 %v323_v35 }
 0x17c   : > { %553 = vrsqrt.f32 %v323_v35 }
 0x181   : > { %v552_v36 = vpop.eup %551 }
 0x182   : > { %v554_v37 = vpop.eup %553  ;;  %v325_v38 = vmul.f32 %v552_v36, %v322_v34  ;;  %vm331_vm5 = vweird.f32 %v552_v36 }
 0x183   : > { %v335_v39 = vmul.f32 %v554_v37, %v323_v35  ;;  %vm341_vm6 = vweird.f32 %v554_v37  ;;  %vm332_vm8 = vmor %vm330_vm7, %vm331_vm5 }
 0x184   : > { %v326_v40 = vmul.f32 %v552_v36, %v325_v38  ;;  %vm342_vm10 = vmor %vm340_vm9, %vm341_vm6 }
 0x185   : > { %v336_v41 = vmul.f32 %v554_v37, %v335_v39 }
 0x186   : > { %v327_v42 = vmul.f32 0.5, %v326_v40 }
 0x187   : > { %v337_v43 = vmul.f32 0.5, %v336_v41 }
 0x188   : > { %v328_v44 = vsub.f32 1.5, %v327_v42 }
 0x189   : > { %v338_v45 = vsub.f32 1.5, %v337_v43 }
 0x18a   : > { %v329_v46 = vmul.f32 %v552_v36, %v328_v44 }
 0x18b   : > { %v339_v48 = vmul.f32 %v554_v37, %v338_v45 }
 0x18c   : > { %v333_v49 = vsel %vm332_vm8, %v552_v36, %v329_v46 }
 0x18d   : > { %v344_v51 = vmul.f32 %v333_v49, %v310_v25  ;;  %v343_v52 = vsel %vm342_vm10, %v554_v37, %v339_v48 }
 0x18e   : > { %v345_v53 = vmul.f32 %v343_v52, %v311_v24 }
 0x18f   : > { %v350_v54 = vmul.f32 %v547_v47, %v344_v51 }
 0x190   : > { %v351_v55 = vmul.f32 %v547_v47, %v345_v53 }
 0x191   : > { %v356_v56 = vadd.f32 %v548_v50, %v350_v54 }
 0x192   : > { %v357_v57 = vadd.f32 %v548_v50, %v351_v55 }
 0x193   : > { %v358_v59 = vpack.c.bf16 %v356_v56, %v356_v56 }
 0x194   : > { %v359_v60 = vpack.c.bf16 %v357_v57, %v357_v57 }
 0x195   : > { %361 = vst.msk [vmem:[%s275_s24] sm:$0xf] %vm360_vm12, %v358_v59 }
 0x196   : > { %v366_v61 = vsel %vm364_vm13, %v359_v60, %v365_v58 }
 0x197   : > { %367 = vst [vmem:[%s275_s24 + $0x4] sm:$0x1] %v366_v61 }
 0x198 PF: > { %s14_s19 = sadd.s32 1, %s593_s19   ;;  %s715_s15 = smov %s585_s17 }
 0x199   : > { %p11_p7 = scmp.ge.s32.totalorder %s14_s19, 6   ;;  %s716_s16 = smov %s589_s18 }
 0x19a   : > { %s717_s17 = smov %s720_s20  ;;  %s718_s18 = smov %s724_s21 }
 0x19b   :  { %13 = sbr.rel (!%p11_p7) target bundleno = 3 (0x3), region = 75 }

// kernel: _lambda_.45
= control target key start
LH: loop header
LB: loop body
LE: loop exit
PB: predicated region body
PF: predicated region fallthrough
CT: control target
= control target key end

     0   :  { %vm128_vm0 = vcmask 1043456   ;;  %vm94_vm1 = vcmask 64512   ;;  %vm216_vm2 = vcmask 60416   ;;  %vm237_vm3 = vcmask 57344   ;;  %s484_s1 = inlined_call_operand.vmem [shape: bf16[8,8], index: 1, kind: input, shape index: {}]   ;;  %s485_s0 = inlined_call_operand.vmem [shape: bf16[162,8], index: 0, kind: input, shape index: {}]   ;;  %s486_s2 = inlined_call_operand.vmem [shape: f32[1,8], index: 2, kind: input, shape index: {}]   ;;  %s487_s3 = inlined_call_operand.vmem [shape: bf16[162,8], index: 3, kind: output, shape index: {}]  }
   0x1   :  { %v36_v0 = vld [vmem:[%s484_s1] sm:$0xf]  ;;  %v297_v3 = vld [vmem:[%s485_s0 + $0x18] sm:$0xff]  ;;  %v300_v4 = vld [vmem:[%s485_s0 + $0x30] sm:$0xff] }
   0x2   :  { %v130_v1 = vsel %vm128_vm0, %v36_v0, 0  ;;  %v294_v2 = vld [vmem:[%s485_s0] sm:$0xff]  ;;  %v303_v5 = vld [vmem:[%s485_s0 + $0x48] sm:$0xff]  ;;  %v35_v6 = vld [vmem:[%s485_s0 + $0x50] sm:$0x1] }
   0x3   :  { %139 = vmatpush.bf16.msra.mxu0 %v130_v1  ;;  %304 = vmatpush.bf16.msra.mxu1 %v130_v1  ;;  %v82_v7 = vunpack.c.l.b16 %v35_v6  ;;  %v295_v8 = vld [vmem:[%s485_s0 + $0x8] sm:$0xff]  ;;  %v298_v9 = vld [vmem:[%s485_s0 + $0x20] sm:$0xff]  ;;  %v301_v10 = vld [vmem:[%s485_s0 + $0x38] sm:$0xff] }
   0x4   :  { %305 = vmatpush.bf16.msra.mxu2 %v130_v1  ;;  %306 = vmatpush.bf16.msra.mxu3 %v130_v1  ;;  %v296_v12 = vld [vmem:[%s485_s0 + $0x10] sm:$0xff]  ;;  %v299_v13 = vld [vmem:[%s485_s0 + $0x28] sm:$0xff]  ;;  %v302_v14 = vld [vmem:[%s485_s0 + $0x40] sm:$0xff] }
   0x5   :  { %v93_v11 = vpack.c.b16 %v82_v7, %v82_v7  ;;  %v378_v15 = vld [vmem:[%s486_s2] ss:$0 sm:$0xff] }
   0x6   :  { %283 = vmatmul.msk.bf16.vlgmr.msra.gmra.mxu0 %vm94_vm1, %v294_v2  ;;  %286 = vmatmul.msk.bf16.vlgmr.msra.gmra.mxu1 %vm94_vm1, %v297_v3 }
   0x7   :  { %289 = vmatmul.msk.bf16.vlgmr.msra.gmra.mxu2 %vm94_vm1, %v300_v4  ;;  %292 = vmatmul.msk.bf16.vlgmr.msra.gmra.mxu3 %vm94_vm1, %v303_v5 }
  0x16   :  { %284 = vmatmul.msk.bf16.gmra.mxu0 %vm94_vm1, %v295_v8  ;;  %287 = vmatmul.msk.bf16.gmra.mxu1 %vm94_vm1, %v298_v9 }
  0x17   :  { %290 = vmatmul.msk.bf16.gmra.mxu2 %vm94_vm1, %v301_v10  ;;  %293 = vmatmul.msk.bf16.gmra.mxu3 %vm94_vm1, %v93_v11 }
  0x26   :  { %285 = vmatmul.msk.bf16.gmra.mxu0 %vm94_vm1, %v296_v12  ;;  %288 = vmatmul.msk.bf16.gmra.mxu1 %vm94_vm1, %v299_v13 }
  0x27   :  { %291 = vmatmul.msk.bf16.gmra.mxu2 %vm94_vm1, %v302_v14 }
  0x83   :  { %v141_v16 = vpop.f32.mrf.mxu0  ;;  %v156_v17 = vpop.f32.mrf.mxu1 }
  0x84   :  { %v142_v18 = vadd.f32 %v378_v15, %v141_v16  ;;  %v157_v19 = vadd.f32 %v378_v15, %v156_v17 }
  0x86   :  { %v195_v20 = vpack.c.bf16 %v142_v18, %v142_v18  ;;  %v201_v21 = vpack.c.bf16 %v157_v19, %v157_v19 }
  0x88   :  { %217 = vst.msk [vmem:[%s487_s3] sm:$0xf] %vm216_vm2, %v195_v20 }
  0x89   :  { %223 = vst.msk [vmem:[%s487_s3 + $0x18] sm:$0xf] %vm216_vm2, %v201_v21 }
  0x8a   :  { %v171_v22 = vpop.f32.mrf.mxu2  ;;  %v186_v23 = vpop.f32.mrf.mxu3 }
  0x8b   :  { %v172_v24 = vadd.f32 %v378_v15, %v171_v22  ;;  %v143_v25 = vpop.f32.mrf.mxu0  ;;  %v158_v26 = vpop.f32.mrf.mxu1  ;;  %v187_v27 = vadd.f32 %v378_v15, %v186_v23 }
  0x8c   :  { %v144_v28 = vadd.f32 %v378_v15, %v143_v25  ;;  %v159_v29 = vadd.f32 %v378_v15, %v158_v26 }
  0x8d   :  { %v207_v30 = vpack.c.bf16 %v172_v24, %v172_v24  ;;  %v213_v33 = vpack.c.bf16 %v187_v27, %v187_v27 }
  0x8e   :  { %v196_v31 = vpack.c.bf16 %v144_v28, %v144_v28  ;;  %v202_v32 = vpack.c.bf16 %v159_v29, %v159_v29 }
  0x8f   :  { %229 = vst.msk [vmem:[%s487_s3 + $0x30] sm:$0xf] %vm216_vm2, %v207_v30 }
  0x90   :  { %218 = vst.msk [vmem:[%s487_s3 + $0x4] sm:$0xf] %vm216_vm2, %v196_v31 }
  0x91   :  { %224 = vst.msk [vmem:[%s487_s3 + $0x1c] sm:$0xf] %vm216_vm2, %v202_v32 }
  0x92   :  { %v173_v34 = vpop.f32.mrf.mxu2  ;;  %235 = vst.msk [vmem:[%s487_s3 + $0x48] sm:$0xf] %vm216_vm2, %v213_v33  ;;  %v188_v35 = vpop.f32.mrf.mxu3 }
  0x93   :  { %v174_v36 = vadd.f32 %v378_v15, %v173_v34  ;;  %v146_v37 = vpop.f32.mrf.mxu0  ;;  %v161_v38 = vpop.f32.mrf.mxu1  ;;  %v189_v39 = vadd.f32 %v378_v15, %v188_v35 }
  0x94   :  { %v147_v40 = vadd.f32 %v378_v15, %v146_v37  ;;  %v162_v41 = vadd.f32 %v378_v15, %v161_v38 }
  0x95   :  { %v208_v42 = vpack.c.bf16 %v174_v36, %v174_v36  ;;  %v214_v45 = vpack.c.bf16 %v189_v39, %v189_v39 }
  0x96   :  { %v197_v43 = vpack.c.bf16 %v147_v40, %v147_v40  ;;  %v203_v44 = vpack.c.bf16 %v162_v41, %v162_v41 }
  0x97   :  { %230 = vst.msk [vmem:[%s487_s3 + $0x34] sm:$0xf] %vm216_vm2, %v208_v42 }
  0x98   :  { %219 = vst.msk [vmem:[%s487_s3 + $0x8] sm:$0xf] %vm216_vm2, %v197_v43 }
  0x99   :  { %225 = vst.msk [vmem:[%s487_s3 + $0x20] sm:$0xf] %vm216_vm2, %v203_v44 }
  0x9a   :  { %v176_v46 = vpop.f32.mrf.mxu2  ;;  %236 = vst.msk [vmem:[%s487_s3 + $0x4c] sm:$0xf] %vm216_vm2, %v214_v45  ;;  %v191_v47 = vpop.f32.mrf.mxu3 }
  0x9b   :  { %v177_v48 = vadd.f32 %v378_v15, %v176_v46  ;;  %v148_v49 = vpop.f32.mrf.mxu0  ;;  %v163_v50 = vpop.f32.mrf.mxu1  ;;  %v192_v51 = vadd.f32 %v378_v15, %v191_v47 }
  0x9c   :  { %v149_v52 = vadd.f32 %v378_v15, %v148_v49  ;;  %v164_v53 = vadd.f32 %v378_v15, %v163_v50 }
  0x9d   :  { %v209_v54 = vpack.c.bf16 %v177_v48, %v177_v48  ;;  %v215_v57 = vpack.c.bf16 %v192_v51, %v192_v51 }
  0x9e   :  { %v198_v55 = vpack.c.bf16 %v149_v52, %v149_v52  ;;  %v204_v56 = vpack.c.bf16 %v164_v53, %v164_v53 }
  0x9f   :  { %231 = vst.msk [vmem:[%s487_s3 + $0x38] sm:$0xf] %vm216_vm2, %v209_v54 }
  0xa0   :  { %220 = vst.msk [vmem:[%s487_s3 + $0xc] sm:$0xf] %vm216_vm2, %v198_v55 }
  0xa1   :  { %226 = vst.msk [vmem:[%s487_s3 + $0x24] sm:$0xf] %vm216_vm2, %v204_v56 }
  0xa2   :  { %v178_v58 = vpop.f32.mrf.mxu2  ;;  %238 = vst.msk [vmem:[%s487_s3 + $0x50] sm:$0x1] %vm237_vm3, %v215_v57  ;;  %v193_v59 = vpop.f32.mrf.mxu3 }
  0xa3   :  { %v179_v60 = vadd.f32 %v378_v15, %v178_v58  ;;  %v151_v61 = vpop.f32.mrf.mxu0  ;;  %v166_v62 = vpop.f32.mrf.mxu1 }
  0xa4   :  { %v152_v63 = vadd.f32 %v378_v15, %v151_v61  ;;  %v167_v0 = vadd.f32 %v378_v15, %v166_v62 }
  0xa5   :  { %v210_v1 = vpack.c.bf16 %v179_v60, %v179_v60 }
  0xa6   :  { %v199_v2 = vpack.c.bf16 %v152_v63, %v152_v63  ;;  %v205_v3 = vpack.c.bf16 %v167_v0, %v167_v0 }
  0xa7   :  { %232 = vst.msk [vmem:[%s487_s3 + $0x3c] sm:$0xf] %vm216_vm2, %v210_v1 }
  0xa8   :  { %221 = vst.msk [vmem:[%s487_s3 + $0x10] sm:$0xf] %vm216_vm2, %v199_v2 }
  0xa9   :  { %227 = vst.msk [vmem:[%s487_s3 + $0x28] sm:$0xf] %vm216_vm2, %v205_v3 }
  0xaa   :  { %v181_v4 = vpop.f32.mrf.mxu2 }
  0xab   :  { %v182_v5 = vadd.f32 %v378_v15, %v181_v4  ;;  %v153_v6 = vpop.f32.mrf.mxu0  ;;  %v168_v7 = vpop.f32.mrf.mxu1 }
  0xac   :  { %v154_v8 = vadd.f32 %v378_v15, %v153_v6  ;;  %v169_v9 = vadd.f32 %v378_v15, %v168_v7 }
  0xad   :  { %v211_v10 = vpack.c.bf16 %v182_v5, %v182_v5 }
  0xae   :  { %v200_v11 = vpack.c.bf16 %v154_v8, %v154_v8  ;;  %v206_v12 = vpack.c.bf16 %v169_v9, %v169_v9 }
  0xaf   :  { %233 = vst.msk [vmem:[%s487_s3 + $0x40] sm:$0xf] %vm216_vm2, %v211_v10 }
  0xb0   :  { %222 = vst.msk [vmem:[%s487_s3 + $0x14] sm:$0xf] %vm216_vm2, %v200_v11 }
  0xb1   :  { %228 = vst.msk [vmem:[%s487_s3 + $0x2c] sm:$0xf] %vm216_vm2, %v206_v12 }
  0xb2   :  { %v183_v13 = vpop.f32.mrf.mxu2 }
  0xb3   :  { %v184_v14 = vadd.f32 %v378_v15, %v183_v13 }
  0xb5   :  { %v212_v16 = vpack.c.bf16 %v184_v14, %v184_v14 }
  0xb7   :  { %234 = vst.msk [vmem:[%s487_s3 + $0x44] sm:$0xf] %vm216_vm2, %v212_v16 }

// kernel: _lambda_.46
= control target key start
LH: loop header
LB: loop body
LE: loop exit
PB: predicated region body
PF: predicated region fallthrough
CT: control target
= control target key end

     0   :  { %v164_v0 = vmov 0   ;;  %vm44_vm2 = vcmask 588800   ;;  %vm51_vm4 = vcmask 582656   ;;  %v165_v18 = vmov 72.0   ;;  %s243_s1 = inlined_call_operand.<no memory space> [shape: f32[1,1], index: 1, kind: input, shape index: {}]   ;;  %s244_s0 = inlined_call_operand.vmem [shape: bf16[18,72], index: 0, kind: input, shape index: {}]   ;;  %s245_s2 = inlined_call_operand.vmem [shape: f32[1,72], index: 2, kind: input, shape index: {}]   ;;  %s246_s3 = inlined_call_operand.vmem [shape: f32[1,72], index: 3, kind: input, shape index: {}]   ;;  %s247_s4 = inlined_call_operand.vmem [shape: f32[18,72], index: 4, kind: input, shape index: {}]   ;;  %s248_s5 = inlined_call_operand.vmem [shape: f32[18,72], index: 5, kind: output, shape index: {}]  }
   0x1   :  { %152 = vset.pattern.permute.xlu0 %v164_v0  ;;  %v10_v1 = vstv %s243_s1  ;;  %v147_v3 = vld [vmem:[%s244_s0] sm:$0xff]   ;;  %v24_v6 = vld [vmem:[%s244_s0 + $0x8] sm:$0x1]  ;;  %156 = vrcp.f32 %v165_v18 }
   0x2   :  { %11 = vst [vmem:[#allocation2] sm:$0x1] %v10_v1  ;;  %v148_v4 = vunpack.c.l.bf16 %v147_v3  ;;  %v149_v5 = vunpack.c.h.bf16 %v147_v3  ;;  %v27_v8 = vunpack.c.l.bf16 %v24_v6  ;;  %v154_v58 = vld [vmem:[%s245_s2] ss:$0 sm:$0xff] }
   0x3   :  { %v155_v62 = vld [vmem:[%s246_s3] ss:$0 sm:$0xff] }
   0x4   :  { %vm30_vm0 = vcmp.ge.f32.partialorder %v149_v5, 0.0  ;;  %vm29_vm1 = vcmp.ge.f32.partialorder %v148_v4, 0.0  ;;  %vm31_vm3 = vcmp.ge.f32.partialorder %v27_v8, 0.0 }
   0x7   :  { %v157_v19 = vpop.eup %156 }
   0x8   :  { %v56_v20 = vmul.f32 72.0, %v157_v19  ;;  %vm60_vm5 = vweird.f32 %v157_v19 }
   0x9   :  { %v153_v2 = vld [vmem:[#allocation2] ss:$0 sm:$0xff] }
   0xa   :  { %35 = vperm.xlu0 %152, %v153_v2   ;;  %v57_v21 = vsub.f32 1.0, %v56_v20 }
   0xc   :  { %v58_v22 = vmul.f32 %v157_v19, %v57_v21 }
   0xe   :  { %v59_v23 = vadd.f32 %v157_v19, %v58_v22 }
  0x10   :  { %v61_v24 = vsel %vm60_vm5, %v157_v19, %v59_v23  ;;  %v134_v19 = vld [vmem:[%s247_s4 + $0x8] sm:$0xff] }
  0x7c   :  { %v36_v7 = vpop.permute.xlu0 %35 }
  0x7d   :  { %v38_v9 = vmul.f32 %v148_v4, %v36_v7  ;;  %v39_v10 = vmul.f32 %v149_v5, %v36_v7  ;;  %v40_v15 = vmul.f32 %v36_v7, %v27_v8 }
  0x7f   :  { %v42_v11 = vsel %vm30_vm0, %v149_v5, %v39_v10  ;;  %v41_v12 = vsel %vm29_vm1, %v148_v4, %v38_v9  ;;  %v43_v16 = vsel %vm31_vm3, %v27_v8, %v40_v15  ;;  %v133_v4 = vld [vmem:[%s247_s4] sm:$0xff] }
  0x80   :  { %v48_v13 = vsel %vm44_vm2, %v42_v11, 0.0  ;;  %v45_v14 = vsel %vm44_vm2, %v41_v12, 0.0  ;;  %v52_v17 = vsel %vm51_vm4, %v43_v16, 0.0 }
  0x81   :  { %49 = vadd.xlane.f32.xlu1 %v48_v13  ;;  %46 = vadd.xlane.f32.xlu0 %v45_v14 }
  0x89   :  { %53 = vadd.xlane.f32.xlu1 %v52_v17 }
  0xf4   :  { %v50_v25 = vpop.xlane.xlu1 %49  ;;  %v47_v26 = vpop.xlane.xlu0 %46 }
  0xf5   :  { %v62_v27 = vmul.f32 %v61_v24, %v47_v26  ;;  %v63_v28 = vmul.f32 %v61_v24, %v50_v25 }
  0xf7   :  { %v65_v29 = vsub.f32 %v41_v12, %v62_v27  ;;  %v208_v31 = vsub.f32 %v42_v11, %v63_v28 }
  0xf9   :  { %v68_v30 = vmul.f32 %v65_v29, %v65_v29  ;;  %v69_v36 = vmul.f32 %v208_v31, %v208_v31 }
  0xfb   :  { %v71_v32 = vsel %vm44_vm2, %v68_v30, 0.0  ;;  %v74_v39 = vsel %vm44_vm2, %v69_v36, 0.0 }
  0xfc   :  { %v54_v33 = vpop.xlane.xlu1 %53  ;;  %72 = vadd.xlane.f32.xlu2 %v71_v32 }
  0xfd   :  { %v64_v34 = vmul.f32 %v61_v24, %v54_v33 }
  0xff   :  { %v67_v35 = vsub.f32 %v43_v16, %v64_v34  ;;  %v135_v16 = vld [vmem:[%s247_s4 + $0x10] sm:$0x3] }
 0x101   :  { %v70_v37 = vmul.f32 %v67_v35, %v67_v35 }
 0x103   :  { %v77_v38 = vsel %vm51_vm4, %v70_v37, 0.0 }
 0x104   :  { %78 = vadd.xlane.f32.xlu1 %v77_v38  ;;  %75 = vadd.xlane.f32.xlu2 %v74_v39 }
 0x16f   :  { %v73_v40 = vpop.xlane.xlu2 %72 }
 0x170   :  { %v80_v41 = vmul.f32 %v73_v40, %v61_v24 }
 0x172   :  { %v83_v42 = vadd.f32 1e-05, %v80_v41 }
 0x174   :  { %158 = vrsqrt.f32 %v83_v42  ;;  %vm92_vm7 = vweird.f32 %v83_v42 }
 0x177   :  { %v79_v43 = vpop.xlane.xlu1 %78  ;;  %v76_v44 = vpop.xlane.xlu2 %75 }
 0x178   :  { %v82_v45 = vmul.f32 %v79_v43, %v61_v24  ;;  %v81_v46 = vmul.f32 %v76_v44, %v61_v24 }
 0x17a   :  { %v159_v47 = vpop.eup %158  ;;  %v85_v48 = vadd.f32 1e-05, %v82_v45  ;;  %v84_v49 = vadd.f32 1e-05, %v81_v46 }
 0x17b   :  { %v87_v50 = vmul.f32 %v159_v47, %v83_v42  ;;  %vm93_vm6 = vweird.f32 %v159_v47 }
 0x17c   :  { %160 = vrsqrt.f32 %v85_v48  ;;  %vm94_vm8 = vmor %vm92_vm7, %vm93_vm6  ;;  %vm112_vm11 = vweird.f32 %v85_v48  ;;  %vm102_vm13 = vweird.f32 %v84_v49 }
 0x17d   :  { %v88_v51 = vmul.f32 %v159_v47, %v87_v50  ;;  %162 = vrsqrt.f32 %v84_v49 }
 0x17f   :  { %v89_v52 = vmul.f32 0.5, %v88_v51 }
 0x181   :  { %v90_v53 = vsub.f32 1.5, %v89_v52 }
 0x182   :  { %v161_v54 = vpop.eup %160 }
 0x183   :  { %v163_v55 = vpop.eup %162  ;;  %v91_v56 = vmul.f32 %v159_v47, %v90_v53  ;;  %v107_v57 = vmul.f32 %v161_v54, %v85_v48  ;;  %vm113_vm9 = vweird.f32 %v161_v54 }
 0x184   :  { %v97_v59 = vmul.f32 %v163_v55, %v84_v49  ;;  %vm103_vm10 = vweird.f32 %v163_v55  ;;  %vm114_vm12 = vmor %vm112_vm11, %vm113_vm9 }
 0x185   :  { %v95_v60 = vsel %vm94_vm8, %v159_v47, %v91_v56  ;;  %v108_v61 = vmul.f32 %v161_v54, %v107_v57  ;;  %vm104_vm14 = vmor %vm102_vm13, %vm103_vm10 }
 0x186   :  { %v116_v63 = vmul.f32 %v95_v60, %v65_v29  ;;  %v98_v0 = vmul.f32 %v163_v55, %v97_v59 }
 0x187   :  { %v109_v1 = vmul.f32 0.5, %v108_v61 }
 0x188   :  { %v123_v2 = vmul.f32 %v154_v58, %v116_v63  ;;  %v99_v3 = vmul.f32 0.5, %v98_v0 }
 0x189   :  { %v110_v5 = vsub.f32 1.5, %v109_v1 }
 0x18a   :  { %v130_v6 = vadd.f32 %v155_v62, %v123_v2  ;;  %v100_v7 = vsub.f32 1.5, %v99_v3 }
 0x18b   :  { %v111_v8 = vmul.f32 %v161_v54, %v110_v5 }
 0x18c   :  { %v136_v9 = vadd.f32 %v133_v4, %v130_v6  ;;  %v101_v10 = vmul.f32 %v163_v55, %v100_v7 }
 0x18d   :  { %v115_v11 = vsel %vm114_vm12, %v161_v54, %v111_v8 }
 0x18e   :  { %139 = vst.msk [vmem:[%s248_s5] sm:$0xff] %vm44_vm2, %v136_v9  ;;  %v118_v12 = vmul.f32 %v115_v11, %v67_v35  ;;  %v105_v13 = vsel %vm104_vm14, %v163_v55, %v101_v10 }
 0x18f   :  { %v117_v14 = vmul.f32 %v105_v13, %v208_v31 }
 0x190   :  { %v125_v15 = vmul.f32 %v154_v58, %v118_v12 }
 0x191   :  { %v124_v17 = vmul.f32 %v154_v58, %v117_v14 }
 0x192   :  { %v132_v18 = vadd.f32 %v155_v62, %v125_v15 }
 0x193   :  { %v131_v20 = vadd.f32 %v155_v62, %v124_v17 }
 0x194   :  { %v138_v21 = vadd.f32 %v135_v16, %v132_v18 }
 0x195   :  { %v137_v22 = vadd.f32 %v134_v19, %v131_v20 }
 0x196   :  { %141 = vst.msk [vmem:[%s248_s5 + $0x10] sm:$0x3] %vm51_vm4, %v138_v21 }
 0x197   :  { %140 = vst.msk [vmem:[%s248_s5 + $0x8] sm:$0xff] %vm44_vm2, %v137_v22 }

// kernel: _lambda_.60
= control target key start
LH: loop header
LB: loop body
LE: loop exit
PB: predicated region body
PF: predicated region fallthrough
CT: control target
= control target key end

     0   :  { %vm121_vm0 = vcmask 1043456   ;;  %vm87_vm1 = vcmask 588800   ;;  %vm188_vm2 = vcmask 31744   ;;  %vm209_vm3 = vcmask 25600   ;;  %s480_s1 = inlined_call_operand.vmem [shape: bf16[72,4], index: 1, kind: input, shape index: {}]   ;;  %s481_s2 = inlined_call_operand.vmem [shape: f32[1,4], index: 2, kind: input, shape index: {}]   ;;  %s482_s0 = inlined_call_operand.vmem [shape: f32[162,72], index: 0, kind: input, shape index: {}]   ;;  %s483_s3 = inlined_call_operand.vmem [shape: f32[162,4], index: 3, kind: output, shape index: {}]  }
   0x1   :  { %v55_v0 = vld [vmem:[%s480_s1 + $0x20] sm:$0xf]  ;;  %v245_v4 = vld [vmem:[%s480_s1 + $0x18] sm:$0xff]  ;;  %v244_v5 = vld [vmem:[%s480_s1 + $0x10] sm:$0xff] }
   0x2   :  { %v77_v1 = vunpack.c.l.b16 %v55_v0  ;;  %v243_v6 = vld [vmem:[%s480_s1 + $0x8] sm:$0xff]  ;;  %v242_v7 = vld [vmem:[%s480_s1] sm:$0xff]  ;;  %v21_v10 = vld [vmem:[%s482_s0 + $0x30] sm:$0xff] }
   0x3   :  { %v15_v8 = vld [vmem:[%s482_s0] sm:$0xff]  ;;  %v16_v9 = vld [vmem:[%s482_s0 + $0x8] sm:$0xff]  ;;  %v22_v11 = vld [vmem:[%s482_s0 + $0x38] sm:$0xff] }
   0x4   :  { %v82_v2 = vpack.c.b16 %v77_v1, %v77_v1  ;;  %v27_v12 = vld [vmem:[%s482_s0 + $0x60] sm:$0xff]  ;;  %v28_v13 = vld [vmem:[%s482_s0 + $0x68] sm:$0xff]  ;;  %v33_v14 = vld [vmem:[%s482_s0 + $0x90] sm:$0xff]  ;;  %v36_v16 = vpack.c.bf16 %v16_v9, %v15_v8  ;;  %v39_v17 = vpack.c.bf16 %v22_v11, %v21_v10 }
   0x5   :  { %v34_v15 = vld [vmem:[%s482_s0 + $0x98] sm:$0xff]  ;;  %v42_v18 = vpack.c.bf16 %v28_v13, %v27_v12  ;;  %v17_v20 = vld [vmem:[%s482_s0 + $0x10] sm:$0xff]  ;;  %v23_v22 = vld [vmem:[%s482_s0 + $0x40] sm:$0xff] }
   0x6   :  { %v123_v3 = vsel %vm121_vm0, %v82_v2, 0  ;;  %v45_v19 = vpack.c.bf16 %v34_v15, %v33_v14  ;;  %v18_v21 = vld [vmem:[%s482_s0 + $0x18] sm:$0xff]  ;;  %v24_v23 = vld [vmem:[%s482_s0 + $0x48] sm:$0xff]  ;;  %v29_v24 = vld [vmem:[%s482_s0 + $0x70] sm:$0xff] }
   0x7   :  { %128 = vmatpush.bf16.msra.mxu0 %v123_v3  ;;  %246 = vmatpush.bf16.msra.mxu1 %v123_v3  ;;  %v30_v25 = vld [vmem:[%s482_s0 + $0x78] sm:$0xff]  ;;  %v35_v26 = vld [vmem:[%s482_s0 + $0xa0] sm:$0x3]  ;;  %v37_v27 = vpack.c.bf16 %v18_v21, %v17_v20  ;;  %v40_v28 = vpack.c.bf16 %v24_v23, %v23_v22  ;;  %v20_v32 = vld [vmem:[%s482_s0 + $0x28] sm:$0xff] }
   0x8   :  { %247 = vmatpush.bf16.msra.mxu2 %v123_v3  ;;  %248 = vmatpush.bf16.msra.mxu3 %v123_v3  ;;  %v43_v29 = vpack.c.bf16 %v30_v25, %v29_v24  ;;  %v46_v30 = vpack.c.bf16 %v35_v26, %v35_v26  ;;  %v19_v31 = vld [vmem:[%s482_s0 + $0x20] sm:$0xff]  ;;  %v25_v33 = vld [vmem:[%s482_s0 + $0x50] sm:$0xff]  ;;  %v26_v34 = vld [vmem:[%s482_s0 + $0x58] sm:$0xff] }
   0x9   :  { %v31_v35 = vld [vmem:[%s482_s0 + $0x80] sm:$0xff]  ;;  %v32_v36 = vld [vmem:[%s482_s0 + $0x88] sm:$0xff]  ;;  %v38_v37 = vpack.c.bf16 %v20_v32, %v19_v31  ;;  %v41_v38 = vpack.c.bf16 %v26_v34, %v25_v33 }
   0xa   :  { %v44_v39 = vpack.c.bf16 %v32_v36, %v31_v35  ;;  %v374_v40 = vld [vmem:[%s481_s2] ss:$0 sm:$0xff] }
   0xb   :  { %129 = vmatpush.bf16.msra.mxu0 %v245_v4  ;;  %249 = vmatpush.bf16.msra.mxu1 %v245_v4 }
   0xc   :  { %250 = vmatpush.bf16.msra.mxu2 %v245_v4  ;;  %251 = vmatpush.bf16.msra.mxu3 %v245_v4 }
   0xf   :  { %130 = vmatpush.bf16.msra.mxu0 %v244_v5  ;;  %252 = vmatpush.bf16.msra.mxu1 %v244_v5 }
  0x10   :  { %253 = vmatpush.bf16.msra.mxu2 %v244_v5  ;;  %254 = vmatpush.bf16.msra.mxu3 %v244_v5 }
  0x13   :  { %131 = vmatpush.bf16.msra.mxu0 %v243_v6  ;;  %255 = vmatpush.bf16.msra.mxu1 %v243_v6 }
  0x14   :  { %256 = vmatpush.bf16.msra.mxu2 %v243_v6  ;;  %257 = vmatpush.bf16.msra.mxu3 %v243_v6 }
  0x17   :  { %132 = vmatpush.bf16.msra.mxu0 %v242_v7  ;;  %258 = vmatpush.bf16.msra.mxu1 %v242_v7 }
  0x18   :  { %259 = vmatpush.bf16.msra.mxu2 %v242_v7  ;;  %260 = vmatpush.bf16.msra.mxu3 %v242_v7 }
  0x1a   :  { %231 = vmatmul.msk.bf16.vlgmr.msra.gmra.mxu0 %vm87_vm1, %v36_v16  ;;  %234 = vmatmul.msk.bf16.vlgmr.msra.gmra.mxu1 %vm87_vm1, %v39_v17 }
  0x1b   :  { %237 = vmatmul.msk.bf16.vlgmr.msra.gmra.mxu2 %vm87_vm1, %v42_v18  ;;  %240 = vmatmul.msk.bf16.vlgmr.msra.gmra.mxu3 %vm87_vm1, %v45_v19 }
  0x2a   :  { %232 = vmatmul.msk.bf16.gmra.mxu0 %vm87_vm1, %v37_v27  ;;  %235 = vmatmul.msk.bf16.gmra.mxu1 %vm87_vm1, %v40_v28 }
  0x2b   :  { %238 = vmatmul.msk.bf16.gmra.mxu2 %vm87_vm1, %v43_v29  ;;  %241 = vmatmul.msk.bf16.gmra.mxu3 %vm87_vm1, %v46_v30 }
  0x3a   :  { %233 = vmatmul.msk.bf16.gmra.mxu0 %vm87_vm1, %v38_v37  ;;  %236 = vmatmul.msk.bf16.gmra.mxu1 %vm87_vm1, %v41_v38 }
  0x3b   :  { %239 = vmatmul.msk.bf16.gmra.mxu2 %vm87_vm1, %v44_v39 }
  0x97   :  { %v134_v41 = vpop.f32.mrf.mxu0  ;;  %v149_v42 = vpop.f32.mrf.mxu1 }
  0x98   :  { %v135_v43 = vadd.f32 %v374_v40, %v134_v41  ;;  %v150_v44 = vadd.f32 %v374_v40, %v149_v42 }
  0x9a   :  { %189 = vst.msk [vmem:[%s483_s3] sm:$0xff] %vm188_vm2, %v135_v43 }
  0x9b   :  { %195 = vst.msk [vmem:[%s483_s3 + $0x30] sm:$0xff] %vm188_vm2, %v150_v44 }
  0x9e   :  { %v164_v45 = vpop.f32.mrf.mxu2  ;;  %v179_v46 = vpop.f32.mrf.mxu3 }
  0x9f   :  { %v165_v47 = vadd.f32 %v374_v40, %v164_v45  ;;  %v136_v48 = vpop.f32.mrf.mxu0  ;;  %v151_v49 = vpop.f32.mrf.mxu1  ;;  %v180_v52 = vadd.f32 %v374_v40, %v179_v46 }
  0xa0   :  { %v137_v50 = vadd.f32 %v374_v40, %v136_v48  ;;  %v152_v51 = vadd.f32 %v374_v40, %v151_v49 }
  0xa1   :  { %201 = vst.msk [vmem:[%s483_s3 + $0x60] sm:$0xff] %vm188_vm2, %v165_v47 }
  0xa2   :  { %190 = vst.msk [vmem:[%s483_s3 + $0x8] sm:$0xff] %vm188_vm2, %v137_v50 }
  0xa3   :  { %196 = vst.msk [vmem:[%s483_s3 + $0x38] sm:$0xff] %vm188_vm2, %v152_v51 }
  0xa4   :  { %207 = vst.msk [vmem:[%s483_s3 + $0x90] sm:$0xff] %vm188_vm2, %v180_v52 }
  0xa6   :  { %v166_v53 = vpop.f32.mrf.mxu2  ;;  %v181_v54 = vpop.f32.mrf.mxu3 }
  0xa7   :  { %v167_v55 = vadd.f32 %v374_v40, %v166_v53  ;;  %v139_v56 = vpop.f32.mrf.mxu0  ;;  %v154_v57 = vpop.f32.mrf.mxu1  ;;  %v182_v60 = vadd.f32 %v374_v40, %v181_v54 }
  0xa8   :  { %v140_v58 = vadd.f32 %v374_v40, %v139_v56  ;;  %v155_v59 = vadd.f32 %v374_v40, %v154_v57 }
  0xa9   :  { %202 = vst.msk [vmem:[%s483_s3 + $0x68] sm:$0xff] %vm188_vm2, %v167_v55 }
  0xaa   :  { %191 = vst.msk [vmem:[%s483_s3 + $0x10] sm:$0xff] %vm188_vm2, %v140_v58 }
  0xab   :  { %197 = vst.msk [vmem:[%s483_s3 + $0x40] sm:$0xff] %vm188_vm2, %v155_v59 }
  0xac   :  { %208 = vst.msk [vmem:[%s483_s3 + $0x98] sm:$0xff] %vm188_vm2, %v182_v60 }
  0xae   :  { %v169_v61 = vpop.f32.mrf.mxu2  ;;  %v184_v62 = vpop.f32.mrf.mxu3 }
  0xaf   :  { %v170_v63 = vadd.f32 %v374_v40, %v169_v61  ;;  %v141_v0 = vpop.f32.mrf.mxu0  ;;  %v156_v1 = vpop.f32.mrf.mxu1  ;;  %v185_v4 = vadd.f32 %v374_v40, %v184_v62 }
  0xb0   :  { %v142_v2 = vadd.f32 %v374_v40, %v141_v0  ;;  %v157_v3 = vadd.f32 %v374_v40, %v156_v1 }
  0xb1   :  { %203 = vst.msk [vmem:[%s483_s3 + $0x70] sm:$0xff] %vm188_vm2, %v170_v63 }
  0xb2   :  { %192 = vst.msk [vmem:[%s483_s3 + $0x18] sm:$0xff] %vm188_vm2, %v142_v2 }
  0xb3   :  { %198 = vst.msk [vmem:[%s483_s3 + $0x48] sm:$0xff] %vm188_vm2, %v157_v3 }
  0xb4   :  { %210 = vst.msk [vmem:[%s483_s3 + $0xa0] sm:$0x3] %vm209_vm3, %v185_v4 }
  0xb6   :  { %v171_v5 = vpop.f32.mrf.mxu2  ;;  %v186_v6 = vpop.f32.mrf.mxu3 }
  0xb7   :  { %v172_v7 = vadd.f32 %v374_v40, %v171_v5  ;;  %v144_v8 = vpop.f32.mrf.mxu0  ;;  %v159_v9 = vpop.f32.mrf.mxu1 }
  0xb8   :  { %v145_v10 = vadd.f32 %v374_v40, %v144_v8  ;;  %v160_v11 = vadd.f32 %v374_v40, %v159_v9 }
  0xb9   :  { %204 = vst.msk [vmem:[%s483_s3 + $0x78] sm:$0xff] %vm188_vm2, %v172_v7 }
  0xba   :  { %193 = vst.msk [vmem:[%s483_s3 + $0x20] sm:$0xff] %vm188_vm2, %v145_v10 }
  0xbb   :  { %199 = vst.msk [vmem:[%s483_s3 + $0x50] sm:$0xff] %vm188_vm2, %v160_v11 }
  0xbe   :  { %v174_v12 = vpop.f32.mrf.mxu2 }
  0xbf   :  { %v175_v13 = vadd.f32 %v374_v40, %v174_v12  ;;  %v146_v14 = vpop.f32.mrf.mxu0  ;;  %v161_v15 = vpop.f32.mrf.mxu1 }
  0xc0   :  { %v147_v16 = vadd.f32 %v374_v40, %v146_v14  ;;  %v162_v17 = vadd.f32 %v374_v40, %v161_v15 }
  0xc1   :  { %205 = vst.msk [vmem:[%s483_s3 + $0x80] sm:$0xff] %vm188_vm2, %v175_v13 }
  0xc2   :  { %194 = vst.msk [vmem:[%s483_s3 + $0x28] sm:$0xff] %vm188_vm2, %v147_v16 }
  0xc3   :  { %200 = vst.msk [vmem:[%s483_s3 + $0x58] sm:$0xff] %vm188_vm2, %v162_v17 }
  0xc6   :  { %v176_v18 = vpop.f32.mrf.mxu2 }
  0xc7   :  { %v177_v19 = vadd.f32 %v374_v40, %v176_v18 }
  0xc9   :  { %206 = vst.msk [vmem:[%s483_s3 + $0x88] sm:$0xff] %vm188_vm2, %v177_v19 }

// kernel: mul.21
= control target key start
LH: loop header
LB: loop body
LE: loop exit
PB: predicated region body
PF: predicated region fallthrough
CT: control target
= control target key end

     0   :  { %s34_s0 = inlined_call_operand.vmem [shape: f32[16], index: 0, kind: input, shape index: {}, may-alias: {0,1}]   ;;  %s35_s1 = inlined_call_operand.vmem [shape: f32[16], index: 1, kind: input, shape index: {}, may-alias: {0,1}]   ;;  %s36_s2 = inlined_call_operand.vmem [shape: f32[16], index: 2, kind: output, shape index: {}]  }
   0x1   :  { %v3_v0 = vld [vmem:[%s34_s0] sm:$0x1] }
   0x2   :  { %v4_v1 = vld [vmem:[%s35_s1] sm:$0x1] }
   0x3   :  { %v7_v2 = vmul.f32 %v4_v1, %v3_v0 }
   0x5   :  { %9 = vst [vmem:[%s36_s2] sm:$0x1] %v7_v2 }

// kernel: _lambda_.61
= control target key start
LH: loop header
LB: loop body
LE: loop exit
PB: predicated region body
PF: predicated region fallthrough
CT: control target
= control target key end

     0   :  { %vm49_vm0 = vcmask 1040384   ;;  %vm39_vm1 = vcmask 146432   ;;  %vm76_vm2 = vcmask 130048   ;;  %vm81_vm3 = vcmask 125952   ;;  %s159_s1 = inlined_call_operand.vmem [shape: bf16[18,16], index: 1, kind: input, shape index: {}]   ;;  %s160_s2 = inlined_call_operand.vmem [shape: f32[1,16], index: 2, kind: input, shape index: {}]   ;;  %s161_s0 = inlined_call_operand.vmem [shape: f32[36,18], index: 0, kind: input, shape index: {}]   ;;  %s162_s3 = inlined_call_operand.vmem [shape: f32[36,16], index: 3, kind: output, shape index: {}]  }
   0x1   :  { %v25_v0 = vld [vmem:[%s159_s1 + $0x8] sm:$0x1]  ;;  %v94_v4 = vld [vmem:[%s159_s1] sm:$0xff]  ;;  %v17_v7 = vld [vmem:[%s161_s0 + $0x10] sm:$0xff] }
   0x2   :  { %v35_v1 = vunpack.c.l.b16 %v25_v0  ;;  %v15_v5 = vld [vmem:[%s161_s0] sm:$0xff]  ;;  %v16_v6 = vld [vmem:[%s161_s0 + $0x8] sm:$0xff]  ;;  %v18_v8 = vld [vmem:[%s161_s0 + $0x18] sm:$0xff] }
   0x3   :  { %v19_v9 = vld [vmem:[%s161_s0 + $0x20] sm:$0xf]  ;;  %v20_v10 = vpack.c.bf16 %v16_v6, %v15_v5  ;;  %v21_v11 = vpack.c.bf16 %v18_v8, %v17_v7 }
   0x4   :  { %v37_v2 = vpack.c.b16 %v35_v1, %v35_v1  ;;  %v22_v12 = vpack.c.bf16 %v19_v9, %v19_v9  ;;  %v99_v13 = vld [vmem:[%s160_s2] ss:$0 sm:$0xff] }
   0x6   :  { %v51_v3 = vsel %vm49_vm0, %v37_v2, 0 }
   0x7   :  { %59 = vmatpush.bf16.msra.mxu0 %v51_v3  ;;  %95 = vmatpush.bf16.msra.mxu1 %v51_v3 }
   0x8   :  { %96 = vmatpush.bf16.msra.mxu2 %v51_v3 }
   0xb   :  { %60 = vmatpush.bf16.msra.mxu0 %v94_v4  ;;  %97 = vmatpush.bf16.msra.mxu1 %v94_v4 }
   0xc   :  { %98 = vmatpush.bf16.msra.mxu2 %v94_v4 }
   0xe   :  { %91 = vmatmul.msk.bf16.vlgmr.msra.gmra.mxu0 %vm39_vm1, %v20_v10  ;;  %92 = vmatmul.msk.bf16.vlgmr.msra.gmra.mxu1 %vm39_vm1, %v21_v11 }
   0xf   :  { %93 = vmatmul.msk.bf16.vlgmr.msra.gmra.mxu2 %vm39_vm1, %v22_v12 }
  0x8b   :  { %v62_v14 = vpop.f32.mrf.mxu0  ;;  %v67_v15 = vpop.f32.mrf.mxu1 }
  0x8c   :  { %v63_v16 = vadd.f32 %v99_v13, %v62_v14  ;;  %v68_v17 = vadd.f32 %v99_v13, %v67_v15 }
  0x8e   :  { %77 = vst.msk [vmem:[%s162_s3] sm:$0xff] %vm76_vm2, %v63_v16 }
  0x8f   :  { %79 = vst.msk [vmem:[%s162_s3 + $0x10] sm:$0xff] %vm76_vm2, %v68_v17 }
  0x92   :  { %v72_v18 = vpop.f32.mrf.mxu2 }
  0x93   :  { %v73_v19 = vadd.f32 %v99_v13, %v72_v18  ;;  %v64_v20 = vpop.f32.mrf.mxu0  ;;  %v69_v21 = vpop.f32.mrf.mxu1 }
  0x94   :  { %v65_v22 = vadd.f32 %v99_v13, %v64_v20  ;;  %v70_v23 = vadd.f32 %v99_v13, %v69_v21 }
  0x95   :  { %82 = vst.msk [vmem:[%s162_s3 + $0x20] sm:$0xf] %vm81_vm3, %v73_v19 }
  0x96   :  { %78 = vst.msk [vmem:[%s162_s3 + $0x8] sm:$0xff] %vm76_vm2, %v65_v22 }
  0x97   :  { %80 = vst.msk [vmem:[%s162_s3 + $0x18] sm:$0xff] %vm76_vm2, %v70_v23 }
  0x9a   :  { %v74_v24 = vpop.f32.mrf.mxu2 }

</bundles_post_ra>
